<compile_context>
chip_gen: v7x
topology: tpu7x:2x2x1
jax: 0.10.0
libtpu: 0.0.40
codegen_flags: <defaults>
</compile_context>

<pallas_src>
import jax
import jax.numpy as jnp
from jax import lax
from jax.experimental import pallas as pl
from jax.experimental.pallas import tpu as pltpu


# ----------------------------- fused Pallas kernel ---------------------------


def _sigmoid(v):
    return 1.0 / (1.0 + jnp.exp(-v))


def _pool2x2(src_ref, ho, wo):
    """2x2 stride-2 max pool of a (N, 2*ho, 2*wo, C) VMEM ref -> (N, ho, wo, C)."""
    a = src_ref[:, pl.ds(0, ho, 2), pl.ds(0, wo, 2), :]
    b = src_ref[:, pl.ds(0, ho, 2), pl.ds(1, wo, 2), :]
    c = src_ref[:, pl.ds(1, ho, 2), pl.ds(0, wo, 2), :]
    d = src_ref[:, pl.ds(1, ho, 2), pl.ds(1, wo, 2), :]
    return jnp.maximum(jnp.maximum(a, b), jnp.maximum(c, d))


def _lenet_kernel(
    cols1_ref,   # (N*24*24, 25) im2col of the 28x28 single-channel input (kk = kh*5+kw)
    w1_ref,      # (25, 6)        conv1 weights
    b1_ref,      # (1, 6)
    w2_ref,      # (25, 6, 16)    conv2 weights [kh*5+kw, cin, cout]
    b2_ref,      # (1, 16)
    w3_ref,      # (4, 4, 16, 120) fc1 weights [h, w, cin, cout] (PyTorch flatten folded in)
    b3_ref,      # (1, 120)
    w4_ref,      # (120, 84)
    b4_ref,      # (1, 84)
    w5_ref,      # (84, 10)
    b5_ref,      # (1, 10)
    o_ref,       # (N, 10)  output
    h1_ref,      # scratch (N, 24, 24, 6)
    p1_ref,      # scratch (N, 12, 12, 6)
    h2_ref,      # scratch (N, 8, 8, 16)
    p2_ref,      # scratch (N, 4, 4, 16)
):
    n = o_ref.shape[0]

    # ---- conv1 (1->6, 5x5) + sigmoid : one MXU matmul over the 25-tap im2col ----
    z1 = jnp.dot(cols1_ref[...], w1_ref[...], preferred_element_type=jnp.float32)
    h1_ref[...] = _sigmoid(z1 + b1_ref[...]).reshape(n, 24, 24, 6)

    # ---- maxpool 2x2 -> (N, 12, 12, 6) ----
    p1_ref[...] = _pool2x2(h1_ref, 12, 12)

    # ---- conv2 (6->16, 5x5) + sigmoid : 25 accumulated (N*64, 6) x (6, 16) dots ----
    acc2 = jnp.zeros((n * 64, 16), jnp.float32)
    for kh in range(5):
        for kw in range(5):
            patch = p1_ref[:, kh:kh + 8, kw:kw + 8, :]           # (N, 8, 8, 6)
            acc2 = acc2 + jnp.dot(
                patch.reshape(n * 64, 6),
                w2_ref[kh * 5 + kw],
                preferred_element_type=jnp.float32,
            )
    h2_ref[...] = _sigmoid(acc2 + b2_ref[...]).reshape(n, 8, 8, 16)

    # ---- maxpool 2x2 -> (N, 4, 4, 16) ----
    p2_ref[...] = _pool2x2(h2_ref, 4, 4)

    # ---- fc1 (256->120) + sigmoid : contraction over (h, w, c) as 16 small dots ----
    acc3 = jnp.zeros((n, 120), jnp.float32)
    for h in range(4):
        for w in range(4):
            acc3 = acc3 + jnp.dot(
                p2_ref[:, h, w, :], w3_ref[h, w],
                preferred_element_type=jnp.float32,
            )
    f1 = _sigmoid(acc3 + b3_ref[...])

    # ---- fc2 (120->84) + sigmoid ----
    f2 = _sigmoid(
        jnp.dot(f1, w4_ref[...], preferred_element_type=jnp.float32) + b4_ref[...]
    )

    # ---- fc3 (84->10) + softmax over classes ----
    logits = jnp.dot(f2, w5_ref[...], preferred_element_type=jnp.float32) + b5_ref[...]
    m = jnp.max(logits, axis=-1, keepdims=True)
    e = jnp.exp(logits - m)
    o_ref[...] = (e / jnp.sum(e, axis=-1, keepdims=True)).astype(o_ref.dtype)


# ------------------------- parameter prep (one-time) -------------------------


def _prep_params(params):
    """Convert PyTorch-convention parameters to the kernel's layouts (one-time)."""
    (w1, b1, w2, b2, fw1, fb1, fw2, fb2, fw3, fb3) = params
    w1k = w1.reshape(6, 25).T                                     # (25, 6), rows kh*5+kw
    w2k = jnp.transpose(w2, (2, 3, 1, 0)).reshape(25, 6, 16)      # [kh*5+kw, cin, cout]
    # PyTorch flattens the (N, 16, 4, 4) feature map as c*16 + h*4 + w; fold that
    # permutation into fc1's weight so the kernel consumes channels-last directly.
    w3k = jnp.transpose(fw1.reshape(120, 16, 4, 4), (2, 3, 1, 0))  # (4, 4, 16, 120)
    return (
        w1k, b1.reshape(1, 6),
        w2k, b2.reshape(1, 16),
        w3k, fb1.reshape(1, 120),
        fw2.T, fb2.reshape(1, 84),
        fw3.T, fb3.reshape(1, 10),
    )


# ------------------------------ forward wrapper ------------------------------


@jax.jit
def lenet_forward(img, kparams):
    """img: (N, 1, 28, 28) float32 -> (N, 10) softmax probabilities."""
    n = img.shape[0]
    # Single fused gather for conv1's im2col (one XLA op); everything else runs
    # inside one pallas_call.  Output: (N, 24, 24, 25) with feature = kh*5 + kw
    # (Cin = 1), reshaped (free) to (N*576, 25).
    cols1 = lax.conv_general_dilated_patches(
        img,
        filter_shape=(5, 5),
        window_strides=(1, 1),
        padding="VALID",
        dimension_numbers=("NCHW", "OIHW", "NHWC"),
    ).reshape(n * 24 * 24, 25)

    return pl.pallas_call(
        _lenet_kernel,
        out_shape=jax.ShapeDtypeStruct((n, 10), jnp.float32),
        in_specs=[pl.BlockSpec(memory_space=pltpu.MemorySpace.VMEM) for _ in range(11)],
        out_specs=pl.BlockSpec(memory_space=pltpu.MemorySpace.VMEM),
        scratch_shapes=[
            pltpu.VMEM((n, 24, 24, 6), jnp.float32),   # conv1+sigmoid output
            pltpu.VMEM((n, 12, 12, 6), jnp.float32),   # pool1 output
            pltpu.VMEM((n, 8, 8, 16), jnp.float32),    # conv2+sigmoid output
            pltpu.VMEM((n, 4, 4, 16), jnp.float32),    # pool2 output
        ],
    )(cols1, *kparams)


# ------------------------------ reference (pure JAX) -------------------------


def reference_forward(img, params):
    (w1, b1, w2, b2, fw1, fb1, fw2, fb2, fw3, fb3) = params

    def conv(x, w, b):
        y = lax.conv_general_dilated(
            x, w, (1, 1), "VALID", dimension_numbers=("NCHW", "OIHW", "NCHW")
        )
        return jax.nn.sigmoid(y + b[None, :, None, None])

    def pool(x):
        nb, c, h, w = x.shape
        return x.reshape(nb, c, h // 2, 2, w // 2, 2).max(axis=(3, 5))

    y = pool(conv(img, w1, b1))
    y = pool(conv(y, w2, b2))
    y = y.reshape(y.shape[0], 256)
    y = jax.nn.sigmoid(y @ fw1.T + fb1)
    y = jax.nn.sigmoid(y @ fw2.T + fb2)
    return jax.nn.softmax(y @ fw3.T + fb3, axis=1)


# ------------------------------ params & main --------------------------------


def init_params(key):
    def uni(k, shape, fan_in):
        bound = 1.0 / jnp.sqrt(jnp.float32(fan_in))
        return jax.random.uniform(k, shape, jnp.float32, -bound, bound)

    ks = jax.random.split(key, 10)
    w1 = uni(ks[0], (6, 1, 5, 5), 1 * 5 * 5)
    b1 = uni(ks[1], (6,), 1 * 5 * 5)
    w2 = uni(ks[2], (16, 6, 5, 5), 6 * 5 * 5)
    b2 = uni(ks[3], (16,), 6 * 5 * 5)
    fw1 = uni(ks[4], (120, 256), 256)
    fb1 = uni(ks[5], (120,), 256)
    fw2 = uni(ks[6], (84, 120), 120)
    fb2 = uni(ks[7], (84,), 120)
    fw3 = uni(ks[8], (10, 84), 84)
    fb3 = uni(ks[9], (10,), 84)
    return (w1, b1, w2, b2, fw1, fb1, fw2, fb2, fw3, fb3)


if __name__ == "__main__":
    key = jax.random.PRNGKey(0)
    k_img, k_par = jax.random.split(key)
    # NCHW input with C=1, 28x28 (so the conv stack yields 16*4*4 = 256 features).
    img = jax.random.normal(k_img, (2, 1, 28, 28), dtype=jnp.float32)
    params = init_params(k_par)
    kparams = _prep_params(params)   # one-time layout conversion of the weights

    out = jax.block_until_ready(lenet_forward(img, kparams))
    ref = jax.block_until_ready(reference_forward(img, params))

    assert out.shape == (2, 10)
    assert jnp.allclose(out, ref, atol=5e-5, rtol=1e-4), "Pallas output mismatch vs reference"
    assert jnp.allclose(jnp.sum(out, axis=1), jnp.ones((2,)), atol=1e-5)

    print("KERNEL_OK")
</pallas_src>

<mosaic_0001>
module attributes {stable_mosaic.version = 11 : i64} {
  func.func @_lenet_kernel(%arg0: memref<1152x25xf32, #tpu.memory_space<vmem>>, %arg1: memref<25x6xf32, #tpu.memory_space<vmem>>, %arg2: memref<1x6xf32, #tpu.memory_space<vmem>>, %arg3: memref<25x6x16xf32, #tpu.memory_space<vmem>>, %arg4: memref<1x16xf32, #tpu.memory_space<vmem>>, %arg5: memref<4x4x16x120xf32, #tpu.memory_space<vmem>>, %arg6: memref<1x120xf32, #tpu.memory_space<vmem>>, %arg7: memref<120x84xf32, #tpu.memory_space<vmem>>, %arg8: memref<1x84xf32, #tpu.memory_space<vmem>>, %arg9: memref<84x10xf32, #tpu.memory_space<vmem>>, %arg10: memref<1x10xf32, #tpu.memory_space<vmem>>, %arg11: memref<2x10xf32, #tpu.memory_space<vmem>>, %arg12: memref<2x24x24x6xf32, #tpu.memory_space<vmem>>, %arg13: memref<2x12x12x6xf32, #tpu.memory_space<vmem>>, %arg14: memref<2x8x8x16xf32, #tpu.memory_space<vmem>>, %arg15: memref<2x4x4x16xf32, #tpu.memory_space<vmem>>) attributes {dimension_semantics = [], scalar_prefetch = 0 : i64, scratch_operands = 4 : i64, tpu.core_type = #tpu.core_type<tc>} {
    %c0 = arith.constant 0 : index
    %c0_0 = arith.constant 0 : index
    %0 = vector.load %arg0[%c0, %c0_0] : memref<1152x25xf32, #tpu.memory_space<vmem>>, vector<1152x25xf32>
    %c0_1 = arith.constant 0 : index
    %c0_2 = arith.constant 0 : index
    %1 = vector.load %arg1[%c0_1, %c0_2] : memref<25x6xf32, #tpu.memory_space<vmem>>, vector<25x6xf32>
    %cst = arith.constant dense<0.000000e+00> : vector<1152x6xf32>
    %2 = tpu.matmul %0, %1, %cst {dimension_numbers = #tpu.dot_dimension_numbers<[1], [0], [0], [1], [0, 0, 1, 1], [], []>} : vector<1152x25xf32>, vector<25x6xf32>, vector<1152x6xf32> -> vector<1152x6xf32>
    %c0_3 = arith.constant 0 : index
    %c0_4 = arith.constant 0 : index
    %3 = vector.load %arg2[%c0_3, %c0_4] : memref<1x6xf32, #tpu.memory_space<vmem>>, vector<1x6xf32>
    %4 = vector.broadcast %3 : vector<1x6xf32> to vector<1152x6xf32>
    %5 = arith.addf %2, %4 : vector<1152x6xf32>
    %cst_5 = arith.constant 0.000000e+00 : f32
    %6 = vector.broadcast %cst_5 : f32 to vector<1152x6xf32>
    %7 = arith.subf %6, %5 : vector<1152x6xf32>
    %8 = math.exp %7 : vector<1152x6xf32>
    %cst_6 = arith.constant 1.000000e+00 : f32
    %9 = vector.broadcast %cst_6 : f32 to vector<1152x6xf32>
    %10 = arith.addf %9, %8 : vector<1152x6xf32>
    %cst_7 = arith.constant 1.000000e+00 : f32
    %11 = vector.broadcast %cst_7 : f32 to vector<1152x6xf32>
    %12 = arith.divf %11, %10 : vector<1152x6xf32>
    %13 = vector.shape_cast %12 : vector<1152x6xf32> to vector<2x24x24x6xf32>
    %c0_8 = arith.constant 0 : index
    %c0_9 = arith.constant 0 : index
    %c0_10 = arith.constant 0 : index
    %c0_11 = arith.constant 0 : index
    %14 = vector.load %arg12[%c0_8, %c0_9, %c0_10, %c0_11] : memref<2x24x24x6xf32, #tpu.memory_space<vmem>>, vector<2x24x24x6xf32>
    tpu.vector_store %arg12[%c0_8, %c0_9, %c0_10, %c0_11], %13 {strides = array<i32>} : memref<2x24x24x6xf32, #tpu.memory_space<vmem>>, vector<2x24x24x6xf32>,
    %c0_12 = arith.constant 0 : index
    %c0_13 = arith.constant 0 : index
    %c0_14 = arith.constant 0 : index
    %c0_15 = arith.constant 0 : index
    %15 = tpu.strided_load %arg12[%c0_12, %c0_13, %c0_14, %c0_15] {strides = array<i32: 1, 2, 2, 1>} : memref<2x24x24x6xf32, #tpu.memory_space<vmem>>, vector<2x12x12x6xf32>
    %c0_16 = arith.constant 0 : index
    %c0_17 = arith.constant 0 : index
    %c1 = arith.constant 1 : index
    %c0_18 = arith.constant 0 : index
    %16 = tpu.strided_load %arg12[%c0_16, %c0_17, %c1, %c0_18] {strides = array<i32: 1, 2, 2, 1>} : memref<2x24x24x6xf32, #tpu.memory_space<vmem>>, vector<2x12x12x6xf32>
    %c0_19 = arith.constant 0 : index
    %c1_20 = arith.constant 1 : index
    %c0_21 = arith.constant 0 : index
    %c0_22 = arith.constant 0 : index
    %17 = tpu.strided_load %arg12[%c0_19, %c1_20, %c0_21, %c0_22] {strides = array<i32: 1, 2, 2, 1>} : memref<2x24x24x6xf32, #tpu.memory_space<vmem>>, vector<2x12x12x6xf32>
    %c0_23 = arith.constant 0 : index
    %c1_24 = arith.constant 1 : index
    %c1_25 = arith.constant 1 : index
    %c0_26 = arith.constant 0 : index
    %18 = tpu.strided_load %arg12[%c0_23, %c1_24, %c1_25, %c0_26] {strides = array<i32: 1, 2, 2, 1>} : memref<2x24x24x6xf32, #tpu.memory_space<vmem>>, vector<2x12x12x6xf32>
    %19 = arith.maximumf %15, %16 : vector<2x12x12x6xf32>
    %20 = arith.maximumf %17, %18 : vector<2x12x12x6xf32>
    %21 = arith.maximumf %19, %20 : vector<2x12x12x6xf32>
    %c0_27 = arith.constant 0 : index
    %c0_28 = arith.constant 0 : index
    %c0_29 = arith.constant 0 : index
    %c0_30 = arith.constant 0 : index
    %22 = vector.load %arg13[%c0_27, %c0_28, %c0_29, %c0_30] : memref<2x12x12x6xf32, #tpu.memory_space<vmem>>, vector<2x12x12x6xf32>
    tpu.vector_store %arg13[%c0_27, %c0_28, %c0_29, %c0_30], %21 {strides = array<i32>} : memref<2x12x12x6xf32, #tpu.memory_space<vmem>>, vector<2x12x12x6xf32>,
    %cst_31 = arith.constant 0.000000e+00 : f32
    %23 = vector.broadcast %cst_31 : f32 to vector<128x16xf32>
    %c0_32 = arith.constant 0 : index
    %c0_33 = arith.constant 0 : index
    %c0_34 = arith.constant 0 : index
    %c0_35 = arith.constant 0 : index
    %24 = vector.load %arg13[%c0_32, %c0_33, %c0_34, %c0_35] : memref<2x12x12x6xf32, #tpu.memory_space<vmem>>, vector<2x8x8x6xf32>
    %25 = vector.shape_cast %24 : vector<2x8x8x6xf32> to vector<128x6xf32>
    %c0_36 = arith.constant 0 : index
    %c0_37 = arith.constant 0 : index
    %c0_38 = arith.constant 0 : index
    %26 = vector.load %arg3[%c0_36, %c0_37, %c0_38] : memref<25x6x16xf32, #tpu.memory_space<vmem>>, vector<1x6x16xf32>
    %27 = vector.shape_cast %26 : vector<1x6x16xf32> to vector<6x16xf32>
    %cst_39 = arith.constant dense<0.000000e+00> : vector<128x16xf32>
    %28 = tpu.matmul %25, %27, %cst_39 {dimension_numbers = #tpu.dot_dimension_numbers<[1], [0], [0], [1], [0, 0, 1, 1], [], []>} : vector<128x6xf32>, vector<6x16xf32>, vector<128x16xf32> -> vector<128x16xf32>
    %29 = arith.addf %23, %28 : vector<128x16xf32>
    %c0_40 = arith.constant 0 : index
    %c0_41 = arith.constant 0 : index
    %c1_42 = arith.constant 1 : index
    %c0_43 = arith.constant 0 : index
    %30 = vector.load %arg13[%c0_40, %c0_41, %c1_42, %c0_43] : memref<2x12x12x6xf32, #tpu.memory_space<vmem>>, vector<2x8x8x6xf32>
    %31 = vector.shape_cast %30 : vector<2x8x8x6xf32> to vector<128x6xf32>
    %c1_44 = arith.constant 1 : index
    %c0_45 = arith.constant 0 : index
    %c0_46 = arith.constant 0 : index
    %32 = vector.load %arg3[%c1_44, %c0_45, %c0_46] : memref<25x6x16xf32, #tpu.memory_space<vmem>>, vector<1x6x16xf32>
    %33 = vector.shape_cast %32 : vector<1x6x16xf32> to vector<6x16xf32>
    %cst_47 = arith.constant dense<0.000000e+00> : vector<128x16xf32>
    %34 = tpu.matmul %31, %33, %cst_47 {dimension_numbers = #tpu.dot_dimension_numbers<[1], [0], [0], [1], [0, 0, 1, 1], [], []>} : vector<128x6xf32>, vector<6x16xf32>, vector<128x16xf32> -> vector<128x16xf32>
    %35 = arith.addf %29, %34 : vector<128x16xf32>
    %c0_48 = arith.constant 0 : index
    %c0_49 = arith.constant 0 : index
    %c2 = arith.constant 2 : index
    %c0_50 = arith.constant 0 : index
    %36 = vector.load %arg13[%c0_48, %c0_49, %c2, %c0_50] : memref<2x12x12x6xf32, #tpu.memory_space<vmem>>, vector<2x8x8x6xf32>
    %37 = vector.shape_cast %36 : vector<2x8x8x6xf32> to vector<128x6xf32>
    %c2_51 = arith.constant 2 : index
    %c0_52 = arith.constant 0 : index
    %c0_53 = arith.constant 0 : index
    %38 = vector.load %arg3[%c2_51, %c0_52, %c0_53] : memref<25x6x16xf32, #tpu.memory_space<vmem>>, vector<1x6x16xf32>
    %39 = vector.shape_cast %38 : vector<1x6x16xf32> to vector<6x16xf32>
    %cst_54 = arith.constant dense<0.000000e+00> : vector<128x16xf32>
    %40 = tpu.matmul %37, %39, %cst_54 {dimension_numbers = #tpu.dot_dimension_numbers<[1], [0], [0], [1], [0, 0, 1, 1], [], []>} : vector<128x6xf32>, vector<6x16xf32>, vector<128x16xf32> -> vector<128x16xf32>
    %41 = arith.addf %35, %40 : vector<128x16xf32>
    %c0_55 = arith.constant 0 : index
    %c0_56 = arith.constant 0 : index
    %c3 = arith.constant 3 : index
    %c0_57 = arith.constant 0 : index
    %42 = vector.load %arg13[%c0_55, %c0_56, %c3, %c0_57] : memref<2x12x12x6xf32, #tpu.memory_space<vmem>>, vector<2x8x8x6xf32>
    %43 = vector.shape_cast %42 : vector<2x8x8x6xf32> to vector<128x6xf32>
    %c3_58 = arith.constant 3 : index
    %c0_59 = arith.constant 0 : index
    %c0_60 = arith.constant 0 : index
    %44 = vector.load %arg3[%c3_58, %c0_59, %c0_60] : memref<25x6x16xf32, #tpu.memory_space<vmem>>, vector<1x6x16xf32>
    %45 = vector.shape_cast %44 : vector<1x6x16xf32> to vector<6x16xf32>
    %cst_61 = arith.constant dense<0.000000e+00> : vector<128x16xf32>
    %46 = tpu.matmul %43, %45, %cst_61 {dimension_numbers = #tpu.dot_dimension_numbers<[1], [0], [0], [1], [0, 0, 1, 1], [], []>} : vector<128x6xf32>, vector<6x16xf32>, vector<128x16xf32> -> vector<128x16xf32>
    %47 = arith.addf %41, %46 : vector<128x16xf32>
    %c0_62 = arith.constant 0 : index
    %c0_63 = arith.constant 0 : index
    %c4 = arith.constant 4 : index
    %c0_64 = arith.constant 0 : index
    %48 = vector.load %arg13[%c0_62, %c0_63, %c4, %c0_64] : memref<2x12x12x6xf32, #tpu.memory_space<vmem>>, vector<2x8x8x6xf32>
    %49 = vector.shape_cast %48 : vector<2x8x8x6xf32> to vector<128x6xf32>
    %c4_65 = arith.constant 4 : index
    %c0_66 = arith.constant 0 : index
    %c0_67 = arith.constant 0 : index
    %50 = vector.load %arg3[%c4_65, %c0_66, %c0_67] : memref<25x6x16xf32, #tpu.memory_space<vmem>>, vector<1x6x16xf32>
    %51 = vector.shape_cast %50 : vector<1x6x16xf32> to vector<6x16xf32>
    %cst_68 = arith.constant dense<0.000000e+00> : vector<128x16xf32>
    %52 = tpu.matmul %49, %51, %cst_68 {dimension_numbers = #tpu.dot_dimension_numbers<[1], [0], [0], [1], [0, 0, 1, 1], [], []>} : vector<128x6xf32>, vector<6x16xf32>, vector<128x16xf32> -> vector<128x16xf32>
    %53 = arith.addf %47, %52 : vector<128x16xf32>
    %c0_69 = arith.constant 0 : index
    %c1_70 = arith.constant 1 : index
    %c0_71 = arith.constant 0 : index
    %c0_72 = arith.constant 0 : index
    %54 = vector.load %arg13[%c0_69, %c1_70, %c0_71, %c0_72] : memref<2x12x12x6xf32, #tpu.memory_space<vmem>>, vector<2x8x8x6xf32>
    %55 = vector.shape_cast %54 : vector<2x8x8x6xf32> to vector<128x6xf32>
    %c5 = arith.constant 5 : index
    %c0_73 = arith.constant 0 : index
    %c0_74 = arith.constant 0 : index
    %56 = vector.load %arg3[%c5, %c0_73, %c0_74] : memref<25x6x16xf32, #tpu.memory_space<vmem>>, vector<1x6x16xf32>
    %57 = vector.shape_cast %56 : vector<1x6x16xf32> to vector<6x16xf32>
    %cst_75 = arith.constant dense<0.000000e+00> : vector<128x16xf32>
    %58 = tpu.matmul %55, %57, %cst_75 {dimension_numbers = #tpu.dot_dimension_numbers<[1], [0], [0], [1], [0, 0, 1, 1], [], []>} : vector<128x6xf32>, vector<6x16xf32>, vector<128x16xf32> -> vector<128x16xf32>
    %59 = arith.addf %53, %58 : vector<128x16xf32>
    %c0_76 = arith.constant 0 : index
    %c1_77 = arith.constant 1 : index
    %c1_78 = arith.constant 1 : index
    %c0_79 = arith.constant 0 : index
    %60 = vector.load %arg13[%c0_76, %c1_77, %c1_78, %c0_79] : memref<2x12x12x6xf32, #tpu.memory_space<vmem>>, vector<2x8x8x6xf32>
    %61 = vector.shape_cast %60 : vector<2x8x8x6xf32> to vector<128x6xf32>
    %c6 = arith.constant 6 : index
    %c0_80 = arith.constant 0 : index
    %c0_81 = arith.constant 0 : index
    %62 = vector.load %arg3[%c6, %c0_80, %c0_81] : memref<25x6x16xf32, #tpu.memory_space<vmem>>, vector<1x6x16xf32>
    %63 = vector.shape_cast %62 : vector<1x6x16xf32> to vector<6x16xf32>
    %cst_82 = arith.constant dense<0.000000e+00> : vector<128x16xf32>
    %64 = tpu.matmul %61, %63, %cst_82 {dimension_numbers = #tpu.dot_dimension_numbers<[1], [0], [0], [1], [0, 0, 1, 1], [], []>} : vector<128x6xf32>, vector<6x16xf32>, vector<128x16xf32> -> vector<128x16xf32>
    %65 = arith.addf %59, %64 : vector<128x16xf32>
    %c0_83 = arith.constant 0 : index
    %c1_84 = arith.constant 1 : index
    %c2_85 = arith.constant 2 : index
    %c0_86 = arith.constant 0 : index
    %66 = vector.load %arg13[%c0_83, %c1_84, %c2_85, %c0_86] : memref<2x12x12x6xf32, #tpu.memory_space<vmem>>, vector<2x8x8x6xf32>
    %67 = vector.shape_cast %66 : vector<2x8x8x6xf32> to vector<128x6xf32>
    %c7 = arith.constant 7 : index
    %c0_87 = arith.constant 0 : index
    %c0_88 = arith.constant 0 : index
    %68 = vector.load %arg3[%c7, %c0_87, %c0_88] : memref<25x6x16xf32, #tpu.memory_space<vmem>>, vector<1x6x16xf32>
    %69 = vector.shape_cast %68 : vector<1x6x16xf32> to vector<6x16xf32>
    %cst_89 = arith.constant dense<0.000000e+00> : vector<128x16xf32>
    %70 = tpu.matmul %67, %69, %cst_89 {dimension_numbers = #tpu.dot_dimension_numbers<[1], [0], [0], [1], [0, 0, 1, 1], [], []>} : vector<128x6xf32>, vector<6x16xf32>, vector<128x16xf32> -> vector<128x16xf32>
    %71 = arith.addf %65, %70 : vector<128x16xf32>
    %c0_90 = arith.constant 0 : index
    %c1_91 = arith.constant 1 : index
    %c3_92 = arith.constant 3 : index
    %c0_93 = arith.constant 0 : index
    %72 = vector.load %arg13[%c0_90, %c1_91, %c3_92, %c0_93] : memref<2x12x12x6xf32, #tpu.memory_space<vmem>>, vector<2x8x8x6xf32>
    %73 = vector.shape_cast %72 : vector<2x8x8x6xf32> to vector<128x6xf32>
    %c8 = arith.constant 8 : index
    %c0_94 = arith.constant 0 : index
    %c0_95 = arith.constant 0 : index
    %74 = vector.load %arg3[%c8, %c0_94, %c0_95] : memref<25x6x16xf32, #tpu.memory_space<vmem>>, vector<1x6x16xf32>
    %75 = vector.shape_cast %74 : vector<1x6x16xf32> to vector<6x16xf32>
    %cst_96 = arith.constant dense<0.000000e+00> : vector<128x16xf32>
    %76 = tpu.matmul %73, %75, %cst_96 {dimension_numbers = #tpu.dot_dimension_numbers<[1], [0], [0], [1], [0, 0, 1, 1], [], []>} : vector<128x6xf32>, vector<6x16xf32>, vector<128x16xf32> -> vector<128x16xf32>
    %77 = arith.addf %71, %76 : vector<128x16xf32>
    %c0_97 = arith.constant 0 : index
    %c1_98 = arith.constant 1 : index
    %c4_99 = arith.constant 4 : index
    %c0_100 = arith.constant 0 : index
    %78 = vector.load %arg13[%c0_97, %c1_98, %c4_99, %c0_100] : memref<2x12x12x6xf32, #tpu.memory_space<vmem>>, vector<2x8x8x6xf32>
    %79 = vector.shape_cast %78 : vector<2x8x8x6xf32> to vector<128x6xf32>
    %c9 = arith.constant 9 : index
    %c0_101 = arith.constant 0 : index
    %c0_102 = arith.constant 0 : index
    %80 = vector.load %arg3[%c9, %c0_101, %c0_102] : memref<25x6x16xf32, #tpu.memory_space<vmem>>, vector<1x6x16xf32>
    %81 = vector.shape_cast %80 : vector<1x6x16xf32> to vector<6x16xf32>
    %cst_103 = arith.constant dense<0.000000e+00> : vector<128x16xf32>
    %82 = tpu.matmul %79, %81, %cst_103 {dimension_numbers = #tpu.dot_dimension_numbers<[1], [0], [0], [1], [0, 0, 1, 1], [], []>} : vector<128x6xf32>, vector<6x16xf32>, vector<128x16xf32> -> vector<128x16xf32>
    %83 = arith.addf %77, %82 : vector<128x16xf32>
    %c0_104 = arith.constant 0 : index
    %c2_105 = arith.constant 2 : index
    %c0_106 = arith.constant 0 : index
    %c0_107 = arith.constant 0 : index
    %84 = vector.load %arg13[%c0_104, %c2_105, %c0_106, %c0_107] : memref<2x12x12x6xf32, #tpu.memory_space<vmem>>, vector<2x8x8x6xf32>
    %85 = vector.shape_cast %84 : vector<2x8x8x6xf32> to vector<128x6xf32>
    %c10 = arith.constant 10 : index
    %c0_108 = arith.constant 0 : index
    %c0_109 = arith.constant 0 : index
    %86 = vector.load %arg3[%c10, %c0_108, %c0_109] : memref<25x6x16xf32, #tpu.memory_space<vmem>>, vector<1x6x16xf32>
    %87 = vector.shape_cast %86 : vector<1x6x16xf32> to vector<6x16xf32>
    %cst_110 = arith.constant dense<0.000000e+00> : vector<128x16xf32>
    %88 = tpu.matmul %85, %87, %cst_110 {dimension_numbers = #tpu.dot_dimension_numbers<[1], [0], [0], [1], [0, 0, 1, 1], [], []>} : vector<128x6xf32>, vector<6x16xf32>, vector<128x16xf32> -> vector<128x16xf32>
    %89 = arith.addf %83, %88 : vector<128x16xf32>
    %c0_111 = arith.constant 0 : index
    %c2_112 = arith.constant 2 : index
    %c1_113 = arith.constant 1 : index
    %c0_114 = arith.constant 0 : index
    %90 = vector.load %arg13[%c0_111, %c2_112, %c1_113, %c0_114] : memref<2x12x12x6xf32, #tpu.memory_space<vmem>>, vector<2x8x8x6xf32>
    %91 = vector.shape_cast %90 : vector<2x8x8x6xf32> to vector<128x6xf32>
    %c11 = arith.constant 11 : index
    %c0_115 = arith.constant 0 : index
    %c0_116 = arith.constant 0 : index
    %92 = vector.load %arg3[%c11, %c0_115, %c0_116] : memref<25x6x16xf32, #tpu.memory_space<vmem>>, vector<1x6x16xf32>
    %93 = vector.shape_cast %92 : vector<1x6x16xf32> to vector<6x16xf32>
    %cst_117 = arith.constant dense<0.000000e+00> : vector<128x16xf32>
    %94 = tpu.matmul %91, %93, %cst_117 {dimension_numbers = #tpu.dot_dimension_numbers<[1], [0], [0], [1], [0, 0, 1, 1], [], []>} : vector<128x6xf32>, vector<6x16xf32>, vector<128x16xf32> -> vector<128x16xf32>
    %95 = arith.addf %89, %94 : vector<128x16xf32>
    %c0_118 = arith.constant 0 : index
    %c2_119 = arith.constant 2 : index
    %c2_120 = arith.constant 2 : index
    %c0_121 = arith.constant 0 : index
    %96 = vector.load %arg13[%c0_118, %c2_119, %c2_120, %c0_121] : memref<2x12x12x6xf32, #tpu.memory_space<vmem>>, vector<2x8x8x6xf32>
    %97 = vector.shape_cast %96 : vector<2x8x8x6xf32> to vector<128x6xf32>
    %c12 = arith.constant 12 : index
    %c0_122 = arith.constant 0 : index
    %c0_123 = arith.constant 0 : index
    %98 = vector.load %arg3[%c12, %c0_122, %c0_123] : memref<25x6x16xf32, #tpu.memory_space<vmem>>, vector<1x6x16xf32>
    %99 = vector.shape_cast %98 : vector<1x6x16xf32> to vector<6x16xf32>
    %cst_124 = arith.constant dense<0.000000e+00> : vector<128x16xf32>
    %100 = tpu.matmul %97, %99, %cst_124 {dimension_numbers = #tpu.dot_dimension_numbers<[1], [0], [0], [1], [0, 0, 1, 1], [], []>} : vector<128x6xf32>, vector<6x16xf32>, vector<128x16xf32> -> vector<128x16xf32>
    %101 = arith.addf %95, %100 : vector<128x16xf32>
    %c0_125 = arith.constant 0 : index
    %c2_126 = arith.constant 2 : index
    %c3_127 = arith.constant 3 : index
    %c0_128 = arith.constant 0 : index
    %102 = vector.load %arg13[%c0_125, %c2_126, %c3_127, %c0_128] : memref<2x12x12x6xf32, #tpu.memory_space<vmem>>, vector<2x8x8x6xf32>
    %103 = vector.shape_cast %102 : vector<2x8x8x6xf32> to vector<128x6xf32>
    %c13 = arith.constant 13 : index
    %c0_129 = arith.constant 0 : index
    %c0_130 = arith.constant 0 : index
    %104 = vector.load %arg3[%c13, %c0_129, %c0_130] : memref<25x6x16xf32, #tpu.memory_space<vmem>>, vector<1x6x16xf32>
    %105 = vector.shape_cast %104 : vector<1x6x16xf32> to vector<6x16xf32>
    %cst_131 = arith.constant dense<0.000000e+00> : vector<128x16xf32>
    %106 = tpu.matmul %103, %105, %cst_131 {dimension_numbers = #tpu.dot_dimension_numbers<[1], [0], [0], [1], [0, 0, 1, 1], [], []>} : vector<128x6xf32>, vector<6x16xf32>, vector<128x16xf32> -> vector<128x16xf32>
    %107 = arith.addf %101, %106 : vector<128x16xf32>
    %c0_132 = arith.constant 0 : index
    %c2_133 = arith.constant 2 : index
    %c4_134 = arith.constant 4 : index
    %c0_135 = arith.constant 0 : index
    %108 = vector.load %arg13[%c0_132, %c2_133, %c4_134, %c0_135] : memref<2x12x12x6xf32, #tpu.memory_space<vmem>>, vector<2x8x8x6xf32>
    %109 = vector.shape_cast %108 : vector<2x8x8x6xf32> to vector<128x6xf32>
    %c14 = arith.constant 14 : index
    %c0_136 = arith.constant 0 : index
    %c0_137 = arith.constant 0 : index
    %110 = vector.load %arg3[%c14, %c0_136, %c0_137] : memref<25x6x16xf32, #tpu.memory_space<vmem>>, vector<1x6x16xf32>
    %111 = vector.shape_cast %110 : vector<1x6x16xf32> to vector<6x16xf32>
    %cst_138 = arith.constant dense<0.000000e+00> : vector<128x16xf32>
    %112 = tpu.matmul %109, %111, %cst_138 {dimension_numbers = #tpu.dot_dimension_numbers<[1], [0], [0], [1], [0, 0, 1, 1], [], []>} : vector<128x6xf32>, vector<6x16xf32>, vector<128x16xf32> -> vector<128x16xf32>
    %113 = arith.addf %107, %112 : vector<128x16xf32>
    %c0_139 = arith.constant 0 : index
    %c3_140 = arith.constant 3 : index
    %c0_141 = arith.constant 0 : index
    %c0_142 = arith.constant 0 : index
    %114 = vector.load %arg13[%c0_139, %c3_140, %c0_141, %c0_142] : memref<2x12x12x6xf32, #tpu.memory_space<vmem>>, vector<2x8x8x6xf32>
    %115 = vector.shape_cast %114 : vector<2x8x8x6xf32> to vector<128x6xf32>
    %c15 = arith.constant 15 : index
    %c0_143 = arith.constant 0 : index
    %c0_144 = arith.constant 0 : index
    %116 = vector.load %arg3[%c15, %c0_143, %c0_144] : memref<25x6x16xf32, #tpu.memory_space<vmem>>, vector<1x6x16xf32>
    %117 = vector.shape_cast %116 : vector<1x6x16xf32> to vector<6x16xf32>
    %cst_145 = arith.constant dense<0.000000e+00> : vector<128x16xf32>
    %118 = tpu.matmul %115, %117, %cst_145 {dimension_numbers = #tpu.dot_dimension_numbers<[1], [0], [0], [1], [0, 0, 1, 1], [], []>} : vector<128x6xf32>, vector<6x16xf32>, vector<128x16xf32> -> vector<128x16xf32>
    %119 = arith.addf %113, %118 : vector<128x16xf32>
    %c0_146 = arith.constant 0 : index
    %c3_147 = arith.constant 3 : index
    %c1_148 = arith.constant 1 : index
    %c0_149 = arith.constant 0 : index
    %120 = vector.load %arg13[%c0_146, %c3_147, %c1_148, %c0_149] : memref<2x12x12x6xf32, #tpu.memory_space<vmem>>, vector<2x8x8x6xf32>
    %121 = vector.shape_cast %120 : vector<2x8x8x6xf32> to vector<128x6xf32>
    %c16 = arith.constant 16 : index
    %c0_150 = arith.constant 0 : index
    %c0_151 = arith.constant 0 : index
    %122 = vector.load %arg3[%c16, %c0_150, %c0_151] : memref<25x6x16xf32, #tpu.memory_space<vmem>>, vector<1x6x16xf32>
    %123 = vector.shape_cast %122 : vector<1x6x16xf32> to vector<6x16xf32>
    %cst_152 = arith.constant dense<0.000000e+00> : vector<128x16xf32>
    %124 = tpu.matmul %121, %123, %cst_152 {dimension_numbers = #tpu.dot_dimension_numbers<[1], [0], [0], [1], [0, 0, 1, 1], [], []>} : vector<128x6xf32>, vector<6x16xf32>, vector<128x16xf32> -> vector<128x16xf32>
    %125 = arith.addf %119, %124 : vector<128x16xf32>
    %c0_153 = arith.constant 0 : index
    %c3_154 = arith.constant 3 : index
    %c2_155 = arith.constant 2 : index
    %c0_156 = arith.constant 0 : index
    %126 = vector.load %arg13[%c0_153, %c3_154, %c2_155, %c0_156] : memref<2x12x12x6xf32, #tpu.memory_space<vmem>>, vector<2x8x8x6xf32>
    %127 = vector.shape_cast %126 : vector<2x8x8x6xf32> to vector<128x6xf32>
    %c17 = arith.constant 17 : index
    %c0_157 = arith.constant 0 : index
    %c0_158 = arith.constant 0 : index
    %128 = vector.load %arg3[%c17, %c0_157, %c0_158] : memref<25x6x16xf32, #tpu.memory_space<vmem>>, vector<1x6x16xf32>
    %129 = vector.shape_cast %128 : vector<1x6x16xf32> to vector<6x16xf32>
    %cst_159 = arith.constant dense<0.000000e+00> : vector<128x16xf32>
    %130 = tpu.matmul %127, %129, %cst_159 {dimension_numbers = #tpu.dot_dimension_numbers<[1], [0], [0], [1], [0, 0, 1, 1], [], []>} : vector<128x6xf32>, vector<6x16xf32>, vector<128x16xf32> -> vector<128x16xf32>
    %131 = arith.addf %125, %130 : vector<128x16xf32>
    %c0_160 = arith.constant 0 : index
    %c3_161 = arith.constant 3 : index
    %c3_162 = arith.constant 3 : index
    %c0_163 = arith.constant 0 : index
    %132 = vector.load %arg13[%c0_160, %c3_161, %c3_162, %c0_163] : memref<2x12x12x6xf32, #tpu.memory_space<vmem>>, vector<2x8x8x6xf32>
    %133 = vector.shape_cast %132 : vector<2x8x8x6xf32> to vector<128x6xf32>
    %c18 = arith.constant 18 : index
    %c0_164 = arith.constant 0 : index
    %c0_165 = arith.constant 0 : index
    %134 = vector.load %arg3[%c18, %c0_164, %c0_165] : memref<25x6x16xf32, #tpu.memory_space<vmem>>, vector<1x6x16xf32>
    %135 = vector.shape_cast %134 : vector<1x6x16xf32> to vector<6x16xf32>
    %cst_166 = arith.constant dense<0.000000e+00> : vector<128x16xf32>
    %136 = tpu.matmul %133, %135, %cst_166 {dimension_numbers = #tpu.dot_dimension_numbers<[1], [0], [0], [1], [0, 0, 1, 1], [], []>} : vector<128x6xf32>, vector<6x16xf32>, vector<128x16xf32> -> vector<128x16xf32>
    %137 = arith.addf %131, %136 : vector<128x16xf32>
    %c0_167 = arith.constant 0 : index
    %c3_168 = arith.constant 3 : index
    %c4_169 = arith.constant 4 : index
    %c0_170 = arith.constant 0 : index
    %138 = vector.load %arg13[%c0_167, %c3_168, %c4_169, %c0_170] : memref<2x12x12x6xf32, #tpu.memory_space<vmem>>, vector<2x8x8x6xf32>
    %139 = vector.shape_cast %138 : vector<2x8x8x6xf32> to vector<128x6xf32>
    %c19 = arith.constant 19 : index
    %c0_171 = arith.constant 0 : index
    %c0_172 = arith.constant 0 : index
    %140 = vector.load %arg3[%c19, %c0_171, %c0_172] : memref<25x6x16xf32, #tpu.memory_space<vmem>>, vector<1x6x16xf32>
    %141 = vector.shape_cast %140 : vector<1x6x16xf32> to vector<6x16xf32>
    %cst_173 = arith.constant dense<0.000000e+00> : vector<128x16xf32>
    %142 = tpu.matmul %139, %141, %cst_173 {dimension_numbers = #tpu.dot_dimension_numbers<[1], [0], [0], [1], [0, 0, 1, 1], [], []>} : vector<128x6xf32>, vector<6x16xf32>, vector<128x16xf32> -> vector<128x16xf32>
    %143 = arith.addf %137, %142 : vector<128x16xf32>
    %c0_174 = arith.constant 0 : index
    %c4_175 = arith.constant 4 : index
    %c0_176 = arith.constant 0 : index
    %c0_177 = arith.constant 0 : index
    %144 = vector.load %arg13[%c0_174, %c4_175, %c0_176, %c0_177] : memref<2x12x12x6xf32, #tpu.memory_space<vmem>>, vector<2x8x8x6xf32>
    %145 = vector.shape_cast %144 : vector<2x8x8x6xf32> to vector<128x6xf32>
    %c20 = arith.constant 20 : index
    %c0_178 = arith.constant 0 : index
    %c0_179 = arith.constant 0 : index
    %146 = vector.load %arg3[%c20, %c0_178, %c0_179] : memref<25x6x16xf32, #tpu.memory_space<vmem>>, vector<1x6x16xf32>
    %147 = vector.shape_cast %146 : vector<1x6x16xf32> to vector<6x16xf32>
    %cst_180 = arith.constant dense<0.000000e+00> : vector<128x16xf32>
    %148 = tpu.matmul %145, %147, %cst_180 {dimension_numbers = #tpu.dot_dimension_numbers<[1], [0], [0], [1], [0, 0, 1, 1], [], []>} : vector<128x6xf32>, vector<6x16xf32>, vector<128x16xf32> -> vector<128x16xf32>
    %149 = arith.addf %143, %148 : vector<128x16xf32>
    %c0_181 = arith.constant 0 : index
    %c4_182 = arith.constant 4 : index
    %c1_183 = arith.constant 1 : index
    %c0_184 = arith.constant 0 : index
    %150 = vector.load %arg13[%c0_181, %c4_182, %c1_183, %c0_184] : memref<2x12x12x6xf32, #tpu.memory_space<vmem>>, vector<2x8x8x6xf32>
    %151 = vector.shape_cast %150 : vector<2x8x8x6xf32> to vector<128x6xf32>
    %c21 = arith.constant 21 : index
    %c0_185 = arith.constant 0 : index
    %c0_186 = arith.constant 0 : index
    %152 = vector.load %arg3[%c21, %c0_185, %c0_186] : memref<25x6x16xf32, #tpu.memory_space<vmem>>, vector<1x6x16xf32>
    %153 = vector.shape_cast %152 : vector<1x6x16xf32> to vector<6x16xf32>
    %cst_187 = arith.constant dense<0.000000e+00> : vector<128x16xf32>
    %154 = tpu.matmul %151, %153, %cst_187 {dimension_numbers = #tpu.dot_dimension_numbers<[1], [0], [0], [1], [0, 0, 1, 1], [], []>} : vector<128x6xf32>, vector<6x16xf32>, vector<128x16xf32> -> vector<128x16xf32>
    %155 = arith.addf %149, %154 : vector<128x16xf32>
    %c0_188 = arith.constant 0 : index
    %c4_189 = arith.constant 4 : index
    %c2_190 = arith.constant 2 : index
    %c0_191 = arith.constant 0 : index
    %156 = vector.load %arg13[%c0_188, %c4_189, %c2_190, %c0_191] : memref<2x12x12x6xf32, #tpu.memory_space<vmem>>, vector<2x8x8x6xf32>
    %157 = vector.shape_cast %156 : vector<2x8x8x6xf32> to vector<128x6xf32>
    %c22 = arith.constant 22 : index
    %c0_192 = arith.constant 0 : index
    %c0_193 = arith.constant 0 : index
    %158 = vector.load %arg3[%c22, %c0_192, %c0_193] : memref<25x6x16xf32, #tpu.memory_space<vmem>>, vector<1x6x16xf32>
    %159 = vector.shape_cast %158 : vector<1x6x16xf32> to vector<6x16xf32>
    %cst_194 = arith.constant dense<0.000000e+00> : vector<128x16xf32>
    %160 = tpu.matmul %157, %159, %cst_194 {dimension_numbers = #tpu.dot_dimension_numbers<[1], [0], [0], [1], [0, 0, 1, 1], [], []>} : vector<128x6xf32>, vector<6x16xf32>, vector<128x16xf32> -> vector<128x16xf32>
    %161 = arith.addf %155, %160 : vector<128x16xf32>
    %c0_195 = arith.constant 0 : index
    %c4_196 = arith.constant 4 : index
    %c3_197 = arith.constant 3 : index
    %c0_198 = arith.constant 0 : index
    %162 = vector.load %arg13[%c0_195, %c4_196, %c3_197, %c0_198] : memref<2x12x12x6xf32, #tpu.memory_space<vmem>>, vector<2x8x8x6xf32>
    %163 = vector.shape_cast %162 : vector<2x8x8x6xf32> to vector<128x6xf32>
    %c23 = arith.constant 23 : index
    %c0_199 = arith.constant 0 : index
    %c0_200 = arith.constant 0 : index
    %164 = vector.load %arg3[%c23, %c0_199, %c0_200] : memref<25x6x16xf32, #tpu.memory_space<vmem>>, vector<1x6x16xf32>
    %165 = vector.shape_cast %164 : vector<1x6x16xf32> to vector<6x16xf32>
    %cst_201 = arith.constant dense<0.000000e+00> : vector<128x16xf32>
    %166 = tpu.matmul %163, %165, %cst_201 {dimension_numbers = #tpu.dot_dimension_numbers<[1], [0], [0], [1], [0, 0, 1, 1], [], []>} : vector<128x6xf32>, vector<6x16xf32>, vector<128x16xf32> -> vector<128x16xf32>
    %167 = arith.addf %161, %166 : vector<128x16xf32>
    %c0_202 = arith.constant 0 : index
    %c4_203 = arith.constant 4 : index
    %c4_204 = arith.constant 4 : index
    %c0_205 = arith.constant 0 : index
    %168 = vector.load %arg13[%c0_202, %c4_203, %c4_204, %c0_205] : memref<2x12x12x6xf32, #tpu.memory_space<vmem>>, vector<2x8x8x6xf32>
    %169 = vector.shape_cast %168 : vector<2x8x8x6xf32> to vector<128x6xf32>
    %c24 = arith.constant 24 : index
    %c0_206 = arith.constant 0 : index
    %c0_207 = arith.constant 0 : index
    %170 = vector.load %arg3[%c24, %c0_206, %c0_207] : memref<25x6x16xf32, #tpu.memory_space<vmem>>, vector<1x6x16xf32>
    %171 = vector.shape_cast %170 : vector<1x6x16xf32> to vector<6x16xf32>
    %cst_208 = arith.constant dense<0.000000e+00> : vector<128x16xf32>
    %172 = tpu.matmul %169, %171, %cst_208 {dimension_numbers = #tpu.dot_dimension_numbers<[1], [0], [0], [1], [0, 0, 1, 1], [], []>} : vector<128x6xf32>, vector<6x16xf32>, vector<128x16xf32> -> vector<128x16xf32>
    %173 = arith.addf %167, %172 : vector<128x16xf32>
    %c0_209 = arith.constant 0 : index
    %c0_210 = arith.constant 0 : index
    %174 = vector.load %arg4[%c0_209, %c0_210] : memref<1x16xf32, #tpu.memory_space<vmem>>, vector<1x16xf32>
    %175 = vector.broadcast %174 : vector<1x16xf32> to vector<128x16xf32>
    %176 = arith.addf %173, %175 : vector<128x16xf32>
    %cst_211 = arith.constant 0.000000e+00 : f32
    %177 = vector.broadcast %cst_211 : f32 to vector<128x16xf32>
    %178 = arith.subf %177, %176 : vector<128x16xf32>
    %179 = math.exp %178 : vector<128x16xf32>
    %cst_212 = arith.constant 1.000000e+00 : f32
    %180 = vector.broadcast %cst_212 : f32 to vector<128x16xf32>
    %181 = arith.addf %180, %179 : vector<128x16xf32>
    %cst_213 = arith.constant 1.000000e+00 : f32
    %182 = vector.broadcast %cst_213 : f32 to vector<128x16xf32>
    %183 = arith.divf %182, %181 : vector<128x16xf32>
    %184 = vector.shape_cast %183 : vector<128x16xf32> to vector<2x8x8x16xf32>
    %c0_214 = arith.constant 0 : index
    %c0_215 = arith.constant 0 : index
    %c0_216 = arith.constant 0 : index
    %c0_217 = arith.constant 0 : index
    %185 = vector.load %arg14[%c0_214, %c0_215, %c0_216, %c0_217] : memref<2x8x8x16xf32, #tpu.memory_space<vmem>>, vector<2x8x8x16xf32>
    tpu.vector_store %arg14[%c0_214, %c0_215, %c0_216, %c0_217], %184 {strides = array<i32>} : memref<2x8x8x16xf32, #tpu.memory_space<vmem>>, vector<2x8x8x16xf32>,
    %c0_218 = arith.constant 0 : index
    %c0_219 = arith.constant 0 : index
    %c0_220 = arith.constant 0 : index
    %c0_221 = arith.constant 0 : index
    %186 = tpu.strided_load %arg14[%c0_218, %c0_219, %c0_220, %c0_221] {strides = array<i32: 1, 2, 2, 1>} : memref<2x8x8x16xf32, #tpu.memory_space<vmem>>, vector<2x4x4x16xf32>
    %c0_222 = arith.constant 0 : index
    %c0_223 = arith.constant 0 : index
    %c1_224 = arith.constant 1 : index
    %c0_225 = arith.constant 0 : index
    %187 = tpu.strided_load %arg14[%c0_222, %c0_223, %c1_224, %c0_225] {strides = array<i32: 1, 2, 2, 1>} : memref<2x8x8x16xf32, #tpu.memory_space<vmem>>, vector<2x4x4x16xf32>
    %c0_226 = arith.constant 0 : index
    %c1_227 = arith.constant 1 : index
    %c0_228 = arith.constant 0 : index
    %c0_229 = arith.constant 0 : index
    %188 = tpu.strided_load %arg14[%c0_226, %c1_227, %c0_228, %c0_229] {strides = array<i32: 1, 2, 2, 1>} : memref<2x8x8x16xf32, #tpu.memory_space<vmem>>, vector<2x4x4x16xf32>
    %c0_230 = arith.constant 0 : index
    %c1_231 = arith.constant 1 : index
    %c1_232 = arith.constant 1 : index
    %c0_233 = arith.constant 0 : index
    %189 = tpu.strided_load %arg14[%c0_230, %c1_231, %c1_232, %c0_233] {strides = array<i32: 1, 2, 2, 1>} : memref<2x8x8x16xf32, #tpu.memory_space<vmem>>, vector<2x4x4x16xf32>
    %190 = arith.maximumf %186, %187 : vector<2x4x4x16xf32>
    %191 = arith.maximumf %188, %189 : vector<2x4x4x16xf32>
    %192 = arith.maximumf %190, %191 : vector<2x4x4x16xf32>
    %c0_234 = arith.constant 0 : index
    %c0_235 = arith.constant 0 : index
    %c0_236 = arith.constant 0 : index
    %c0_237 = arith.constant 0 : index
    %193 = vector.load %arg15[%c0_234, %c0_235, %c0_236, %c0_237] : memref<2x4x4x16xf32, #tpu.memory_space<vmem>>, vector<2x4x4x16xf32>
    tpu.vector_store %arg15[%c0_234, %c0_235, %c0_236, %c0_237], %192 {strides = array<i32>} : memref<2x4x4x16xf32, #tpu.memory_space<vmem>>, vector<2x4x4x16xf32>,
    %cst_238 = arith.constant 0.000000e+00 : f32
    %194 = vector.broadcast %cst_238 : f32 to vector<2x120xf32>
    %c0_239 = arith.constant 0 : index
    %c0_240 = arith.constant 0 : index
    %c0_241 = arith.constant 0 : index
    %c0_242 = arith.constant 0 : index
    %195 = vector.load %arg15[%c0_239, %c0_240, %c0_241, %c0_242] : memref<2x4x4x16xf32, #tpu.memory_space<vmem>>, vector<2x1x1x16xf32>
    %196 = vector.shape_cast %195 : vector<2x1x1x16xf32> to vector<2x16xf32>
    %c0_243 = arith.constant 0 : index
    %c0_244 = arith.constant 0 : index
    %c0_245 = arith.constant 0 : index
    %c0_246 = arith.constant 0 : index
    %197 = vector.load %arg5[%c0_243, %c0_244, %c0_245, %c0_246] : memref<4x4x16x120xf32, #tpu.memory_space<vmem>>, vector<1x1x16x120xf32>
    %198 = vector.shape_cast %197 : vector<1x1x16x120xf32> to vector<16x120xf32>
    %cst_247 = arith.constant dense<0.000000e+00> : vector<2x120xf32>
    %199 = tpu.matmul %196, %198, %cst_247 {dimension_numbers = #tpu.dot_dimension_numbers<[1], [0], [0], [1], [0, 0, 1, 1], [], []>} : vector<2x16xf32>, vector<16x120xf32>, vector<2x120xf32> -> vector<2x120xf32>
    %200 = arith.addf %194, %199 : vector<2x120xf32>
    %c0_248 = arith.constant 0 : index
    %c0_249 = arith.constant 0 : index
    %c1_250 = arith.constant 1 : index
    %c0_251 = arith.constant 0 : index
    %201 = vector.load %arg15[%c0_248, %c0_249, %c1_250, %c0_251] : memref<2x4x4x16xf32, #tpu.memory_space<vmem>>, vector<2x1x1x16xf32>
    %202 = vector.shape_cast %201 : vector<2x1x1x16xf32> to vector<2x16xf32>
    %c0_252 = arith.constant 0 : index
    %c1_253 = arith.constant 1 : index
    %c0_254 = arith.constant 0 : index
    %c0_255 = arith.constant 0 : index
    %203 = vector.load %arg5[%c0_252, %c1_253, %c0_254, %c0_255] : memref<4x4x16x120xf32, #tpu.memory_space<vmem>>, vector<1x1x16x120xf32>
    %204 = vector.shape_cast %203 : vector<1x1x16x120xf32> to vector<16x120xf32>
    %cst_256 = arith.constant dense<0.000000e+00> : vector<2x120xf32>
    %205 = tpu.matmul %202, %204, %cst_256 {dimension_numbers = #tpu.dot_dimension_numbers<[1], [0], [0], [1], [0, 0, 1, 1], [], []>} : vector<2x16xf32>, vector<16x120xf32>, vector<2x120xf32> -> vector<2x120xf32>
    %206 = arith.addf %200, %205 : vector<2x120xf32>
    %c0_257 = arith.constant 0 : index
    %c0_258 = arith.constant 0 : index
    %c2_259 = arith.constant 2 : index
    %c0_260 = arith.constant 0 : index
    %207 = vector.load %arg15[%c0_257, %c0_258, %c2_259, %c0_260] : memref<2x4x4x16xf32, #tpu.memory_space<vmem>>, vector<2x1x1x16xf32>
    %208 = vector.shape_cast %207 : vector<2x1x1x16xf32> to vector<2x16xf32>
    %c0_261 = arith.constant 0 : index
    %c2_262 = arith.constant 2 : index
    %c0_263 = arith.constant 0 : index
    %c0_264 = arith.constant 0 : index
    %209 = vector.load %arg5[%c0_261, %c2_262, %c0_263, %c0_264] : memref<4x4x16x120xf32, #tpu.memory_space<vmem>>, vector<1x1x16x120xf32>
    %210 = vector.shape_cast %209 : vector<1x1x16x120xf32> to vector<16x120xf32>
    %cst_265 = arith.constant dense<0.000000e+00> : vector<2x120xf32>
    %211 = tpu.matmul %208, %210, %cst_265 {dimension_numbers = #tpu.dot_dimension_numbers<[1], [0], [0], [1], [0, 0, 1, 1], [], []>} : vector<2x16xf32>, vector<16x120xf32>, vector<2x120xf32> -> vector<2x120xf32>
    %212 = arith.addf %206, %211 : vector<2x120xf32>
    %c0_266 = arith.constant 0 : index
    %c0_267 = arith.constant 0 : index
    %c3_268 = arith.constant 3 : index
    %c0_269 = arith.constant 0 : index
    %213 = vector.load %arg15[%c0_266, %c0_267, %c3_268, %c0_269] : memref<2x4x4x16xf32, #tpu.memory_space<vmem>>, vector<2x1x1x16xf32>
    %214 = vector.shape_cast %213 : vector<2x1x1x16xf32> to vector<2x16xf32>
    %c0_270 = arith.constant 0 : index
    %c3_271 = arith.constant 3 : index
    %c0_272 = arith.constant 0 : index
    %c0_273 = arith.constant 0 : index
    %215 = vector.load %arg5[%c0_270, %c3_271, %c0_272, %c0_273] : memref<4x4x16x120xf32, #tpu.memory_space<vmem>>, vector<1x1x16x120xf32>
    %216 = vector.shape_cast %215 : vector<1x1x16x120xf32> to vector<16x120xf32>
    %cst_274 = arith.constant dense<0.000000e+00> : vector<2x120xf32>
    %217 = tpu.matmul %214, %216, %cst_274 {dimension_numbers = #tpu.dot_dimension_numbers<[1], [0], [0], [1], [0, 0, 1, 1], [], []>} : vector<2x16xf32>, vector<16x120xf32>, vector<2x120xf32> -> vector<2x120xf32>
    %218 = arith.addf %212, %217 : vector<2x120xf32>
    %c0_275 = arith.constant 0 : index
    %c1_276 = arith.constant 1 : index
    %c0_277 = arith.constant 0 : index
    %c0_278 = arith.constant 0 : index
    %219 = vector.load %arg15[%c0_275, %c1_276, %c0_277, %c0_278] : memref<2x4x4x16xf32, #tpu.memory_space<vmem>>, vector<2x1x1x16xf32>
    %220 = vector.shape_cast %219 : vector<2x1x1x16xf32> to vector<2x16xf32>
    %c1_279 = arith.constant 1 : index
    %c0_280 = arith.constant 0 : index
    %c0_281 = arith.constant 0 : index
    %c0_282 = arith.constant 0 : index
    %221 = vector.load %arg5[%c1_279, %c0_280, %c0_281, %c0_282] : memref<4x4x16x120xf32, #tpu.memory_space<vmem>>, vector<1x1x16x120xf32>
    %222 = vector.shape_cast %221 : vector<1x1x16x120xf32> to vector<16x120xf32>
    %cst_283 = arith.constant dense<0.000000e+00> : vector<2x120xf32>
    %223 = tpu.matmul %220, %222, %cst_283 {dimension_numbers = #tpu.dot_dimension_numbers<[1], [0], [0], [1], [0, 0, 1, 1], [], []>} : vector<2x16xf32>, vector<16x120xf32>, vector<2x120xf32> -> vector<2x120xf32>
    %224 = arith.addf %218, %223 : vector<2x120xf32>
    %c0_284 = arith.constant 0 : index
    %c1_285 = arith.constant 1 : index
    %c1_286 = arith.constant 1 : index
    %c0_287 = arith.constant 0 : index
    %225 = vector.load %arg15[%c0_284, %c1_285, %c1_286, %c0_287] : memref<2x4x4x16xf32, #tpu.memory_space<vmem>>, vector<2x1x1x16xf32>
    %226 = vector.shape_cast %225 : vector<2x1x1x16xf32> to vector<2x16xf32>
    %c1_288 = arith.constant 1 : index
    %c1_289 = arith.constant 1 : index
    %c0_290 = arith.constant 0 : index
    %c0_291 = arith.constant 0 : index
    %227 = vector.load %arg5[%c1_288, %c1_289, %c0_290, %c0_291] : memref<4x4x16x120xf32, #tpu.memory_space<vmem>>, vector<1x1x16x120xf32>
    %228 = vector.shape_cast %227 : vector<1x1x16x120xf32> to vector<16x120xf32>
    %cst_292 = arith.constant dense<0.000000e+00> : vector<2x120xf32>
    %229 = tpu.matmul %226, %228, %cst_292 {dimension_numbers = #tpu.dot_dimension_numbers<[1], [0], [0], [1], [0, 0, 1, 1], [], []>} : vector<2x16xf32>, vector<16x120xf32>, vector<2x120xf32> -> vector<2x120xf32>
    %230 = arith.addf %224, %229 : vector<2x120xf32>
    %c0_293 = arith.constant 0 : index
    %c1_294 = arith.constant 1 : index
    %c2_295 = arith.constant 2 : index
    %c0_296 = arith.constant 0 : index
    %231 = vector.load %arg15[%c0_293, %c1_294, %c2_295, %c0_296] : memref<2x4x4x16xf32, #tpu.memory_space<vmem>>, vector<2x1x1x16xf32>
    %232 = vector.shape_cast %231 : vector<2x1x1x16xf32> to vector<2x16xf32>
    %c1_297 = arith.constant 1 : index
    %c2_298 = arith.constant 2 : index
    %c0_299 = arith.constant 0 : index
    %c0_300 = arith.constant 0 : index
    %233 = vector.load %arg5[%c1_297, %c2_298, %c0_299, %c0_300] : memref<4x4x16x120xf32, #tpu.memory_space<vmem>>, vector<1x1x16x120xf32>
    %234 = vector.shape_cast %233 : vector<1x1x16x120xf32> to vector<16x120xf32>
    %cst_301 = arith.constant dense<0.000000e+00> : vector<2x120xf32>
    %235 = tpu.matmul %232, %234, %cst_301 {dimension_numbers = #tpu.dot_dimension_numbers<[1], [0], [0], [1], [0, 0, 1, 1], [], []>} : vector<2x16xf32>, vector<16x120xf32>, vector<2x120xf32> -> vector<2x120xf32>
    %236 = arith.addf %230, %235 : vector<2x120xf32>
    %c0_302 = arith.constant 0 : index
    %c1_303 = arith.constant 1 : index
    %c3_304 = arith.constant 3 : index
    %c0_305 = arith.constant 0 : index
    %237 = vector.load %arg15[%c0_302, %c1_303, %c3_304, %c0_305] : memref<2x4x4x16xf32, #tpu.memory_space<vmem>>, vector<2x1x1x16xf32>
    %238 = vector.shape_cast %237 : vector<2x1x1x16xf32> to vector<2x16xf32>
    %c1_306 = arith.constant 1 : index
    %c3_307 = arith.constant 3 : index
    %c0_308 = arith.constant 0 : index
    %c0_309 = arith.constant 0 : index
    %239 = vector.load %arg5[%c1_306, %c3_307, %c0_308, %c0_309] : memref<4x4x16x120xf32, #tpu.memory_space<vmem>>, vector<1x1x16x120xf32>
    %240 = vector.shape_cast %239 : vector<1x1x16x120xf32> to vector<16x120xf32>
    %cst_310 = arith.constant dense<0.000000e+00> : vector<2x120xf32>
    %241 = tpu.matmul %238, %240, %cst_310 {dimension_numbers = #tpu.dot_dimension_numbers<[1], [0], [0], [1], [0, 0, 1, 1], [], []>} : vector<2x16xf32>, vector<16x120xf32>, vector<2x120xf32> -> vector<2x120xf32>
    %242 = arith.addf %236, %241 : vector<2x120xf32>
    %c0_311 = arith.constant 0 : index
    %c2_312 = arith.constant 2 : index
    %c0_313 = arith.constant 0 : index
    %c0_314 = arith.constant 0 : index
    %243 = vector.load %arg15[%c0_311, %c2_312, %c0_313, %c0_314] : memref<2x4x4x16xf32, #tpu.memory_space<vmem>>, vector<2x1x1x16xf32>
    %244 = vector.shape_cast %243 : vector<2x1x1x16xf32> to vector<2x16xf32>
    %c2_315 = arith.constant 2 : index
    %c0_316 = arith.constant 0 : index
    %c0_317 = arith.constant 0 : index
    %c0_318 = arith.constant 0 : index
    %245 = vector.load %arg5[%c2_315, %c0_316, %c0_317, %c0_318] : memref<4x4x16x120xf32, #tpu.memory_space<vmem>>, vector<1x1x16x120xf32>
    %246 = vector.shape_cast %245 : vector<1x1x16x120xf32> to vector<16x120xf32>
    %cst_319 = arith.constant dense<0.000000e+00> : vector<2x120xf32>
    %247 = tpu.matmul %244, %246, %cst_319 {dimension_numbers = #tpu.dot_dimension_numbers<[1], [0], [0], [1], [0, 0, 1, 1], [], []>} : vector<2x16xf32>, vector<16x120xf32>, vector<2x120xf32> -> vector<2x120xf32>
    %248 = arith.addf %242, %247 : vector<2x120xf32>
    %c0_320 = arith.constant 0 : index
    %c2_321 = arith.constant 2 : index
    %c1_322 = arith.constant 1 : index
    %c0_323 = arith.constant 0 : index
    %249 = vector.load %arg15[%c0_320, %c2_321, %c1_322, %c0_323] : memref<2x4x4x16xf32, #tpu.memory_space<vmem>>, vector<2x1x1x16xf32>
    %250 = vector.shape_cast %249 : vector<2x1x1x16xf32> to vector<2x16xf32>
    %c2_324 = arith.constant 2 : index
    %c1_325 = arith.constant 1 : index
    %c0_326 = arith.constant 0 : index
    %c0_327 = arith.constant 0 : index
    %251 = vector.load %arg5[%c2_324, %c1_325, %c0_326, %c0_327] : memref<4x4x16x120xf32, #tpu.memory_space<vmem>>, vector<1x1x16x120xf32>
    %252 = vector.shape_cast %251 : vector<1x1x16x120xf32> to vector<16x120xf32>
    %cst_328 = arith.constant dense<0.000000e+00> : vector<2x120xf32>
    %253 = tpu.matmul %250, %252, %cst_328 {dimension_numbers = #tpu.dot_dimension_numbers<[1], [0], [0], [1], [0, 0, 1, 1], [], []>} : vector<2x16xf32>, vector<16x120xf32>, vector<2x120xf32> -> vector<2x120xf32>
    %254 = arith.addf %248, %253 : vector<2x120xf32>
    %c0_329 = arith.constant 0 : index
    %c2_330 = arith.constant 2 : index
    %c2_331 = arith.constant 2 : index
    %c0_332 = arith.constant 0 : index
    %255 = vector.load %arg15[%c0_329, %c2_330, %c2_331, %c0_332] : memref<2x4x4x16xf32, #tpu.memory_space<vmem>>, vector<2x1x1x16xf32>
    %256 = vector.shape_cast %255 : vector<2x1x1x16xf32> to vector<2x16xf32>
    %c2_333 = arith.constant 2 : index
    %c2_334 = arith.constant 2 : index
    %c0_335 = arith.constant 0 : index
    %c0_336 = arith.constant 0 : index
    %257 = vector.load %arg5[%c2_333, %c2_334, %c0_335, %c0_336] : memref<4x4x16x120xf32, #tpu.memory_space<vmem>>, vector<1x1x16x120xf32>
    %258 = vector.shape_cast %257 : vector<1x1x16x120xf32> to vector<16x120xf32>
    %cst_337 = arith.constant dense<0.000000e+00> : vector<2x120xf32>
    %259 = tpu.matmul %256, %258, %cst_337 {dimension_numbers = #tpu.dot_dimension_numbers<[1], [0], [0], [1], [0, 0, 1, 1], [], []>} : vector<2x16xf32>, vector<16x120xf32>, vector<2x120xf32> -> vector<2x120xf32>
    %260 = arith.addf %254, %259 : vector<2x120xf32>
    %c0_338 = arith.constant 0 : index
    %c2_339 = arith.constant 2 : index
    %c3_340 = arith.constant 3 : index
    %c0_341 = arith.constant 0 : index
    %261 = vector.load %arg15[%c0_338, %c2_339, %c3_340, %c0_341] : memref<2x4x4x16xf32, #tpu.memory_space<vmem>>, vector<2x1x1x16xf32>
    %262 = vector.shape_cast %261 : vector<2x1x1x16xf32> to vector<2x16xf32>
    %c2_342 = arith.constant 2 : index
    %c3_343 = arith.constant 3 : index
    %c0_344 = arith.constant 0 : index
    %c0_345 = arith.constant 0 : index
    %263 = vector.load %arg5[%c2_342, %c3_343, %c0_344, %c0_345] : memref<4x4x16x120xf32, #tpu.memory_space<vmem>>, vector<1x1x16x120xf32>
    %264 = vector.shape_cast %263 : vector<1x1x16x120xf32> to vector<16x120xf32>
    %cst_346 = arith.constant dense<0.000000e+00> : vector<2x120xf32>
    %265 = tpu.matmul %262, %264, %cst_346 {dimension_numbers = #tpu.dot_dimension_numbers<[1], [0], [0], [1], [0, 0, 1, 1], [], []>} : vector<2x16xf32>, vector<16x120xf32>, vector<2x120xf32> -> vector<2x120xf32>
    %266 = arith.addf %260, %265 : vector<2x120xf32>
    %c0_347 = arith.constant 0 : index
    %c3_348 = arith.constant 3 : index
    %c0_349 = arith.constant 0 : index
    %c0_350 = arith.constant 0 : index
    %267 = vector.load %arg15[%c0_347, %c3_348, %c0_349, %c0_350] : memref<2x4x4x16xf32, #tpu.memory_space<vmem>>, vector<2x1x1x16xf32>
    %268 = vector.shape_cast %267 : vector<2x1x1x16xf32> to vector<2x16xf32>
    %c3_351 = arith.constant 3 : index
    %c0_352 = arith.constant 0 : index
    %c0_353 = arith.constant 0 : index
    %c0_354 = arith.constant 0 : index
    %269 = vector.load %arg5[%c3_351, %c0_352, %c0_353, %c0_354] : memref<4x4x16x120xf32, #tpu.memory_space<vmem>>, vector<1x1x16x120xf32>
    %270 = vector.shape_cast %269 : vector<1x1x16x120xf32> to vector<16x120xf32>
    %cst_355 = arith.constant dense<0.000000e+00> : vector<2x120xf32>
    %271 = tpu.matmul %268, %270, %cst_355 {dimension_numbers = #tpu.dot_dimension_numbers<[1], [0], [0], [1], [0, 0, 1, 1], [], []>} : vector<2x16xf32>, vector<16x120xf32>, vector<2x120xf32> -> vector<2x120xf32>
    %272 = arith.addf %266, %271 : vector<2x120xf32>
    %c0_356 = arith.constant 0 : index
    %c3_357 = arith.constant 3 : index
    %c1_358 = arith.constant 1 : index
    %c0_359 = arith.constant 0 : index
    %273 = vector.load %arg15[%c0_356, %c3_357, %c1_358, %c0_359] : memref<2x4x4x16xf32, #tpu.memory_space<vmem>>, vector<2x1x1x16xf32>
    %274 = vector.shape_cast %273 : vector<2x1x1x16xf32> to vector<2x16xf32>
    %c3_360 = arith.constant 3 : index
    %c1_361 = arith.constant 1 : index
    %c0_362 = arith.constant 0 : index
    %c0_363 = arith.constant 0 : index
    %275 = vector.load %arg5[%c3_360, %c1_361, %c0_362, %c0_363] : memref<4x4x16x120xf32, #tpu.memory_space<vmem>>, vector<1x1x16x120xf32>
    %276 = vector.shape_cast %275 : vector<1x1x16x120xf32> to vector<16x120xf32>
    %cst_364 = arith.constant dense<0.000000e+00> : vector<2x120xf32>
    %277 = tpu.matmul %274, %276, %cst_364 {dimension_numbers = #tpu.dot_dimension_numbers<[1], [0], [0], [1], [0, 0, 1, 1], [], []>} : vector<2x16xf32>, vector<16x120xf32>, vector<2x120xf32> -> vector<2x120xf32>
    %278 = arith.addf %272, %277 : vector<2x120xf32>
    %c0_365 = arith.constant 0 : index
    %c3_366 = arith.constant 3 : index
    %c2_367 = arith.constant 2 : index
    %c0_368 = arith.constant 0 : index
    %279 = vector.load %arg15[%c0_365, %c3_366, %c2_367, %c0_368] : memref<2x4x4x16xf32, #tpu.memory_space<vmem>>, vector<2x1x1x16xf32>
    %280 = vector.shape_cast %279 : vector<2x1x1x16xf32> to vector<2x16xf32>
    %c3_369 = arith.constant 3 : index
    %c2_370 = arith.constant 2 : index
    %c0_371 = arith.constant 0 : index
    %c0_372 = arith.constant 0 : index
    %281 = vector.load %arg5[%c3_369, %c2_370, %c0_371, %c0_372] : memref<4x4x16x120xf32, #tpu.memory_space<vmem>>, vector<1x1x16x120xf32>
    %282 = vector.shape_cast %281 : vector<1x1x16x120xf32> to vector<16x120xf32>
    %cst_373 = arith.constant dense<0.000000e+00> : vector<2x120xf32>
    %283 = tpu.matmul %280, %282, %cst_373 {dimension_numbers = #tpu.dot_dimension_numbers<[1], [0], [0], [1], [0, 0, 1, 1], [], []>} : vector<2x16xf32>, vector<16x120xf32>, vector<2x120xf32> -> vector<2x120xf32>
    %284 = arith.addf %278, %283 : vector<2x120xf32>
    %c0_374 = arith.constant 0 : index
    %c3_375 = arith.constant 3 : index
    %c3_376 = arith.constant 3 : index
    %c0_377 = arith.constant 0 : index
    %285 = vector.load %arg15[%c0_374, %c3_375, %c3_376, %c0_377] : memref<2x4x4x16xf32, #tpu.memory_space<vmem>>, vector<2x1x1x16xf32>
    %286 = vector.shape_cast %285 : vector<2x1x1x16xf32> to vector<2x16xf32>
    %c3_378 = arith.constant 3 : index
    %c3_379 = arith.constant 3 : index
    %c0_380 = arith.constant 0 : index
    %c0_381 = arith.constant 0 : index
    %287 = vector.load %arg5[%c3_378, %c3_379, %c0_380, %c0_381] : memref<4x4x16x120xf32, #tpu.memory_space<vmem>>, vector<1x1x16x120xf32>
    %288 = vector.shape_cast %287 : vector<1x1x16x120xf32> to vector<16x120xf32>
    %cst_382 = arith.constant dense<0.000000e+00> : vector<2x120xf32>
    %289 = tpu.matmul %286, %288, %cst_382 {dimension_numbers = #tpu.dot_dimension_numbers<[1], [0], [0], [1], [0, 0, 1, 1], [], []>} : vector<2x16xf32>, vector<16x120xf32>, vector<2x120xf32> -> vector<2x120xf32>
    %290 = arith.addf %284, %289 : vector<2x120xf32>
    %c0_383 = arith.constant 0 : index
    %c0_384 = arith.constant 0 : index
    %291 = vector.load %arg6[%c0_383, %c0_384] : memref<1x120xf32, #tpu.memory_space<vmem>>, vector<1x120xf32>
    %292 = vector.broadcast %291 : vector<1x120xf32> to vector<2x120xf32>
    %293 = arith.addf %290, %292 : vector<2x120xf32>
    %cst_385 = arith.constant 0.000000e+00 : f32
    %294 = vector.broadcast %cst_385 : f32 to vector<2x120xf32>
    %295 = arith.subf %294, %293 : vector<2x120xf32>
    %296 = math.exp %295 : vector<2x120xf32>
    %cst_386 = arith.constant 1.000000e+00 : f32
    %297 = vector.broadcast %cst_386 : f32 to vector<2x120xf32>
    %298 = arith.addf %297, %296 : vector<2x120xf32>
    %cst_387 = arith.constant 1.000000e+00 : f32
    %299 = vector.broadcast %cst_387 : f32 to vector<2x120xf32>
    %300 = arith.divf %299, %298 : vector<2x120xf32>
    %c0_388 = arith.constant 0 : index
    %c0_389 = arith.constant 0 : index
    %301 = vector.load %arg7[%c0_388, %c0_389] : memref<120x84xf32, #tpu.memory_space<vmem>>, vector<120x84xf32>
    %cst_390 = arith.constant dense<0.000000e+00> : vector<2x84xf32>
    %302 = tpu.matmul %300, %301, %cst_390 {dimension_numbers = #tpu.dot_dimension_numbers<[1], [0], [0], [1], [0, 0, 1, 1], [], []>} : vector<2x120xf32>, vector<120x84xf32>, vector<2x84xf32> -> vector<2x84xf32>
    %c0_391 = arith.constant 0 : index
    %c0_392 = arith.constant 0 : index
    %303 = vector.load %arg8[%c0_391, %c0_392] : memref<1x84xf32, #tpu.memory_space<vmem>>, vector<1x84xf32>
    %304 = vector.broadcast %303 : vector<1x84xf32> to vector<2x84xf32>
    %305 = arith.addf %302, %304 : vector<2x84xf32>
    %cst_393 = arith.constant 0.000000e+00 : f32
    %306 = vector.broadcast %cst_393 : f32 to vector<2x84xf32>
    %307 = arith.subf %306, %305 : vector<2x84xf32>
    %308 = math.exp %307 : vector<2x84xf32>
    %cst_394 = arith.constant 1.000000e+00 : f32
    %309 = vector.broadcast %cst_394 : f32 to vector<2x84xf32>
    %310 = arith.addf %309, %308 : vector<2x84xf32>
    %cst_395 = arith.constant 1.000000e+00 : f32
    %311 = vector.broadcast %cst_395 : f32 to vector<2x84xf32>
    %312 = arith.divf %311, %310 : vector<2x84xf32>
    %c0_396 = arith.constant 0 : index
    %c0_397 = arith.constant 0 : index
    %313 = vector.load %arg9[%c0_396, %c0_397] : memref<84x10xf32, #tpu.memory_space<vmem>>, vector<84x10xf32>
    %cst_398 = arith.constant dense<0.000000e+00> : vector<2x10xf32>
    %314 = tpu.matmul %312, %313, %cst_398 {dimension_numbers = #tpu.dot_dimension_numbers<[1], [0], [0], [1], [0, 0, 1, 1], [], []>} : vector<2x84xf32>, vector<84x10xf32>, vector<2x10xf32> -> vector<2x10xf32>
    %c0_399 = arith.constant 0 : index
    %c0_400 = arith.constant 0 : index
    %315 = vector.load %arg10[%c0_399, %c0_400] : memref<1x10xf32, #tpu.memory_space<vmem>>, vector<1x10xf32>
    %316 = vector.broadcast %315 : vector<1x10xf32> to vector<2x10xf32>
    %317 = arith.addf %314, %316 : vector<2x10xf32>
    %cst_401 = arith.constant dense<0xFF800000> : vector<2xf32>
    %318 = vector.multi_reduction <maximumf>, %317, %cst_401 [1] : vector<2x10xf32> to vector<2xf32>
    %319 = vector.shape_cast %318 : vector<2xf32> to vector<2x1xf32>
    %320 = vector.broadcast %319 : vector<2x1xf32> to vector<2x10xf32>
    %321 = arith.subf %317, %320 : vector<2x10xf32>
    %322 = math.exp %321 : vector<2x10xf32>
    %cst_402 = arith.constant dense<0.000000e+00> : vector<2xf32>
    %323 = vector.multi_reduction <add>, %322, %cst_402 [1] : vector<2x10xf32> to vector<2xf32>
    %324 = vector.shape_cast %323 : vector<2xf32> to vector<2x1xf32>
    %325 = vector.broadcast %324 : vector<2x1xf32> to vector<2x10xf32>
    %326 = arith.divf %322, %325 : vector<2x10xf32>
    %c0_403 = arith.constant 0 : index
    %c0_404 = arith.constant 0 : index
    %327 = vector.load %arg11[%c0_403, %c0_404] : memref<2x10xf32, #tpu.memory_space<vmem>>, vector<2x10xf32>
    tpu.vector_store %arg11[%c0_403, %c0_404], %326 {strides = array<i32>} : memref<2x10xf32, #tpu.memory_space<vmem>>, vector<2x10xf32>,
    return
  }
}

</mosaic_0001>

<bundles_post_ra>
// kernel: lenet_forward.1
= control target key start
LH: loop header
LB: loop body
LE: loop exit
PB: predicated region body
PF: predicated region fallthrough
CT: control target
= control target key end

     0   :  { %vm627_vm0 = vcmask 1040384   ;;  %vm194_vm1 = vcmask 203776   ;;  %vm14124_vm2 = vmmov 1   ;;  %s16707_s0 = inlined_call_operand.vmem [shape: f32[1152,25], index: 0, kind: input, shape index: {}]   ;;  %s16708_s1 = inlined_call_operand.vmem [shape: f32[25,6], index: 1, kind: input, shape index: {}]   ;;  %s16709_s2 = inlined_call_operand.vmem [shape: f32[1,6], index: 2, kind: input, shape index: {}]   ;;  %s16710_s3 = inlined_call_operand.vmem [shape: f32[25,6,16], index: 3, kind: input, shape index: {}]   ;;  %s16711_s4 = inlined_call_operand.vmem [shape: f32[1,16], index: 4, kind: input, shape index: {}]   ;;  %s16712_s5 = inlined_call_operand.vmem [shape: f32[4,4,16,120], index: 5, kind: input, shape index: {}]   ;;  %s16713_s6 = inlined_call_operand.vmem [shape: f32[1,120], index: 6, kind: input, shape index: {}]   ;;  %s16714_s7 = inlined_call_operand.vmem [shape: f32[120,84], index: 7, kind: input, shape index: {}]   ;;  %s16715_s8 = inlined_call_operand.vmem [shape: f32[1,84], index: 8, kind: input, shape index: {}]   ;;  %s16716_s9 = inlined_call_operand.vmem [shape: f32[84,10], index: 9, kind: input, shape index: {}]   ;;  %s16717_s10 = inlined_call_operand.vmem [shape: f32[1,10], index: 10, kind: input, shape index: {}]   ;;  %s16718_s11 = inlined_call_operand.hbm [shape: f32[2,10], index: 11, kind: output, shape index: {}]  }
   0x1   :  { %v183_v0 = vld [vmem:[%s16708_s1] sm:$0xff]  ;;  %v184_v1 = vld [vmem:[%s16708_s1 + $0x8] sm:$0xff]  ;;  %v185_v2 = vld [vmem:[%s16708_s1 + $0x10] sm:$0xff] }
   0x2   :  { %v12958_v3 = vpack.c.bf16 %v184_v1, %v183_v0  ;;  %v186_v4 = vld [vmem:[%s16708_s1 + $0x18] sm:$0x1]  ;;  %v39_v5 = vld [vmem:[%s16707_s0] sm:$0xff]  ;;  %vm12963_vm3 = vmpackc.low %vm627_vm0, %vm14124_vm2 }
   0x3   :  { %v12962_v6 = vpack.c.bf16 %v186_v4, %v185_v2  ;;  %11922 = vmatprep.mubr.msk.f32.mxu0 %vm194_vm1, %v39_v5  ;;  %v40_v7 = vld [vmem:[%s16707_s0 + $0x8] sm:$0xff]  ;;  %v41_v8 = vld [vmem:[%s16707_s0 + $0x10] sm:$0xff]  ;;  %v42_v9 = vld [vmem:[%s16707_s0 + $0x18] sm:$0xff] }
   0x4   :  { %12959 = vmatprep.subr.bf16.mxu0 %v12958_v3  ;;  %v43_v10 = vld [vmem:[%s16707_s0 + $0x20] sm:$0xff]  ;;  %v44_v11 = vld [vmem:[%s16707_s0 + $0x28] sm:$0xff]  ;;  %v45_v12 = vld [vmem:[%s16707_s0 + $0x30] sm:$0xff] }
   0x5   :  { %12961 = vmatpush3.bf16.msra.mxu0 %v12958_v3  ;;  %v46_v13 = vld [vmem:[%s16707_s0 + $0x38] sm:$0xff]  ;;  %v47_v14 = vld [vmem:[%s16707_s0 + $0x40] sm:$0xff]  ;;  %v48_v15 = vld [vmem:[%s16707_s0 + $0x48] sm:$0xff] }
   0x6   :  { %12964 = vmatprep.subr.msk.bf16.mxu0 %vm12963_vm3, %v12962_v6  ;;  %v49_v16 = vld [vmem:[%s16707_s0 + $0x50] sm:$0xff] }
   0x9   :  { %12967 = vmatpush3.bf16.msk.msra.mxu0 %vm12963_vm3, %v12962_v6 }
   0xc   :  { %11923 = vmatmul.mubr.msk.f32.vlgmr.msra.gmra.mrb[0].mxu0 %vm194_vm1, %v40_v7 }
   0xd   :  { %11925 = vmatprep.mubr.msk.f32.mxu0 %vm194_vm1, %v41_v8 }
  0x10   :  { %11926 = vmatmul.mubr.msk.f32.gmra.mrb[2].mxu0 %vm194_vm1, %v42_v9 }
  0x11   :  { %11928 = vmatprep.mubr.msk.f32.mxu0 %vm194_vm1, %v43_v10 }
  0x14   :  { %11929 = vmatmul.mubr.msk.f32.gmra.mrb[4].mxu0 %vm194_vm1, %v44_v11 }
  0x15   :  { %11931 = vmatprep.mubr.msk.f32.mxu0 %vm194_vm1, %v45_v12 }
  0x18   :  { %11932 = vmatmul.mubr.msk.f32.gmra.mrb[6].mxu0 %vm194_vm1, %v46_v13 }
  0x19   :  { %11934 = vmatprep.mubr.msk.f32.mxu0 %vm194_vm1, %v47_v14 }
  0x1a   :  { %16 = vsyncpa [#allocation7], 0  ;;  %v50_v17 = vld [vmem:[%s16707_s0 + $0x58] sm:$0xff]  ;;  %v51_v18 = vld [vmem:[%s16707_s0 + $0x60] sm:$0xff]  ;;  %vm3084_vm4 = vcmask 1045504   ;;  %vm2280_vm5 = vcmask 48128  }
  0x1b   :  { %v52_v19 = vld [vmem:[%s16707_s0 + $0x68] sm:$0xff]  ;;  %v53_v20 = vld [vmem:[%s16707_s0 + $0x70] sm:$0xff]  ;;  %v54_v21 = vld [vmem:[%s16707_s0 + $0x78] sm:$0xff]  ;;  %vm2953_vm6 = vcmask 44032   ;;  %vm14126_vm7 = vmmov 0   ;;  %vm8842_vm8 = vcmask 130048  }
  0x1c   :  { %11935 = vmatmul.mubr.msk.f32.gmra.mrb[8].mxu0 %vm194_vm1, %v48_v15  ;;  %v55_v22 = vld [vmem:[%s16707_s0 + $0x80] sm:$0xff]  ;;  %v56_v23 = vld [vmem:[%s16707_s0 + $0x88] sm:$0xff]  ;;  %v57_v24 = vld [vmem:[%s16707_s0 + $0x90] sm:$0xff]  ;;  %vm8946_vm9 = vcmask 125952   ;;  %vm8967_vm10 = vcmask 1041409   ;;  %vm10304_vm11 = vcmask 982016  }
  0x1d   :  { %11937 = vmatprep.mubr.msk.f32.mxu0 %vm194_vm1, %v49_v16  ;;  %v58_v25 = vld [vmem:[%s16707_s0 + $0x98] sm:$0xff]  ;;  %v59_v26 = vld [vmem:[%s16707_s0 + $0xa0] sm:$0xff]  ;;  %v60_v27 = vld [vmem:[%s16707_s0 + $0xa8] sm:$0xff]  ;;  %vm10406_vm12 = vcmask 1043456   ;;  %vm10402_vm13 = vcmask 687104   ;;  %vm10480_vm14 = vcmask 74752  }
  0x1e   :  { %v61_v28 = vld [vmem:[%s16707_s0 + $0xb0] sm:$0xff]  ;;  %v62_v29 = vld [vmem:[%s16707_s0 + $0xb8] sm:$0xff]  ;;  %v63_v30 = vld [vmem:[%s16707_s0 + $0xc0] sm:$0xff] }
  0x1f   :  { %v64_v31 = vld [vmem:[%s16707_s0 + $0xc8] sm:$0xff]  ;;  %v65_v32 = vld [vmem:[%s16707_s0 + $0xd0] sm:$0xff]  ;;  %v66_v33 = vld [vmem:[%s16707_s0 + $0xd8] sm:$0xff] }
  0x20   :  { %11938 = vmatmul.mubr.msk.f32.gmra.mrb[10].mxu0 %vm194_vm1, %v50_v17  ;;  %v67_v34 = vld [vmem:[%s16707_s0 + $0xe0] sm:$0xff]  ;;  %v68_v35 = vld [vmem:[%s16707_s0 + $0xe8] sm:$0xff]  ;;  %v69_v36 = vld [vmem:[%s16707_s0 + $0xf0] sm:$0xff] }
  0x21   :  { %11940 = vmatprep.mubr.msk.f32.mxu0 %vm194_vm1, %v51_v18  ;;  %v70_v37 = vld [vmem:[%s16707_s0 + $0xf8] sm:$0xff]  ;;  %v71_v38 = vld [vmem:[%s16707_s0 + $0x100] sm:$0xff]  ;;  %v72_v39 = vld [vmem:[%s16707_s0 + $0x108] sm:$0xff] }
  0x22   :  { %v73_v40 = vld [vmem:[%s16707_s0 + $0x110] sm:$0xff]  ;;  %v74_v41 = vld [vmem:[%s16707_s0 + $0x118] sm:$0xff]  ;;  %v75_v42 = vld [vmem:[%s16707_s0 + $0x120] sm:$0xff] }
  0x23   :  { %v76_v43 = vld [vmem:[%s16707_s0 + $0x128] sm:$0xff]  ;;  %v77_v44 = vld [vmem:[%s16707_s0 + $0x130] sm:$0xff]  ;;  %v78_v45 = vld [vmem:[%s16707_s0 + $0x138] sm:$0xff] }
  0x24   :  { %11941 = vmatmul.mubr.msk.f32.gmra.mrb[12].mxu0 %vm194_vm1, %v52_v19  ;;  %v79_v46 = vld [vmem:[%s16707_s0 + $0x140] sm:$0xff]  ;;  %v80_v47 = vld [vmem:[%s16707_s0 + $0x148] sm:$0xff]  ;;  %v81_v48 = vld [vmem:[%s16707_s0 + $0x150] sm:$0xff] }
  0x25   :  { %11943 = vmatprep.mubr.msk.f32.mxu0 %vm194_vm1, %v53_v20  ;;  %v82_v49 = vld [vmem:[%s16707_s0 + $0x158] sm:$0xff]  ;;  %v83_v50 = vld [vmem:[%s16707_s0 + $0x160] sm:$0xff]  ;;  %v84_v51 = vld [vmem:[%s16707_s0 + $0x168] sm:$0xff] }
  0x26   :  { %v85_v52 = vld [vmem:[%s16707_s0 + $0x170] sm:$0xff]  ;;  %v86_v53 = vld [vmem:[%s16707_s0 + $0x178] sm:$0xff]  ;;  %v87_v54 = vld [vmem:[%s16707_s0 + $0x180] sm:$0xff] }
  0x27   :  { %v88_v55 = vld [vmem:[%s16707_s0 + $0x188] sm:$0xff]  ;;  %v89_v56 = vld [vmem:[%s16707_s0 + $0x190] sm:$0xff]  ;;  %v90_v57 = vld [vmem:[%s16707_s0 + $0x198] sm:$0xff] }
  0x28   :  { %11944 = vmatmul.mubr.msk.f32.gmra.mrb[14].mxu0 %vm194_vm1, %v54_v21  ;;  %v91_v58 = vld [vmem:[%s16707_s0 + $0x1a0] sm:$0xff]  ;;  %v92_v59 = vld [vmem:[%s16707_s0 + $0x1a8] sm:$0xff]  ;;  %v93_v60 = vld [vmem:[%s16707_s0 + $0x1b0] sm:$0xff] }
  0x29   :  { %11946 = vmatprep.mubr.msk.f32.mxu0 %vm194_vm1, %v55_v22  ;;  %v94_v61 = vld [vmem:[%s16707_s0 + $0x1b8] sm:$0xff]  ;;  %v95_v62 = vld [vmem:[%s16707_s0 + $0x1c0] sm:$0xff]  ;;  %v96_v63 = vld [vmem:[%s16707_s0 + $0x1c8] sm:$0xff] }
  0x2a   :  { %v97_v0 = vld [vmem:[%s16707_s0 + $0x1d0] sm:$0xff]  ;;  %v98_v1 = vld [vmem:[%s16707_s0 + $0x1d8] sm:$0xff]  ;;  %v99_v2 = vld [vmem:[%s16707_s0 + $0x1e0] sm:$0xff] }
  0x2b   :  { %v100_v3 = vld [vmem:[%s16707_s0 + $0x1e8] sm:$0xff]  ;;  %v101_v4 = vld [vmem:[%s16707_s0 + $0x1f0] sm:$0xff]  ;;  %v102_v5 = vld [vmem:[%s16707_s0 + $0x1f8] sm:$0xff] }
  0x2c   :  { %11947 = vmatmul.mubr.msk.f32.gmra.mrb[16].mxu0 %vm194_vm1, %v56_v23  ;;  %v103_v6 = vld [vmem:[%s16707_s0 + $0x200] sm:$0xff]  ;;  %v104_v7 = vld [vmem:[%s16707_s0 + $0x208] sm:$0xff]  ;;  %v105_v8 = vld [vmem:[%s16707_s0 + $0x210] sm:$0xff] }
  0x2d   :  { %11949 = vmatprep.mubr.msk.f32.mxu0 %vm194_vm1, %v57_v24  ;;  %v106_v9 = vld [vmem:[%s16707_s0 + $0x218] sm:$0xff]  ;;  %v107_v10 = vld [vmem:[%s16707_s0 + $0x220] sm:$0xff]  ;;  %v108_v11 = vld [vmem:[%s16707_s0 + $0x228] sm:$0xff] }
  0x2e   :  { %v109_v12 = vld [vmem:[%s16707_s0 + $0x230] sm:$0xff]  ;;  %v110_v13 = vld [vmem:[%s16707_s0 + $0x238] sm:$0xff]  ;;  %v111_v14 = vld [vmem:[%s16707_s0 + $0x240] sm:$0xff] }
  0x2f   :  { %v112_v15 = vld [vmem:[%s16707_s0 + $0x248] sm:$0xff]  ;;  %v113_v16 = vld [vmem:[%s16707_s0 + $0x250] sm:$0xff]  ;;  %v114_v17 = vld [vmem:[%s16707_s0 + $0x258] sm:$0xff] }
  0x30   :  { %11950 = vmatmul.mubr.msk.f32.gmra.mrb[18].mxu0 %vm194_vm1, %v58_v25  ;;  %v115_v18 = vld [vmem:[%s16707_s0 + $0x260] sm:$0xff]  ;;  %v116_v19 = vld [vmem:[%s16707_s0 + $0x268] sm:$0xff]  ;;  %v117_v20 = vld [vmem:[%s16707_s0 + $0x270] sm:$0xff] }
  0x31   :  { %11952 = vmatprep.mubr.msk.f32.mxu0 %vm194_vm1, %v59_v26  ;;  %v118_v21 = vld [vmem:[%s16707_s0 + $0x278] sm:$0xff]  ;;  %v119_v22 = vld [vmem:[%s16707_s0 + $0x280] sm:$0xff]  ;;  %v120_v23 = vld [vmem:[%s16707_s0 + $0x288] sm:$0xff] }
  0x32   :  { %v121_v24 = vld [vmem:[%s16707_s0 + $0x290] sm:$0xff]  ;;  %v10763_v25 = vld [vmem:[%s16710_s3 + $0x8] sm:$0x3f]  ;;  %v122_v26 = vld [vmem:[%s16707_s0 + $0x298] sm:$0xff] }
  0x33   :  { %12138 = vmatprep.subr.msk.mxu0 %vm3084_vm4, %v10763_v25 }
  0x34   :  { %11953 = vmatmul.mubr.msk.f32.gmra.mrb[20].mxu0 %vm194_vm1, %v60_v27  ;;  %v123_v27 = vld [vmem:[%s16707_s0 + $0x2a0] sm:$0xff] }
  0x35   :  { %11955 = vmatprep.mubr.msk.f32.mxu0 %vm194_vm1, %v61_v28  ;;  %12139 = vmatpush3.msk.msra.mxu0 %vm3084_vm4, %v10763_v25  ;;  %v124_v28 = vld [vmem:[%s16707_s0 + $0x2a8] sm:$0xff] }
  0x38   :  { %11956 = vmatmul.mubr.msk.f32.gmra.mrb[22].mxu0 %vm194_vm1, %v62_v29  ;;  %v125_v29 = vld [vmem:[%s16707_s0 + $0x2b0] sm:$0xff] }
  0x39   :  { %11958 = vmatprep.mubr.msk.f32.mxu0 %vm194_vm1, %v63_v30  ;;  %v10870_v30 = vld [vmem:[%s16710_s3 + $0x30] sm:$0x3f] }
  0x3a   :  { %12294 = vmatprep.subr.msk.mxu1 %vm3084_vm4, %v10870_v30 }
  0x3b   :  { %12295 = vmatpush3.msk.msra.mxu1 %vm3084_vm4, %v10870_v30 }
  0x3c   :  { %11959 = vmatmul.mubr.msk.f32.gmra.mrb[24].mxu0 %vm194_vm1, %v64_v31  ;;  %v126_v31 = vld [vmem:[%s16707_s0 + $0x2b8] sm:$0xff] }
  0x3d   :  { %11961 = vmatprep.mubr.msk.f32.mxu0 %vm194_vm1, %v65_v32  ;;  %v127_v32 = vld [vmem:[%s16707_s0 + $0x2c0] sm:$0xff] }
  0x40   :  { %11962 = vmatmul.mubr.msk.f32.gmra.mrb[26].mxu0 %vm194_vm1, %v66_v33  ;;  %v128_v33 = vld [vmem:[%s16707_s0 + $0x2c8] sm:$0xff] }
  0x41   :  { %11964 = vmatprep.mubr.msk.f32.mxu0 %vm194_vm1, %v67_v34  ;;  %v129_v34 = vld [vmem:[%s16707_s0 + $0x2d0] sm:$0xff] }
  0x44   :  { %11965 = vmatmul.mubr.msk.f32.gmra.mrb[28].mxu0 %vm194_vm1, %v68_v35  ;;  %v130_v35 = vld [vmem:[%s16707_s0 + $0x2d8] sm:$0xff] }
  0x45   :  { %11967 = vmatprep.mubr.msk.f32.mxu0 %vm194_vm1, %v69_v36  ;;  %v131_v36 = vld [vmem:[%s16707_s0 + $0x2e0] sm:$0xff] }
  0x48   :  { %11968 = vmatmul.mubr.msk.f32.gmra.mrb[30].mxu0 %vm194_vm1, %v70_v37  ;;  %v132_v37 = vld [vmem:[%s16707_s0 + $0x2e8] sm:$0xff] }
  0x49   :  { %11970 = vmatprep.mubr.msk.f32.mxu0 %vm194_vm1, %v71_v38  ;;  %v133_v38 = vld [vmem:[%s16707_s0 + $0x2f0] sm:$0xff] }
  0x4c   :  { %11971 = vmatmul.mubr.msk.f32.gmra.mrb[32].mxu0 %vm194_vm1, %v72_v39  ;;  %v134_v39 = vld [vmem:[%s16707_s0 + $0x2f8] sm:$0xff] }
  0x4d   :  { %11973 = vmatprep.mubr.msk.f32.mxu0 %vm194_vm1, %v73_v40  ;;  %v135_v40 = vld [vmem:[%s16707_s0 + $0x300] sm:$0xff] }
  0x50   :  { %11974 = vmatmul.mubr.msk.f32.gmra.mrb[34].mxu0 %vm194_vm1, %v74_v41  ;;  %v136_v41 = vld [vmem:[%s16707_s0 + $0x308] sm:$0xff] }
  0x51   :  { %11976 = vmatprep.mubr.msk.f32.mxu0 %vm194_vm1, %v75_v42  ;;  %v137_v42 = vld [vmem:[%s16707_s0 + $0x310] sm:$0xff] }
  0x54   :  { %11977 = vmatmul.mubr.msk.f32.gmra.mrb[36].mxu0 %vm194_vm1, %v76_v43  ;;  %v138_v43 = vld [vmem:[%s16707_s0 + $0x318] sm:$0xff] }
  0x55   :  { %11979 = vmatprep.mubr.msk.f32.mxu0 %vm194_vm1, %v77_v44  ;;  %v139_v44 = vld [vmem:[%s16707_s0 + $0x320] sm:$0xff] }
  0x58   :  { %11980 = vmatmul.mubr.msk.f32.gmra.mrb[38].mxu0 %vm194_vm1, %v78_v45  ;;  %v140_v45 = vld [vmem:[%s16707_s0 + $0x328] sm:$0xff] }
  0x59   :  { %11982 = vmatprep.mubr.msk.f32.mxu0 %vm194_vm1, %v79_v46  ;;  %v141_v46 = vld [vmem:[%s16707_s0 + $0x330] sm:$0xff] }
  0x5c   :  { %11983 = vmatmul.mubr.msk.f32.gmra.mrb[40].mxu0 %vm194_vm1, %v80_v47  ;;  %v142_v47 = vld [vmem:[%s16707_s0 + $0x338] sm:$0xff] }
  0x5d   :  { %11985 = vmatprep.mubr.msk.f32.mxu0 %vm194_vm1, %v81_v48  ;;  %v143_v48 = vld [vmem:[%s16707_s0 + $0x340] sm:$0xff] }
  0x60   :  { %11986 = vmatmul.mubr.msk.f32.gmra.mrb[42].mxu0 %vm194_vm1, %v82_v49  ;;  %v144_v49 = vld [vmem:[%s16707_s0 + $0x348] sm:$0xff] }
  0x61   :  { %11988 = vmatprep.mubr.msk.f32.mxu0 %vm194_vm1, %v83_v50  ;;  %v145_v50 = vld [vmem:[%s16707_s0 + $0x350] sm:$0xff] }
  0x64   :  { %11989 = vmatmul.mubr.msk.f32.gmra.mrb[44].mxu0 %vm194_vm1, %v84_v51  ;;  %v14641_v51 = vld [vmem:[%s16709_s2] ss:$0 sm:$0xff] }
  0x65   :  { %11991 = vmatprep.mubr.msk.f32.mxu0 %vm194_vm1, %v85_v52  ;;  %v146_v52 = vld [vmem:[%s16707_s0 + $0x358] sm:$0xff] }
  0x68   :  { %11992 = vmatmul.mubr.msk.f32.gmra.mrb[46].mxu0 %vm194_vm1, %v86_v53  ;;  %v147_v53 = vld [vmem:[%s16707_s0 + $0x360] sm:$0xff] }
  0x69   :  { %11994 = vmatprep.mubr.msk.f32.mxu0 %vm194_vm1, %v87_v54 }
  0x6c   :  { %11995 = vmatmul.mubr.msk.f32.gmra.mrb[48].mxu0 %vm194_vm1, %v88_v55 }
  0x6d   :  { %11997 = vmatprep.mubr.msk.f32.mxu0 %vm194_vm1, %v89_v56 }
  0x70   :  { %11998 = vmatmul.mubr.msk.f32.gmra.mrb[50].mxu0 %vm194_vm1, %v90_v57 }
  0x71   :  { %12000 = vmatprep.mubr.msk.f32.mxu0 %vm194_vm1, %v91_v58  ;;  %v148_v58 = vld [vmem:[%s16707_s0 + $0x368] sm:$0xff] }
  0x74   :  { %12001 = vmatmul.mubr.msk.f32.gmra.mrb[52].mxu0 %vm194_vm1, %v92_v59 }
  0x75   :  { %12003 = vmatprep.mubr.msk.f32.mxu0 %vm194_vm1, %v93_v60  ;;  %v149_v60 = vld [vmem:[%s16707_s0 + $0x370] sm:$0xff] }
  0x78   :  { %12004 = vmatmul.mubr.msk.f32.gmra.mrb[54].mxu0 %vm194_vm1, %v94_v61 }
  0x79   :  { %12006 = vmatprep.mubr.msk.f32.mxu0 %vm194_vm1, %v95_v62 }
  0x7c   :  { %12007 = vmatmul.mubr.msk.f32.gmra.mrb[56].mxu0 %vm194_vm1, %v96_v63 }
  0x7d   :  { %12009 = vmatprep.mubr.msk.f32.mxu0 %vm194_vm1, %v97_v0 }
  0x80   :  { %12010 = vmatmul.mubr.msk.f32.gmra.mrb[58].mxu0 %vm194_vm1, %v98_v1 }
  0x81   :  { %12012 = vmatprep.mubr.msk.f32.mxu0 %vm194_vm1, %v99_v2 }
  0x84   :  { %12013 = vmatmul.mubr.msk.f32.gmra.mrb[60].mxu0 %vm194_vm1, %v100_v3 }
  0x85   :  { %12015 = vmatprep.mubr.msk.f32.mxu0 %vm194_vm1, %v101_v4  ;;  %v150_v4 = vld [vmem:[%s16707_s0 + $0x378] sm:$0xff] }
  0x88   :  { %12016 = vmatmul.mubr.msk.f32.gmra.mrb[62].mxu0 %vm194_vm1, %v102_v5 }
  0x89   :  { %12018 = vmatprep.mubr.msk.f32.mxu0 %vm194_vm1, %v103_v6  ;;  %v151_v6 = vld [vmem:[%s16707_s0 + $0x380] sm:$0xff] }
  0x8c   :  { %12019 = vmatmul.mubr.msk.f32.gmra.mrb[64].mxu0 %vm194_vm1, %v104_v7 }
  0x8d   :  { %12021 = vmatprep.mubr.msk.f32.mxu0 %vm194_vm1, %v105_v8 }
  0x90   :  { %12022 = vmatmul.mubr.msk.f32.gmra.mrb[66].mxu0 %vm194_vm1, %v106_v9 }
  0x91   :  { %12024 = vmatprep.mubr.msk.f32.mxu0 %vm194_vm1, %v107_v10 }
  0x94   :  { %12025 = vmatmul.mubr.msk.f32.gmra.mrb[68].mxu0 %vm194_vm1, %v108_v11 }
  0x95   :  { %12027 = vmatprep.mubr.msk.f32.mxu0 %vm194_vm1, %v109_v12 }
  0x98   :  { %12028 = vmatmul.mubr.msk.f32.gmra.mrb[70].mxu0 %vm194_vm1, %v110_v13 }
  0x99   :  { %12030 = vmatprep.mubr.msk.f32.mxu0 %vm194_vm1, %v111_v14  ;;  %v152_v14 = vld [vmem:[%s16707_s0 + $0x388] sm:$0xff] }
  0x9c   :  { %12031 = vmatmul.mubr.msk.f32.gmra.mrb[72].mxu0 %vm194_vm1, %v112_v15 }
  0x9d   :  { %12033 = vmatprep.mubr.msk.f32.mxu0 %vm194_vm1, %v113_v16  ;;  %v153_v16 = vld [vmem:[%s16707_s0 + $0x390] sm:$0xff] }
  0xa0   :  { %12034 = vmatmul.mubr.msk.f32.gmra.mrb[74].mxu0 %vm194_vm1, %v114_v17 }
  0xa1   :  { %12036 = vmatprep.mubr.msk.f32.mxu0 %vm194_vm1, %v115_v18 }
  0xa4   :  { %12037 = vmatmul.mubr.msk.f32.gmra.mrb[76].mxu0 %vm194_vm1, %v116_v19 }
  0xa5   :  { %12039 = vmatprep.mubr.msk.f32.mxu0 %vm194_vm1, %v117_v20 }
  0xa8   :  { %12040 = vmatmul.mubr.msk.f32.gmra.mrb[78].mxu0 %vm194_vm1, %v118_v21 }
  0xa9   :  { %12042 = vmatprep.mubr.msk.f32.mxu0 %vm194_vm1, %v119_v22 }
  0xac   :  { %12043 = vmatmul.mubr.msk.f32.gmra.mrb[80].mxu0 %vm194_vm1, %v120_v23 }
  0xad   :  { %12045 = vmatprep.mubr.msk.f32.mxu0 %vm194_vm1, %v121_v24  ;;  %v154_v24 = vld [vmem:[%s16707_s0 + $0x398] sm:$0xff] }
  0xb0   :  { %12046 = vmatmul.mubr.msk.f32.gmra.mrb[82].mxu0 %vm194_vm1, %v122_v26  ;;  %v155_v26 = vld [vmem:[%s16707_s0 + $0x3a0] sm:$0xff] }
  0xb1   :  { %12048 = vmatprep.mubr.msk.f32.mxu0 %vm194_vm1, %v123_v27 }
  0xb4   :  { %12049 = vmatmul.mubr.msk.f32.gmra.mrb[84].mxu0 %vm194_vm1, %v124_v28 }
  0xb5   :  { %12051 = vmatprep.mubr.msk.f32.mxu0 %vm194_vm1, %v125_v29 }
  0xb8   :  { %12052 = vmatmul.mubr.msk.f32.gmra.mrb[86].mxu0 %vm194_vm1, %v126_v31 }
  0xb9   :  { %12054 = vmatprep.mubr.msk.f32.mxu0 %vm194_vm1, %v127_v32 }
  0xbc   :  { %12055 = vmatmul.mubr.msk.f32.gmra.mrb[88].mxu0 %vm194_vm1, %v128_v33 }
  0xbd   :  { %12057 = vmatprep.mubr.msk.f32.mxu0 %vm194_vm1, %v129_v34 }
  0xc0   :  { %12058 = vmatmul.mubr.msk.f32.gmra.mrb[90].mxu0 %vm194_vm1, %v130_v35 }
  0xc1   :  { %12060 = vmatprep.mubr.msk.f32.mxu0 %vm194_vm1, %v131_v36 }
  0xc4   :  { %12061 = vmatmul.mubr.msk.f32.gmra.mrb[92].mxu0 %vm194_vm1, %v132_v37  ;;  %v156_v37 = vld [vmem:[%s16707_s0 + $0x3a8] sm:$0xff] }
  0xc5   :  { %12063 = vmatprep.mubr.msk.f32.mxu0 %vm194_vm1, %v133_v38 }
  0xc8   :  { %12064 = vmatmul.mubr.msk.f32.gmra.mrb[94].mxu0 %vm194_vm1, %v134_v39 }
  0xc9   :  { %12066 = vmatprep.mubr.msk.f32.mxu0 %vm194_vm1, %v135_v40  ;;  %v157_v40 = vld [vmem:[%s16707_s0 + $0x3b0] sm:$0xff] }
  0xcc   :  { %12067 = vmatmul.mubr.msk.f32.gmra.mrb[96].mxu0 %vm194_vm1, %v136_v41 }
  0xcd   :  { %12069 = vmatprep.mubr.msk.f32.mxu0 %vm194_vm1, %v137_v42 }
  0xd0   :  { %12070 = vmatmul.mubr.msk.f32.gmra.mrb[98].mxu0 %vm194_vm1, %v138_v43 }
  0xd1   :  { %12072 = vmatprep.mubr.msk.f32.mxu0 %vm194_vm1, %v139_v44 }
  0xd4   :  { %12073 = vmatmul.mubr.msk.f32.gmra.mrb[100].mxu0 %vm194_vm1, %v140_v45 }
  0xd5   :  { %12075 = vmatprep.mubr.msk.f32.mxu0 %vm194_vm1, %v141_v46 }
  0xd8   :  { %12076 = vmatmul.mubr.msk.f32.gmra.mrb[102].mxu0 %vm194_vm1, %v142_v47 }
  0xd9   :  { %12078 = vmatprep.mubr.msk.f32.mxu0 %vm194_vm1, %v143_v48 }
  0xdc   :  { %12079 = vmatmul.mubr.msk.f32.gmra.mrb[104].mxu0 %vm194_vm1, %v144_v49 }
  0xdd   :  { %12081 = vmatprep.mubr.msk.f32.mxu0 %vm194_vm1, %v145_v50 }
  0xdf   :  { %v11924_v54 = vpop.f32.mrb[0].mxu0 }
  0xe0   :  { %v703_v55 = vadd.f32 %v11924_v54, %v14641_v51  ;;  %v697_v56 = vpop.f32.mrb[1].mxu0  ;;  %12082 = vmatmul.mubr.msk.f32.gmra.mrb[106].mxu0 %vm194_vm1, %v146_v52  ;;  %v158_v52 = vld [vmem:[%s16707_s0 + $0x3b8] sm:$0xff] }
  0xe1   :  { %v698_v57 = vadd.f32 %v14641_v51, %v697_v56  ;;  %12084 = vmatprep.mubr.msk.f32.mxu0 %vm194_vm1, %v147_v53 }
  0xe2   :  { %v1417_v59 = vsub.f32 0.0, %v703_v55  ;;  %v159_v55 = vld [vmem:[%s16707_s0 + $0x3c0] sm:$0xff] }
  0xe3   :  { %v1416_v61 = vsub.f32 0.0, %v698_v57  ;;  %v11927_v62 = vpop.f32.mrb[2].mxu0 }
  0xe4   :  { %v1562_v63 = vmul.f32 1.442695, %v1417_v59  ;;  %v713_v0 = vadd.f32 %v11927_v62, %v14641_v51  ;;  %v707_v1 = vpop.f32.mrb[3].mxu0  ;;  %12085 = vmatmul.mubr.msk.f32.gmra.mrb[108].mxu0 %vm194_vm1, %v148_v58 }
  0xe5   :  { %v1560_v2 = vmul.f32 1.442695, %v1416_v61  ;;  %v708_v3 = vadd.f32 %v14641_v51, %v707_v1  ;;  %12087 = vmatprep.mubr.msk.f32.mxu0 %vm194_vm1, %v149_v60 }
  0xe6   :  { %13441 = vpow2.f32 %v1562_v63  ;;  %v1419_v5 = vsub.f32 0.0, %v713_v0 }
  0xe7   :  { %13443 = vpow2.f32 %v1560_v2  ;;  %v1418_v7 = vsub.f32 0.0, %v708_v3  ;;  %v11930_v8 = vpop.f32.mrb[4].mxu0  ;;  %v160_v2 = vld [vmem:[%s16707_s0 + $0x3c8] sm:$0xff] }
  0xe8   :  { %v1566_v9 = vmul.f32 1.442695, %v1419_v5  ;;  %v723_v10 = vadd.f32 %v11930_v8, %v14641_v51  ;;  %v717_v11 = vpop.f32.mrb[5].mxu0  ;;  %12088 = vmatmul.mubr.msk.f32.gmra.mrb[110].mxu0 %vm194_vm1, %v150_v4  ;;  %v161_v5 = vld [vmem:[%s16707_s0 + $0x3d0] sm:$0xff] }
  0xe9   :  { %v1564_v12 = vmul.f32 1.442695, %v1418_v7  ;;  %v718_v13 = vadd.f32 %v14641_v51, %v717_v11  ;;  %12090 = vmatprep.mubr.msk.f32.mxu0 %vm194_vm1, %v151_v6 }
  0xea   :  { %13445 = vpow2.f32 %v1566_v9  ;;  %v1421_v15 = vsub.f32 0.0, %v723_v10 }
  0xeb   :  { %13447 = vpow2.f32 %v1564_v12  ;;  %v1420_v17 = vsub.f32 0.0, %v718_v13  ;;  %v11933_v18 = vpop.f32.mrb[6].mxu0 }
  0xec   :  { %v1570_v19 = vmul.f32 1.442695, %v1421_v15  ;;  %v733_v20 = vadd.f32 %v11933_v18, %v14641_v51  ;;  %v727_v21 = vpop.f32.mrb[7].mxu0  ;;  %12091 = vmatmul.mubr.msk.f32.gmra.mrb[112].mxu0 %vm194_vm1, %v152_v14 }
  0xed   :  { %v1568_v22 = vmul.f32 1.442695, %v1420_v17  ;;  %v728_v23 = vadd.f32 %v14641_v51, %v727_v21  ;;  %12093 = vmatprep.mubr.msk.f32.mxu0 %vm194_vm1, %v153_v16  ;;  %v162_v16 = vld [vmem:[%s16707_s0 + $0x3d8] sm:$0xff] }
  0xee   :  { %13449 = vpow2.f32 %v1570_v19  ;;  %v1423_v25 = vsub.f32 0.0, %v733_v20  ;;  %v163_v19 = vld [vmem:[%s16707_s0 + $0x3e0] sm:$0xff] }
  0xef   :  { %13451 = vpow2.f32 %v1568_v22  ;;  %v1422_v27 = vsub.f32 0.0, %v728_v23  ;;  %v11936_v28 = vpop.f32.mrb[8].mxu0 }
  0xf0   :  { %v13442_v29 = vpop.eup %13441  ;;  %v1574_v30 = vmul.f32 1.442695, %v1423_v25  ;;  %v743_v31 = vadd.f32 %v11936_v28, %v14641_v51  ;;  %v737_v32 = vpop.f32.mrb[9].mxu0  ;;  %12094 = vmatmul.mubr.msk.f32.gmra.mrb[114].mxu0 %vm194_vm1, %v154_v24 }
  0xf1   :  { %v13444_v33 = vpop.eup %13443  ;;  %v1849_v34 = vadd.f32 1.0, %v13442_v29  ;;  %v1572_v35 = vmul.f32 1.442695, %v1422_v27  ;;  %v738_v36 = vadd.f32 %v14641_v51, %v737_v32  ;;  %12096 = vmatprep.mubr.msk.f32.mxu0 %vm194_vm1, %v155_v26  ;;  %v164_v32 = vld [vmem:[%s16707_s0 + $0x3e8] sm:$0xff] }
  0xf2   :  { %v1848_v38 = vadd.f32 1.0, %v13444_v33  ;;  %13453 = vpow2.f32 %v1574_v30  ;;  %v1425_v39 = vsub.f32 0.0, %v743_v31 }
  0xf3   :  { %13455 = vrcp.f32 %v1849_v34  ;;  %v1424_v41 = vsub.f32 0.0, %v738_v36  ;;  %v11939_v42 = vpop.f32.mrb[10].mxu0 }
  0xf4   :  { %v13446_v43 = vpop.eup %13445  ;;  %13457 = vrcp.f32 %v1848_v38  ;;  %v1578_v44 = vmul.f32 1.442695, %v1425_v39  ;;  %v753_v45 = vadd.f32 %v11939_v42, %v14641_v51  ;;  %v747_v46 = vpop.f32.mrb[11].mxu0  ;;  %12097 = vmatmul.mubr.msk.f32.gmra.mrb[116].mxu0 %vm194_vm1, %v156_v37 }
  0xf5   :  { %v13448_v47 = vpop.eup %13447  ;;  %v1851_v48 = vadd.f32 1.0, %v13446_v43  ;;  %13459 = vpow2.f32 %v1572_v35  ;;  %v1576_v49 = vmul.f32 1.442695, %v1424_v41  ;;  %v748_v50 = vadd.f32 %v14641_v51, %v747_v46  ;;  %12099 = vmatprep.mubr.msk.f32.mxu0 %vm194_vm1, %v157_v40  ;;  %v165_v35 = vld [vmem:[%s16707_s0 + $0x3f0] sm:$0xff] }
  0xf6   :  { %v1850_v53 = vadd.f32 1.0, %v13448_v47  ;;  %13461 = vpow2.f32 %v1578_v44  ;;  %v1427_v54 = vsub.f32 0.0, %v753_v45 }
  0xf7   :  { %13463 = vrcp.f32 %v1851_v48  ;;  %v1426_v56 = vsub.f32 0.0, %v748_v50  ;;  %v11942_v57 = vpop.f32.mrb[12].mxu0  ;;  %v166_v48 = vld [vmem:[%s16707_s0 + $0x3f8] sm:$0xff] }
  0xf8   :  { %v13450_v58 = vpop.eup %13449  ;;  %13465 = vrcp.f32 %v1850_v53  ;;  %v1582_v59 = vmul.f32 1.442695, %v1427_v54  ;;  %v763_v60 = vadd.f32 %v11942_v57, %v14641_v51  ;;  %v757_v61 = vpop.f32.mrb[13].mxu0  ;;  %12100 = vmatmul.mubr.msk.f32.gmra.mrb[118].mxu0 %vm194_vm1, %v158_v52  ;;  %v167_v52 = vld [vmem:[%s16707_s0 + $0x400] sm:$0xff] }
  0xf9   :  { %v13452_v62 = vpop.eup %13451  ;;  %v1853_v63 = vadd.f32 1.0, %v13450_v58  ;;  %13467 = vpow2.f32 %v1576_v49  ;;  %v1580_v0 = vmul.f32 1.442695, %v1426_v56  ;;  %v758_v1 = vadd.f32 %v14641_v51, %v757_v61  ;;  %12102 = vmatprep.mubr.msk.f32.mxu0 %vm194_vm1, %v159_v55  ;;  %v168_v61 = vld [vmem:[%s16707_s0 + $0x408] sm:$0xff] }
  0xfa   :  { %v1852_v3 = vadd.f32 1.0, %v13452_v62  ;;  %13469 = vpow2.f32 %v1582_v59  ;;  %v1429_v4 = vsub.f32 0.0, %v763_v60 }
  0xfb   :  { %13471 = vrcp.f32 %v1853_v63  ;;  %v1428_v6 = vsub.f32 0.0, %v758_v1  ;;  %v11945_v7 = vpop.f32.mrb[14].mxu0  ;;  %v169_v1 = vld [vmem:[%s16707_s0 + $0x410] sm:$0xff] }
  0xfc   :  { %v13454_v8 = vpop.eup %13453  ;;  %13473 = vrcp.f32 %v1852_v3  ;;  %v1586_v9 = vmul.f32 1.442695, %v1429_v4  ;;  %v773_v10 = vadd.f32 %v11945_v7, %v14641_v51  ;;  %v767_v11 = vpop.f32.mrb[15].mxu0  ;;  %12103 = vmatmul.mubr.msk.f32.gmra.mrb[120].mxu0 %vm194_vm1, %v160_v2 }
  0xfd   :  { %v13456_v12 = vpop.eup %13455  ;;  %v1855_v13 = vadd.f32 1.0, %v13454_v8  ;;  %13475 = vpow2.f32 %v1580_v0  ;;  %v1584_v14 = vmul.f32 1.442695, %v1428_v6  ;;  %v768_v15 = vadd.f32 %v14641_v51, %v767_v11  ;;  %12105 = vmatprep.mubr.msk.f32.mxu0 %vm194_vm1, %v161_v5 }
  0xfe   :  { %v13458_v17 = vpop.eup %13457  ;;  %2282 = vst.msk [vmem:[#allocation2 + $0x8] sm:$0xff] %vm2280_vm5, %v13456_v12  ;;  %13477 = vpow2.f32 %v1586_v9  ;;  %v1431_v18 = vsub.f32 0.0, %v773_v10 }
  0xff   :  { %v13460_v20 = vpop.eup %13459  ;;  %2281 = vst.msk [vmem:[#allocation2] sm:$0xff] %vm2280_vm5, %v13458_v17  ;;  %13479 = vrcp.f32 %v1855_v13  ;;  %v1430_v21 = vsub.f32 0.0, %v768_v15  ;;  %v11948_v22 = vpop.f32.mrb[16].mxu0 }
 0x100   :  { %v13462_v23 = vpop.eup %13461  ;;  %v1854_v24 = vadd.f32 1.0, %v13460_v20  ;;  %13481 = vpow2.f32 %v1584_v14  ;;  %v1590_v25 = vmul.f32 1.442695, %v1431_v18  ;;  %v783_v26 = vadd.f32 %v11948_v22, %v14641_v51  ;;  %v777_v27 = vpop.f32.mrb[17].mxu0  ;;  %12106 = vmatmul.mubr.msk.f32.gmra.mrb[122].mxu0 %vm194_vm1, %v162_v16 }
 0x101   :  { %v13464_v28 = vpop.eup %13463  ;;  %v1857_v29 = vadd.f32 1.0, %v13462_v23  ;;  %v1588_v30 = vmul.f32 1.442695, %v1430_v21  ;;  %v778_v31 = vadd.f32 %v14641_v51, %v777_v27  ;;  %12108 = vmatprep.mubr.msk.f32.mxu0 %vm194_vm1, %v163_v19  ;;  %v170_v19 = vld [vmem:[%s16707_s0 + $0x418] sm:$0xff]  ;;  %v171_v23 = vld [vmem:[%s16707_s0 + $0x420] sm:$0xff] }
 0x102   :  { %v13466_v33 = vpop.eup %13465  ;;  %2284 = vst.msk [vmem:[#allocation2 + $0x18] sm:$0xff] %vm2280_vm5, %v13464_v28  ;;  %13483 = vrcp.f32 %v1854_v24  ;;  %v1433_v34 = vsub.f32 0.0, %v783_v26 }
 0x103   :  { %v13468_v36 = vpop.eup %13467  ;;  %2283 = vst.msk [vmem:[#allocation2 + $0x10] sm:$0xff] %vm2280_vm5, %v13466_v33  ;;  %13485 = vrcp.f32 %v1857_v29  ;;  %v1432_v37 = vsub.f32 0.0, %v778_v31  ;;  %v11951_v38 = vpop.f32.mrb[18].mxu0 }
 0x104   :  { %v13470_v39 = vpop.eup %13469  ;;  %v1856_v40 = vadd.f32 1.0, %v13468_v36  ;;  %13487 = vpow2.f32 %v1590_v25  ;;  %v1594_v41 = vmul.f32 1.442695, %v1433_v34  ;;  %v793_v42 = vadd.f32 %v11951_v38, %v14641_v51  ;;  %v787_v43 = vpop.f32.mrb[19].mxu0  ;;  %12109 = vmatmul.mubr.msk.f32.gmra.mrb[124].mxu0 %vm194_vm1, %v164_v32 }
 0x105   :  { %v13472_v44 = vpop.eup %13471  ;;  %v1859_v45 = vadd.f32 1.0, %v13470_v39  ;;  %13489 = vpow2.f32 %v1588_v30  ;;  %v1592_v46 = vmul.f32 1.442695, %v1432_v37  ;;  %v788_v47 = vadd.f32 %v14641_v51, %v787_v43  ;;  %12111 = vmatprep.mubr.msk.f32.mxu0 %vm194_vm1, %v165_v35 }
 0x106   :  { %v13474_v49 = vpop.eup %13473  ;;  %2286 = vst.msk [vmem:[#allocation2 + $0x28] sm:$0xff] %vm2280_vm5, %v13472_v44  ;;  %13491 = vrcp.f32 %v1856_v40  ;;  %v1435_v50 = vsub.f32 0.0, %v793_v42  ;;  %v14766_v2 = vld [vmem:[#allocation2] ss:$2 sm:$0xff]  ;;  %v14768_v3 = vld [vmem:[#allocation2 + $0x1] ss:$2 sm:$0xff] }
 0x107   :  { %v13476_v53 = vpop.eup %13475  ;;  %2285 = vst.msk [vmem:[#allocation2 + $0x20] sm:$0xff] %vm2280_vm5, %v13474_v49  ;;  %13493 = vrcp.f32 %v1859_v45  ;;  %v1434_v54 = vsub.f32 0.0, %v788_v47  ;;  %v11954_v55 = vpop.f32.mrb[20].mxu0  ;;  %v2808_v26 = vmax.f32 %v14766_v2, %v14768_v3  ;;  %v172_v42 = vld [vmem:[%s16707_s0 + $0x428] sm:$0xff] }
 0x108   :  { %v13478_v56 = vpop.eup %13477  ;;  %v1858_v57 = vadd.f32 1.0, %v13476_v53  ;;  %13495 = vpow2.f32 %v1594_v41  ;;  %v1598_v58 = vmul.f32 1.442695, %v1435_v50  ;;  %v803_v59 = vadd.f32 %v11954_v55, %v14641_v51  ;;  %v797_v60 = vpop.f32.mrb[21].mxu0  ;;  %12112 = vmatmul.mubr.msk.f32.gmra.mrb[126].mxu0 %vm194_vm1, %v166_v48 }
 0x109   :  { %v13480_v62 = vpop.eup %13479  ;;  %v1861_v63 = vadd.f32 1.0, %v13478_v56  ;;  %13497 = vpow2.f32 %v1592_v46  ;;  %v798_v0 = vadd.f32 %v14641_v51, %v797_v60  ;;  %12114 = vmatprep.mubr.msk.f32.mxu0 %vm194_vm1, %v167_v52  ;;  %v1596_v5 = vmul.f32 1.442695, %v1434_v54  ;;  %v173_v46 = vld [vmem:[%s16707_s0 + $0x430] sm:$0xff] }
 0x10a   :  { %v13482_v4 = vpop.eup %13481  ;;  %2288 = vst.msk [vmem:[#allocation2 + $0x38] sm:$0xff] %vm2280_vm5, %v13480_v62  ;;  %13499 = vrcp.f32 %v1858_v57  ;;  %v1437_v6 = vsub.f32 0.0, %v803_v59  ;;  %v14771_v7 = vld [vmem:[#allocation2 + $0x10] ss:$2 sm:$0xf]  ;;  %v174_v62 = vld [vmem:[%s16707_s0 + $0x438] sm:$0xff] }
 0x10b   :  { %13501 = vrcp.f32 %v1861_v63  ;;  %v1860_v8 = vadd.f32 1.0, %v13482_v4  ;;  %v1436_v9 = vsub.f32 0.0, %v798_v0  ;;  %v11957_v10 = vpop.f32.mrb[22].mxu0  ;;  %v2523_v11 = vld [vmem:[#allocation2 + $0x11] ss:$2 sm:$0xf] }
 0x10c   :  { %v13484_v12 = vpop.eup %13483  ;;  %13503 = vpow2.f32 %v1598_v58  ;;  %v1602_v13 = vmul.f32 1.442695, %v1437_v6  ;;  %v813_v14 = vadd.f32 %v11957_v10, %v14641_v51  ;;  %v807_v15 = vpop.f32.mrb[23].mxu0  ;;  %12115 = vmatmul.mubr.msk.f32.gmra.mrb[128].mxu0 %vm194_vm1, %v168_v61  ;;  %v2809_v27 = vmax.f32 %v14771_v7, %v2523_v11  ;;  %v176_v7 = vld [vmem:[%s16707_s0 + $0x448] sm:$0xff] }
 0x10d   :  { %v13486_v16 = vpop.eup %13485  ;;  %2287 = vst.msk [vmem:[#allocation2 + $0x30] sm:$0xff] %vm2280_vm5, %v13484_v12  ;;  %13505 = vrcp.f32 %v1860_v8  ;;  %v1600_v17 = vmul.f32 1.442695, %v1436_v9  ;;  %v808_v18 = vadd.f32 %v14641_v51, %v807_v15  ;;  %12117 = vmatprep.mubr.msk.f32.mxu0 %vm194_vm1, %v169_v1  ;;  %v2619_v20 = vld [vmem:[#allocation2 + $0x28] ss:$2 sm:$0xf] }
 0x10e   :  { %v13488_v21 = vpop.eup %13487  ;;  %2290 = vst.msk [vmem:[#allocation2 + $0x48] sm:$0xff] %vm2280_vm5, %v13486_v16  ;;  %13507 = vpow2.f32 %v1596_v5  ;;  %v1439_v22 = vsub.f32 0.0, %v813_v14  ;;  %v2617_v24 = vld [vmem:[#allocation2 + $0x18] ss:$2 sm:$0xff]  ;;  %v2713_v25 = vld [vmem:[#allocation2 + $0x19] ss:$2 sm:$0xff] }
 0x10f   :  { %v13490_v28 = vpop.eup %13489  ;;  %v1863_v29 = vadd.f32 1.0, %v13488_v21  ;;  %13509 = vpow2.f32 %v1602_v13  ;;  %v1438_v30 = vsub.f32 0.0, %v808_v18  ;;  %v11960_v31 = vpop.f32.mrb[24].mxu0  ;;  %v2715_v32 = vld [vmem:[#allocation2 + $0x29] ss:$2 sm:$0xf]  ;;  %v2856_v33 = vmax.f32 %v2617_v24, %v2713_v25 }
 0x110   :  { %v13492_v34 = vpop.eup %13491  ;;  %v1862_v35 = vadd.f32 1.0, %v13490_v28  ;;  %13511 = vpow2.f32 %v1600_v17  ;;  %v1606_v36 = vmul.f32 1.442695, %v1439_v22  ;;  %v823_v37 = vadd.f32 %v11960_v31, %v14641_v51  ;;  %v817_v38 = vpop.f32.mrb[25].mxu0  ;;  %12118 = vmatmul.mubr.msk.f32.gmra.mrb[130].mxu0 %vm194_vm1, %v170_v19  ;;  %v175_v1 = vld [vmem:[%s16707_s0 + $0x440] sm:$0xff]  ;;  %v177_v22 = vld [vmem:[%s16707_s0 + $0x450] sm:$0xff] }
 0x111   :  { %v13494_v39 = vpop.eup %13493  ;;  %2289 = vst.msk [vmem:[#allocation2 + $0x40] sm:$0xff] %vm2280_vm5, %v13492_v34  ;;  %13513 = vrcp.f32 %v1863_v29  ;;  %v1604_v40 = vmul.f32 1.442695, %v1438_v30  ;;  %v818_v41 = vadd.f32 %v14641_v51, %v817_v38  ;;  %12120 = vmatprep.mubr.msk.f32.mxu0 %vm194_vm1, %v171_v23  ;;  %v2857_v43 = vmax.f32 %v2619_v20, %v2715_v32 }
 0x112   :  { %v13496_v44 = vpop.eup %13495  ;;  %2292 = vst.msk [vmem:[#allocation2 + $0x58] sm:$0xff] %vm2280_vm5, %v13494_v39  ;;  %13515 = vrcp.f32 %v1862_v35  ;;  %v1441_v45 = vsub.f32 0.0, %v823_v37  ;;  %v2904_v47 = vmax.f32 %v2808_v26, %v2856_v33  ;;  %v178_v39 = vld [vmem:[%s16707_s0 + $0x458] sm:$0xff] }
 0x113   :  { %v13498_v48 = vpop.eup %13497  ;;  %v1865_v49 = vadd.f32 1.0, %v13496_v44  ;;  %13517 = vpow2.f32 %v1606_v36  ;;  %v1440_v50 = vsub.f32 0.0, %v818_v41  ;;  %v11963_v52 = vpop.f32.mrb[26].mxu0  ;;  %v2905_v53 = vmax.f32 %v2809_v27, %v2857_v43 }
 0x114   :  { %v13500_v54 = vpop.eup %13499  ;;  %v1864_v55 = vadd.f32 1.0, %v13498_v48  ;;  %13519 = vpow2.f32 %v1604_v40  ;;  %v1610_v56 = vmul.f32 1.442695, %v1441_v45  ;;  %v833_v57 = vadd.f32 %v11963_v52, %v14641_v51  ;;  %v827_v58 = vpop.f32.mrb[27].mxu0  ;;  %12121 = vmatmul.mubr.msk.f32.gmra.mrb[132].mxu0 %vm194_vm1, %v172_v42  ;;  %2952 = vst.msk [vmem:[#allocation3] sm:$0xff] %vm2280_vm5, %v2904_v47  ;;  %v179_v45 = vld [vmem:[%s16707_s0 + $0x460] sm:$0xff] }
 0x115   :  { %v13502_v59 = vpop.eup %13501  ;;  %2291 = vst.msk [vmem:[#allocation2 + $0x50] sm:$0xff] %vm2280_vm5, %v13500_v54  ;;  %13521 = vrcp.f32 %v1865_v49  ;;  %v1608_v60 = vmul.f32 1.442695, %v1440_v50  ;;  %v828_v61 = vadd.f32 %v14641_v51, %v827_v58  ;;  %12123 = vmatprep.mubr.msk.f32.mxu0 %vm194_vm1, %v173_v46  ;;  %v14814_v2 = vld [vmem:[#allocation2 + $0x30] ss:$2 sm:$0xff] }
 0x116   :  { %2954 = vst.msk [vmem:[#allocation3 + $0x8] sm:$0xf] %vm2953_vm6, %v2905_v53  ;;  %v13504_v63 = vpop.eup %13503  ;;  %13523 = vrcp.f32 %v1864_v55  ;;  %v1443_v0 = vsub.f32 0.0, %v833_v57  ;;  %v14819_v8 = vld [vmem:[#allocation2 + $0x31] ss:$2 sm:$0xff] }
 0x117   :  { %2294 = vst.msk [vmem:[#allocation2 + $0x68] sm:$0xff] %vm2280_vm5, %v13502_v59  ;;  %v13506_v3 = vpop.eup %13505  ;;  %v1867_v4 = vadd.f32 1.0, %v13504_v63  ;;  %13525 = vpow2.f32 %v1610_v56  ;;  %v1442_v5 = vsub.f32 0.0, %v828_v61  ;;  %v11966_v6 = vpop.f32.mrb[28].mxu0  ;;  %v2810_v29 = vmax.f32 %v14814_v2, %v14819_v8 }
 0x118   :  { %v13508_v9 = vpop.eup %13507  ;;  %2293 = vst.msk [vmem:[#allocation2 + $0x60] sm:$0xff] %vm2280_vm5, %v13506_v3  ;;  %13527 = vpow2.f32 %v1608_v60  ;;  %v1614_v10 = vmul.f32 1.442695, %v1443_v0  ;;  %v843_v11 = vadd.f32 %v11966_v6, %v14641_v51  ;;  %v837_v12 = vpop.f32.mrb[29].mxu0  ;;  %12124 = vmatmul.mubr.msk.f32.gmra.mrb[134].mxu0 %vm194_vm1, %v174_v62  ;;  %v180_v60 = vld [vmem:[%s16707_s0 + $0x468] sm:$0xff] }
 0x119   :  { %v2431_v13 = vld [vmem:[#allocation2 + $0x40] ss:$2 sm:$0xf]  ;;  %v13510_v14 = vpop.eup %13509  ;;  %13529 = vrcp.f32 %v1867_v4  ;;  %v1866_v15 = vadd.f32 1.0, %v13508_v9  ;;  %v1612_v16 = vmul.f32 1.442695, %v1442_v5  ;;  %v838_v17 = vadd.f32 %v14641_v51, %v837_v12  ;;  %12126 = vmatprep.mubr.msk.f32.mxu0 %vm194_vm1, %v175_v1 }
 0x11a   :  { %v2527_v18 = vld [vmem:[#allocation2 + $0x41] ss:$2 sm:$0xf]  ;;  %v13512_v19 = vpop.eup %13511  ;;  %v1869_v20 = vadd.f32 1.0, %v13510_v14  ;;  %13531 = vpow2.f32 %v1614_v10  ;;  %v1445_v21 = vsub.f32 0.0, %v843_v11  ;;  %v181_v1 = vld [vmem:[%s16707_s0 + $0x470] sm:$0xff] }
 0x11b   :  { %v2623_v23 = vld [vmem:[#allocation2 + $0x58] ss:$2 sm:$0xf]  ;;  %v13514_v24 = vpop.eup %13513  ;;  %13533 = vrcp.f32 %v1866_v15  ;;  %v1868_v25 = vadd.f32 1.0, %v13512_v19  ;;  %v1444_v26 = vsub.f32 0.0, %v838_v17  ;;  %v11969_v27 = vpop.f32.mrb[30].mxu0  ;;  %v2811_v41 = vmax.f32 %v2431_v13, %v2527_v18 }
 0x11c   :  { %v2719_v28 = vld [vmem:[#allocation2 + $0x59] ss:$2 sm:$0xf]  ;;  %v13516_v30 = vpop.eup %13515  ;;  %2296 = vst.msk [vmem:[#allocation2 + $0x78] sm:$0xff] %vm2280_vm5, %v13514_v24  ;;  %13535 = vrcp.f32 %v1869_v20  ;;  %v1618_v31 = vmul.f32 1.442695, %v1445_v21  ;;  %v853_v32 = vadd.f32 %v11969_v27, %v14641_v51  ;;  %12127 = vmatmul.mubr.msk.f32.gmra.mrb[136].mxu0 %vm194_vm1, %v176_v7 }
 0x11d   :  { %v847_v33 = vpop.f32.mrb[31].mxu0  ;;  %v2621_v34 = vld [vmem:[#allocation2 + $0x48] ss:$2 sm:$0xff]  ;;  %v2859_v35 = vmax.f32 %v2623_v23, %v2719_v28  ;;  %v13518_v36 = vpop.eup %13517  ;;  %2295 = vst.msk [vmem:[#allocation2 + $0x70] sm:$0xff] %vm2280_vm5, %v13516_v30  ;;  %13537 = vrcp.f32 %v1868_v25  ;;  %v1616_v37 = vmul.f32 1.442695, %v1444_v26  ;;  %12129 = vmatprep.mubr.msk.f32.mxu0 %vm194_vm1, %v177_v22 }
 0x11e   :  { %v848_v38 = vadd.f32 %v14641_v51, %v847_v33  ;;  %v2717_v40 = vld [vmem:[#allocation2 + $0x49] ss:$2 sm:$0xff]  ;;  %v13520_v42 = vpop.eup %13519  ;;  %v1871_v43 = vadd.f32 1.0, %v13518_v36  ;;  %13539 = vpow2.f32 %v1612_v16  ;;  %v1447_v44 = vsub.f32 0.0, %v853_v32  ;;  %v182_v15 = vld [vmem:[%s16707_s0 + $0x478] sm:$0xff] }
 0x11f   :  { %v2858_v46 = vmax.f32 %v2621_v34, %v2717_v40  ;;  %v13522_v47 = vpop.eup %13521  ;;  %v1870_v48 = vadd.f32 1.0, %v13520_v42  ;;  %13541 = vpow2.f32 %v1618_v31  ;;  %v11972_v50 = vpop.f32.mrb[32].mxu0  ;;  %v2907_v52 = vmax.f32 %v2811_v41, %v2859_v35  ;;  %v2433_v10 = vld [vmem:[#allocation2 + $0x60] ss:$2 sm:$0xff]  ;;  %v2529_v16 = vld [vmem:[#allocation2 + $0x61] ss:$2 sm:$0xff] }
 0x120   :  { %v1446_v49 = vsub.f32 0.0, %v848_v38  ;;  %v13524_v53 = vpop.eup %13523  ;;  %2298 = vst.msk [vmem:[#allocation2 + $0x88] sm:$0xff] %vm2280_vm5, %v13522_v47  ;;  %13543 = vrcp.f32 %v1871_v43  ;;  %v1622_v54 = vmul.f32 1.442695, %v1447_v44  ;;  %v863_v55 = vadd.f32 %v11972_v50, %v14641_v51  ;;  %v857_v56 = vpop.f32.mrb[33].mxu0  ;;  %12130 = vmatmul.mubr.msk.f32.gmra.mrb[138].mxu0 %vm194_vm1, %v178_v39 }
 0x121   :  { %v2906_v57 = vmax.f32 %v2810_v29, %v2858_v46  ;;  %v13526_v58 = vpop.eup %13525  ;;  %2297 = vst.msk [vmem:[#allocation2 + $0x80] sm:$0xff] %vm2280_vm5, %v13524_v53  ;;  %13545 = vrcp.f32 %v1870_v48  ;;  %v858_v59 = vadd.f32 %v14641_v51, %v857_v56  ;;  %12132 = vmatprep.mubr.msk.f32.mxu0 %vm194_vm1, %v179_v45  ;;  %v3018_v29 = vld [vmem:[#allocation3 + $0x1] sm:$0xff]  ;;  %v2812_v31 = vmax.f32 %v2433_v10, %v2529_v16 }
 0x122   :  { %2956 = vst.msk [vmem:[#allocation3 + $0x18] sm:$0xf] %vm2953_vm6, %v2907_v52  ;;  %v13528_v61 = vpop.eup %13527  ;;  %v1873_v62 = vadd.f32 1.0, %v13526_v58  ;;  %13547 = vpow2.f32 %v1616_v37  ;;  %v1620_v63 = vmul.f32 1.442695, %v1446_v49  ;;  %v1449_v0 = vsub.f32 0.0, %v863_v55 }
 0x123   :  { %2955 = vst.msk [vmem:[#allocation3 + $0x10] sm:$0xff] %vm2280_vm5, %v2906_v57  ;;  %v13530_v2 = vpop.eup %13529  ;;  %v1872_v3 = vadd.f32 1.0, %v13528_v61  ;;  %13549 = vpow2.f32 %v1622_v54  ;;  %v1448_v4 = vsub.f32 0.0, %v858_v59  ;;  %v11975_v5 = vpop.f32.mrb[34].mxu0 }
 0x124   :  { %v13532_v6 = vpop.eup %13531  ;;  %2300 = vst.msk [vmem:[#allocation2 + $0x98] sm:$0xff] %vm2280_vm5, %v13530_v2  ;;  %13551 = vrcp.f32 %v1873_v62  ;;  %v1626_v7 = vmul.f32 1.442695, %v1449_v0  ;;  %v873_v8 = vadd.f32 %v11975_v5, %v14641_v51  ;;  %v867_v9 = vpop.f32.mrb[35].mxu0  ;;  %12133 = vmatmul.mubr.msk.f32.gmra.mrb[140].mxu0 %vm194_vm1, %v180_v60 }
 0x125   :  { %v13534_v11 = vpop.eup %13533  ;;  %13553 = vrcp.f32 %v1872_v3  ;;  %v1875_v12 = vadd.f32 1.0, %v13532_v6  ;;  %v1624_v13 = vmul.f32 1.442695, %v1448_v4  ;;  %v868_v14 = vadd.f32 %v14641_v51, %v867_v9  ;;  %12135 = vmatprep.mubr.msk.f32.mxu0 %vm194_vm1, %v181_v1  ;;  %v2435_v19 = vld [vmem:[#allocation2 + $0x70] ss:$2 sm:$0xf] }
 0x126   :  { %v13536_v17 = vpop.eup %13535  ;;  %2299 = vst.msk [vmem:[#allocation2 + $0x90] sm:$0xff] %vm2280_vm5, %v13534_v11  ;;  %13555 = vpow2.f32 %v1620_v63  ;;  %v1451_v18 = vsub.f32 0.0, %v873_v8  ;;  %v2531_v20 = vld [vmem:[#allocation2 + $0x71] ss:$2 sm:$0xf] }
 0x127   :  { %v13538_v21 = vpop.eup %13537  ;;  %2302 = vst.msk [vmem:[#allocation2 + $0xa8] sm:$0xff] %vm2280_vm5, %v13536_v17  ;;  %13557 = vrcp.f32 %v1875_v12  ;;  %v1450_v22 = vsub.f32 0.0, %v868_v14  ;;  %v11978_v23 = vpop.f32.mrb[36].mxu0  ;;  %v2627_v24 = vld [vmem:[#allocation2 + $0x88] ss:$2 sm:$0xf]  ;;  %v2813_v46 = vmax.f32 %v2435_v19, %v2531_v20 }
 0x128   :  { %v13540_v25 = vpop.eup %13539  ;;  %2301 = vst.msk [vmem:[#allocation2 + $0xa0] sm:$0xff] %vm2280_vm5, %v13538_v21  ;;  %13559 = vpow2.f32 %v1626_v7  ;;  %v1630_v26 = vmul.f32 1.442695, %v1451_v18  ;;  %v883_v27 = vadd.f32 %v11978_v23, %v14641_v51  ;;  %v877_v28 = vpop.f32.mrb[37].mxu0  ;;  %12136 = vmatmul.mubr.msk.f32.gmra.mrb[142].mxu0 %vm194_vm1, %v182_v15  ;;  %v2625_v30 = vld [vmem:[#allocation2 + $0x78] ss:$2 sm:$0xff] }
 0x129   :  { %v13542_v32 = vpop.eup %13541  ;;  %v1874_v33 = vadd.f32 1.0, %v13540_v25  ;;  %13561 = vpow2.f32 %v1624_v13  ;;  %v1628_v34 = vmul.f32 1.442695, %v1450_v22  ;;  %v878_v36 = vadd.f32 %v14641_v51, %v877_v28  ;;  %12140 = vmatprep.mubr.msk.f32.mxu0 %vm2280_vm5, %v3018_v29  ;;  %v2721_v37 = vld [vmem:[#allocation2 + $0x79] ss:$2 sm:$0xff] }
 0x12a   :  { %v4350_v35 = vld [vmem:[#allocation3 + $0x11] sm:$0xff]  ;;  %v13544_v38 = vpop.eup %13543  ;;  %v1877_v39 = vadd.f32 1.0, %v13542_v32  ;;  %13563 = vpow2.f32 %v1630_v26  ;;  %v1453_v40 = vsub.f32 0.0, %v883_v27  ;;  %v2723_v41 = vld [vmem:[#allocation2 + $0x89] ss:$2 sm:$0xf]  ;;  %v2860_v42 = vmax.f32 %v2625_v30, %v2721_v37 }
 0x12b   :  { %12296 = vmatprep.mubr.msk.f32.mxu1 %vm2280_vm5, %v4350_v35  ;;  %v13546_v43 = vpop.eup %13545  ;;  %2304 = vst.msk [vmem:[#allocation2 + $0xb8] sm:$0xff] %vm2280_vm5, %v13544_v38  ;;  %13565 = vrcp.f32 %v1874_v33  ;;  %v1452_v44 = vsub.f32 0.0, %v878_v36  ;;  %v11981_v45 = vpop.f32.mrb[38].mxu0  ;;  %v2861_v47 = vmax.f32 %v2627_v24, %v2723_v41 }
 0x12c   :  { %v13548_v48 = vpop.eup %13547  ;;  %2303 = vst.msk [vmem:[#allocation2 + $0xb0] sm:$0xff] %vm2280_vm5, %v13546_v43  ;;  %13567 = vrcp.f32 %v1877_v39  ;;  %v1634_v49 = vmul.f32 1.442695, %v1453_v40  ;;  %v893_v50 = vadd.f32 %v11981_v45, %v14641_v51  ;;  %v887_v52 = vpop.f32.mrb[39].mxu0  ;;  %12141 = vmatmul.mubr.msk.f32.vlgmr.msra.gmra.mrb[144].mxu0 %vm2280_vm5, %v4350_v35  ;;  %v2908_v53 = vmax.f32 %v2812_v31, %v2860_v42 }
 0x12d   :  { %v13550_v54 = vpop.eup %13549  ;;  %v1876_v55 = vadd.f32 1.0, %v13548_v48  ;;  %13569 = vpow2.f32 %v1628_v34  ;;  %v1632_v56 = vmul.f32 1.442695, %v1452_v44  ;;  %v888_v57 = vadd.f32 %v14641_v51, %v887_v52  ;;  %v2437_v11 = vld [vmem:[#allocation2 + $0x90] ss:$2 sm:$0xff] }
 0x12e   :  { %v13552_v58 = vpop.eup %13551  ;;  %v1879_v59 = vadd.f32 1.0, %v13550_v54  ;;  %13571 = vpow2.f32 %v1634_v49  ;;  %v1455_v60 = vsub.f32 0.0, %v893_v50  ;;  %v2909_v61 = vmax.f32 %v2813_v46, %v2861_v47  ;;  %2957 = vst.msk [vmem:[#allocation3 + $0x20] sm:$0xff] %vm2280_vm5, %v2908_v53  ;;  %v2533_v13 = vld [vmem:[#allocation2 + $0x91] ss:$2 sm:$0xff] }
 0x12f   :  { %v13554_v62 = vpop.eup %13553  ;;  %2306 = vst.msk [vmem:[#allocation2 + $0xc8] sm:$0xff] %vm2280_vm5, %v13552_v58  ;;  %13573 = vrcp.f32 %v1876_v55  ;;  %v1454_v63 = vsub.f32 0.0, %v888_v57  ;;  %v11984_v0 = vpop.f32.mrb[40].mxu0  ;;  %v2439_v12 = vld [vmem:[#allocation2 + $0xa0] ss:$2 sm:$0xf]  ;;  %v2814_v40 = vmax.f32 %v2437_v11, %v2533_v13 }
 0x130   :  { %v13556_v1 = vpop.eup %13555  ;;  %2305 = vst.msk [vmem:[#allocation2 + $0xc0] sm:$0xff] %vm2280_vm5, %v13554_v62  ;;  %13575 = vrcp.f32 %v1879_v59  ;;  %v1638_v2 = vmul.f32 1.442695, %v1455_v60  ;;  %v903_v3 = vadd.f32 %v11984_v0, %v14641_v51  ;;  %v897_v4 = vpop.f32.mrb[41].mxu0  ;;  %v14894_v44 = vld [vmem:[%s16709_s2] ss:$0 sm:$0xff] }
 0x131   :  { %2958 = vst.msk [vmem:[#allocation3 + $0x28] sm:$0xf] %vm2953_vm6, %v2909_v61  ;;  %v13558_v5 = vpop.eup %13557  ;;  %v1878_v6 = vadd.f32 1.0, %v13556_v1  ;;  %13577 = vpow2.f32 %v1632_v56  ;;  %v1636_v7 = vmul.f32 1.442695, %v1454_v63  ;;  %v898_v8 = vadd.f32 %v14641_v51, %v897_v4 }
 0x132   :  { %v13560_v9 = vpop.eup %13559  ;;  %2308 = vst.msk [vmem:[#allocation2 + $0xd8] sm:$0xff] %vm2280_vm5, %v13558_v5  ;;  %13579 = vpow2.f32 %v1638_v2  ;;  %v1457_v10 = vsub.f32 0.0, %v903_v3  ;;  %v2535_v14 = vld [vmem:[#allocation2 + $0xa1] ss:$2 sm:$0xf] }
 0x133   :  { %v2631_v15 = vld [vmem:[#allocation2 + $0xb8] ss:$2 sm:$0xf]  ;;  %v13562_v16 = vpop.eup %13561  ;;  %13581 = vrcp.f32 %v1878_v6  ;;  %v1881_v17 = vadd.f32 1.0, %v13560_v9  ;;  %v1456_v18 = vsub.f32 0.0, %v898_v8  ;;  %v11987_v19 = vpop.f32.mrb[42].mxu0  ;;  %v2815_v41 = vmax.f32 %v2439_v12, %v2535_v14 }
 0x134   :  { %v2629_v20 = vld [vmem:[#allocation2 + $0xa8] ss:$2 sm:$0xff]  ;;  %v13564_v21 = vpop.eup %13563  ;;  %v1880_v22 = vadd.f32 1.0, %v13562_v16  ;;  %13583 = vpow2.f32 %v1636_v7  ;;  %v1642_v23 = vmul.f32 1.442695, %v1457_v10  ;;  %v913_v24 = vadd.f32 %v11987_v19, %v14641_v51  ;;  %v907_v25 = vpop.f32.mrb[43].mxu0 }
 0x135   :  { %v2725_v26 = vld [vmem:[#allocation2 + $0xa9] ss:$2 sm:$0xff]  ;;  %v13566_v27 = vpop.eup %13565  ;;  %13585 = vrcp.f32 %v1881_v17  ;;  %v1883_v28 = vadd.f32 1.0, %v13564_v21  ;;  %v1640_v29 = vmul.f32 1.442695, %v1456_v18  ;;  %v908_v30 = vadd.f32 %v14641_v51, %v907_v25 }
 0x136   :  { %v2727_v31 = vld [vmem:[#allocation2 + $0xb9] ss:$2 sm:$0xf]  ;;  %v13568_v32 = vpop.eup %13567  ;;  %2307 = vst.msk [vmem:[#allocation2 + $0xd0] sm:$0xff] %vm2280_vm5, %v13566_v27  ;;  %13587 = vrcp.f32 %v1880_v22  ;;  %v1459_v33 = vsub.f32 0.0, %v913_v24  ;;  %v2862_v34 = vmax.f32 %v2629_v20, %v2725_v26 }
 0x137   :  { %v2863_v35 = vmax.f32 %v2631_v15, %v2727_v31  ;;  %v13570_v36 = vpop.eup %13569  ;;  %2310 = vst.msk [vmem:[#allocation2 + $0xe8] sm:$0xff] %vm2280_vm5, %v13568_v32  ;;  %13589 = vrcp.f32 %v1883_v28  ;;  %v1458_v38 = vsub.f32 0.0, %v908_v30  ;;  %v11990_v39 = vpop.f32.mrb[44].mxu0  ;;  %v2441_v3 = vld [vmem:[#allocation2 + $0xc0] ss:$2 sm:$0xff] }
 0x138   :  { %v3020_v37 = vld [vmem:[#allocation3 + $0x21] sm:$0xff]  ;;  %v13572_v42 = vpop.eup %13571  ;;  %v1882_v43 = vadd.f32 1.0, %v13570_v36  ;;  %13591 = vpow2.f32 %v1642_v23  ;;  %v1646_v51 = vmul.f32 1.442695, %v1459_v33  ;;  %v923_v45 = vadd.f32 %v14894_v44, %v11990_v39  ;;  %v917_v46 = vpop.f32.mrb[45].mxu0 }
 0x139   :  { %12143 = vmatprep.mubr.msk.f32.mxu0 %vm2280_vm5, %v3020_v37  ;;  %12297 = vmatmul.mubr.msk.f32.vlgmr.msra.gmra.mrb[0].mxu1 %vm2280_vm5, %v3020_v37  ;;  %v13574_v47 = vpop.eup %13573  ;;  %v1885_v48 = vadd.f32 1.0, %v13572_v42  ;;  %13593 = vpow2.f32 %v1640_v29  ;;  %v1644_v49 = vmul.f32 1.442695, %v1458_v38  ;;  %v918_v50 = vadd.f32 %v14894_v44, %v917_v46  ;;  %v2537_v5 = vld [vmem:[#allocation2 + $0xc1] ss:$2 sm:$0xff] }
 0x13a   :  { %v13576_v52 = vpop.eup %13575  ;;  %2309 = vst.msk [vmem:[#allocation2 + $0xe0] sm:$0xff] %vm2280_vm5, %v13574_v47  ;;  %13595 = vrcp.f32 %v1882_v43  ;;  %v1461_v53 = vsub.f32 0.0, %v923_v45  ;;  %v2910_v54 = vmax.f32 %v2814_v40, %v2862_v34  ;;  %v2911_v55 = vmax.f32 %v2815_v41, %v2863_v35 }
 0x13b   :  { %v13578_v56 = vpop.eup %13577  ;;  %2312 = vst.msk [vmem:[#allocation2 + $0xf8] sm:$0xff] %vm2280_vm5, %v13576_v52  ;;  %13597 = vrcp.f32 %v1885_v48  ;;  %v1460_v57 = vsub.f32 0.0, %v918_v50  ;;  %v11993_v58 = vpop.f32.mrb[46].mxu0  ;;  %v2816_v29 = vmax.f32 %v2441_v3, %v2537_v5 }
 0x13c   :  { %v13580_v59 = vpop.eup %13579  ;;  %v1884_v60 = vadd.f32 1.0, %v13578_v56  ;;  %13599 = vpow2.f32 %v1646_v51  ;;  %v1650_v61 = vmul.f32 1.442695, %v1461_v53  ;;  %v933_v62 = vadd.f32 %v14894_v44, %v11993_v58  ;;  %v927_v63 = vpop.f32.mrb[47].mxu0  ;;  %2959 = vst.msk [vmem:[#allocation3 + $0x30] sm:$0xff] %vm2280_vm5, %v2910_v54 }
 0x13d   :  { %2960 = vst.msk [vmem:[#allocation3 + $0x38] sm:$0xf] %vm2953_vm6, %v2911_v55  ;;  %v13582_v0 = vpop.eup %13581  ;;  %v1887_v1 = vadd.f32 1.0, %v13580_v59  ;;  %13601 = vpow2.f32 %v1644_v49  ;;  %v928_v2 = vadd.f32 %v14894_v44, %v927_v63  ;;  %v2443_v4 = vld [vmem:[#allocation2 + $0xd0] ss:$2 sm:$0xf] }
 0x13e   :  { %v13584_v6 = vpop.eup %13583  ;;  %2311 = vst.msk [vmem:[#allocation2 + $0xf0] sm:$0xff] %vm2280_vm5, %v13582_v0  ;;  %13603 = vrcp.f32 %v1884_v60  ;;  %v1648_v7 = vmul.f32 1.442695, %v1460_v57  ;;  %v1463_v8 = vsub.f32 0.0, %v933_v62 }
 0x13f   :  { %v2539_v9 = vld [vmem:[#allocation2 + $0xd1] ss:$2 sm:$0xf]  ;;  %v13586_v10 = vpop.eup %13585  ;;  %13605 = vrcp.f32 %v1887_v1  ;;  %v1886_v11 = vadd.f32 1.0, %v13584_v6  ;;  %v1462_v12 = vsub.f32 0.0, %v928_v2  ;;  %v11996_v13 = vpop.f32.mrb[48].mxu0 }
 0x140   :  { %v2635_v14 = vld [vmem:[#allocation2 + $0xe8] ss:$2 sm:$0xf]  ;;  %v13588_v15 = vpop.eup %13587  ;;  %2314 = vst.msk [vmem:[#allocation2 + $0x108] sm:$0xff] %vm2280_vm5, %v13586_v10  ;;  %13607 = vpow2.f32 %v1650_v61  ;;  %v1654_v16 = vmul.f32 1.442695, %v1463_v8  ;;  %v943_v17 = vadd.f32 %v14894_v44, %v11996_v13  ;;  %v2817_v20 = vmax.f32 %v2443_v4, %v2539_v9 }
 0x141   :  { %v937_v18 = vpop.f32.mrb[49].mxu0  ;;  %v2731_v19 = vld [vmem:[#allocation2 + $0xe9] ss:$2 sm:$0xf]  ;;  %v13590_v21 = vpop.eup %13589  ;;  %2313 = vst.msk [vmem:[#allocation2 + $0x100] sm:$0xff] %vm2280_vm5, %v13588_v15  ;;  %13609 = vrcp.f32 %v1886_v11 }
 0x142   :  { %v1652_v22 = vmul.f32 1.442695, %v1462_v12  ;;  %v938_v23 = vadd.f32 %v14894_v44, %v937_v18  ;;  %v2633_v24 = vld [vmem:[#allocation2 + $0xd8] ss:$2 sm:$0xff]  ;;  %v2729_v25 = vld [vmem:[#allocation2 + $0xd9] ss:$2 sm:$0xff]  ;;  %v2865_v26 = vmax.f32 %v2635_v14, %v2731_v19  ;;  %v13592_v27 = vpop.eup %13591  ;;  %13611 = vpow2.f32 %v1648_v7 }
 0x143   :  { %2316 = vst.msk [vmem:[#allocation2 + $0x118] sm:$0xff] %vm2280_vm5, %v13590_v21  ;;  %v1465_v28 = vsub.f32 0.0, %v943_v17  ;;  %v2864_v30 = vmax.f32 %v2633_v24, %v2729_v25  ;;  %v13594_v31 = vpop.eup %13593  ;;  %v1889_v32 = vadd.f32 1.0, %v13592_v27  ;;  %13613 = vpow2.f32 %v1654_v16  ;;  %v11999_v35 = vpop.f32.mrb[50].mxu0 }
 0x144   :  { %v3021_v33 = vld [vmem:[#allocation3 + $0x31] sm:$0xff]  ;;  %v1464_v34 = vsub.f32 0.0, %v938_v23  ;;  %v2913_v36 = vmax.f32 %v2817_v20, %v2865_v26  ;;  %v13596_v37 = vpop.eup %13595  ;;  %v1888_v38 = vadd.f32 1.0, %v13594_v31  ;;  %13615 = vpow2.f32 %v1652_v22  ;;  %v947_v41 = vpop.f32.mrb[51].mxu0 }
 0x145   :  { %v1658_v39 = vmul.f32 1.442695, %v1465_v28  ;;  %12144 = vmatmul.mubr.msk.f32.gmra.mrb[146].mxu0 %vm2280_vm5, %v3021_v33  ;;  %12299 = vmatprep.mubr.msk.f32.mxu1 %vm2280_vm5, %v3021_v33  ;;  %v953_v40 = vadd.f32 %v14894_v44, %v11999_v35  ;;  %v13598_v42 = vpop.eup %13597  ;;  %2315 = vst.msk [vmem:[#allocation2 + $0x110] sm:$0xff] %vm2280_vm5, %v13596_v37  ;;  %13617 = vrcp.f32 %v1889_v32  ;;  %v948_v51 = vadd.f32 %v14894_v44, %v947_v41  ;;  %v2445_v53 = vld [vmem:[#allocation2 + $0xf0] ss:$2 sm:$0xff] }
 0x146   :  { %v1656_v43 = vmul.f32 1.442695, %v1464_v34  ;;  %v2912_v45 = vmax.f32 %v2816_v29, %v2864_v30  ;;  %2962 = vst.msk [vmem:[#allocation3 + $0x48] sm:$0xf] %vm2953_vm6, %v2913_v36  ;;  %v13600_v46 = vpop.eup %13599  ;;  %13619 = vrcp.f32 %v1888_v38  ;;  %v2541_v59 = vld [vmem:[#allocation2 + $0xf1] ss:$2 sm:$0xff] }
 0x147   :  { %2318 = vst.msk [vmem:[#allocation2 + $0x128] sm:$0xff] %vm2280_vm5, %v13598_v42  ;;  %v1467_v47 = vsub.f32 0.0, %v953_v40  ;;  %v13602_v48 = vpop.eup %13601  ;;  %v1891_v49 = vadd.f32 1.0, %v13600_v46  ;;  %13621 = vpow2.f32 %v1658_v39  ;;  %v1466_v50 = vsub.f32 0.0, %v948_v51  ;;  %v12002_v52 = vpop.f32.mrb[52].mxu0 }
 0x148   :  { %2961 = vst.msk [vmem:[#allocation3 + $0x40] sm:$0xff] %vm2280_vm5, %v2912_v45  ;;  %v13604_v54 = vpop.eup %13603  ;;  %v1890_v55 = vadd.f32 1.0, %v13602_v48  ;;  %13623 = vpow2.f32 %v1656_v43  ;;  %v963_v57 = vadd.f32 %v14894_v44, %v12002_v52  ;;  %v957_v58 = vpop.f32.mrb[53].mxu0  ;;  %v2447_v63 = vld [vmem:[#allocation2 + $0x100] ss:$2 sm:$0xf]  ;;  %v2818_v8 = vmax.f32 %v2445_v53, %v2541_v59 }
 0x149   :  { %v1662_v56 = vmul.f32 1.442695, %v1467_v47  ;;  %v13606_v60 = vpop.eup %13605  ;;  %2317 = vst.msk [vmem:[#allocation2 + $0x120] sm:$0xff] %vm2280_vm5, %v13604_v54  ;;  %13625 = vrcp.f32 %v1891_v49  ;;  %v1660_v61 = vmul.f32 1.442695, %v1466_v50  ;;  %v958_v62 = vadd.f32 %v14894_v44, %v957_v58 }
 0x14a   :  { %v13608_v0 = vpop.eup %13607  ;;  %2320 = vst.msk [vmem:[#allocation2 + $0x138] sm:$0xff] %vm2280_vm5, %v13606_v60  ;;  %13627 = vrcp.f32 %v1890_v55  ;;  %v1469_v1 = vsub.f32 0.0, %v963_v57  ;;  %v2543_v2 = vld [vmem:[#allocation2 + $0x101] ss:$2 sm:$0xf] }
 0x14b   :  { %v13610_v3 = vpop.eup %13609  ;;  %v1893_v4 = vadd.f32 1.0, %v13608_v0  ;;  %13629 = vpow2.f32 %v1662_v56  ;;  %v1468_v5 = vsub.f32 0.0, %v958_v62  ;;  %v12005_v6 = vpop.f32.mrb[54].mxu0  ;;  %v2639_v7 = vld [vmem:[#allocation2 + $0x118] ss:$2 sm:$0xf]  ;;  %v2819_v14 = vmax.f32 %v2447_v63, %v2543_v2 }
 0x14c   :  { %v13612_v9 = vpop.eup %13611  ;;  %2319 = vst.msk [vmem:[#allocation2 + $0x130] sm:$0xff] %vm2280_vm5, %v13610_v3  ;;  %13631 = vpow2.f32 %v1660_v61  ;;  %v1666_v10 = vmul.f32 1.442695, %v1469_v1  ;;  %v973_v11 = vadd.f32 %v14894_v44, %v12005_v6  ;;  %v967_v12 = vpop.f32.mrb[55].mxu0  ;;  %v2637_v13 = vld [vmem:[#allocation2 + $0x108] ss:$2 sm:$0xff] }
 0x14d   :  { %v13614_v15 = vpop.eup %13613  ;;  %13633 = vrcp.f32 %v1893_v4  ;;  %v1892_v16 = vadd.f32 1.0, %v13612_v9  ;;  %v1664_v17 = vmul.f32 1.442695, %v1468_v5  ;;  %v968_v18 = vadd.f32 %v14894_v44, %v967_v12  ;;  %v2733_v19 = vld [vmem:[#allocation2 + $0x109] ss:$2 sm:$0xff] }
 0x14e   :  { %v13616_v20 = vpop.eup %13615  ;;  %v1895_v21 = vadd.f32 1.0, %v13614_v15  ;;  %13635 = vpow2.f32 %v1666_v10  ;;  %v1471_v22 = vsub.f32 0.0, %v973_v11  ;;  %v2735_v24 = vld [vmem:[#allocation2 + $0x119] ss:$2 sm:$0xf]  ;;  %v2866_v25 = vmax.f32 %v2637_v13, %v2733_v19 }
 0x14f   :  { %v3022_v23 = vld [vmem:[#allocation3 + $0x41] sm:$0xff]  ;;  %v13618_v26 = vpop.eup %13617  ;;  %13637 = vrcp.f32 %v1892_v16  ;;  %v1894_v27 = vadd.f32 1.0, %v13616_v20  ;;  %v1470_v28 = vsub.f32 0.0, %v968_v18  ;;  %v12008_v29 = vpop.f32.mrb[56].mxu0  ;;  %v2867_v30 = vmax.f32 %v2639_v7, %v2735_v24 }
 0x150   :  { %12146 = vmatprep.mubr.msk.f32.mxu0 %vm2280_vm5, %v3022_v23  ;;  %12300 = vmatmul.mubr.msk.f32.gmra.mrb[2].mxu1 %vm2280_vm5, %v3022_v23  ;;  %v13620_v31 = vpop.eup %13619  ;;  %2322 = vst.msk [vmem:[#allocation2 + $0x148] sm:$0xff] %vm2280_vm5, %v13618_v26  ;;  %13639 = vrcp.f32 %v1895_v21  ;;  %v1670_v32 = vmul.f32 1.442695, %v1471_v22  ;;  %v983_v33 = vadd.f32 %v14894_v44, %v12008_v29  ;;  %v977_v34 = vpop.f32.mrb[57].mxu0  ;;  %v2914_v35 = vmax.f32 %v2818_v8, %v2866_v25  ;;  %v2449_v54 = vld [vmem:[#allocation2 + $0x120] ss:$2 sm:$0xff] }
 0x151   :  { %v13622_v36 = vpop.eup %13621  ;;  %2321 = vst.msk [vmem:[#allocation2 + $0x140] sm:$0xff] %vm2280_vm5, %v13620_v31  ;;  %13641 = vrcp.f32 %v1894_v27  ;;  %v978_v37 = vadd.f32 %v14894_v44, %v977_v34  ;;  %v2915_v38 = vmax.f32 %v2819_v14, %v2867_v30  ;;  %v1668_v41 = vmul.f32 1.442695, %v1470_v28  ;;  %v2545_v60 = vld [vmem:[#allocation2 + $0x121] ss:$2 sm:$0xff] }
 0x152   :  { %v13624_v39 = vpop.eup %13623  ;;  %v1897_v40 = vadd.f32 1.0, %v13622_v36  ;;  %13643 = vpow2.f32 %v1664_v17  ;;  %v1473_v42 = vsub.f32 0.0, %v983_v33  ;;  %2963 = vst.msk [vmem:[#allocation3 + $0x50] sm:$0xff] %vm2280_vm5, %v2914_v35  ;;  %v2820_v17 = vmax.f32 %v2449_v54, %v2545_v60 }
 0x153   :  { %v13626_v43 = vpop.eup %13625  ;;  %v1896_v51 = vadd.f32 1.0, %v13624_v39  ;;  %13645 = vpow2.f32 %v1670_v32  ;;  %v1472_v45 = vsub.f32 0.0, %v978_v37  ;;  %v12011_v46 = vpop.f32.mrb[58].mxu0  ;;  %2964 = vst.msk [vmem:[#allocation3 + $0x58] sm:$0xf] %vm2953_vm6, %v2915_v38 }
 0x154   :  { %v13628_v47 = vpop.eup %13627  ;;  %2324 = vst.msk [vmem:[#allocation2 + $0x158] sm:$0xff] %vm2280_vm5, %v13626_v43  ;;  %13647 = vrcp.f32 %v1897_v40  ;;  %v1674_v48 = vmul.f32 1.442695, %v1473_v42  ;;  %v993_v49 = vadd.f32 %v14894_v44, %v12011_v46  ;;  %v987_v50 = vpop.f32.mrb[59].mxu0 }
 0x155   :  { %v13630_v52 = vpop.eup %13629  ;;  %2323 = vst.msk [vmem:[#allocation2 + $0x150] sm:$0xff] %vm2280_vm5, %v13628_v47  ;;  %13649 = vrcp.f32 %v1896_v51  ;;  %v988_v53 = vadd.f32 %v14894_v44, %v987_v50  ;;  %v1672_v57 = vmul.f32 1.442695, %v1472_v45  ;;  %v2451_v59 = vld [vmem:[#allocation2 + $0x130] ss:$2 sm:$0xf] }
 0x156   :  { %v13632_v55 = vpop.eup %13631  ;;  %v1899_v56 = vadd.f32 1.0, %v13630_v52  ;;  %13651 = vpow2.f32 %v1668_v41  ;;  %v1475_v58 = vsub.f32 0.0, %v993_v49  ;;  %v2547_v61 = vld [vmem:[#allocation2 + $0x131] ss:$2 sm:$0xf] }
 0x157   :  { %v13634_v62 = vpop.eup %13633  ;;  %v1898_v63 = vadd.f32 1.0, %v13632_v55  ;;  %13653 = vpow2.f32 %v1674_v48  ;;  %v1474_v0 = vsub.f32 0.0, %v988_v53  ;;  %v12014_v1 = vpop.f32.mrb[60].mxu0  ;;  %v2643_v2 = vld [vmem:[#allocation2 + $0x148] ss:$2 sm:$0xf]  ;;  %v2821_v22 = vmax.f32 %v2451_v59, %v2547_v61 }
 0x158   :  { %v13636_v3 = vpop.eup %13635  ;;  %2326 = vst.msk [vmem:[#allocation2 + $0x168] sm:$0xff] %vm2280_vm5, %v13634_v62  ;;  %13655 = vrcp.f32 %v1899_v56  ;;  %v1678_v4 = vmul.f32 1.442695, %v1475_v58  ;;  %v1003_v5 = vadd.f32 %v14894_v44, %v12014_v1  ;;  %v997_v6 = vpop.f32.mrb[61].mxu0  ;;  %v2641_v7 = vld [vmem:[#allocation2 + $0x138] ss:$2 sm:$0xff] }
 0x159   :  { %v13638_v8 = vpop.eup %13637  ;;  %13657 = vrcp.f32 %v1898_v63  ;;  %v1901_v9 = vadd.f32 1.0, %v13636_v3  ;;  %v1676_v10 = vmul.f32 1.442695, %v1474_v0  ;;  %v998_v11 = vadd.f32 %v14894_v44, %v997_v6  ;;  %v2737_v12 = vld [vmem:[#allocation2 + $0x139] ss:$2 sm:$0xff] }
 0x15a   :  { %v13640_v13 = vpop.eup %13639  ;;  %2325 = vst.msk [vmem:[#allocation2 + $0x160] sm:$0xff] %vm2280_vm5, %v13638_v8  ;;  %13659 = vpow2.f32 %v1672_v57  ;;  %v1477_v14 = vsub.f32 0.0, %v1003_v5  ;;  %v3023_v15 = vld [vmem:[#allocation3 + $0x51] sm:$0xff]  ;;  %v2739_v16 = vld [vmem:[#allocation2 + $0x149] ss:$2 sm:$0xf]  ;;  %v2868_v18 = vmax.f32 %v2641_v7, %v2737_v12 }
 0x15b   :  { %v13642_v19 = vpop.eup %13641  ;;  %2328 = vst.msk [vmem:[#allocation2 + $0x178] sm:$0xff] %vm2280_vm5, %v13640_v13  ;;  %13661 = vrcp.f32 %v1901_v9  ;;  %12147 = vmatmul.mubr.msk.f32.gmra.mrb[148].mxu0 %vm2280_vm5, %v3023_v15  ;;  %12302 = vmatprep.mubr.msk.f32.mxu1 %vm2280_vm5, %v3023_v15  ;;  %v1476_v20 = vsub.f32 0.0, %v998_v11  ;;  %v12017_v21 = vpop.f32.mrb[62].mxu0  ;;  %v2869_v23 = vmax.f32 %v2643_v2, %v2739_v16 }
 0x15c   :  { %v13644_v24 = vpop.eup %13643  ;;  %2327 = vst.msk [vmem:[#allocation2 + $0x170] sm:$0xff] %vm2280_vm5, %v13642_v19  ;;  %13663 = vpow2.f32 %v1678_v4  ;;  %v1682_v25 = vmul.f32 1.442695, %v1477_v14  ;;  %v1013_v26 = vadd.f32 %v14894_v44, %v12017_v21  ;;  %v1007_v27 = vpop.f32.mrb[63].mxu0  ;;  %v2916_v28 = vmax.f32 %v2820_v17, %v2868_v18  ;;  %v2453_v40 = vld [vmem:[#allocation2 + $0x150] ss:$2 sm:$0xff] }
 0x15d   :  { %v13646_v29 = vpop.eup %13645  ;;  %v1900_v30 = vadd.f32 1.0, %v13644_v24  ;;  %13665 = vpow2.f32 %v1676_v10  ;;  %v1680_v31 = vmul.f32 1.442695, %v1476_v20  ;;  %v1008_v32 = vadd.f32 %v14894_v44, %v1007_v27  ;;  %v2549_v45 = vld [vmem:[#allocation2 + $0x151] ss:$2 sm:$0xff] }
 0x15e   :  { %v13648_v33 = vpop.eup %13647  ;;  %v1903_v34 = vadd.f32 1.0, %v13646_v29  ;;  %13667 = vpow2.f32 %v1682_v25  ;;  %v1479_v35 = vsub.f32 0.0, %v1013_v26  ;;  %v2917_v36 = vmax.f32 %v2821_v22, %v2869_v23  ;;  %2965 = vst.msk [vmem:[#allocation3 + $0x60] sm:$0xff] %vm2280_vm5, %v2916_v28 }
 0x15f   :  { %v13650_v37 = vpop.eup %13649  ;;  %2330 = vst.msk [vmem:[#allocation2 + $0x188] sm:$0xff] %vm2280_vm5, %v13648_v33  ;;  %13669 = vrcp.f32 %v1900_v30  ;;  %v1478_v38 = vsub.f32 0.0, %v1008_v32  ;;  %v12020_v39 = vpop.f32.mrb[64].mxu0  ;;  %v2822_v61 = vmax.f32 %v2453_v40, %v2549_v45 }
 0x160   :  { %v13652_v41 = vpop.eup %13651  ;;  %2329 = vst.msk [vmem:[#allocation2 + $0x180] sm:$0xff] %vm2280_vm5, %v13650_v37  ;;  %13671 = vrcp.f32 %v1903_v34  ;;  %v1686_v42 = vmul.f32 1.442695, %v1479_v35  ;;  %v1023_v43 = vadd.f32 %v14894_v44, %v12020_v39  ;;  %v1017_v51 = vpop.f32.mrb[65].mxu0 }
 0x161   :  { %2966 = vst.msk [vmem:[#allocation3 + $0x68] sm:$0xf] %vm2953_vm6, %v2917_v36  ;;  %v13654_v46 = vpop.eup %13653  ;;  %v1902_v47 = vadd.f32 1.0, %v13652_v41  ;;  %13673 = vpow2.f32 %v1680_v31  ;;  %v1684_v48 = vmul.f32 1.442695, %v1478_v38  ;;  %v1018_v49 = vadd.f32 %v14894_v44, %v1017_v51 }
 0x162   :  { %v13656_v50 = vpop.eup %13655  ;;  %v1905_v52 = vadd.f32 1.0, %v13654_v46  ;;  %13675 = vpow2.f32 %v1686_v42  ;;  %v1481_v53 = vsub.f32 0.0, %v1023_v43  ;;  %v2455_v54 = vld [vmem:[#allocation2 + $0x160] ss:$2 sm:$0xf] }
 0x163   :  { %v2551_v55 = vld [vmem:[#allocation2 + $0x161] ss:$2 sm:$0xf]  ;;  %v13658_v56 = vpop.eup %13657  ;;  %2332 = vst.msk [vmem:[#allocation2 + $0x198] sm:$0xff] %vm2280_vm5, %v13656_v50  ;;  %13677 = vrcp.f32 %v1902_v47  ;;  %v1480_v57 = vsub.f32 0.0, %v1018_v49  ;;  %v12023_v58 = vpop.f32.mrb[66].mxu0 }
 0x164   :  { %v2645_v59 = vld [vmem:[#allocation2 + $0x168] ss:$2 sm:$0xff]  ;;  %v2741_v60 = vld [vmem:[#allocation2 + $0x169] ss:$2 sm:$0xff]  ;;  %v13660_v62 = vpop.eup %13659  ;;  %2331 = vst.msk [vmem:[#allocation2 + $0x190] sm:$0xff] %vm2280_vm5, %v13658_v56  ;;  %13679 = vrcp.f32 %v1905_v52  ;;  %v1033_v0 = vadd.f32 %v14894_v44, %v12023_v58  ;;  %v1027_v1 = vpop.f32.mrb[67].mxu0  ;;  %v2823_v18 = vmax.f32 %v2455_v54, %v2551_v55 }
 0x165   :  { %v1690_v63 = vmul.f32 1.442695, %v1481_v53  ;;  %v2647_v2 = vld [vmem:[#allocation2 + $0x178] ss:$2 sm:$0xf]  ;;  %v2870_v3 = vmax.f32 %v2645_v59, %v2741_v60  ;;  %v13662_v4 = vpop.eup %13661  ;;  %v1904_v5 = vadd.f32 1.0, %v13660_v62  ;;  %13681 = vpow2.f32 %v1684_v48 }
 0x166   :  { %v1688_v6 = vmul.f32 1.442695, %v1480_v57  ;;  %v1028_v7 = vadd.f32 %v14894_v44, %v1027_v1  ;;  %v2743_v8 = vld [vmem:[#allocation2 + $0x179] ss:$2 sm:$0xf]  ;;  %v13664_v9 = vpop.eup %13663  ;;  %2334 = vst.msk [vmem:[#allocation2 + $0x1a8] sm:$0xff] %vm2280_vm5, %v13662_v4 }
 0x167   :  { %13683 = vpow2.f32 %v1690_v63  ;;  %v1483_v10 = vsub.f32 0.0, %v1033_v0  ;;  %v2871_v11 = vmax.f32 %v2647_v2, %v2743_v8  ;;  %v2918_v12 = vmax.f32 %v2822_v61, %v2870_v3  ;;  %v13666_v13 = vpop.eup %13665  ;;  %v12026_v17 = vpop.f32.mrb[68].mxu0  ;;  %v14965_v34 = vld [vmem:[#allocation2 + $0x180] ss:$2 sm:$0xff]  ;;  %v2553_v41 = vld [vmem:[#allocation2 + $0x181] ss:$2 sm:$0xff] }
 0x168   :  { %13685 = vrcp.f32 %v1904_v5  ;;  %v1907_v14 = vadd.f32 1.0, %v13664_v9  ;;  %v3024_v15 = vld [vmem:[#allocation3 + $0x61] sm:$0xff]  ;;  %v1482_v16 = vsub.f32 0.0, %v1028_v7  ;;  %v13668_v19 = vpop.eup %13667  ;;  %v1906_v20 = vadd.f32 1.0, %v13666_v13  ;;  %v1037_v23 = vpop.f32.mrb[69].mxu0 }
 0x169   :  { %13687 = vpow2.f32 %v1688_v6  ;;  %v1694_v21 = vmul.f32 1.442695, %v1483_v10  ;;  %12149 = vmatprep.mubr.msk.f32.mxu0 %vm2280_vm5, %v3024_v15  ;;  %12303 = vmatmul.mubr.msk.f32.gmra.mrb[4].mxu1 %vm2280_vm5, %v3024_v15  ;;  %v1043_v22 = vadd.f32 %v14894_v44, %v12026_v17  ;;  %2967 = vst.msk [vmem:[#allocation3 + $0x70] sm:$0xff] %vm2280_vm5, %v2918_v12  ;;  %v13670_v24 = vpop.eup %13669  ;;  %v1909_v25 = vadd.f32 1.0, %v13668_v19 }
 0x16a   :  { %13689 = vrcp.f32 %v1907_v14  ;;  %v1692_v26 = vmul.f32 1.442695, %v1482_v16  ;;  %v1038_v27 = vadd.f32 %v14894_v44, %v1037_v23  ;;  %v13672_v28 = vpop.eup %13671  ;;  %2333 = vst.msk [vmem:[#allocation2 + $0x1a0] sm:$0xff] %vm2280_vm5, %v13670_v24  ;;  %v2919_v30 = vmax.f32 %v2823_v18, %v2871_v11 }
 0x16b   :  { %13691 = vrcp.f32 %v1906_v20  ;;  %v1485_v29 = vsub.f32 0.0, %v1043_v22  ;;  %v13674_v31 = vpop.eup %13673  ;;  %2336 = vst.msk [vmem:[#allocation2 + $0x1b8] sm:$0xff] %vm2280_vm5, %v13672_v28  ;;  %v12029_v33 = vpop.f32.mrb[70].mxu0  ;;  %v2459_v40 = vld [vmem:[#allocation2 + $0x190] ss:$2 sm:$0xf]  ;;  %v2824_v55 = vmax.f32 %v14965_v34, %v2553_v41 }
 0x16c   :  { %13693 = vrcp.f32 %v1909_v25  ;;  %v1484_v32 = vsub.f32 0.0, %v1038_v27  ;;  %v13676_v35 = vpop.eup %13675  ;;  %v1908_v36 = vadd.f32 1.0, %v13674_v31  ;;  %v1053_v38 = vadd.f32 %v14894_v44, %v12029_v33  ;;  %v1047_v39 = vpop.f32.mrb[71].mxu0  ;;  %2968 = vst.msk [vmem:[#allocation3 + $0x78] sm:$0xf] %vm2953_vm6, %v2919_v30 }
 0x16d   :  { %13695 = vpow2.f32 %v1694_v21  ;;  %v1698_v37 = vmul.f32 1.442695, %v1485_v29  ;;  %v13678_v42 = vpop.eup %13677  ;;  %v1911_v43 = vadd.f32 1.0, %v13676_v35  ;;  %v1048_v45 = vadd.f32 %v14894_v44, %v1047_v39  ;;  %v2555_v46 = vld [vmem:[#allocation2 + $0x191] ss:$2 sm:$0xf] }
 0x16e   :  { %13697 = vpow2.f32 %v1692_v26  ;;  %v1696_v51 = vmul.f32 1.442695, %v1484_v32  ;;  %v13680_v47 = vpop.eup %13679  ;;  %2335 = vst.msk [vmem:[#allocation2 + $0x1b0] sm:$0xff] %vm2280_vm5, %v13678_v42  ;;  %v1487_v48 = vsub.f32 0.0, %v1053_v38  ;;  %v2825_v1 = vmax.f32 %v2459_v40, %v2555_v46  ;;  %v10888_v33 = vld [vmem:[%s16710_s3 + $0x38] sm:$0x3f] }
 0x16f   :  { %13699 = vrcp.f32 %v1908_v36  ;;  %v2651_v49 = vld [vmem:[#allocation2 + $0x1a8] ss:$2 sm:$0xf]  ;;  %v13682_v50 = vpop.eup %13681  ;;  %2338 = vst.msk [vmem:[#allocation2 + $0x1c8] sm:$0xff] %vm2280_vm5, %v13680_v47  ;;  %v1486_v52 = vsub.f32 0.0, %v1048_v45  ;;  %v12032_v53 = vpop.f32.mrb[72].mxu0  ;;  %12320 = vmatprep.subr.msk.mxu1 %vm3084_vm4, %v10888_v33 }
 0x170   :  { %13701 = vrcp.f32 %v1911_v43  ;;  %v2747_v54 = vld [vmem:[#allocation2 + $0x1a9] ss:$2 sm:$0xf]  ;;  %v1910_v57 = vadd.f32 1.0, %v13682_v50  ;;  %v1702_v58 = vmul.f32 1.442695, %v1487_v48  ;;  %v1063_v59 = vadd.f32 %v14894_v44, %v12032_v53  ;;  %12321 = vmatpush3.msk.msra.mxu1 %vm3084_vm4, %v10888_v33 }
 0x171   :  { %v13684_v56 = vpop.eup %13683  ;;  %13703 = vpow2.f32 %v1698_v37  ;;  %v1057_v60 = vpop.f32.mrb[73].mxu0  ;;  %v2649_v0 = vld [vmem:[#allocation2 + $0x198] ss:$2 sm:$0xff]  ;;  %v1700_v3 = vmul.f32 1.442695, %v1486_v52  ;;  %v2873_v6 = vmax.f32 %v2651_v49, %v2747_v54 }
 0x172   :  { %v13686_v61 = vpop.eup %13685  ;;  %v1913_v62 = vadd.f32 1.0, %v13684_v56  ;;  %13705 = vpow2.f32 %v1696_v51  ;;  %v1058_v63 = vadd.f32 %v14894_v44, %v1057_v60  ;;  %v1489_v4 = vsub.f32 0.0, %v1063_v59  ;;  %v2745_v5 = vld [vmem:[#allocation2 + $0x199] ss:$2 sm:$0xff] }
 0x173   :  { %v13688_v2 = vpop.eup %13687  ;;  %2337 = vst.msk [vmem:[#allocation2 + $0x1c0] sm:$0xff] %vm2280_vm5, %v13686_v61  ;;  %13707 = vrcp.f32 %v1910_v57  ;;  %v3025_v9 = vld [vmem:[#allocation3 + $0x71] sm:$0xff]  ;;  %v12035_v11 = vpop.f32.mrb[74].mxu0  ;;  %v2872_v12 = vmax.f32 %v2649_v0, %v2745_v5  ;;  %v2921_v17 = vmax.f32 %v2825_v1, %v2873_v6 }
 0x174   :  { %v13690_v7 = vpop.eup %13689  ;;  %13709 = vrcp.f32 %v1913_v62  ;;  %v1912_v8 = vadd.f32 1.0, %v13688_v2  ;;  %v1488_v10 = vsub.f32 0.0, %v1058_v63  ;;  %v1706_v14 = vmul.f32 1.442695, %v1489_v4  ;;  %12150 = vmatmul.mubr.msk.f32.gmra.mrb[150].mxu0 %vm2280_vm5, %v3025_v9  ;;  %12305 = vmatprep.mubr.msk.f32.mxu1 %vm2280_vm5, %v3025_v9  ;;  %v1067_v16 = vpop.f32.mrb[75].mxu0 }
 0x175   :  { %v13692_v13 = vpop.eup %13691  ;;  %2340 = vst.msk [vmem:[#allocation2 + $0x1d8] sm:$0xff] %vm2280_vm5, %v13690_v7  ;;  %13711 = vpow2.f32 %v1702_v58  ;;  %v1073_v15 = vadd.f32 %v14894_v44, %v12035_v11  ;;  %v1068_v20 = vadd.f32 %v14894_v44, %v1067_v16  ;;  %v2920_v21 = vmax.f32 %v2824_v55, %v2872_v12  ;;  %v2461_v37 = vld [vmem:[#allocation2 + $0x1b0] ss:$2 sm:$0xff]  ;;  %v2557_v40 = vld [vmem:[#allocation2 + $0x1b1] ss:$2 sm:$0xff] }
 0x176   :  { %v13694_v18 = vpop.eup %13693  ;;  %2339 = vst.msk [vmem:[#allocation2 + $0x1d0] sm:$0xff] %vm2280_vm5, %v13692_v13  ;;  %13713 = vrcp.f32 %v1912_v8  ;;  %v1704_v19 = vmul.f32 1.442695, %v1488_v10  ;;  %v2826_v61 = vmax.f32 %v2461_v37, %v2557_v40 }
 0x177   :  { %v13696_v22 = vpop.eup %13695  ;;  %2342 = vst.msk [vmem:[#allocation2 + $0x1e8] sm:$0xff] %vm2280_vm5, %v13694_v18  ;;  %13715 = vpow2.f32 %v1700_v3  ;;  %v1491_v23 = vsub.f32 0.0, %v1073_v15  ;;  %v1490_v26 = vsub.f32 0.0, %v1068_v20  ;;  %v12038_v27 = vpop.f32.mrb[76].mxu0  ;;  %2969 = vst.msk [vmem:[#allocation3 + $0x80] sm:$0xff] %vm2280_vm5, %v2920_v21 }
 0x178   :  { %2970 = vst.msk [vmem:[#allocation3 + $0x88] sm:$0xf] %vm2953_vm6, %v2921_v17  ;;  %v13698_v24 = vpop.eup %13697  ;;  %v1915_v25 = vadd.f32 1.0, %v13696_v22  ;;  %13717 = vpow2.f32 %v1706_v14  ;;  %v1083_v31 = vadd.f32 %v14894_v44, %v12038_v27  ;;  %v1077_v32 = vpop.f32.mrb[77].mxu0  ;;  %v3017_v18 = vld [vmem:[%s16710_s3] sm:$0x3f] }
 0x179   :  { %v13700_v28 = vpop.eup %13699  ;;  %v1914_v29 = vadd.f32 1.0, %v13698_v24  ;;  %13719 = vpow2.f32 %v1704_v19  ;;  %v1710_v30 = vmul.f32 1.442695, %v1491_v23  ;;  %v1708_v35 = vmul.f32 1.442695, %v1490_v26  ;;  %12164 = vmatprep.subr.msk.mxu0 %vm3084_vm4, %v3017_v18 }
 0x17a   :  { %v13702_v34 = vpop.eup %13701  ;;  %2341 = vst.msk [vmem:[#allocation2 + $0x1e0] sm:$0xff] %vm2280_vm5, %v13700_v28  ;;  %13721 = vrcp.f32 %v1915_v25  ;;  %v1078_v36 = vadd.f32 %v14894_v44, %v1077_v32  ;;  %v1493_v39 = vsub.f32 0.0, %v1083_v31  ;;  %v14994_v41 = vld [vmem:[#allocation2 + $0x1c0] ss:$2 sm:$0xf]  ;;  %12165 = vmatpush3.msk.msra.mxu0 %vm3084_vm4, %v3017_v18 }
 0x17b   :  { %v13704_v38 = vpop.eup %13703  ;;  %2344 = vst.msk [vmem:[#allocation2 + $0x1f8] sm:$0xff] %vm2280_vm5, %v13702_v34  ;;  %13723 = vrcp.f32 %v1914_v29  ;;  %v12041_v45 = vpop.f32.mrb[78].mxu0  ;;  %v14996_v46 = vld [vmem:[#allocation2 + $0x1c1] ss:$2 sm:$0xf] }
 0x17c   :  { %v13706_v42 = vpop.eup %13705  ;;  %v1917_v43 = vadd.f32 1.0, %v13704_v38  ;;  %13725 = vpow2.f32 %v1710_v30  ;;  %v1492_v51 = vsub.f32 0.0, %v1078_v36  ;;  %v1714_v49 = vmul.f32 1.442695, %v1493_v39  ;;  %v1087_v52 = vpop.f32.mrb[79].mxu0 }
 0x17d   :  { %v13708_v47 = vpop.eup %13707  ;;  %v1916_v48 = vadd.f32 1.0, %v13706_v42  ;;  %13727 = vpow2.f32 %v1708_v35  ;;  %v1093_v50 = vadd.f32 %v14894_v44, %v12041_v45  ;;  %v2653_v53 = vld [vmem:[#allocation2 + $0x1c8] ss:$2 sm:$0xff]  ;;  %v1088_v56 = vadd.f32 %v14894_v44, %v1087_v52  ;;  %v2749_v57 = vld [vmem:[#allocation2 + $0x1c9] ss:$2 sm:$0xff] }
 0x17e   :  { %v13710_v54 = vpop.eup %13709  ;;  %2343 = vst.msk [vmem:[#allocation2 + $0x1f0] sm:$0xff] %vm2280_vm5, %v13708_v47  ;;  %13729 = vrcp.f32 %v1917_v43  ;;  %v1712_v55 = vmul.f32 1.442695, %v1492_v51  ;;  %v2874_v62 = vmax.f32 %v2653_v53, %v2749_v57  ;;  %v2655_v3 = vld [vmem:[#allocation2 + $0x1d8] ss:$2 sm:$0xf]  ;;  %v2827_v4 = vmax.f32 %v14994_v41, %v14996_v46 }
 0x17f   :  { %v13712_v58 = vpop.eup %13711  ;;  %2346 = vst.msk [vmem:[#allocation2 + $0x208] sm:$0xff] %vm2280_vm5, %v13710_v54  ;;  %13731 = vrcp.f32 %v1916_v48  ;;  %v1495_v59 = vsub.f32 0.0, %v1093_v50  ;;  %v4357_v60 = vld [vmem:[#allocation3 + $0x81] sm:$0xff]  ;;  %v1494_v1 = vsub.f32 0.0, %v1088_v56  ;;  %v12044_v2 = vpop.f32.mrb[80].mxu0 }
 0x180   :  { %v13714_v63 = vpop.eup %13713  ;;  %v1919_v0 = vadd.f32 1.0, %v13712_v58  ;;  %13733 = vpow2.f32 %v1714_v49  ;;  %12306 = vmatmul.mubr.msk.f32.gmra.mrb[6].mxu1 %vm2280_vm5, %v4357_v60  ;;  %v1103_v7 = vadd.f32 %v14894_v44, %v12044_v2  ;;  %v1097_v8 = vpop.f32.mrb[81].mxu0  ;;  %v2922_v9 = vmax.f32 %v2826_v61, %v2874_v62  ;;  %v2751_v10 = vld [vmem:[#allocation2 + $0x1d9] ss:$2 sm:$0xf] }
 0x181   :  { %v13716_v5 = vpop.eup %13715  ;;  %2345 = vst.msk [vmem:[#allocation2 + $0x200] sm:$0xff] %vm2280_vm5, %v13714_v63  ;;  %13735 = vpow2.f32 %v1712_v55  ;;  %v1718_v6 = vmul.f32 1.442695, %v1495_v59  ;;  %v1716_v13 = vmul.f32 1.442695, %v1494_v1  ;;  %v1098_v14 = vadd.f32 %v14894_v44, %v1097_v8 }
 0x182   :  { %v13718_v11 = vpop.eup %13717  ;;  %13737 = vrcp.f32 %v1919_v0  ;;  %v1918_v12 = vadd.f32 1.0, %v13716_v5  ;;  %v1497_v17 = vsub.f32 0.0, %v1103_v7  ;;  %2971 = vst.msk [vmem:[#allocation3 + $0x90] sm:$0xff] %vm2280_vm5, %v2922_v9  ;;  %v2875_v19 = vmax.f32 %v2655_v3, %v2751_v10  ;;  %v15012_v20 = vld [vmem:[#allocation2 + $0x1e0] ss:$2 sm:$0xff] }
 0x183   :  { %v13720_v15 = vpop.eup %13719  ;;  %v1921_v16 = vadd.f32 1.0, %v13718_v11  ;;  %13739 = vpow2.f32 %v1718_v6  ;;  %v1496_v23 = vsub.f32 0.0, %v1098_v14  ;;  %v12047_v24 = vpop.f32.mrb[82].mxu0  ;;  %v2561_v25 = vld [vmem:[#allocation2 + $0x1e1] ss:$2 sm:$0xff] }
 0x184   :  { %v13722_v21 = vpop.eup %13721  ;;  %13741 = vrcp.f32 %v1918_v12  ;;  %v1920_v22 = vadd.f32 1.0, %v13720_v15  ;;  %v1722_v27 = vmul.f32 1.442695, %v1497_v17  ;;  %v1113_v28 = vadd.f32 %v14894_v44, %v12047_v24  ;;  %v1107_v29 = vpop.f32.mrb[83].mxu0  ;;  %v15026_v47 = vld [vmem:[%s16709_s2] ss:$0 sm:$0xff] }
 0x185   :  { %v13724_v26 = vpop.eup %13723  ;;  %2348 = vst.msk [vmem:[#allocation2 + $0x218] sm:$0xff] %vm2280_vm5, %v13722_v21  ;;  %13743 = vrcp.f32 %v1921_v16  ;;  %v2923_v30 = vmax.f32 %v2827_v4, %v2875_v19  ;;  %v2467_v31 = vld [vmem:[#allocation2 + $0x1f0] ss:$2 sm:$0xf]  ;;  %v1720_v33 = vmul.f32 1.442695, %v1496_v23  ;;  %v1108_v34 = vadd.f32 %v14894_v44, %v1107_v29 }
 0x186   :  { %v13726_v32 = vpop.eup %13725  ;;  %2347 = vst.msk [vmem:[#allocation2 + $0x210] sm:$0xff] %vm2280_vm5, %v13724_v26  ;;  %13745 = vrcp.f32 %v1920_v22  ;;  %v2563_v35 = vld [vmem:[#allocation2 + $0x1f1] ss:$2 sm:$0xf]  ;;  %v1499_v38 = vsub.f32 0.0, %v1113_v28  ;;  %v2828_v45 = vmax.f32 %v15012_v20, %v2561_v25 }
 0x187   :  { %v13728_v36 = vpop.eup %13727  ;;  %v1923_v37 = vadd.f32 1.0, %v13726_v32  ;;  %13747 = vpow2.f32 %v1716_v13  ;;  %2972 = vst.msk [vmem:[#allocation3 + $0x98] sm:$0xf] %vm2953_vm6, %v2923_v30  ;;  %v2659_v39 = vld [vmem:[#allocation2 + $0x208] ss:$2 sm:$0xf]  ;;  %v2829_v52 = vmax.f32 %v2467_v31, %v2563_v35 }
 0x188   :  { %v13730_v40 = vpop.eup %13729  ;;  %v1922_v41 = vadd.f32 1.0, %v13728_v36  ;;  %13749 = vpow2.f32 %v1722_v27  ;;  %v1498_v42 = vsub.f32 0.0, %v1108_v34  ;;  %v12050_v43 = vpop.f32.mrb[84].mxu0  ;;  %v2657_v51 = vld [vmem:[#allocation2 + $0x1f8] ss:$2 sm:$0xff] }
 0x189   :  { %v13732_v46 = vpop.eup %13731  ;;  %2350 = vst.msk [vmem:[#allocation2 + $0x228] sm:$0xff] %vm2280_vm5, %v13730_v40  ;;  %13751 = vrcp.f32 %v1923_v37  ;;  %v1726_v44 = vmul.f32 1.442695, %v1499_v38  ;;  %v1123_v48 = vadd.f32 %v15026_v47, %v12050_v43  ;;  %v1117_v49 = vpop.f32.mrb[85].mxu0  ;;  %v2753_v50 = vld [vmem:[#allocation2 + $0x1f9] ss:$2 sm:$0xff] }
 0x18a   :  { %v13734_v53 = vpop.eup %13733  ;;  %2349 = vst.msk [vmem:[#allocation2 + $0x220] sm:$0xff] %vm2280_vm5, %v13732_v46  ;;  %13753 = vrcp.f32 %v1922_v41  ;;  %v1724_v54 = vmul.f32 1.442695, %v1498_v42  ;;  %v1118_v55 = vadd.f32 %v15026_v47, %v1117_v49  ;;  %v2876_v56 = vmax.f32 %v2657_v51, %v2753_v50  ;;  %v2755_v57 = vld [vmem:[#allocation2 + $0x209] ss:$2 sm:$0xf] }
 0x18b   :  { %v13736_v58 = vpop.eup %13735  ;;  %v1925_v59 = vadd.f32 1.0, %v13734_v53  ;;  %13755 = vpow2.f32 %v1720_v33  ;;  %v1501_v60 = vsub.f32 0.0, %v1123_v48  ;;  %v2877_v61 = vmax.f32 %v2659_v39, %v2755_v57  ;;  %v12053_v1 = vpop.f32.mrb[86].mxu0  ;;  %v10906_v14 = vld [vmem:[%s16710_s3 + $0x40] sm:$0x3f] }
 0x18c   :  { %v13738_v62 = vpop.eup %13737  ;;  %v1924_v63 = vadd.f32 1.0, %v13736_v58  ;;  %13757 = vpow2.f32 %v1726_v44  ;;  %v1500_v0 = vsub.f32 0.0, %v1118_v55  ;;  %v2924_v2 = vmax.f32 %v2828_v45, %v2876_v56  ;;  %v1127_v6 = vpop.f32.mrb[87].mxu0  ;;  %12346 = vmatprep.subr.msk.mxu1 %vm3084_vm4, %v10906_v14 }
 0x18d   :  { %v13740_v3 = vpop.eup %13739  ;;  %2352 = vst.msk [vmem:[#allocation2 + $0x238] sm:$0xff] %vm2280_vm5, %v13738_v62  ;;  %13759 = vrcp.f32 %v1925_v59  ;;  %v1730_v4 = vmul.f32 1.442695, %v1501_v60  ;;  %v1133_v5 = vadd.f32 %v15026_v47, %v12053_v1  ;;  %v2925_v7 = vmax.f32 %v2829_v52, %v2877_v61  ;;  %v15046_v32 = vld [vmem:[#allocation2 + $0x210] ss:$2 sm:$0xff] }
 0x18e   :  { %v13742_v8 = vpop.eup %13741  ;;  %13761 = vrcp.f32 %v1924_v63  ;;  %v1927_v9 = vadd.f32 1.0, %v13740_v3  ;;  %v1728_v10 = vmul.f32 1.442695, %v1500_v0  ;;  %v1128_v11 = vadd.f32 %v15026_v47, %v1127_v6  ;;  %2973 = vst.msk [vmem:[#allocation3 + $0xa0] sm:$0xff] %vm2280_vm5, %v2924_v2  ;;  %v15050_v37 = vld [vmem:[#allocation2 + $0x211] ss:$2 sm:$0xff] }
 0x18f   :  { %v13744_v12 = vpop.eup %13743  ;;  %2351 = vst.msk [vmem:[#allocation2 + $0x230] sm:$0xff] %vm2280_vm5, %v13742_v8  ;;  %13763 = vpow2.f32 %v1724_v54  ;;  %v1503_v13 = vsub.f32 0.0, %v1133_v5  ;;  %v12056_v17 = vpop.f32.mrb[88].mxu0  ;;  %v2830_v58 = vmax.f32 %v15046_v32, %v15050_v37 }
 0x190   :  { %2974 = vst.msk [vmem:[#allocation3 + $0xa8] sm:$0xf] %vm2953_vm6, %v2925_v7  ;;  %v13746_v15 = vpop.eup %13745  ;;  %13765 = vrcp.f32 %v1927_v9  ;;  %v1502_v16 = vsub.f32 0.0, %v1128_v11  ;;  %v1143_v20 = vadd.f32 %v15026_v47, %v12056_v17  ;;  %v1137_v21 = vpop.f32.mrb[89].mxu0 }
 0x191   :  { %2354 = vst.msk [vmem:[#allocation2 + $0x248] sm:$0xff] %vm2280_vm5, %v13744_v12  ;;  %v13748_v18 = vpop.eup %13747  ;;  %2353 = vst.msk [vmem:[#allocation2 + $0x240] sm:$0xff] %vm2280_vm5, %v13746_v15  ;;  %13767 = vpow2.f32 %v1730_v4  ;;  %v1734_v19 = vmul.f32 1.442695, %v1503_v13  ;;  %v1138_v25 = vadd.f32 %v15026_v47, %v1137_v21 }
 0x192   :  { %v13750_v22 = vpop.eup %13749  ;;  %v1926_v23 = vadd.f32 1.0, %v13748_v18  ;;  %13769 = vpow2.f32 %v1728_v10  ;;  %v1732_v24 = vmul.f32 1.442695, %v1502_v16  ;;  %v1505_v28 = vsub.f32 0.0, %v1143_v20 }
 0x193   :  { %v13752_v26 = vpop.eup %13751  ;;  %v1929_v27 = vadd.f32 1.0, %v13750_v22  ;;  %13771 = vpow2.f32 %v1734_v19  ;;  %v1504_v30 = vsub.f32 0.0, %v1138_v25  ;;  %v12059_v31 = vpop.f32.mrb[90].mxu0  ;;  %v15053_v42 = vld [vmem:[#allocation2 + $0x220] ss:$2 sm:$0xf] }
 0x194   :  { %v13754_v29 = vpop.eup %13753  ;;  %2356 = vst.msk [vmem:[#allocation2 + $0x258] sm:$0xff] %vm2280_vm5, %v13752_v26  ;;  %13773 = vrcp.f32 %v1926_v23  ;;  %v1738_v34 = vmul.f32 1.442695, %v1505_v28  ;;  %v1153_v35 = vadd.f32 %v15026_v47, %v12059_v31  ;;  %v1147_v36 = vpop.f32.mrb[91].mxu0 }
 0x195   :  { %v13756_v33 = vpop.eup %13755  ;;  %2355 = vst.msk [vmem:[#allocation2 + $0x250] sm:$0xff] %vm2280_vm5, %v13754_v29  ;;  %13775 = vrcp.f32 %v1929_v27  ;;  %v1736_v40 = vmul.f32 1.442695, %v1504_v30  ;;  %v1148_v41 = vadd.f32 %v15026_v47, %v1147_v36  ;;  %v15055_v43 = vld [vmem:[#allocation2 + $0x221] ss:$2 sm:$0xf] }
 0x196   :  { %v13758_v38 = vpop.eup %13757  ;;  %v1928_v39 = vadd.f32 1.0, %v13756_v33  ;;  %13777 = vpow2.f32 %v1732_v24  ;;  %v1507_v46 = vsub.f32 0.0, %v1153_v35  ;;  %v2663_v44 = vld [vmem:[#allocation2 + $0x238] ss:$2 sm:$0xf]  ;;  %v2831_v3 = vmax.f32 %v15053_v42, %v15055_v43 }
 0x197   :  { %v13760_v51 = vpop.eup %13759  ;;  %v1931_v45 = vadd.f32 1.0, %v13758_v38  ;;  %13779 = vpow2.f32 %v1738_v34  ;;  %v1506_v49 = vsub.f32 0.0, %v1148_v41  ;;  %v12062_v50 = vpop.f32.mrb[92].mxu0  ;;  %v2661_v52 = vld [vmem:[#allocation2 + $0x228] ss:$2 sm:$0xff] }
 0x198   :  { %v13762_v48 = vpop.eup %13761  ;;  %2358 = vst.msk [vmem:[#allocation2 + $0x268] sm:$0xff] %vm2280_vm5, %v13760_v51  ;;  %13781 = vrcp.f32 %v1928_v39  ;;  %v1742_v54 = vmul.f32 1.442695, %v1507_v46  ;;  %v1163_v55 = vadd.f32 %v15026_v47, %v12062_v50  ;;  %v1157_v56 = vpop.f32.mrb[93].mxu0  ;;  %v2757_v57 = vld [vmem:[#allocation2 + $0x229] ss:$2 sm:$0xff] }
 0x199   :  { %v13764_v53 = vpop.eup %13763  ;;  %2357 = vst.msk [vmem:[#allocation2 + $0x260] sm:$0xff] %vm2280_vm5, %v13762_v48  ;;  %13783 = vrcp.f32 %v1931_v45  ;;  %v1740_v61 = vmul.f32 1.442695, %v1506_v49  ;;  %v1158_v62 = vadd.f32 %v15026_v47, %v1157_v56  ;;  %v2759_v63 = vld [vmem:[#allocation2 + $0x239] ss:$2 sm:$0xf]  ;;  %v2878_v2 = vmax.f32 %v2661_v52, %v2757_v57 }
 0x19a   :  { %v13766_v59 = vpop.eup %13765  ;;  %v1930_v60 = vadd.f32 1.0, %v13764_v53  ;;  %13785 = vpow2.f32 %v1736_v40  ;;  %v1509_v1 = vsub.f32 0.0, %v1163_v55  ;;  %v2879_v8 = vmax.f32 %v2663_v44, %v2759_v63  ;;  %v2473_v20 = vld [vmem:[#allocation2 + $0x240] ss:$2 sm:$0xff]  ;;  %v2569_v36 = vld [vmem:[#allocation2 + $0x241] ss:$2 sm:$0xff] }
 0x19b   :  { %v13768_v0 = vpop.eup %13767  ;;  %2360 = vst.msk [vmem:[#allocation2 + $0x278] sm:$0xff] %vm2280_vm5, %v13766_v59  ;;  %13787 = vpow2.f32 %v1742_v54  ;;  %v1508_v6 = vsub.f32 0.0, %v1158_v62  ;;  %v12065_v7 = vpop.f32.mrb[94].mxu0  ;;  %v2926_v24 = vmax.f32 %v2830_v58, %v2878_v2  ;;  %v10798_v46 = vld [vmem:[%s16710_s3 + $0x10] sm:$0x3f]  ;;  %v2832_v50 = vmax.f32 %v2473_v20, %v2569_v36 }
 0x19c   :  { %v13770_v4 = vpop.eup %13769  ;;  %13789 = vrcp.f32 %v1930_v60  ;;  %v1933_v5 = vadd.f32 1.0, %v13768_v0  ;;  %v1746_v11 = vmul.f32 1.442695, %v1509_v1  ;;  %v1173_v12 = vadd.f32 %v15026_v47, %v12065_v7  ;;  %v1167_v13 = vpop.f32.mrb[95].mxu0  ;;  %12190 = vmatprep.subr.msk.mxu0 %vm3084_vm4, %v10798_v46 }
 0x19d   :  { %v13772_v9 = vpop.eup %13771  ;;  %v1932_v10 = vadd.f32 1.0, %v13770_v4  ;;  %13791 = vpow2.f32 %v1740_v61  ;;  %v1744_v16 = vmul.f32 1.442695, %v1508_v6  ;;  %v1168_v17 = vadd.f32 %v15026_v47, %v1167_v13  ;;  %v2475_v21 = vld [vmem:[#allocation2 + $0x250] ss:$2 sm:$0xf] }
 0x19e   :  { %v13774_v14 = vpop.eup %13773  ;;  %13793 = vrcp.f32 %v1933_v5  ;;  %v1935_v15 = vadd.f32 1.0, %v13772_v9  ;;  %v1511_v19 = vsub.f32 0.0, %v1173_v12  ;;  %v2571_v22 = vld [vmem:[#allocation2 + $0x251] ss:$2 sm:$0xf]  ;;  %v2927_v30 = vmax.f32 %v2831_v3, %v2879_v8  ;;  %2975 = vst.msk [vmem:[#allocation3 + $0xb0] sm:$0xff] %vm2280_vm5, %v2926_v24 }
 0x19f   :  { %v13776_v18 = vpop.eup %13775  ;;  %2359 = vst.msk [vmem:[#allocation2 + $0x270] sm:$0xff] %vm2280_vm5, %v13774_v14  ;;  %13795 = vrcp.f32 %v1932_v10  ;;  %v2667_v23 = vld [vmem:[#allocation2 + $0x268] ss:$2 sm:$0xf]  ;;  %v1510_v26 = vsub.f32 0.0, %v1168_v17  ;;  %v12068_v27 = vpop.f32.mrb[96].mxu0  ;;  %v2833_v52 = vmax.f32 %v2475_v21, %v2571_v22 }
 0x1a0   :  { %v13778_v25 = vpop.eup %13777  ;;  %2362 = vst.msk [vmem:[#allocation2 + $0x288] sm:$0xff] %vm2280_vm5, %v13776_v18  ;;  %13797 = vrcp.f32 %v1935_v15  ;;  %v2665_v28 = vld [vmem:[#allocation2 + $0x258] ss:$2 sm:$0xff]  ;;  %v2761_v29 = vld [vmem:[#allocation2 + $0x259] ss:$2 sm:$0xff]  ;;  %v1183_v34 = vadd.f32 %v15026_v47, %v12068_v27  ;;  %v1177_v35 = vpop.f32.mrb[97].mxu0 }
 0x1a1   :  { %v13780_v31 = vpop.eup %13779  ;;  %v1934_v32 = vadd.f32 1.0, %v13778_v25  ;;  %13799 = vpow2.f32 %v1746_v11  ;;  %v1750_v33 = vmul.f32 1.442695, %v1511_v19  ;;  %v1748_v39 = vmul.f32 1.442695, %v1510_v26 }
 0x1a2   :  { %v13782_v37 = vpop.eup %13781  ;;  %v1937_v38 = vadd.f32 1.0, %v13780_v31  ;;  %13801 = vpow2.f32 %v1744_v16  ;;  %v1178_v40 = vadd.f32 %v15026_v47, %v1177_v35  ;;  %v2763_v41 = vld [vmem:[#allocation2 + $0x269] ss:$2 sm:$0xf]  ;;  %2976 = vst.msk [vmem:[#allocation3 + $0xb8] sm:$0xf] %vm2953_vm6, %v2927_v30  ;;  %v2880_v51 = vmax.f32 %v2665_v28, %v2761_v29 }
 0x1a3   :  { %v13784_v42 = vpop.eup %13783  ;;  %2361 = vst.msk [vmem:[#allocation2 + $0x280] sm:$0xff] %vm2280_vm5, %v13782_v37  ;;  %13803 = vrcp.f32 %v1934_v32  ;;  %v1513_v43 = vsub.f32 0.0, %v1183_v34  ;;  %v2881_v45 = vmax.f32 %v2667_v23, %v2763_v41  ;;  %v12071_v49 = vpop.f32.mrb[98].mxu0 }
 0x1a4   :  { %v13786_v44 = vpop.eup %13785  ;;  %2364 = vst.msk [vmem:[#allocation2 + $0x298] sm:$0xff] %vm2280_vm5, %v13784_v42  ;;  %13805 = vrcp.f32 %v1937_v38  ;;  %v1512_v48 = vsub.f32 0.0, %v1178_v40  ;;  %v1193_v56 = vadd.f32 %v15026_v47, %v12071_v49  ;;  %v1187_v57 = vpop.f32.mrb[99].mxu0  ;;  %v2928_v0 = vmax.f32 %v2832_v50, %v2880_v51 }
 0x1a5   :  { %v13788_v53 = vpop.eup %13787  ;;  %v1936_v54 = vadd.f32 1.0, %v13786_v44  ;;  %13807 = vpow2.f32 %v1750_v33  ;;  %v1754_v55 = vmul.f32 1.442695, %v1513_v43  ;;  %v1188_v61 = vadd.f32 %v15026_v47, %v1187_v57 }
 0x1a6   :  { %v13790_v58 = vpop.eup %13789  ;;  %v1939_v59 = vadd.f32 1.0, %v13788_v53  ;;  %13809 = vpow2.f32 %v1748_v39  ;;  %v1752_v60 = vmul.f32 1.442695, %v1512_v48  ;;  %v1515_v63 = vsub.f32 0.0, %v1193_v56  ;;  %2977 = vst.msk [vmem:[#allocation3 + $0xc0] sm:$0xff] %vm2280_vm5, %v2928_v0 }
 0x1a7   :  { %v13792_v62 = vpop.eup %13791  ;;  %2363 = vst.msk [vmem:[#allocation2 + $0x290] sm:$0xff] %vm2280_vm5, %v13790_v58  ;;  %13811 = vrcp.f32 %v1936_v54  ;;  %v2929_v1 = vmax.f32 %v2833_v52, %v2881_v45  ;;  %v1514_v4 = vsub.f32 0.0, %v1188_v61  ;;  %v12074_v5 = vpop.f32.mrb[100].mxu0  ;;  %v2477_v10 = vld [vmem:[#allocation2 + $0x270] ss:$2 sm:$0xff] }
 0x1a8   :  { %v13794_v2 = vpop.eup %13793  ;;  %13813 = vrcp.f32 %v1939_v59  ;;  %v1938_v3 = vadd.f32 1.0, %v13792_v62  ;;  %v1758_v7 = vmul.f32 1.442695, %v1515_v63  ;;  %v1203_v8 = vadd.f32 %v15026_v47, %v12074_v5  ;;  %v1197_v9 = vpop.f32.mrb[101].mxu0  ;;  %v2573_v17 = vld [vmem:[#allocation2 + $0x271] ss:$2 sm:$0xff] }
 0x1a9   :  { %v13796_v6 = vpop.eup %13795  ;;  %2366 = vst.msk [vmem:[#allocation2 + $0x2a8] sm:$0xff] %vm2280_vm5, %v13794_v2  ;;  %13815 = vpow2.f32 %v1754_v55  ;;  %v1756_v12 = vmul.f32 1.442695, %v1514_v4  ;;  %v1198_v13 = vadd.f32 %v15026_v47, %v1197_v9  ;;  %v2834_v34 = vmax.f32 %v2477_v10, %v2573_v17 }
 0x1aa   :  { %2978 = vst.msk [vmem:[#allocation3 + $0xc8] sm:$0xf] %vm2953_vm6, %v2929_v1  ;;  %v13798_v11 = vpop.eup %13797  ;;  %13817 = vrcp.f32 %v1938_v3  ;;  %v2479_v14 = vld [vmem:[#allocation2 + $0x280] ss:$2 sm:$0xf]  ;;  %v1517_v16 = vsub.f32 0.0, %v1203_v8 }
 0x1ab   :  { %2365 = vst.msk [vmem:[#allocation2 + $0x2a0] sm:$0xff] %vm2280_vm5, %v13796_v6  ;;  %v13800_v15 = vpop.eup %13799  ;;  %2368 = vst.msk [vmem:[#allocation2 + $0x2b8] sm:$0xff] %vm2280_vm5, %v13798_v11  ;;  %13819 = vpow2.f32 %v1752_v60  ;;  %v2575_v18 = vld [vmem:[#allocation2 + $0x281] ss:$2 sm:$0xf]  ;;  %v1516_v21 = vsub.f32 0.0, %v1198_v13 }
 0x1ac   :  { %v13802_v19 = vpop.eup %13801  ;;  %v1941_v20 = vadd.f32 1.0, %v13800_v15  ;;  %13821 = vpow2.f32 %v1758_v7  ;;  %v12077_v22 = vpop.f32.mrb[102].mxu0  ;;  %v2671_v23 = vld [vmem:[#allocation2 + $0x298] ss:$2 sm:$0xf]  ;;  %v2835_v38 = vmax.f32 %v2479_v14, %v2575_v18 }
 0x1ad   :  { %v13804_v24 = vpop.eup %13803  ;;  %v1940_v25 = vadd.f32 1.0, %v13802_v19  ;;  %13823 = vpow2.f32 %v1756_v12  ;;  %v1762_v26 = vmul.f32 1.442695, %v1517_v16  ;;  %v1213_v27 = vadd.f32 %v15026_v47, %v12077_v22  ;;  %v1207_v28 = vpop.f32.mrb[103].mxu0 }
 0x1ae   :  { %v13806_v29 = vpop.eup %13805  ;;  %2367 = vst.msk [vmem:[#allocation2 + $0x2b0] sm:$0xff] %vm2280_vm5, %v13804_v24  ;;  %13825 = vrcp.f32 %v1941_v20  ;;  %v1760_v30 = vmul.f32 1.442695, %v1516_v21  ;;  %v1208_v31 = vadd.f32 %v15026_v47, %v1207_v28  ;;  %v2669_v32 = vld [vmem:[#allocation2 + $0x288] ss:$2 sm:$0xff] }
 0x1af   :  { %v2765_v33 = vld [vmem:[#allocation2 + $0x289] ss:$2 sm:$0xff]  ;;  %v13808_v35 = vpop.eup %13807  ;;  %2370 = vst.msk [vmem:[#allocation2 + $0x2c8] sm:$0xff] %vm2280_vm5, %v13806_v29  ;;  %13827 = vrcp.f32 %v1940_v25  ;;  %v1519_v36 = vsub.f32 0.0, %v1213_v27  ;;  %v12080_v51 = vpop.f32.mrb[104].mxu0 }
 0x1b0   :  { %v2767_v37 = vld [vmem:[#allocation2 + $0x299] ss:$2 sm:$0xf]  ;;  %v2882_v39 = vmax.f32 %v2669_v32, %v2765_v33  ;;  %v13810_v40 = vpop.eup %13809  ;;  %v1943_v41 = vadd.f32 1.0, %v13808_v35  ;;  %13829 = vpow2.f32 %v1762_v26  ;;  %v1518_v43 = vsub.f32 0.0, %v1208_v31  ;;  %v1217_v50 = vpop.f32.mrb[105].mxu0 }
 0x1b1   :  { %v3026_v42 = vld [vmem:[#allocation3 + $0xc1] sm:$0xff]  ;;  %v2883_v45 = vmax.f32 %v2671_v23, %v2767_v37  ;;  %v13812_v46 = vpop.eup %13811  ;;  %v1942_v44 = vadd.f32 1.0, %v13810_v40  ;;  %13831 = vpow2.f32 %v1760_v30  ;;  %v1766_v48 = vmul.f32 1.442695, %v1519_v36 }
 0x1b2   :  { %12152 = vmatprep.mubr.msk.f32.mxu0 %vm2280_vm5, %v3026_v42  ;;  %v1223_v49 = vadd.f32 %v15026_v47, %v12080_v51  ;;  %v13814_v52 = vpop.eup %13813  ;;  %2369 = vst.msk [vmem:[#allocation2 + $0x2c0] sm:$0xff] %vm2280_vm5, %v13812_v46  ;;  %13833 = vrcp.f32 %v1943_v41  ;;  %v1764_v53 = vmul.f32 1.442695, %v1518_v43  ;;  %v1218_v54 = vadd.f32 %v15026_v47, %v1217_v50  ;;  %v15099_v59 = vld [vmem:[#allocation2 + $0x2a0] ss:$2 sm:$0xff] }
 0x1b3   :  { %v2930_v55 = vmax.f32 %v2834_v34, %v2882_v39  ;;  %v13816_v56 = vpop.eup %13815  ;;  %2372 = vst.msk [vmem:[#allocation2 + $0x2d8] sm:$0xff] %vm2280_vm5, %v13814_v52  ;;  %13835 = vrcp.f32 %v1942_v44  ;;  %v2931_v58 = vmax.f32 %v2835_v38, %v2883_v45  ;;  %v12083_v63 = vpop.f32.mrb[106].mxu0  ;;  %v15102_v0 = vld [vmem:[#allocation2 + $0x2a1] ss:$2 sm:$0xff] }
 0x1b4   :  { %v1521_v57 = vsub.f32 0.0, %v1223_v49  ;;  %v13818_v60 = vpop.eup %13817  ;;  %v1945_v61 = vadd.f32 1.0, %v13816_v56  ;;  %13837 = vpow2.f32 %v1766_v48  ;;  %v1520_v62 = vsub.f32 0.0, %v1218_v54  ;;  %v1227_v4 = vpop.f32.mrb[107].mxu0 }
 0x1b5   :  { %2979 = vst.msk [vmem:[#allocation3 + $0xd0] sm:$0xff] %vm2280_vm5, %v2930_v55  ;;  %v13820_v1 = vpop.eup %13819  ;;  %2371 = vst.msk [vmem:[#allocation2 + $0x2d0] sm:$0xff] %vm2280_vm5, %v13818_v60  ;;  %13839 = vpow2.f32 %v1764_v53  ;;  %v1233_v3 = vadd.f32 %v15026_v47, %v12083_v63  ;;  %v2483_v5 = vld [vmem:[#allocation2 + $0x2b0] ss:$2 sm:$0xf]  ;;  %v1228_v9 = vadd.f32 %v15026_v47, %v1227_v4  ;;  %v2836_v20 = vmax.f32 %v15099_v59, %v15102_v0 }
 0x1b6   :  { %v1770_v2 = vmul.f32 1.442695, %v1521_v57  ;;  %2980 = vst.msk [vmem:[#allocation3 + $0xd8] sm:$0xf] %vm2953_vm6, %v2931_v58  ;;  %v13822_v6 = vpop.eup %13821  ;;  %13841 = vrcp.f32 %v1945_v61  ;;  %v1944_v7 = vadd.f32 1.0, %v13820_v1 }
 0x1b7   :  { %v1768_v8 = vmul.f32 1.442695, %v1520_v62  ;;  %v2579_v10 = vld [vmem:[#allocation2 + $0x2b1] ss:$2 sm:$0xf]  ;;  %v13824_v11 = vpop.eup %13823  ;;  %v1947_v12 = vadd.f32 1.0, %v13822_v6 }
 0x1b8   :  { %13843 = vpow2.f32 %v1770_v2  ;;  %v1523_v13 = vsub.f32 0.0, %v1233_v3  ;;  %v2675_v14 = vld [vmem:[#allocation2 + $0x2c8] ss:$2 sm:$0xf]  ;;  %v13826_v15 = vpop.eup %13825  ;;  %v1946_v16 = vadd.f32 1.0, %v13824_v11  ;;  %v1522_v17 = vsub.f32 0.0, %v1228_v9 }
 0x1b9   :  { %13845 = vrcp.f32 %v1944_v7  ;;  %v12086_v18 = vpop.f32.mrb[108].mxu0  ;;  %v2771_v19 = vld [vmem:[#allocation2 + $0x2c9] ss:$2 sm:$0xf]  ;;  %v13828_v21 = vpop.eup %13827  ;;  %2374 = vst.msk [vmem:[#allocation2 + $0x2e8] sm:$0xff] %vm2280_vm5, %v13826_v15  ;;  %v2837_v31 = vmax.f32 %v2483_v5, %v2579_v10 }
 0x1ba   :  { %13847 = vrcp.f32 %v1947_v12  ;;  %v1774_v22 = vmul.f32 1.442695, %v1523_v13  ;;  %v1243_v23 = vadd.f32 %v15026_v47, %v12086_v18  ;;  %v1237_v24 = vpop.f32.mrb[109].mxu0  ;;  %v2673_v25 = vld [vmem:[#allocation2 + $0x2b8] ss:$2 sm:$0xff]  ;;  %v2885_v26 = vmax.f32 %v2675_v14, %v2771_v19  ;;  %v13830_v27 = vpop.eup %13829  ;;  %2373 = vst.msk [vmem:[#allocation2 + $0x2e0] sm:$0xff] %vm2280_vm5, %v13828_v21 }
 0x1bb   :  { %13849 = vrcp.f32 %v1946_v16  ;;  %v1772_v28 = vmul.f32 1.442695, %v1522_v17  ;;  %v1238_v29 = vadd.f32 %v15026_v47, %v1237_v24  ;;  %v2769_v30 = vld [vmem:[#allocation2 + $0x2b9] ss:$2 sm:$0xff]  ;;  %v13832_v32 = vpop.eup %13831  ;;  %v1949_v33 = vadd.f32 1.0, %v13830_v27  ;;  %v12089_v40 = vpop.f32.mrb[110].mxu0 }
 0x1bc   :  { %13851 = vpow2.f32 %v1768_v8  ;;  %v1525_v34 = vsub.f32 0.0, %v1243_v23  ;;  %v2884_v35 = vmax.f32 %v2673_v25, %v2769_v30  ;;  %v13834_v36 = vpop.eup %13833  ;;  %v1948_v37 = vadd.f32 1.0, %v13832_v32  ;;  %v1247_v45 = vpop.f32.mrb[111].mxu0  ;;  %v2485_v62 = vld [vmem:[#allocation2 + $0x2d0] ss:$2 sm:$0xff] }
 0x1bd   :  { %13853 = vpow2.f32 %v1774_v22  ;;  %v3027_v38 = vld [vmem:[#allocation3 + $0xd1] sm:$0xff]  ;;  %v1524_v39 = vsub.f32 0.0, %v1238_v29  ;;  %v2933_v41 = vmax.f32 %v2837_v31, %v2885_v26  ;;  %v13836_v42 = vpop.eup %13835  ;;  %2376 = vst.msk [vmem:[#allocation2 + $0x2f8] sm:$0xff] %vm2280_vm5, %v13834_v36  ;;  %v1253_v51 = vadd.f32 %v15026_v47, %v12089_v40 }
 0x1be   :  { %13855 = vrcp.f32 %v1949_v33  ;;  %v1778_v43 = vmul.f32 1.442695, %v1525_v34  ;;  %12153 = vmatmul.mubr.msk.f32.gmra.mrb[152].mxu0 %vm2280_vm5, %v3027_v38  ;;  %12308 = vmatprep.mubr.msk.f32.mxu1 %vm2280_vm5, %v3027_v38  ;;  %v2932_v46 = vmax.f32 %v2836_v20, %v2884_v35  ;;  %v13838_v44 = vpop.eup %13837  ;;  %2375 = vst.msk [vmem:[#allocation2 + $0x2f0] sm:$0xff] %vm2280_vm5, %v13836_v42  ;;  %v1248_v48 = vadd.f32 %v15026_v47, %v1247_v45  ;;  %v2581_v3 = vld [vmem:[#allocation2 + $0x2d1] ss:$2 sm:$0xff] }
 0x1bf   :  { %13857 = vrcp.f32 %v1948_v37  ;;  %2982 = vst.msk [vmem:[#allocation3 + $0xe8] sm:$0xf] %vm2953_vm6, %v2933_v41  ;;  %v13840_v49 = vpop.eup %13839  ;;  %v1951_v50 = vadd.f32 1.0, %v13838_v44  ;;  %v1776_v52 = vmul.f32 1.442695, %v1524_v39  ;;  %v1527_v53 = vsub.f32 0.0, %v1253_v51 }
 0x1c0   :  { %13859 = vpow2.f32 %v1772_v28  ;;  %2981 = vst.msk [vmem:[#allocation3 + $0xe0] sm:$0xff] %vm2280_vm5, %v2932_v46  ;;  %v13842_v54 = vpop.eup %13841  ;;  %v1950_v55 = vadd.f32 1.0, %v13840_v49  ;;  %v1526_v56 = vsub.f32 0.0, %v1248_v48  ;;  %v12092_v57 = vpop.f32.mrb[112].mxu0  ;;  %v2838_v17 = vmax.f32 %v2485_v62, %v2581_v3 }
 0x1c1   :  { %13861 = vpow2.f32 %v1778_v43  ;;  %2378 = vst.msk [vmem:[#allocation2 + $0x308] sm:$0xff] %vm2280_vm5, %v13842_v54  ;;  %v1782_v59 = vmul.f32 1.442695, %v1527_v53  ;;  %v1263_v60 = vadd.f32 %v15026_v47, %v12092_v57  ;;  %v1257_v61 = vpop.f32.mrb[113].mxu0 }
 0x1c2   :  { %v13844_v58 = vpop.eup %13843  ;;  %13863 = vrcp.f32 %v1951_v50  ;;  %v1780_v1 = vmul.f32 1.442695, %v1526_v56  ;;  %v1258_v2 = vadd.f32 %v15026_v47, %v1257_v61  ;;  %v2487_v6 = vld [vmem:[#allocation2 + $0x2e0] ss:$2 sm:$0xf] }
 0x1c3   :  { %v13846_v63 = vpop.eup %13845  ;;  %13865 = vrcp.f32 %v1950_v55  ;;  %v1953_v0 = vadd.f32 1.0, %v13844_v58  ;;  %v1529_v5 = vsub.f32 0.0, %v1263_v60  ;;  %v2583_v7 = vld [vmem:[#allocation2 + $0x2e1] ss:$2 sm:$0xf]  ;;  %v12095_v10 = vpop.f32.mrb[114].mxu0 }
 0x1c4   :  { %v13848_v4 = vpop.eup %13847  ;;  %2377 = vst.msk [vmem:[#allocation2 + $0x300] sm:$0xff] %vm2280_vm5, %v13846_v63  ;;  %13867 = vpow2.f32 %v1776_v52  ;;  %v1528_v9 = vsub.f32 0.0, %v1258_v2  ;;  %v2679_v11 = vld [vmem:[#allocation2 + $0x2f8] ss:$2 sm:$0xf]  ;;  %v1273_v14 = vadd.f32 %v15026_v47, %v12095_v10  ;;  %v1267_v15 = vpop.f32.mrb[115].mxu0  ;;  %v2839_v32 = vmax.f32 %v2487_v6, %v2583_v7 }
 0x1c5   :  { %v13850_v8 = vpop.eup %13849  ;;  %2380 = vst.msk [vmem:[#allocation2 + $0x318] sm:$0xff] %vm2280_vm5, %v13848_v4  ;;  %13869 = vrcp.f32 %v1953_v0  ;;  %v1786_v13 = vmul.f32 1.442695, %v1529_v5  ;;  %v2677_v16 = vld [vmem:[#allocation2 + $0x2e8] ss:$2 sm:$0xff]  ;;  %v1268_v22 = vadd.f32 %v15026_v47, %v1267_v15 }
 0x1c6   :  { %v13852_v12 = vpop.eup %13851  ;;  %2379 = vst.msk [vmem:[#allocation2 + $0x310] sm:$0xff] %vm2280_vm5, %v13850_v8  ;;  %13871 = vpow2.f32 %v1782_v59  ;;  %v1784_v20 = vmul.f32 1.442695, %v1528_v9  ;;  %v2773_v23 = vld [vmem:[#allocation2 + $0x2e9] ss:$2 sm:$0xff]  ;;  %v1531_v26 = vsub.f32 0.0, %v1273_v14 }
 0x1c7   :  { %v13854_v18 = vpop.eup %13853  ;;  %v1952_v19 = vadd.f32 1.0, %v13852_v12  ;;  %13873 = vpow2.f32 %v1780_v1  ;;  %v3028_v21 = vld [vmem:[#allocation3 + $0xe1] sm:$0xff]  ;;  %v2775_v27 = vld [vmem:[#allocation2 + $0x2f9] ss:$2 sm:$0xf]  ;;  %v2886_v28 = vmax.f32 %v2677_v16, %v2773_v23  ;;  %v1530_v30 = vsub.f32 0.0, %v1268_v22 }
 0x1c8   :  { %v13856_v24 = vpop.eup %13855  ;;  %v1955_v25 = vadd.f32 1.0, %v13854_v18  ;;  %13875 = vpow2.f32 %v1786_v13  ;;  %12155 = vmatprep.mubr.msk.f32.mxu0 %vm2280_vm5, %v3028_v21  ;;  %12309 = vmatmul.mubr.msk.f32.gmra.mrb[8].mxu1 %vm2280_vm5, %v3028_v21  ;;  %v12098_v31 = vpop.f32.mrb[116].mxu0  ;;  %v2887_v33 = vmax.f32 %v2679_v11, %v2775_v27  ;;  %v1790_v35 = vmul.f32 1.442695, %v1531_v26 }
 0x1c9   :  { %v13858_v29 = vpop.eup %13857  ;;  %2382 = vst.msk [vmem:[#allocation2 + $0x328] sm:$0xff] %vm2280_vm5, %v13856_v24  ;;  %13877 = vrcp.f32 %v1952_v19  ;;  %v1283_v36 = vadd.f32 %v15026_v47, %v12098_v31  ;;  %v1277_v37 = vpop.f32.mrb[117].mxu0  ;;  %v2934_v38 = vmax.f32 %v2838_v17, %v2886_v28  ;;  %v1788_v41 = vmul.f32 1.442695, %v1530_v30 }
 0x1ca   :  { %v13860_v34 = vpop.eup %13859  ;;  %2381 = vst.msk [vmem:[#allocation2 + $0x320] sm:$0xff] %vm2280_vm5, %v13858_v29  ;;  %13879 = vrcp.f32 %v1955_v25  ;;  %v1278_v42 = vadd.f32 %v15026_v47, %v1277_v37  ;;  %v2935_v46 = vmax.f32 %v2839_v32, %v2887_v33 }
 0x1cb   :  { %v13862_v39 = vpop.eup %13861  ;;  %v1954_v40 = vadd.f32 1.0, %v13860_v34  ;;  %13881 = vpow2.f32 %v1784_v20  ;;  %v1533_v45 = vsub.f32 0.0, %v1283_v36  ;;  %2983 = vst.msk [vmem:[#allocation3 + $0xf0] sm:$0xff] %vm2280_vm5, %v2934_v38  ;;  %v12101_v49 = vpop.f32.mrb[118].mxu0  ;;  %v2489_v61 = vld [vmem:[#allocation2 + $0x300] ss:$2 sm:$0xff] }
 0x1cc   :  { %v13864_v43 = vpop.eup %13863  ;;  %v1957_v51 = vadd.f32 1.0, %v13862_v39  ;;  %13883 = vpow2.f32 %v1790_v35  ;;  %v1532_v48 = vsub.f32 0.0, %v1278_v42  ;;  %v1293_v53 = vadd.f32 %v15026_v47, %v12101_v49  ;;  %v1287_v54 = vpop.f32.mrb[119].mxu0  ;;  %2984 = vst.msk [vmem:[#allocation3 + $0xf8] sm:$0xf] %vm2953_vm6, %v2935_v46 }
 0x1cd   :  { %v13866_v44 = vpop.eup %13865  ;;  %2384 = vst.msk [vmem:[#allocation2 + $0x338] sm:$0xff] %vm2280_vm5, %v13864_v43  ;;  %13885 = vrcp.f32 %v1954_v40  ;;  %v1794_v52 = vmul.f32 1.442695, %v1533_v45  ;;  %v1288_v58 = vadd.f32 %v15026_v47, %v1287_v54  ;;  %v2491_v62 = vld [vmem:[#allocation2 + $0x310] ss:$2 sm:$0xf] }
 0x1ce   :  { %v13868_v50 = vpop.eup %13867  ;;  %2383 = vst.msk [vmem:[#allocation2 + $0x330] sm:$0xff] %vm2280_vm5, %v13866_v44  ;;  %13887 = vrcp.f32 %v1957_v51  ;;  %v1792_v57 = vmul.f32 1.442695, %v1532_v48  ;;  %v1535_v60 = vsub.f32 0.0, %v1293_v53  ;;  %v2585_v63 = vld [vmem:[#allocation2 + $0x301] ss:$2 sm:$0xff] }
 0x1cf   :  { %v13870_v55 = vpop.eup %13869  ;;  %v1956_v56 = vadd.f32 1.0, %v13868_v50  ;;  %13889 = vpow2.f32 %v1788_v41  ;;  %v2587_v0 = vld [vmem:[#allocation2 + $0x311] ss:$2 sm:$0xf]  ;;  %v1534_v4 = vsub.f32 0.0, %v1288_v58  ;;  %v12104_v5 = vpop.f32.mrb[120].mxu0  ;;  %v2840_v26 = vmax.f32 %v2489_v61, %v2585_v63 }
 0x1d0   :  { %v13872_v59 = vpop.eup %13871  ;;  %2386 = vst.msk [vmem:[#allocation2 + $0x348] sm:$0xff] %vm2280_vm5, %v13870_v55  ;;  %13891 = vpow2.f32 %v1794_v52  ;;  %v2683_v1 = vld [vmem:[#allocation2 + $0x328] ss:$2 sm:$0xf]  ;;  %v1798_v9 = vmul.f32 1.442695, %v1535_v60  ;;  %v1303_v10 = vadd.f32 %v15026_v47, %v12104_v5  ;;  %v2841_v27 = vmax.f32 %v2491_v62, %v2587_v0 }
 0x1d1   :  { %v13874_v2 = vpop.eup %13873  ;;  %13893 = vrcp.f32 %v1956_v56  ;;  %v1959_v3 = vadd.f32 1.0, %v13872_v59  ;;  %v2681_v6 = vld [vmem:[#allocation2 + $0x318] ss:$2 sm:$0xff]  ;;  %v1297_v11 = vpop.f32.mrb[121].mxu0  ;;  %v2777_v12 = vld [vmem:[#allocation2 + $0x319] ss:$2 sm:$0xff] }
 0x1d2   :  { %v13876_v7 = vpop.eup %13875  ;;  %v1958_v8 = vadd.f32 1.0, %v13874_v2  ;;  %13895 = vpow2.f32 %v1792_v57  ;;  %v1796_v15 = vmul.f32 1.442695, %v1534_v4  ;;  %v1298_v16 = vadd.f32 %v15026_v47, %v1297_v11  ;;  %v2779_v17 = vld [vmem:[#allocation2 + $0x329] ss:$2 sm:$0xf] }
 0x1d3   :  { %v13878_v13 = vpop.eup %13877  ;;  %13897 = vrcp.f32 %v1959_v3  ;;  %v1961_v14 = vadd.f32 1.0, %v13876_v7  ;;  %v1537_v19 = vsub.f32 0.0, %v1303_v10  ;;  %v2888_v20 = vmax.f32 %v2681_v6, %v2777_v12  ;;  %v3029_v23 = vld [vmem:[#allocation3 + $0xf1] sm:$0xff]  ;;  %v12107_v25 = vpop.f32.mrb[122].mxu0 }
 0x1d4   :  { %v13880_v18 = vpop.eup %13879  ;;  %2385 = vst.msk [vmem:[#allocation2 + $0x340] sm:$0xff] %vm2280_vm5, %v13878_v13  ;;  %13899 = vrcp.f32 %v1958_v8  ;;  %v2889_v21 = vmax.f32 %v2683_v1, %v2779_v17  ;;  %v1536_v24 = vsub.f32 0.0, %v1298_v16  ;;  %12156 = vmatmul.mubr.msk.f32.gmra.mrb[154].mxu0 %vm2280_vm5, %v3029_v23  ;;  %12311 = vmatprep.mubr.msk.f32.mxu1 %vm2280_vm5, %v3029_v23  ;;  %v1313_v31 = vadd.f32 %v15026_v47, %v12107_v25  ;;  %v1307_v32 = vpop.f32.mrb[123].mxu0 }
 0x1d5   :  { %v13882_v22 = vpop.eup %13881  ;;  %2388 = vst.msk [vmem:[#allocation2 + $0x358] sm:$0xff] %vm2280_vm5, %v13880_v18  ;;  %13901 = vrcp.f32 %v1961_v14  ;;  %v1802_v30 = vmul.f32 1.442695, %v1537_v19  ;;  %v1308_v36 = vadd.f32 %v15026_v47, %v1307_v32  ;;  %v2936_v39 = vmax.f32 %v2840_v26, %v2888_v20  ;;  %v15156_v47 = vld [vmem:[%s16709_s2] ss:$0 sm:$0xff] }
 0x1d6   :  { %v13884_v28 = vpop.eup %13883  ;;  %v1960_v29 = vadd.f32 1.0, %v13882_v22  ;;  %13903 = vpow2.f32 %v1798_v9  ;;  %v1800_v35 = vmul.f32 1.442695, %v1536_v24  ;;  %v1539_v38 = vsub.f32 0.0, %v1313_v31  ;;  %v2493_v53 = vld [vmem:[#allocation2 + $0x330] ss:$2 sm:$0xff] }
 0x1d7   :  { %v13886_v33 = vpop.eup %13885  ;;  %v1963_v34 = vadd.f32 1.0, %v13884_v28  ;;  %13905 = vpow2.f32 %v1796_v15  ;;  %v2937_v40 = vmax.f32 %v2841_v27, %v2889_v21  ;;  %v1538_v42 = vsub.f32 0.0, %v1308_v36  ;;  %v12110_v43 = vpop.f32.mrb[124].mxu0  ;;  %2985 = vst.msk [vmem:[#allocation3 + $0x100] sm:$0xff] %vm2280_vm5, %v2936_v39  ;;  %v2589_v55 = vld [vmem:[#allocation2 + $0x331] ss:$2 sm:$0xff] }
 0x1d8   :  { %v13888_v37 = vpop.eup %13887  ;;  %2387 = vst.msk [vmem:[#allocation2 + $0x350] sm:$0xff] %vm2280_vm5, %v13886_v33  ;;  %13907 = vrcp.f32 %v1960_v29  ;;  %v1806_v46 = vmul.f32 1.442695, %v1539_v38  ;;  %v1323_v44 = vadd.f32 %v15156_v47, %v12110_v43  ;;  %v1317_v48 = vpop.f32.mrb[125].mxu0  ;;  %v2842_v14 = vmax.f32 %v2493_v53, %v2589_v55 }
 0x1d9   :  { %v13890_v41 = vpop.eup %13889  ;;  %2390 = vst.msk [vmem:[#allocation2 + $0x368] sm:$0xff] %vm2280_vm5, %v13888_v37  ;;  %13909 = vrcp.f32 %v1963_v34  ;;  %v1318_v52 = vadd.f32 %v15156_v47, %v1317_v48  ;;  %v1804_v57 = vmul.f32 1.442695, %v1538_v42 }
 0x1da   :  { %v13892_v51 = vpop.eup %13891  ;;  %v1962_v45 = vadd.f32 1.0, %v13890_v41  ;;  %13911 = vpow2.f32 %v1802_v30  ;;  %2986 = vst.msk [vmem:[#allocation3 + $0x108] sm:$0xf] %vm2953_vm6, %v2937_v40  ;;  %v1541_v58 = vsub.f32 0.0, %v1323_v44 }
 0x1db   :  { %v13894_v49 = vpop.eup %13893  ;;  %v1965_v50 = vadd.f32 1.0, %v13892_v51  ;;  %13913 = vpow2.f32 %v1800_v35  ;;  %v2495_v54 = vld [vmem:[#allocation2 + $0x340] ss:$2 sm:$0xf]  ;;  %v1540_v62 = vsub.f32 0.0, %v1318_v52  ;;  %v12113_v0 = vpop.f32.mrb[126].mxu0 }
 0x1dc   :  { %v13896_v56 = vpop.eup %13895  ;;  %2389 = vst.msk [vmem:[#allocation2 + $0x360] sm:$0xff] %vm2280_vm5, %v13894_v49  ;;  %13915 = vrcp.f32 %v1962_v45  ;;  %v2591_v59 = vld [vmem:[#allocation2 + $0x341] ss:$2 sm:$0xf]  ;;  %v1810_v2 = vmul.f32 1.442695, %v1541_v58  ;;  %v1333_v5 = vadd.f32 %v15156_v47, %v12113_v0 }
 0x1dd   :  { %v13898_v60 = vpop.eup %13897  ;;  %13917 = vrcp.f32 %v1965_v50  ;;  %v1964_v61 = vadd.f32 1.0, %v13896_v56  ;;  %v2687_v63 = vld [vmem:[#allocation2 + $0x358] ss:$2 sm:$0xf]  ;;  %v2843_v4 = vmax.f32 %v2495_v54, %v2591_v59  ;;  %v1327_v6 = vpop.f32.mrb[127].mxu0 }
 0x1de   :  { %v13900_v1 = vpop.eup %13899  ;;  %2392 = vst.msk [vmem:[#allocation2 + $0x378] sm:$0xff] %vm2280_vm5, %v13898_v60  ;;  %13919 = vpow2.f32 %v1806_v46  ;;  %v2783_v3 = vld [vmem:[#allocation2 + $0x359] ss:$2 sm:$0xf]  ;;  %v1808_v8 = vmul.f32 1.442695, %v1540_v62  ;;  %v1328_v12 = vadd.f32 %v15156_v47, %v1327_v6 }
 0x1df   :  { %v13902_v7 = vpop.eup %13901  ;;  %2391 = vst.msk [vmem:[#allocation2 + $0x370] sm:$0xff] %vm2280_vm5, %v13900_v1  ;;  %13921 = vrcp.f32 %v1964_v61  ;;  %v2685_v9 = vld [vmem:[#allocation2 + $0x348] ss:$2 sm:$0xff]  ;;  %v2781_v10 = vld [vmem:[#allocation2 + $0x349] ss:$2 sm:$0xff]  ;;  %v2891_v11 = vmax.f32 %v2687_v63, %v2783_v3  ;;  %v1543_v16 = vsub.f32 0.0, %v1333_v5 }
 0x1e0   :  { %v13904_v13 = vpop.eup %13903  ;;  %2394 = vst.msk [vmem:[#allocation2 + $0x388] sm:$0xff] %vm2280_vm5, %v13902_v7  ;;  %13923 = vpow2.f32 %v1804_v57  ;;  %v2890_v15 = vmax.f32 %v2685_v9, %v2781_v10  ;;  %v1542_v21 = vsub.f32 0.0, %v1328_v12  ;;  %v12116_v22 = vpop.f32.mrb[128].mxu0 }
 0x1e1   :  { %v13906_v17 = vpop.eup %13905  ;;  %v1967_v18 = vadd.f32 1.0, %v13904_v13  ;;  %13925 = vpow2.f32 %v1810_v2  ;;  %v3030_v19 = vld [vmem:[#allocation3 + $0x101] sm:$0xff]  ;;  %v2939_v20 = vmax.f32 %v2843_v4, %v2891_v11  ;;  %v1814_v26 = vmul.f32 1.442695, %v1543_v16  ;;  %v1337_v27 = vpop.f32.mrb[129].mxu0 }
 0x1e2   :  { %v13908_v23 = vpop.eup %13907  ;;  %v1966_v24 = vadd.f32 1.0, %v13906_v17  ;;  %13927 = vpow2.f32 %v1808_v8  ;;  %12158 = vmatprep.mubr.msk.f32.mxu0 %vm2280_vm5, %v3030_v19  ;;  %12312 = vmatmul.mubr.msk.f32.gmra.mrb[10].mxu1 %vm2280_vm5, %v3030_v19  ;;  %v2938_v25 = vmax.f32 %v2842_v14, %v2890_v15  ;;  %v1812_v29 = vmul.f32 1.442695, %v1542_v21 }
 0x1e3   :  { %v13910_v28 = vpop.eup %13909  ;;  %2393 = vst.msk [vmem:[#allocation2 + $0x380] sm:$0xff] %vm2280_vm5, %v13908_v23  ;;  %13929 = vrcp.f32 %v1967_v18  ;;  %v1343_v30 = vadd.f32 %v15156_v47, %v12116_v22  ;;  %v1338_v31 = vadd.f32 %v15156_v47, %v1337_v27  ;;  %v2497_v35 = vld [vmem:[#allocation2 + $0x360] ss:$2 sm:$0xff]  ;;  %v2593_v36 = vld [vmem:[#allocation2 + $0x361] ss:$2 sm:$0xff]  ;;  %v12119_v39 = vpop.f32.mrb[130].mxu0 }
 0x1e4   :  { %2988 = vst.msk [vmem:[#allocation3 + $0x118] sm:$0xf] %vm2953_vm6, %v2939_v20  ;;  %v13912_v32 = vpop.eup %13911  ;;  %13931 = vrcp.f32 %v1966_v24  ;;  %v1353_v43 = vadd.f32 %v15156_v47, %v12119_v39  ;;  %v1347_v51 = vpop.f32.mrb[131].mxu0  ;;  %v2844_v63 = vmax.f32 %v2497_v35, %v2593_v36 }
 0x1e5   :  { %2396 = vst.msk [vmem:[#allocation2 + $0x398] sm:$0xff] %vm2280_vm5, %v13910_v28  ;;  %2987 = vst.msk [vmem:[#allocation3 + $0x110] sm:$0xff] %vm2280_vm5, %v2938_v25  ;;  %v13914_v33 = vpop.eup %13913  ;;  %v1969_v34 = vadd.f32 1.0, %v13912_v32  ;;  %13933 = vpow2.f32 %v1814_v26  ;;  %v1545_v37 = vsub.f32 0.0, %v1343_v30  ;;  %v1544_v38 = vsub.f32 0.0, %v1338_v31 }
 0x1e6   :  { %v13916_v40 = vpop.eup %13915  ;;  %v1968_v41 = vadd.f32 1.0, %v13914_v33  ;;  %v2499_v42 = vld [vmem:[#allocation2 + $0x370] ss:$2 sm:$0xf]  ;;  %13935 = vpow2.f32 %v1812_v29  ;;  %v1348_v48 = vadd.f32 %v15156_v47, %v1347_v51  ;;  %v1547_v54 = vsub.f32 0.0, %v1353_v43 }
 0x1e7   :  { %v13918_v45 = vpop.eup %13917  ;;  %2395 = vst.msk [vmem:[#allocation2 + $0x390] sm:$0xff] %vm2280_vm5, %v13916_v40  ;;  %13937 = vrcp.f32 %v1969_v34  ;;  %v2595_v46 = vld [vmem:[#allocation2 + $0x371] ss:$2 sm:$0xf]  ;;  %v1818_v53 = vmul.f32 1.442695, %v1545_v37 }
 0x1e8   :  { %v2691_v44 = vld [vmem:[#allocation2 + $0x388] ss:$2 sm:$0xf]  ;;  %v13920_v49 = vpop.eup %13919  ;;  %2398 = vst.msk [vmem:[#allocation2 + $0x3a8] sm:$0xff] %vm2280_vm5, %v13918_v45  ;;  %13939 = vrcp.f32 %v1968_v41  ;;  %v2845_v52 = vmax.f32 %v2499_v42, %v2595_v46  ;;  %v1816_v58 = vmul.f32 1.442695, %v1544_v38 }
 0x1e9   :  { %v2787_v50 = vld [vmem:[#allocation2 + $0x389] ss:$2 sm:$0xf]  ;;  %v13922_v55 = vpop.eup %13921  ;;  %v1971_v56 = vadd.f32 1.0, %v13920_v49  ;;  %v1546_v59 = vsub.f32 0.0, %v1348_v48  ;;  %13941 = vpow2.f32 %v1818_v53 }
 0x1ea   :  { %v2893_v57 = vmax.f32 %v2691_v44, %v2787_v50  ;;  %v13924_v60 = vpop.eup %13923  ;;  %2397 = vst.msk [vmem:[#allocation2 + $0x3a0] sm:$0xff] %vm2280_vm5, %v13922_v55  ;;  %v2689_v61 = vld [vmem:[#allocation2 + $0x378] ss:$2 sm:$0xff]  ;;  %v2785_v62 = vld [vmem:[#allocation2 + $0x379] ss:$2 sm:$0xff] }
 0x1eb   :  { %v13926_v0 = vpop.eup %13925  ;;  %13943 = vrcp.f32 %v1971_v56  ;;  %v1970_v1 = vadd.f32 1.0, %v13924_v60  ;;  %v2892_v3 = vmax.f32 %v2689_v61, %v2785_v62  ;;  %v1822_v7 = vmul.f32 1.442695, %v1547_v54 }
 0x1ec   :  { %v15181_v2 = vld [vmem:[#allocation3 + $0x111] sm:$0xff]  ;;  %v2941_v4 = vmax.f32 %v2845_v52, %v2893_v57  ;;  %v13928_v5 = vpop.eup %13927  ;;  %v1973_v6 = vadd.f32 1.0, %v13926_v0  ;;  %13945 = vpow2.f32 %v1816_v58  ;;  %v1820_v11 = vmul.f32 1.442695, %v1546_v59  ;;  %v3001_v0 = vld [vmem:[#allocation3] sm:$0xff] }
 0x1ed   :  { %12159 = vmatmul.mubr.msk.f32.gmra.mrb[156].mxu0 %vm2280_vm5, %v15181_v2  ;;  %12314 = vmatprep.mubr.msk.f32.mxu1 %vm2280_vm5, %v15181_v2  ;;  %v13930_v8 = vpop.eup %13929  ;;  %13947 = vrcp.f32 %v1970_v1  ;;  %v1972_v9 = vadd.f32 1.0, %v13928_v5  ;;  %v2940_v10 = vmax.f32 %v2844_v63, %v2892_v3  ;;  %v15223_v5 = vld [vmem:[%s16710_s3 + $0x18] sm:$0x3f] }
 0x1ee   :  { %2990 = vst.msk [vmem:[#allocation3 + $0x128] sm:$0xf] %vm2953_vm6, %v2941_v4  ;;  %v13932_v12 = vpop.eup %13931  ;;  %13949 = vrcp.f32 %v1973_v6  ;;  %v2501_v22 = vld [vmem:[#allocation2 + $0x390] ss:$2 sm:$0xff]  ;;  %v2597_v23 = vld [vmem:[#allocation2 + $0x391] ss:$2 sm:$0xff] }
 0x1ef   :  { %2400 = vst.msk [vmem:[#allocation2 + $0x3b8] sm:$0xff] %vm2280_vm5, %v13930_v8  ;;  %v13934_v13 = vpop.eup %13933  ;;  %2399 = vst.msk [vmem:[#allocation2 + $0x3b0] sm:$0xff] %vm2280_vm5, %v13932_v12  ;;  %13951 = vrcp.f32 %v1972_v9  ;;  %v2846_v35 = vmax.f32 %v2501_v22, %v2597_v23  ;;  %v15217_v4 = vld [vmem:[#allocation3 + $0x10] sm:$0xff] }
 0x1f0   :  { %2989 = vst.msk [vmem:[#allocation3 + $0x120] sm:$0xff] %vm2280_vm5, %v2940_v10  ;;  %v13936_v14 = vpop.eup %13935  ;;  %v1975_v15 = vadd.f32 1.0, %v13934_v13  ;;  %13953 = vpow2.f32 %v1822_v7  ;;  %v15227_v7 = vld [vmem:[#allocation3 + $0x20] sm:$0xff]  ;;  %v14096_v9 = vld [vmem:[%s16710_s3 + $0x10] sm:$0x3f] }
 0x1f1   :  { %v13938_v16 = vpop.eup %13937  ;;  %13955 = vpow2.f32 %v1820_v11  ;;  %v1974_v18 = vadd.f32 1.0, %v13936_v14  ;;  %v2503_v19 = vld [vmem:[#allocation2 + $0x3a0] ss:$2 sm:$0xf]  ;;  %v15239_v10 = vld [vmem:[#allocation3 + $0x30] sm:$0xff] }
 0x1f2   :  { %v13940_v17 = vpop.eup %13939  ;;  %2402 = vst.msk [vmem:[#allocation2 + $0x3c8] sm:$0xff] %vm2280_vm5, %v13938_v16  ;;  %13957 = vrcp.f32 %v1975_v15  ;;  %v2599_v20 = vld [vmem:[#allocation2 + $0x3a1] ss:$2 sm:$0xf] }
 0x1f3   :  { %2401 = vst.msk [vmem:[#allocation2 + $0x3c0] sm:$0xff] %vm2280_vm5, %v13940_v17  ;;  %v13942_v21 = vpop.eup %13941  ;;  %13959 = vrcp.f32 %v1974_v18  ;;  %v2847_v31 = vmax.f32 %v2503_v19, %v2599_v20  ;;  %v15241_v11 = vld [vmem:[#allocation3 + $0x40] sm:$0xff]  ;;  %v15249_v17 = vld [vmem:[#allocation3 + $0x50] sm:$0xff] }
 0x1f4   :  { %v1977_v33 = vadd.f32 1.0, %v13942_v21  ;;  %v15253_v18 = vld [vmem:[#allocation3 + $0x60] sm:$0xff]  ;;  %v15255_v19 = vld [vmem:[#allocation3 + $0x12] sm:$0xff] }
 0x1f5   :  { %v13944_v24 = vpop.eup %13943 }
 0x1f6   :  { %v2695_v25 = vld [vmem:[#allocation2 + $0x3b8] ss:$2 sm:$0xf]  ;;  %v2791_v26 = vld [vmem:[#allocation2 + $0x3b9] ss:$2 sm:$0xf]  ;;  %v13946_v27 = vpop.eup %13945  ;;  %13961 = vrcp.f32 %v1977_v33 }
 0x1f7   :  { %2404 = vst.msk [vmem:[#allocation2 + $0x3d8] sm:$0xff] %vm2280_vm5, %v13944_v24  ;;  %v15194_v28 = vld [vmem:[#allocation3 + $0x121] sm:$0xff]  ;;  %v2789_v30 = vld [vmem:[#allocation2 + $0x3a9] ss:$2 sm:$0xff]  ;;  %v2895_v32 = vmax.f32 %v2695_v25, %v2791_v26  ;;  %v13948_v34 = vpop.eup %13947  ;;  %v1976_v37 = vadd.f32 1.0, %v13946_v27 }
 0x1f8   :  { %v2693_v29 = vld [vmem:[#allocation2 + $0x3a8] ss:$2 sm:$0xff]  ;;  %12161 = vmatprep.mubr.msk.f32.mxu0 %vm2280_vm5, %v15194_v28  ;;  %12315 = vmatmul.mubr.msk.f32.gmra.mrb[12].mxu1 %vm2280_vm5, %v15194_v28  ;;  %v13950_v38 = vpop.eup %13949  ;;  %2403 = vst.msk [vmem:[#allocation2 + $0x3d0] sm:$0xff] %vm2280_vm5, %v13948_v34  ;;  %v14097_v33 = vld [vmem:[%s16710_s3 + $0x40] sm:$0x3f] }
 0x1f9   :  { %v2894_v36 = vmax.f32 %v2693_v29, %v2789_v30  ;;  %v2943_v39 = vmax.f32 %v2847_v31, %v2895_v32  ;;  %v13952_v40 = vpop.eup %13951  ;;  %2406 = vst.msk [vmem:[#allocation2 + $0x3e8] sm:$0xff] %vm2280_vm5, %v13950_v38  ;;  %13963 = vrcp.f32 %v1976_v37  ;;  %v15263_v27 = vld [vmem:[#allocation3 + $0x22] sm:$0xff]  ;;  %v15265_v30 = vld [vmem:[#allocation3 + $0x70] sm:$0xff] }
 0x1fa   :  { %v13954_v42 = vpop.eup %13953  ;;  %2405 = vst.msk [vmem:[#allocation2 + $0x3e0] sm:$0xff] %vm2280_vm5, %v13952_v40  ;;  %v2505_v48 = vld [vmem:[#allocation2 + $0x3c0] ss:$2 sm:$0xff]  ;;  %v2601_v49 = vld [vmem:[#allocation2 + $0x3c1] ss:$2 sm:$0xff]  ;;  %v15291_v38 = vld [vmem:[#allocation3 + $0xd0] sm:$0xff] }
 0x1fb   :  { %v2942_v41 = vmax.f32 %v2846_v35, %v2894_v36  ;;  %2992 = vst.msk [vmem:[#allocation3 + $0x138] sm:$0xf] %vm2953_vm6, %v2943_v39  ;;  %v13956_v43 = vpop.eup %13955  ;;  %v1979_v51 = vadd.f32 1.0, %v13954_v42  ;;  %v2848_v61 = vmax.f32 %v2505_v48, %v2601_v49  ;;  %v15272_v31 = vld [vmem:[%s16710_s3 + $0x48] sm:$0x3f]  ;;  %v3009_v34 = vld [vmem:[#allocation3 + $0xc0] sm:$0xff] }
 0x1fc   :  { %v13958_v45 = vpop.eup %13957  ;;  %v1978_v46 = vadd.f32 1.0, %v13956_v43  ;;  %v15280_v35 = vld [vmem:[#allocation3 + $0x32] sm:$0xff]  ;;  %v15286_v37 = vld [vmem:[#allocation3 + $0x42] sm:$0xff] }
 0x1fd   :  { %2991 = vst.msk [vmem:[#allocation3 + $0x130] sm:$0xff] %vm2280_vm5, %v2942_v41  ;;  %2408 = vst.msk [vmem:[#allocation2 + $0x3f8] sm:$0xff] %vm2280_vm5, %v13958_v45  ;;  %13965 = vrcp.f32 %v1979_v51  ;;  %v13960_v44 = vpop.eup %13959  ;;  %v15295_v39 = vld [vmem:[#allocation3 + $0x52] sm:$0xff]  ;;  %v15299_v40 = vld [vmem:[#allocation3 + $0xe0] sm:$0xff] }
 0x1fe   :  { %13967 = vrcp.f32 %v1978_v46  ;;  %2407 = vst.msk [vmem:[#allocation2 + $0x3f0] sm:$0xff] %vm2280_vm5, %v13960_v44  ;;  %v15305_v41 = vld [vmem:[#allocation3 + $0x62] sm:$0xff]  ;;  %v15307_v42 = vld [vmem:[#allocation3 + $0xf0] sm:$0xff] }
 0x1ff   :  { %v2507_v50 = vld [vmem:[#allocation2 + $0x3d0] ss:$2 sm:$0xf]  ;;  %v2603_v52 = vld [vmem:[#allocation2 + $0x3d1] ss:$2 sm:$0xf] }
 0x200   :  { %v2699_v53 = vld [vmem:[#allocation2 + $0x3e8] ss:$2 sm:$0xf]  ;;  %v2795_v54 = vld [vmem:[#allocation2 + $0x3e9] ss:$2 sm:$0xf]  ;;  %v2849_v57 = vmax.f32 %v2507_v50, %v2603_v52  ;;  %v13962_v59 = vpop.eup %13961 }
 0x201   :  { %v2697_v55 = vld [vmem:[#allocation2 + $0x3d8] ss:$2 sm:$0xff]  ;;  %v2793_v56 = vld [vmem:[#allocation2 + $0x3d9] ss:$2 sm:$0xff]  ;;  %v2897_v58 = vmax.f32 %v2699_v53, %v2795_v54  ;;  %2410 = vst.msk [vmem:[#allocation2 + $0x408] sm:$0xff] %vm2280_vm5, %v13962_v59  ;;  %v15323_v46 = vld [vmem:[#allocation3 + $0x110] sm:$0xff] }
 0x202   :  { %v2896_v62 = vmax.f32 %v2697_v55, %v2793_v56  ;;  %v15311_v43 = vld [vmem:[#allocation3 + $0x72] sm:$0xff]  ;;  %v15315_v51 = vld [vmem:[#allocation3 + $0x100] sm:$0xff] }
 0x203   :  { %v13964_v63 = vpop.eup %13963  ;;  %v2945_v1 = vmax.f32 %v2849_v57, %v2897_v58  ;;  %v15321_v45 = vld [vmem:[#allocation3 + $0x82] sm:$0xff]  ;;  %v4588_v44 = vld [vmem:[#allocation3 + $0xd2] sm:$0xff] }
 0x204   :  { %v15207_v60 = vld [vmem:[#allocation3 + $0x131] sm:$0xff]  ;;  %v2944_v3 = vmax.f32 %v2848_v61, %v2896_v62  ;;  %2409 = vst.msk [vmem:[#allocation2 + $0x400] sm:$0xff] %vm2280_vm5, %v13964_v63  ;;  %v15329_v48 = vld [vmem:[#allocation3 + $0x120] sm:$0xff] }
 0x205   :  { %12162 = vmatmul.mubr.msk.f32.gmra.mrb[158].mxu0 %vm2280_vm5, %v15207_v60  ;;  %12317 = vmatprep.mubr.msk.f32.mxu1 %vm2280_vm5, %v15207_v60  ;;  %2994 = vst.msk [vmem:[#allocation3 + $0x148] sm:$0xf] %vm2953_vm6, %v2945_v1  ;;  %v2509_v14 = vld [vmem:[#allocation2 + $0x3f0] ss:$2 sm:$0xff]  ;;  %v2605_v15 = vld [vmem:[#allocation2 + $0x3f1] ss:$2 sm:$0xff] }
 0x206   :  { %12166 = vmatprep.mubr.msk.f32.mxu0 %vm2280_vm5, %v3001_v0  ;;  %2993 = vst.msk [vmem:[#allocation3 + $0x140] sm:$0xff] %vm2280_vm5, %v2944_v3  ;;  %v2850_v21 = vmax.f32 %v2509_v14, %v2605_v15  ;;  %v15334_v49 = vld [vmem:[#allocation3 + $0xe2] sm:$0xff]  ;;  %v15336_v50 = vld [vmem:[#allocation3 + $0x130] sm:$0xff] }
 0x207   :  { %v13966_v6 = vpop.eup %13965  ;;  %v15340_v52 = vld [vmem:[#allocation3 + $0xf2] sm:$0xff]  ;;  %v3429_v53 = vld [vmem:[#allocation3 + $0x2] sm:$0xff] }
 0x208   :  { %v13968_v8 = vpop.eup %13967  ;;  %2412 = vst.msk [vmem:[#allocation2 + $0x418] sm:$0xff] %vm2280_vm5, %v13966_v6  ;;  %v15347_v54 = vld [vmem:[#allocation3 + $0x102] sm:$0xff]  ;;  %v15351_v55 = vld [vmem:[#allocation3 + $0x112] sm:$0xff] }
 0x209   :  { %12167 = vmatmul.mubr.msk.f32.vlgmr.msra.gmra.mrb[144].mxu0 %vm2280_vm5, %v15217_v4  ;;  %2411 = vst.msk [vmem:[#allocation2 + $0x410] sm:$0xff] %vm2280_vm5, %v13968_v8  ;;  %v10834_v56 = vld [vmem:[%s16710_s3 + $0x20] sm:$0x3f]  ;;  %v15369_v58 = vld [vmem:[#allocation3 + $0x132] sm:$0xff] }
 0x20a   :  { %12169 = vmatprep.mubr.msk.f32.mxu0 %vm2280_vm5, %v15227_v7  ;;  %12191 = vmatpush3.msk.msra.mxu0 %vm3084_vm4, %v14096_v9  ;;  %v15364_v57 = vld [vmem:[#allocation3 + $0x122] sm:$0xff]  ;;  %v4810_v61 = vld [vmem:[#allocation3 + $0x13] sm:$0xff] }
 0x20b   :  { %12216 = vmatprep.subr.msk.mxu0 %vm3084_vm4, %v15223_v5  ;;  %v2511_v12 = vld [vmem:[#allocation2 + $0x400] ss:$2 sm:$0xf]  ;;  %v2607_v13 = vld [vmem:[#allocation2 + $0x401] ss:$2 sm:$0xf] }
 0x20c   :  { %v2851_v20 = vmax.f32 %v2511_v12, %v2607_v13  ;;  %v15386_v62 = vld [vmem:[#allocation3 + $0x23] sm:$0xff]  ;;  %v10942_v63 = vld [vmem:[%s16710_s3 + $0x50] sm:$0x3f] }
 0x20d   :  { %12170 = vmatmul.mubr.msk.f32.gmra.mrb[146].mxu0 %vm2280_vm5, %v15239_v10  ;;  %v15247_v16 = vld [vmem:[#allocation3 + $0x141] sm:$0xff]  ;;  %v15397_v1 = vld [vmem:[#allocation3 + $0x33] sm:$0xff] }
 0x20e   :  { %12172 = vmatprep.mubr.msk.f32.mxu0 %vm2280_vm5, %v15241_v11  ;;  %12318 = vmatmul.mubr.msk.f32.gmra.mrb[14].mxu1 %vm2280_vm5, %v15247_v16  ;;  %v15377_v59 = vld [vmem:[#allocation3 + $0x142] sm:$0xff]  ;;  %v15418_v8 = vld [vmem:[#allocation3 + $0x73] sm:$0xff] }
 0x20f   :  { %12322 = vmatprep.mubr.msk.f32.mxu1 %vm2280_vm5, %v15255_v19  ;;  %v2703_v22 = vld [vmem:[#allocation2 + $0x418] ss:$2 sm:$0xf]  ;;  %v2799_v23 = vld [vmem:[#allocation2 + $0x419] ss:$2 sm:$0xf] }
 0x210   :  { %v2701_v24 = vld [vmem:[#allocation2 + $0x408] ss:$2 sm:$0xff]  ;;  %v2797_v25 = vld [vmem:[#allocation2 + $0x409] ss:$2 sm:$0xff]  ;;  %v2899_v26 = vmax.f32 %v2703_v22, %v2799_v23 }
 0x211   :  { %12173 = vmatmul.mubr.msk.f32.gmra.mrb[148].mxu0 %vm2280_vm5, %v15249_v17  ;;  %v2898_v29 = vmax.f32 %v2701_v24, %v2797_v25  ;;  %v3437_v0 = vld [vmem:[#allocation3 + $0xc2] sm:$0xff]  ;;  %v4818_v12 = vld [vmem:[#allocation3 + $0xd3] sm:$0xff] }
 0x212   :  { %12175 = vmatprep.mubr.msk.f32.mxu0 %vm2280_vm5, %v15253_v18  ;;  %12323 = vmatmul.mubr.msk.f32.vlgmr.msra.gmra.mrb[0].mxu1 %vm2280_vm5, %v15263_v27  ;;  %v2947_v32 = vmax.f32 %v2851_v20, %v2899_v26  ;;  %v15402_v3 = vld [vmem:[#allocation3 + $0x43] sm:$0xff]  ;;  %v15439_v14 = vld [vmem:[#allocation3 + $0xf3] sm:$0xff] }
 0x213   :  { %12347 = vmatpush3.msk.msra.mxu1 %vm3084_vm4, %v14097_v33  ;;  %v2946_v36 = vmax.f32 %v2850_v21, %v2898_v29  ;;  %12325 = vmatprep.mubr.msk.f32.mxu1 %vm2280_vm5, %v15280_v35  ;;  %v15414_v6 = vld [vmem:[#allocation3 + $0x63] sm:$0xff]  ;;  %16732 = vst [vmem:[#allocation10_spill] sm:$0xff] %v15439_v14  ;;  %v15450_v20 = vld [vmem:[#allocation3 + $0x113] sm:$0xff] }
 0x214   :  { %2996 = vst.msk [vmem:[#allocation3 + $0x158] sm:$0xf] %vm2953_vm6, %v2947_v32  ;;  %12372 = vmatprep.subr.msk.mxu1 %vm3084_vm4, %v15272_v31  ;;  %v15426_v9 = vld [vmem:[#allocation3 + $0x83] sm:$0xff]  ;;  %16734 = vst [vmem:[#allocation12_spill] sm:$0xff] %v15450_v20  ;;  %v15466_v23 = vld [vmem:[#allocation3 + $0x133] sm:$0xff] }
 0x215   :  { %12176 = vmatmul.mubr.msk.f32.gmra.mrb[150].mxu0 %vm2280_vm5, %v15265_v30  ;;  %2995 = vst.msk [vmem:[#allocation3 + $0x150] sm:$0xff] %vm2280_vm5, %v2946_v36  ;;  %v15435_v13 = vld [vmem:[#allocation3 + $0xe3] sm:$0xff]  ;;  %16736 = vst [vmem:[#allocation14_spill] sm:$0xff] %v15466_v23  ;;  %v5040_v25 = vld [vmem:[#allocation3 + $0x14] sm:$0xff] }
 0x216   :  { %12178 = vmatprep.mubr.msk.f32.mxu0 %vm2280_vm5, %v3009_v34  ;;  %12326 = vmatmul.mubr.msk.f32.gmra.mrb[2].mxu1 %vm2280_vm5, %v15286_v37  ;;  %16731 = vst [vmem:[#allocation9_spill] sm:$0xff] %v15435_v13  ;;  %v3659_v15 = vld [vmem:[#allocation3 + $0x3] sm:$0xff]  ;;  %v15490_v29 = vld [vmem:[%s16710_s3 + $0x58] sm:$0x3f] }
 0x217   :  { %12328 = vmatprep.mubr.msk.f32.mxu1 %vm2280_vm5, %v15295_v39  ;;  %v10852_v21 = vld [vmem:[%s16710_s3 + $0x28] sm:$0x3f]  ;;  %v15495_v32 = vld [vmem:[#allocation3 + $0x34] sm:$0xff] }
 0x218   :  { %v15461_v22 = vld [vmem:[#allocation3 + $0x123] sm:$0xff]  ;;  %16739 = vst [vmem:[#allocation17_spill] sm:$0xff] %v15495_v32  ;;  %v15506_v34 = vld [vmem:[#allocation3 + $0x54] sm:$0xff] }
 0x219   :  { %12179 = vmatmul.mubr.msk.f32.gmra.mrb[152].mxu0 %vm2280_vm5, %v15291_v38  ;;  %16735 = vst [vmem:[#allocation13_spill] sm:$0xff] %v15461_v22  ;;  %v15474_v24 = vld [vmem:[#allocation3 + $0x143] sm:$0xff] }
 0x21a   :  { %12181 = vmatprep.mubr.msk.f32.mxu0 %vm2280_vm5, %v15299_v40  ;;  %12329 = vmatmul.mubr.msk.f32.gmra.mrb[4].mxu1 %vm2280_vm5, %v15305_v41  ;;  %16737 = vst [vmem:[#allocation15_spill] sm:$0xff] %v15474_v24  ;;  %v15483_v26 = vld [vmem:[#allocation3 + $0x24] sm:$0xff] }
 0x21b   :  { %12331 = vmatprep.mubr.msk.f32.mxu1 %vm2280_vm5, %v15311_v43  ;;  %16738 = vst [vmem:[#allocation16_spill] sm:$0xff] %v15483_v26  ;;  %v15500_v33 = vld [vmem:[#allocation3 + $0x44] sm:$0xff] }
 0x21c   :  { %16740 = vst [vmem:[#allocation18_spill] sm:$0xff] %v15500_v33  ;;  %v15513_v36 = vld [vmem:[#allocation3 + $0x64] sm:$0xff] }
 0x21d   :  { %12182 = vmatmul.mubr.msk.f32.gmra.mrb[154].mxu0 %vm2280_vm5, %v15307_v42 }
 0x21e   :  { %12184 = vmatprep.mubr.msk.f32.mxu0 %vm2280_vm5, %v15315_v51  ;;  %12332 = vmatmul.mubr.msk.f32.gmra.mrb[6].mxu1 %vm2280_vm5, %v15321_v45 }
 0x21f   :  { %12334 = vmatprep.mubr.msk.f32.mxu1 %vm2280_vm5, %v4588_v44 }
 0x221   :  { %12185 = vmatmul.mubr.msk.f32.gmra.mrb[156].mxu0 %vm2280_vm5, %v15323_v46 }
 0x222   :  { %12187 = vmatprep.mubr.msk.f32.mxu0 %vm2280_vm5, %v15329_v48  ;;  %12335 = vmatmul.mubr.msk.f32.gmra.mrb[8].mxu1 %vm2280_vm5, %v15334_v49 }
 0x223   :  { %12337 = vmatprep.mubr.msk.f32.mxu1 %vm2280_vm5, %v15340_v52 }
 0x225   :  { %12188 = vmatmul.mubr.msk.f32.gmra.mrb[158].mxu0 %vm2280_vm5, %v15336_v50 }
 0x226   :  { %12192 = vmatprep.mubr.msk.f32.mxu0 %vm2280_vm5, %v3429_v53  ;;  %12338 = vmatmul.mubr.msk.f32.gmra.mrb[10].mxu1 %vm2280_vm5, %v15347_v54  ;;  %v15525_v53 = vld [vmem:[#allocation3 + $0x84] sm:$0xff] }
 0x227   :  { %12340 = vmatprep.mubr.msk.f32.mxu1 %vm2280_vm5, %v15351_v55  ;;  %16741 = vst [vmem:[#allocation19_spill] sm:$0xff] %v15525_v53 }
 0x229   :  { %12193 = vmatmul.mubr.msk.f32.vlgmr.msra.gmra.mrb[144].mxu0 %vm2280_vm5, %v15255_v19  ;;  %v15446_v19 = vld [vmem:[#allocation3 + $0x103] sm:$0xff] }
 0x22a   :  { %12195 = vmatprep.mubr.msk.f32.mxu0 %vm2280_vm5, %v15263_v27  ;;  %12217 = vmatpush3.msk.msra.mxu0 %vm3084_vm4, %v15223_v5  ;;  %v15407_v5 = vld [vmem:[#allocation3 + $0x53] sm:$0xff]  ;;  %16733 = vst [vmem:[#allocation11_spill] sm:$0xff] %v15446_v19 }
 0x22b   :  { %12242 = vmatprep.subr.msk.mxu0 %vm3084_vm4, %v10834_v56  ;;  %12341 = vmatmul.mubr.msk.f32.gmra.mrb[12].mxu1 %vm2280_vm5, %v15364_v57 }
 0x22c   :  { %12343 = vmatprep.mubr.msk.f32.mxu1 %vm2280_vm5, %v15369_v58 }
 0x22d   :  { %12196 = vmatmul.mubr.msk.f32.gmra.mrb[146].mxu0 %vm2280_vm5, %v15280_v35 }
 0x22e   :  { %12198 = vmatprep.mubr.msk.f32.mxu0 %vm2280_vm5, %v15286_v37 }
 0x22f   :  { %12344 = vmatmul.mubr.msk.f32.gmra.mrb[14].mxu1 %vm2280_vm5, %v15377_v59 }
 0x230   :  { %12348 = vmatprep.mubr.msk.f32.mxu1 %vm2280_vm5, %v4810_v61 }
 0x231   :  { %12199 = vmatmul.mubr.msk.f32.gmra.mrb[148].mxu0 %vm2280_vm5, %v15295_v39 }
 0x232   :  { %12201 = vmatprep.mubr.msk.f32.mxu0 %vm2280_vm5, %v15305_v41 }
 0x233   :  { %12349 = vmatmul.mubr.msk.f32.vlgmr.msra.gmra.mrb[0].mxu1 %vm2280_vm5, %v15386_v62 }
 0x234   :  { %12373 = vmatpush3.msk.msra.mxu1 %vm3084_vm4, %v15272_v31  ;;  %12351 = vmatprep.mubr.msk.f32.mxu1 %vm2280_vm5, %v15397_v1  ;;  %v3667_v31 = vld [vmem:[#allocation3 + $0xc3] sm:$0xff] }
 0x235   :  { %12202 = vmatmul.mubr.msk.f32.gmra.mrb[150].mxu0 %vm2280_vm5, %v15311_v43  ;;  %12398 = vmatprep.subr.msk.mxu1 %vm3084_vm4, %v10942_v63 }
 0x236   :  { %12204 = vmatprep.mubr.msk.f32.mxu0 %vm2280_vm5, %v3437_v0  ;;  %v3889_v0 = vld [vmem:[#allocation3 + $0x4] sm:$0xff] }
 0x237   :  { %12352 = vmatmul.mubr.msk.f32.gmra.mrb[2].mxu1 %vm2280_vm5, %v15402_v3 }
 0x238   :  { %12354 = vmatprep.mubr.msk.f32.mxu1 %vm2280_vm5, %v15407_v5 }
 0x239   :  { %12205 = vmatmul.mubr.msk.f32.gmra.mrb[152].mxu0 %vm2280_vm5, %v4588_v44  ;;  %v15517_v44 = vld [vmem:[#allocation3 + $0x74] sm:$0xff] }
 0x23a   :  { %12207 = vmatprep.mubr.msk.f32.mxu0 %vm2280_vm5, %v15334_v49 }
 0x23b   :  { %12355 = vmatmul.mubr.msk.f32.gmra.mrb[4].mxu1 %vm2280_vm5, %v15414_v6 }
 0x23c   :  { %12357 = vmatprep.mubr.msk.f32.mxu1 %vm2280_vm5, %v15418_v8 }
 0x23d   :  { %12208 = vmatmul.mubr.msk.f32.gmra.mrb[154].mxu0 %vm2280_vm5, %v15340_v52 }
 0x23e   :  { %12210 = vmatprep.mubr.msk.f32.mxu0 %vm2280_vm5, %v15347_v54 }
 0x23f   :  { %12358 = vmatmul.mubr.msk.f32.gmra.mrb[6].mxu1 %vm2280_vm5, %v15426_v9 }
 0x240   :  { %12360 = vmatprep.mubr.msk.f32.mxu1 %vm2280_vm5, %v4818_v12 }
 0x241   :  { %12211 = vmatmul.mubr.msk.f32.gmra.mrb[156].mxu0 %vm2280_vm5, %v15351_v55 }
 0x242   :  { %12213 = vmatprep.mubr.msk.f32.mxu0 %vm2280_vm5, %v15364_v57 }
 0x243   :  { %12361 = vmatmul.mubr.msk.f32.gmra.mrb[8].mxu1 %vm2280_vm5, %v15435_v13 }
 0x244   :  { %12363 = vmatprep.mubr.msk.f32.mxu1 %vm2280_vm5, %v15439_v14 }
 0x245   :  { %12214 = vmatmul.mubr.msk.f32.gmra.mrb[158].mxu0 %vm2280_vm5, %v15369_v58 }
 0x246   :  { %12218 = vmatprep.mubr.msk.f32.mxu0 %vm2280_vm5, %v3659_v15  ;;  %v15552_v15 = vld [vmem:[#allocation3 + $0x114] sm:$0xff] }
 0x247   :  { %12364 = vmatmul.mubr.msk.f32.gmra.mrb[10].mxu1 %vm2280_vm5, %v15446_v19 }
 0x248   :  { %12366 = vmatprep.mubr.msk.f32.mxu1 %vm2280_vm5, %v15450_v20 }
 0x249   :  { %12219 = vmatmul.mubr.msk.f32.vlgmr.msra.gmra.mrb[144].mxu0 %vm2280_vm5, %v4810_v61  ;;  %v15537_v61 = vld [vmem:[#allocation3 + $0xe4] sm:$0xff] }
 0x24a   :  { %12221 = vmatprep.mubr.msk.f32.mxu0 %vm2280_vm5, %v15386_v62  ;;  %12243 = vmatpush3.msk.msra.mxu0 %vm3084_vm4, %v10834_v56  ;;  %v15529_v56 = vld [vmem:[#allocation3 + $0xd4] sm:$0xff] }
 0x24b   :  { %12268 = vmatprep.subr.msk.mxu0 %vm3084_vm4, %v10852_v21  ;;  %12367 = vmatmul.mubr.msk.f32.gmra.mrb[12].mxu1 %vm2280_vm5, %v15461_v22 }
 0x24c   :  { %12369 = vmatprep.mubr.msk.f32.mxu1 %vm2280_vm5, %v15466_v23 }
 0x24d   :  { %12222 = vmatmul.mubr.msk.f32.gmra.mrb[146].mxu0 %vm2280_vm5, %v15397_v1 }
 0x24e   :  { %12224 = vmatprep.mubr.msk.f32.mxu0 %vm2280_vm5, %v15402_v3 }
 0x24f   :  { %12370 = vmatmul.mubr.msk.f32.gmra.mrb[14].mxu1 %vm2280_vm5, %v15474_v24 }
 0x250   :  { %12374 = vmatprep.mubr.msk.f32.mxu1 %vm2280_vm5, %v5040_v25 }
 0x251   :  { %12225 = vmatmul.mubr.msk.f32.gmra.mrb[148].mxu0 %vm2280_vm5, %v15407_v5 }
 0x252   :  { %12227 = vmatprep.mubr.msk.f32.mxu0 %vm2280_vm5, %v15414_v6 }
 0x253   :  { %12375 = vmatmul.mubr.msk.f32.vlgmr.msra.gmra.mrb[0].mxu1 %vm2280_vm5, %v15483_v26 }
 0x254   :  { %12399 = vmatpush3.msk.msra.mxu1 %vm3084_vm4, %v10942_v63  ;;  %12377 = vmatprep.mubr.msk.f32.mxu1 %vm2280_vm5, %v15495_v32  ;;  %v15541_v63 = vld [vmem:[#allocation3 + $0xf4] sm:$0xff] }
 0x255   :  { %12228 = vmatmul.mubr.msk.f32.gmra.mrb[150].mxu0 %vm2280_vm5, %v15418_v8  ;;  %12424 = vmatprep.subr.msk.mxu1 %vm3084_vm4, %v15490_v29 }
 0x256   :  { %12230 = vmatprep.mubr.msk.f32.mxu0 %vm2280_vm5, %v3667_v31  ;;  %v15560_v31 = vld [vmem:[#allocation3 + $0x124] sm:$0xff] }
 0x257   :  { %12378 = vmatmul.mubr.msk.f32.gmra.mrb[2].mxu1 %vm2280_vm5, %v15500_v33 }
 0x258   :  { %12380 = vmatprep.mubr.msk.f32.mxu1 %vm2280_vm5, %v15506_v34 }
 0x259   :  { %12231 = vmatmul.mubr.msk.f32.gmra.mrb[152].mxu0 %vm2280_vm5, %v4818_v12  ;;  %v15548_v12 = vld [vmem:[#allocation3 + $0x104] sm:$0xff] }
 0x25a   :  { %12233 = vmatprep.mubr.msk.f32.mxu0 %vm2280_vm5, %v15435_v13 }
 0x25b   :  { %12381 = vmatmul.mubr.msk.f32.gmra.mrb[4].mxu1 %vm2280_vm5, %v15513_v36 }
 0x25c   :  { %12383 = vmatprep.mubr.msk.f32.mxu1 %vm2280_vm5, %v15517_v44 }
 0x25d   :  { %12234 = vmatmul.mubr.msk.f32.gmra.mrb[154].mxu0 %vm2280_vm5, %v15439_v14 }
 0x25e   :  { %12236 = vmatprep.mubr.msk.f32.mxu0 %vm2280_vm5, %v15446_v19 }
 0x25f   :  { %12384 = vmatmul.mubr.msk.f32.gmra.mrb[6].mxu1 %vm2280_vm5, %v15525_v53 }
 0x260   :  { %12386 = vmatprep.mubr.msk.f32.mxu1 %vm2280_vm5, %v15529_v56 }
 0x261   :  { %12237 = vmatmul.mubr.msk.f32.gmra.mrb[156].mxu0 %vm2280_vm5, %v15450_v20 }
 0x262   :  { %12239 = vmatprep.mubr.msk.f32.mxu0 %vm2280_vm5, %v15461_v22 }
 0x263   :  { %12387 = vmatmul.mubr.msk.f32.gmra.mrb[8].mxu1 %vm2280_vm5, %v15537_v61 }
 0x264   :  { %12389 = vmatprep.mubr.msk.f32.mxu1 %vm2280_vm5, %v15541_v63 }
 0x265   :  { %12240 = vmatmul.mubr.msk.f32.gmra.mrb[158].mxu0 %vm2280_vm5, %v15466_v23 }
 0x266   :  { %12244 = vmatprep.mubr.msk.f32.mxu0 %vm2280_vm5, %v3889_v0  ;;  %v15564_v0 = vld [vmem:[#allocation3 + $0x134] sm:$0xff] }
 0x267   :  { %12390 = vmatmul.mubr.msk.f32.gmra.mrb[10].mxu1 %vm2280_vm5, %v15548_v12 }
 0x268   :  { %12392 = vmatprep.mubr.msk.f32.mxu1 %vm2280_vm5, %v15552_v15 }
 0x269   :  { %12245 = vmatmul.mubr.msk.f32.vlgmr.msra.gmra.mrb[144].mxu0 %vm2280_vm5, %v5040_v25  ;;  %v12122_v25 = vpop.f32.mrb[132].mxu0 }
 0x26a   :  { %12247 = vmatprep.mubr.msk.f32.mxu0 %vm2280_vm5, %v15483_v26  ;;  %12269 = vmatpush3.msk.msra.mxu0 %vm3084_vm4, %v10852_v21  ;;  %v1363_v53 = vadd.f32 %v15156_v47, %v12122_v25  ;;  %v1357_v21 = vpop.f32.mrb[133].mxu0  ;;  %v15573_v26 = vld [vmem:[#allocation3 + $0x144] sm:$0xff] }
 0x26b   :  { %12393 = vmatmul.mubr.msk.f32.gmra.mrb[12].mxu1 %vm2280_vm5, %v15560_v31  ;;  %16742 = vst [vmem:[#allocation20_spill] sm:$0xff] %v15573_v26  ;;  %v1358_v24 = vadd.f32 %v15156_v47, %v1357_v21  ;;  %v12125_v22 = vpop.f32.mrb[134].mxu0 }
 0x26c   :  { %12395 = vmatprep.mubr.msk.f32.mxu1 %vm2280_vm5, %v15564_v0  ;;  %v1549_v23 = vsub.f32 0.0, %v1363_v53  ;;  %v1367_v25 = vpop.f32.mrb[135].mxu0 }
 0x26d   :  { %12248 = vmatmul.mubr.msk.f32.gmra.mrb[146].mxu0 %vm2280_vm5, %v15495_v32  ;;  %v1548_v32 = vsub.f32 0.0, %v1358_v24  ;;  %v1368_v21 = vadd.f32 %v15156_v47, %v1367_v25  ;;  %v12128_v19 = vpop.f32.mrb[136].mxu0 }
 0x26e   :  { %12250 = vmatprep.mubr.msk.f32.mxu0 %vm2280_vm5, %v15500_v33  ;;  %v1373_v33 = vadd.f32 %v15156_v47, %v12125_v22  ;;  %v1826_v20 = vmul.f32 1.442695, %v1549_v23  ;;  %v1383_v14 = vadd.f32 %v15156_v47, %v12128_v19  ;;  %v1377_v13 = vpop.f32.mrb[137].mxu0  ;;  %v15592_v22 = vld [vmem:[%s16710_s3 + $0x60] sm:$0x3f] }
 0x26f   :  { %12396 = vmatmul.mubr.msk.f32.gmra.mrb[14].mxu1 %vm2280_vm5, %v15573_v26  ;;  %v1824_v26 = vmul.f32 1.442695, %v1548_v32  ;;  %v1550_v24 = vsub.f32 0.0, %v1368_v21  ;;  %v1378_v23 = vadd.f32 %v15156_v47, %v1377_v13  ;;  %v3897_v19 = vld [vmem:[#allocation3 + $0xc4] sm:$0xff] }
 0x270   :  { %12400 = vmatprep.mubr.msk.f32.mxu1 %vm2280_vm5, %v15227_v7  ;;  %v1551_v53 = vsub.f32 0.0, %v1373_v33  ;;  %13969 = vpow2.f32 %v1826_v20  ;;  %v1553_v33 = vsub.f32 0.0, %v1383_v14  ;;  %v15614_v14 = vld [vmem:[#allocation3 + $0x80] sm:$0xff] }
 0x271   :  { %12251 = vmatmul.mubr.msk.f32.gmra.mrb[148].mxu0 %vm2280_vm5, %v15506_v34  ;;  %13971 = vpow2.f32 %v1824_v26  ;;  %v1828_v25 = vmul.f32 1.442695, %v1550_v24  ;;  %v1552_v20 = vsub.f32 0.0, %v1378_v23 }
 0x272   :  { %12253 = vmatprep.mubr.msk.f32.mxu0 %vm2280_vm5, %v15513_v36  ;;  %v1830_v32 = vmul.f32 1.442695, %v1551_v53  ;;  %v1834_v47 = vmul.f32 1.442695, %v1553_v33 }
 0x273   :  { %12401 = vmatmul.mubr.msk.f32.vlgmr.msra.gmra.mrb[0].mxu1 %vm2280_vm5, %v15239_v10  ;;  %v1832_v13 = vmul.f32 1.442695, %v1552_v20 }
 0x274   :  { %12425 = vmatpush3.msk.msra.mxu1 %vm3084_vm4, %v15490_v29  ;;  %12403 = vmatprep.mubr.msk.f32.mxu1 %vm2280_vm5, %v15241_v11  ;;  %13973 = vpow2.f32 %v1830_v32 }
 0x275   :  { %12254 = vmatmul.mubr.msk.f32.gmra.mrb[150].mxu0 %vm2280_vm5, %v15517_v44  ;;  %12450 = vmatprep.subr.msk.mxu1 %vm3084_vm4, %v15592_v22  ;;  %13975 = vpow2.f32 %v1828_v25 }
 0x276   :  { %12256 = vmatprep.mubr.msk.f32.mxu0 %vm2280_vm5, %v3897_v19  ;;  %13977 = vpow2.f32 %v1834_v47 }
 0x277   :  { %12404 = vmatmul.mubr.msk.f32.gmra.mrb[2].mxu1 %vm2280_vm5, %v15249_v17  ;;  %13979 = vpow2.f32 %v1832_v13 }
 0x278   :  { %12406 = vmatprep.mubr.msk.f32.mxu1 %vm2280_vm5, %v15253_v18 }
 0x279   :  { %12257 = vmatmul.mubr.msk.f32.gmra.mrb[152].mxu0 %vm2280_vm5, %v15529_v56  ;;  %v15622_v56 = vld [vmem:[#allocation3 + $0x90] sm:$0xff] }
 0x27a   :  { %12259 = vmatprep.mubr.msk.f32.mxu0 %vm2280_vm5, %v15537_v61  ;;  %v13970_v26 = vpop.eup %13969 }
 0x27b   :  { %12407 = vmatmul.mubr.msk.f32.gmra.mrb[4].mxu1 %vm2280_vm5, %v15265_v30  ;;  %v13972_v29 = vpop.eup %13971  ;;  %v1981_v21 = vadd.f32 1.0, %v13970_v26 }
 0x27c   :  { %12409 = vmatprep.mubr.msk.f32.mxu1 %vm2280_vm5, %v15614_v14  ;;  %v1980_v53 = vadd.f32 1.0, %v13972_v29  ;;  %v15660_v29 = vld [vmem:[#allocation3 + $0x150] sm:$0xff] }
 0x27d   :  { %12260 = vmatmul.mubr.msk.f32.gmra.mrb[154].mxu0 %vm2280_vm5, %v15541_v63  ;;  %13981 = vrcp.f32 %v1981_v21 }
 0x27e   :  { %12262 = vmatprep.mubr.msk.f32.mxu0 %vm2280_vm5, %v15548_v12  ;;  %v13974_v24 = vpop.eup %13973  ;;  %13983 = vrcp.f32 %v1980_v53  ;;  %v5501_v53 = vld [vmem:[#allocation3 + $0x21] sm:$0xff] }
 0x27f   :  { %12410 = vmatmul.mubr.msk.f32.gmra.mrb[6].mxu1 %vm2280_vm5, %v15622_v56  ;;  %v13976_v23 = vpop.eup %13975  ;;  %v1983_v19 = vadd.f32 1.0, %v13974_v24  ;;  %v10996_v24 = vld [vmem:[%s16710_s3 + $0x68] sm:$0x3f] }
 0x280   :  { %12412 = vmatprep.mubr.msk.f32.mxu1 %vm2280_vm5, %v15299_v40  ;;  %v13978_v32 = vpop.eup %13977  ;;  %v1982_v33 = vadd.f32 1.0, %v13976_v23  ;;  %v15695_v23 = vld [vmem:[#allocation3 + $0x61] sm:$0xff] }
 0x281   :  { %12263 = vmatmul.mubr.msk.f32.gmra.mrb[156].mxu0 %vm2280_vm5, %v15552_v15  ;;  %v13980_v25 = vpop.eup %13979  ;;  %13985 = vrcp.f32 %v1983_v19  ;;  %v1985_v20 = vadd.f32 1.0, %v13978_v32 }
 0x282   :  { %12265 = vmatprep.mubr.msk.f32.mxu0 %vm2280_vm5, %v15560_v31  ;;  %13987 = vrcp.f32 %v1982_v33  ;;  %v1984_v47 = vadd.f32 1.0, %v13980_v25  ;;  %v15724_v33 = vld [vmem:[#allocation3 + $0xf1] sm:$0xff] }
 0x283   :  { %12413 = vmatmul.mubr.msk.f32.gmra.mrb[8].mxu1 %vm2280_vm5, %v15307_v42  ;;  %13989 = vrcp.f32 %v1985_v20 }
 0x284   :  { %12415 = vmatprep.mubr.msk.f32.mxu1 %vm2280_vm5, %v15315_v51  ;;  %13991 = vrcp.f32 %v1984_v47 }
 0x285   :  { %12266 = vmatmul.mubr.msk.f32.gmra.mrb[158].mxu0 %vm2280_vm5, %v15564_v0 }
 0x286   :  { %12270 = vmatprep.mubr.msk.f32.mxu0 %vm2280_vm5, %v15217_v4  ;;  %v15650_v4 = vld [vmem:[#allocation3 + $0x140] sm:$0xff] }
 0x287   :  { %12416 = vmatmul.mubr.msk.f32.gmra.mrb[10].mxu1 %vm2280_vm5, %v15323_v46  ;;  %v13982_v13 = vpop.eup %13981 }
 0x288   :  { %12418 = vmatprep.mubr.msk.f32.mxu1 %vm2280_vm5, %v15329_v48  ;;  %v13984_v26 = vpop.eup %13983  ;;  %2414 = vst.msk [vmem:[#allocation2 + $0x428] sm:$0xff] %vm2280_vm5, %v13982_v13 }
 0x289   :  { %12271 = vmatmul.mubr.msk.f32.vlgmr.msra.gmra.mrb[144].mxu0 %vm2280_vm5, %v15227_v7  ;;  %2413 = vst.msk [vmem:[#allocation2 + $0x420] sm:$0xff] %vm2280_vm5, %v13984_v26 }
 0x28a   :  { %12273 = vmatprep.mubr.msk.f32.mxu0 %vm2280_vm5, %v15239_v10 }
 0x28b   :  { %12419 = vmatmul.mubr.msk.f32.gmra.mrb[12].mxu1 %vm2280_vm5, %v15336_v50  ;;  %v13986_v7 = vpop.eup %13985 }
 0x28c   :  { %12421 = vmatprep.mubr.msk.f32.mxu1 %vm2280_vm5, %v15650_v4  ;;  %v13988_v10 = vpop.eup %13987  ;;  %2416 = vst.msk [vmem:[#allocation2 + $0x438] sm:$0xff] %vm2280_vm5, %v13986_v7 }
 0x28d   :  { %12274 = vmatmul.mubr.msk.f32.gmra.mrb[146].mxu0 %vm2280_vm5, %v15241_v11  ;;  %v13990_v21 = vpop.eup %13989  ;;  %2415 = vst.msk [vmem:[#allocation2 + $0x430] sm:$0xff] %vm2280_vm5, %v13988_v10  ;;  %v14098_v10 = vld [vmem:[#allocation3 + $0x101] sm:$0xff] }
 0x28e   :  { %12276 = vmatprep.mubr.msk.f32.mxu0 %vm2280_vm5, %v15249_v17  ;;  %v13992_v11 = vpop.eup %13991  ;;  %2418 = vst.msk [vmem:[#allocation2 + $0x448] sm:$0xff] %vm2280_vm5, %v13990_v21  ;;  %v15673_v17 = vld [vmem:[#allocation3 + $0x31] sm:$0xff] }
 0x28f   :  { %12422 = vmatmul.mubr.msk.f32.gmra.mrb[14].mxu1 %vm2280_vm5, %v15660_v29  ;;  %2417 = vst.msk [vmem:[#allocation2 + $0x440] sm:$0xff] %vm2280_vm5, %v13992_v11  ;;  %v15741_v11 = vld [vmem:[#allocation3 + $0x151] sm:$0xff] }
 0x290   :  { %12426 = vmatprep.mubr.msk.f32.mxu1 %vm2280_vm5, %v5501_v53  ;;  %v2513_v19 = vld [vmem:[#allocation2 + $0x420] ss:$2 sm:$0xff]  ;;  %v2609_v32 = vld [vmem:[#allocation2 + $0x421] ss:$2 sm:$0xff] }
 0x291   :  { %12277 = vmatmul.mubr.msk.f32.gmra.mrb[148].mxu0 %vm2280_vm5, %v15253_v18  ;;  %v15684_v18 = vld [vmem:[#allocation3 + $0x41] sm:$0xff]  ;;  %v2852_v25 = vmax.f32 %v2513_v19, %v2609_v32 }
 0x292   :  { %12279 = vmatprep.mubr.msk.f32.mxu0 %vm2280_vm5, %v15265_v30  ;;  %v15690_v30 = vld [vmem:[#allocation3 + $0x51] sm:$0xff] }
 0x293   :  { %12427 = vmatmul.mubr.msk.f32.vlgmr.msra.gmra.mrb[0].mxu1 %vm2280_vm5, %v15673_v17 }
 0x294   :  { %12451 = vmatpush3.msk.msra.mxu1 %vm3084_vm4, %v15592_v22  ;;  %12429 = vmatprep.mubr.msk.f32.mxu1 %vm2280_vm5, %v15684_v18  ;;  %v15707_v22 = vld [vmem:[#allocation3 + $0x81] sm:$0xff]  ;;  %v2515_v20 = vld [vmem:[#allocation2 + $0x430] ss:$2 sm:$0xf] }
 0x295   :  { %12280 = vmatmul.mubr.msk.f32.gmra.mrb[150].mxu0 %vm2280_vm5, %v15614_v14  ;;  %12476 = vmatprep.subr.msk.mxu1 %vm3084_vm4, %v10996_v24  ;;  %v2611_v13 = vld [vmem:[#allocation2 + $0x431] ss:$2 sm:$0xf]  ;;  %v2707_v26 = vld [vmem:[#allocation2 + $0x448] ss:$2 sm:$0xf] }
 0x296   :  { %12282 = vmatprep.mubr.msk.f32.mxu0 %vm2280_vm5, %v15291_v38  ;;  %v15703_v38 = vld [vmem:[#allocation3 + $0x71] sm:$0xff]  ;;  %v2853_v7 = vmax.f32 %v2515_v20, %v2611_v13 }
 0x297   :  { %12430 = vmatmul.mubr.msk.f32.gmra.mrb[2].mxu1 %vm2280_vm5, %v15690_v30  ;;  %v16744_v20 = vld [vmem:[#allocation10_spill] sm:$0xff] }
 0x298   :  { %12432 = vmatprep.mubr.msk.f32.mxu1 %vm2280_vm5, %v15695_v23 }
 0x299   :  { %12283 = vmatmul.mubr.msk.f32.gmra.mrb[152].mxu0 %vm2280_vm5, %v15299_v40  ;;  %v15715_v40 = vld [vmem:[#allocation3 + $0x91] sm:$0xff] }
 0x29a   :  { %12285 = vmatprep.mubr.msk.f32.mxu0 %vm2280_vm5, %v15307_v42  ;;  %v5509_v42 = vld [vmem:[#allocation3 + $0xe1] sm:$0xff] }
 0x29b   :  { %12433 = vmatmul.mubr.msk.f32.gmra.mrb[4].mxu1 %vm2280_vm5, %v15703_v38 }
 0x29c   :  { %12435 = vmatprep.mubr.msk.f32.mxu1 %vm2280_vm5, %v15707_v22 }
 0x29d   :  { %12286 = vmatmul.mubr.msk.f32.gmra.mrb[154].mxu0 %vm2280_vm5, %v15315_v51  ;;  %v2705_v51 = vld [vmem:[#allocation2 + $0x438] ss:$2 sm:$0xff] }
 0x29e   :  { %12288 = vmatprep.mubr.msk.f32.mxu0 %vm2280_vm5, %v15323_v46  ;;  %v2801_v46 = vld [vmem:[#allocation2 + $0x439] ss:$2 sm:$0xff] }
 0x29f   :  { %12436 = vmatmul.mubr.msk.f32.gmra.mrb[6].mxu1 %vm2280_vm5, %v15715_v40  ;;  %v2900_v47 = vmax.f32 %v2705_v51, %v2801_v46  ;;  %v15811_v46 = vld [vmem:[#allocation3 + $0x93] sm:$0xff] }
 0x2a0   :  { %12438 = vmatprep.mubr.msk.f32.mxu1 %vm2280_vm5, %v5509_v42 }
 0x2a1   :  { %12289 = vmatmul.mubr.msk.f32.gmra.mrb[156].mxu0 %vm2280_vm5, %v15329_v48  ;;  %v2803_v48 = vld [vmem:[#allocation2 + $0x449] ss:$2 sm:$0xf] }
 0x2a2   :  { %12291 = vmatprep.mubr.msk.f32.mxu0 %vm2280_vm5, %v15336_v50  ;;  %v2948_v50 = vmax.f32 %v2852_v25, %v2900_v47  ;;  %v2901_v21 = vmax.f32 %v2707_v26, %v2803_v48 }
 0x2a3   :  { %12439 = vmatmul.mubr.msk.f32.gmra.mrb[8].mxu1 %vm2280_vm5, %v15724_v33 }
 0x2a4   :  { %12441 = vmatprep.mubr.msk.f32.mxu1 %vm2280_vm5, %v14098_v10  ;;  %2997 = vst.msk [vmem:[#allocation3 + $0x160] sm:$0xff] %vm2280_vm5, %v2948_v50  ;;  %v2949_v53 = vmax.f32 %v2853_v7, %v2901_v21  ;;  %v16746_v7 = vld [vmem:[#allocation12_spill] sm:$0xff]  ;;  %v16747_v21 = vld [vmem:[#allocation13_spill] sm:$0xff] }
 0x2a5   :  { %12292 = vmatmul.mubr.msk.f32.gmra.mrb[158].mxu0 %vm2280_vm5, %v15650_v4 }
 0x2a6   :  { %2998 = vst.msk [vmem:[#allocation3 + $0x168] sm:$0xf] %vm2953_vm6, %v2949_v53 }
 0x2a7   :  { %12442 = vmatmul.mubr.msk.f32.gmra.mrb[10].mxu1 %vm2280_vm5, %v15181_v2  ;;  %v11014_v2 = vld [vmem:[%s16710_s3 + $0x70] sm:$0x3f] }
 0x2a8   :  { %12444 = vmatprep.mubr.msk.f32.mxu1 %vm2280_vm5, %v15194_v28  ;;  %v15764_v28 = vld [vmem:[#allocation3 + $0x92] sm:$0xff] }
 0x2ab   :  { %12445 = vmatmul.mubr.msk.f32.gmra.mrb[12].mxu1 %vm2280_vm5, %v15207_v60  ;;  %v15782_v60 = vld [vmem:[#allocation3 + $0x152] sm:$0xff] }
 0x2ac   :  { %12447 = vmatprep.mubr.msk.f32.mxu1 %vm2280_vm5, %v15247_v16  ;;  %v15791_v16 = vld [vmem:[%s16710_s3 + $0x78] sm:$0x3f] }
 0x2af   :  { %12448 = vmatmul.mubr.msk.f32.gmra.mrb[14].mxu1 %vm2280_vm5, %v15741_v11 }
 0x2b0   :  { %12452 = vmatprep.mubr.msk.f32.mxu1 %vm2280_vm5, %v15263_v27  ;;  %v12131_v27 = vpop.f32.mrb[138].mxu0 }
 0x2b3   :  { %12453 = vmatmul.mubr.msk.f32.vlgmr.msra.gmra.mrb[0].mxu1 %vm2280_vm5, %v15280_v35  ;;  %v14099_v35 = vld [vmem:[%s16709_s2] ss:$0 sm:$0xff] }
 0x2b4   :  { %12477 = vmatpush3.msk.msra.mxu1 %vm3084_vm4, %v10996_v24  ;;  %12455 = vmatprep.mubr.msk.f32.mxu1 %vm2280_vm5, %v15286_v37  ;;  %v1393_v37 = vadd.f32 %v14099_v35, %v12131_v27 }
 0x2b5   :  { %12502 = vmatprep.subr.msk.mxu1 %vm3084_vm4, %v11014_v2 }
 0x2b7   :  { %12456 = vmatmul.mubr.msk.f32.gmra.mrb[2].mxu1 %vm2280_vm5, %v15295_v39  ;;  %v1387_v39 = vpop.f32.mrb[139].mxu0 }
 0x2b8   :  { %12458 = vmatprep.mubr.msk.f32.mxu1 %vm2280_vm5, %v15305_v41  ;;  %v1388_v41 = vadd.f32 %v14099_v35, %v1387_v39  ;;  %v16748_v39 = vld [vmem:[#allocation14_spill] sm:$0xff] }
 0x2bb   :  { %12459 = vmatmul.mubr.msk.f32.gmra.mrb[4].mxu1 %vm2280_vm5, %v15311_v43  ;;  %v12134_v43 = vpop.f32.mrb[140].mxu0 }
 0x2bc   :  { %12461 = vmatprep.mubr.msk.f32.mxu1 %vm2280_vm5, %v15321_v45  ;;  %v1555_v45 = vsub.f32 0.0, %v1393_v37 }
 0x2bf   :  { %12462 = vmatmul.mubr.msk.f32.gmra.mrb[6].mxu1 %vm2280_vm5, %v15764_v28 }
 0x2c0   :  { %12464 = vmatprep.mubr.msk.f32.mxu1 %vm2280_vm5, %v15334_v49  ;;  %v1403_v49 = vadd.f32 %v14099_v35, %v12134_v43  ;;  %v16749_v43 = vld [vmem:[#allocation15_spill] sm:$0xff] }
 0x2c3   :  { %12465 = vmatmul.mubr.msk.f32.gmra.mrb[8].mxu1 %vm2280_vm5, %v15340_v52  ;;  %v1397_v52 = vpop.f32.mrb[141].mxu0 }
 0x2c4   :  { %12467 = vmatprep.mubr.msk.f32.mxu1 %vm2280_vm5, %v15347_v54  ;;  %v1554_v54 = vsub.f32 0.0, %v1388_v41 }
 0x2c7   :  { %12468 = vmatmul.mubr.msk.f32.gmra.mrb[10].mxu1 %vm2280_vm5, %v15351_v55  ;;  %v1398_v55 = vadd.f32 %v14099_v35, %v1397_v52 }
 0x2c8   :  { %12470 = vmatprep.mubr.msk.f32.mxu1 %vm2280_vm5, %v15364_v57  ;;  %v12137_v57 = vpop.f32.mrb[142].mxu0 }
 0x2c9   :  { %v1556_v24 = vsub.f32 0.0, %v1398_v55 }
 0x2cb   :  { %12471 = vmatmul.mubr.msk.f32.gmra.mrb[12].mxu1 %vm2280_vm5, %v15369_v58  ;;  %v1838_v58 = vmul.f32 1.442695, %v1555_v45  ;;  %v15829_v45 = vld [vmem:[#allocation3 + $0x153] sm:$0xff] }
 0x2cc   :  { %12473 = vmatprep.mubr.msk.f32.mxu1 %vm2280_vm5, %v15377_v59  ;;  %v1557_v59 = vsub.f32 0.0, %v1403_v49  ;;  %v16750_v49 = vld [vmem:[#allocation16_spill] sm:$0xff] }
 0x2cd   :  { %13993 = vpow2.f32 %v1838_v58 }
 0x2cf   :  { %12474 = vmatmul.mubr.msk.f32.gmra.mrb[14].mxu1 %vm2280_vm5, %v15782_v60 }
 0x2d0   :  { %12478 = vmatprep.mubr.msk.f32.mxu1 %vm2280_vm5, %v15386_v62  ;;  %v1413_v62 = vadd.f32 %v14099_v35, %v12137_v57  ;;  %v16751_v57 = vld [vmem:[#allocation17_spill] sm:$0xff] }
 0x2d2   :  { %v1559_v19 = vsub.f32 0.0, %v1413_v62 }
 0x2d3   :  { %12479 = vmatmul.mubr.msk.f32.vlgmr.msra.gmra.mrb[0].mxu1 %vm2280_vm5, %v15397_v1  ;;  %v1407_v1 = vpop.f32.mrb[143].mxu0 }
 0x2d4   :  { %12503 = vmatpush3.msk.msra.mxu1 %vm3084_vm4, %v11014_v2  ;;  %12481 = vmatprep.mubr.msk.f32.mxu1 %vm2280_vm5, %v15402_v3  ;;  %v1836_v3 = vmul.f32 1.442695, %v1554_v54  ;;  %v1408_v42 = vadd.f32 %v14099_v35, %v1407_v1  ;;  %v1846_v51 = vmul.f32 1.442695, %v1559_v19  ;;  %v11050_v54 = vld [vmem:[%s16710_s3 + $0x80] sm:$0x3f] }
 0x2d5   :  { %12528 = vmatprep.subr.msk.mxu1 %vm3084_vm4, %v15791_v16  ;;  %v15916_v19 = vld [vmem:[#allocation3 + $0x110] sm:$0xff] }
 0x2d6   :  { %13995 = vpow2.f32 %v1836_v3  ;;  %v1558_v32 = vsub.f32 0.0, %v1408_v42  ;;  %v6430_v42 = vld [vmem:[#allocation3 + $0xf0] sm:$0xff] }
 0x2d7   :  { %12482 = vmatmul.mubr.msk.f32.gmra.mrb[2].mxu1 %vm2280_vm5, %v15407_v5  ;;  %v1842_v5 = vmul.f32 1.442695, %v1557_v59  ;;  %v13994_v47 = vpop.eup %13993  ;;  %v16752_v59 = vld [vmem:[#allocation18_spill] sm:$0xff] }
 0x2d8   :  { %12484 = vmatprep.mubr.msk.f32.mxu1 %vm2280_vm5, %v15414_v6  ;;  %v1840_v6 = vmul.f32 1.442695, %v1556_v24  ;;  %v1844_v25 = vmul.f32 1.442695, %v1558_v32  ;;  %v1987_v26 = vadd.f32 1.0, %v13994_v47  ;;  %v15859_v24 = vld [vmem:[#allocation3 + $0x94] sm:$0xff] }
 0x2d9   :  { %13997 = vpow2.f32 %v1842_v5  ;;  %v15912_v5 = vld [vmem:[#allocation3 + $0x100] sm:$0xff]  ;;  %v11086_v32 = vld [vmem:[%s16710_s3 + $0x90] sm:$0x3f] }
 0x2da   :  { %13999 = vpow2.f32 %v1840_v6  ;;  %v15932_v6 = vld [vmem:[#allocation3 + $0x160] sm:$0xff] }
 0x2db   :  { %12485 = vmatmul.mubr.msk.f32.gmra.mrb[4].mxu1 %vm2280_vm5, %v15418_v8  ;;  %14001 = vpow2.f32 %v1846_v51  ;;  %v16743_v8 = vld [vmem:[#allocation9_spill] sm:$0xff] }
 0x2dc   :  { %12487 = vmatprep.mubr.msk.f32.mxu1 %vm2280_vm5, %v15426_v9  ;;  %14003 = vpow2.f32 %v1844_v25  ;;  %v16745_v9 = vld [vmem:[#allocation11_spill] sm:$0xff] }
 0x2dd   :  { %14005 = vrcp.f32 %v1987_v26  ;;  %v15973_v26 = vld [vmem:[#allocation3 + $0x131] sm:$0xff] }
 0x2df   :  { %12488 = vmatmul.mubr.msk.f32.gmra.mrb[6].mxu1 %vm2280_vm5, %v15811_v46 }
 0x2e0   :  { %12490 = vmatprep.mubr.msk.f32.mxu1 %vm2280_vm5, %v16743_v8  ;;  %v13996_v13 = vpop.eup %13995 }
 0x2e1   :  { %v1986_v10 = vadd.f32 1.0, %v13996_v13 }
 0x2e3   :  { %12491 = vmatmul.mubr.msk.f32.gmra.mrb[8].mxu1 %vm2280_vm5, %v16744_v20  ;;  %v13998_v48 = vpop.eup %13997  ;;  %14007 = vrcp.f32 %v1986_v10  ;;  %v15985_v10 = vld [vmem:[#allocation3 + $0x161] sm:$0xff] }
 0x2e4   :  { %12493 = vmatprep.mubr.msk.f32.mxu1 %vm2280_vm5, %v16745_v9  ;;  %v14000_v50 = vpop.eup %13999  ;;  %v1989_v53 = vadd.f32 1.0, %v13998_v48  ;;  %v15969_v9 = vld [vmem:[#allocation3 + $0x121] sm:$0xff] }
 0x2e5   :  { %v14002_v2 = vpop.eup %14001  ;;  %v1988_v27 = vadd.f32 1.0, %v14000_v50  ;;  %v6882_v50 = vld [vmem:[#allocation3 + $0x32] sm:$0xff] }
 0x2e6   :  { %v14004_v35 = vpop.eup %14003  ;;  %14009 = vrcp.f32 %v1989_v53  ;;  %v1991_v37 = vadd.f32 1.0, %v14002_v2  ;;  %v11104_v53 = vld [vmem:[%s16710_s3 + $0x98] sm:$0x3f] }
 0x2e7   :  { %12494 = vmatmul.mubr.msk.f32.gmra.mrb[10].mxu1 %vm2280_vm5, %v16746_v7  ;;  %14011 = vrcp.f32 %v1988_v27  ;;  %v1990_v41 = vadd.f32 1.0, %v14004_v35  ;;  %v14006_v52 = vpop.eup %14005  ;;  %v15978_v7 = vld [vmem:[#allocation3 + $0x141] sm:$0xff]  ;;  %v15997_v2 = vld [vmem:[#allocation3 + $0x52] sm:$0xff] }
 0x2e8   :  { %12496 = vmatprep.mubr.msk.f32.mxu1 %vm2280_vm5, %v16747_v21  ;;  %14013 = vrcp.f32 %v1991_v37  ;;  %2420 = vst.msk [vmem:[#allocation2 + $0x458] sm:$0xff] %vm2280_vm5, %v14006_v52  ;;  %v15990_v21 = vld [vmem:[#allocation3 + $0x42] sm:$0xff]  ;;  %v16007_v27 = vld [vmem:[#allocation3 + $0x72] sm:$0xff] }
 0x2e9   :  { %14015 = vrcp.f32 %v1990_v41  ;;  %v16011_v35 = vld [vmem:[#allocation3 + $0x82] sm:$0xff] }
 0x2ea   :  { %v16021_v41 = vld [vmem:[#allocation3 + $0xa2] sm:$0xff] }
 0x2eb   :  { %12497 = vmatmul.mubr.msk.f32.gmra.mrb[12].mxu1 %vm2280_vm5, %v16748_v39 }
 0x2ec   :  { %12499 = vmatprep.mubr.msk.f32.mxu1 %vm2280_vm5, %v16749_v43 }
 0x2ed   :  { %v14008_v55 = vpop.eup %14007 }
 0x2ee   :  { %2419 = vst.msk [vmem:[#allocation2 + $0x450] sm:$0xff] %vm2280_vm5, %v14008_v55 }
 0x2ef   :  { %12500 = vmatmul.mubr.msk.f32.gmra.mrb[14].mxu1 %vm2280_vm5, %v15829_v45 }
 0x2f0   :  { %12504 = vmatprep.mubr.msk.f32.mxu1 %vm2280_vm5, %v16750_v49  ;;  %v14010_v58 = vpop.eup %14009  ;;  %v6890_v49 = vld [vmem:[#allocation3 + $0xf2] sm:$0xff] }
 0x2f1   :  { %v14012_v62 = vpop.eup %14011  ;;  %2422 = vst.msk [vmem:[#allocation2 + $0x468] sm:$0xff] %vm2280_vm5, %v14010_v58  ;;  %v16042_v58 = vld [vmem:[#allocation3 + $0x122] sm:$0xff] }
 0x2f2   :  { %v14014_v1 = vpop.eup %14013  ;;  %2421 = vst.msk [vmem:[#allocation2 + $0x460] sm:$0xff] %vm2280_vm5, %v14012_v62  ;;  %v16048_v62 = vld [vmem:[#allocation3 + $0x132] sm:$0xff] }
 0x2f3   :  { %12505 = vmatmul.mubr.msk.f32.vlgmr.msra.gmra.mrb[0].mxu1 %vm2280_vm5, %v16751_v57  ;;  %v14016_v3 = vpop.eup %14015  ;;  %2424 = vst.msk [vmem:[#allocation2 + $0x478] sm:$0xff] %vm2280_vm5, %v14014_v1 }
 0x2f4   :  { %12529 = vmatpush3.msk.msra.mxu1 %vm3084_vm4, %v15791_v16  ;;  %12507 = vmatprep.mubr.msk.f32.mxu1 %vm2280_vm5, %v16752_v59  ;;  %2423 = vst.msk [vmem:[#allocation2 + $0x470] sm:$0xff] %vm2280_vm5, %v14016_v3  ;;  %v16753_v16 = vld [vmem:[#allocation19_spill] sm:$0xff]  ;;  %v16054_v3 = vld [vmem:[#allocation3 + $0x142] sm:$0xff] }
 0x2f5   :  { %12554 = vmatprep.subr.msk.mxu1 %vm3084_vm4, %v11050_v54 }
 0x2f7   :  { %12508 = vmatmul.mubr.msk.f32.gmra.mrb[2].mxu1 %vm2280_vm5, %v15506_v34  ;;  %v16754_v34 = vld [vmem:[#allocation20_spill] sm:$0xff] }
 0x2f8   :  { %12510 = vmatprep.mubr.msk.f32.mxu1 %vm2280_vm5, %v15513_v36  ;;  %v15877_v36 = vld [vmem:[#allocation3 + $0x154] sm:$0xff] }
 0x2f9   :  { %v2615_v25 = vld [vmem:[#allocation2 + $0x461] ss:$2 sm:$0xf] }
 0x2fa   :  { %v2711_v8 = vld [vmem:[#allocation2 + $0x478] ss:$2 sm:$0xf] }
 0x2fb   :  { %12511 = vmatmul.mubr.msk.f32.gmra.mrb[4].mxu1 %vm2280_vm5, %v15517_v44  ;;  %v6422_v44 = vld [vmem:[#allocation3 + $0x30] sm:$0xff] }
 0x2fc   :  { %12513 = vmatprep.mubr.msk.f32.mxu1 %vm2280_vm5, %v16753_v16 }
 0x2ff   :  { %12514 = vmatmul.mubr.msk.f32.gmra.mrb[6].mxu1 %vm2280_vm5, %v15859_v24 }
 0x300   :  { %12516 = vmatprep.mubr.msk.f32.mxu1 %vm2280_vm5, %v15537_v61  ;;  %v15882_v61 = vld [vmem:[#allocation3 + $0x40] sm:$0xff] }
 0x303   :  { %12517 = vmatmul.mubr.msk.f32.gmra.mrb[8].mxu1 %vm2280_vm5, %v15541_v63  ;;  %v11068_v63 = vld [vmem:[%s16710_s3 + $0x88] sm:$0x3f] }
 0x304   :  { %12519 = vmatprep.mubr.msk.f32.mxu1 %vm2280_vm5, %v15548_v12  ;;  %v15889_v12 = vld [vmem:[#allocation3 + $0x50] sm:$0xff] }
 0x307   :  { %12520 = vmatmul.mubr.msk.f32.gmra.mrb[10].mxu1 %vm2280_vm5, %v15552_v15  ;;  %v15895_v15 = vld [vmem:[#allocation3 + $0x60] sm:$0xff] }
 0x308   :  { %12522 = vmatprep.mubr.msk.f32.mxu1 %vm2280_vm5, %v15560_v31  ;;  %v15899_v31 = vld [vmem:[#allocation3 + $0x70] sm:$0xff] }
 0x30b   :  { %12523 = vmatmul.mubr.msk.f32.gmra.mrb[12].mxu1 %vm2280_vm5, %v15564_v0  ;;  %v15907_v0 = vld [vmem:[#allocation3 + $0xa0] sm:$0xff] }
 0x30c   :  { %12525 = vmatprep.mubr.msk.f32.mxu1 %vm2280_vm5, %v16754_v34 }
 0x30f   :  { %12526 = vmatmul.mubr.msk.f32.gmra.mrb[14].mxu1 %vm2280_vm5, %v15877_v36 }
 0x310   :  { %12530 = vmatprep.mubr.msk.f32.mxu1 %vm2280_vm5, %v6422_v44  ;;  %v16064_v44 = vld [vmem:[#allocation3 + $0x162] sm:$0xff] }
 0x313   :  { %12531 = vmatmul.mubr.msk.f32.vlgmr.msra.gmra.mrb[0].mxu1 %vm2280_vm5, %v15882_v61 }
 0x314   :  { %12555 = vmatpush3.msk.msra.mxu1 %vm3084_vm4, %v11050_v54  ;;  %12533 = vmatprep.mubr.msk.f32.mxu1 %vm2280_vm5, %v15889_v12  ;;  %v16030_v54 = vld [vmem:[#allocation3 + $0x102] sm:$0xff] }
 0x315   :  { %12580 = vmatprep.subr.msk.mxu1 %vm3084_vm4, %v11068_v63 }
 0x317   :  { %12534 = vmatmul.mubr.msk.f32.gmra.mrb[2].mxu1 %vm2280_vm5, %v15895_v15 }
 0x318   :  { %12536 = vmatprep.mubr.msk.f32.mxu1 %vm2280_vm5, %v15899_v31 }
 0x31b   :  { %12537 = vmatmul.mubr.msk.f32.gmra.mrb[4].mxu1 %vm2280_vm5, %v15614_v14  ;;  %v15920_v14 = vld [vmem:[#allocation3 + $0x120] sm:$0xff] }
 0x31c   :  { %12539 = vmatprep.mubr.msk.f32.mxu1 %vm2280_vm5, %v15622_v56  ;;  %v15924_v56 = vld [vmem:[#allocation3 + $0x130] sm:$0xff] }
 0x31f   :  { %12540 = vmatmul.mubr.msk.f32.gmra.mrb[6].mxu1 %vm2280_vm5, %v15907_v0 }
 0x320   :  { %12542 = vmatprep.mubr.msk.f32.mxu1 %vm2280_vm5, %v6430_v42  ;;  %v7112_v42 = vld [vmem:[#allocation3 + $0x33] sm:$0xff] }
 0x323   :  { %12543 = vmatmul.mubr.msk.f32.gmra.mrb[8].mxu1 %vm2280_vm5, %v15912_v5 }
 0x324   :  { %12545 = vmatprep.mubr.msk.f32.mxu1 %vm2280_vm5, %v15916_v19 }
 0x327   :  { %12546 = vmatmul.mubr.msk.f32.gmra.mrb[10].mxu1 %vm2280_vm5, %v15920_v14 }
 0x328   :  { %12548 = vmatprep.mubr.msk.f32.mxu1 %vm2280_vm5, %v15924_v56 }
 0x32b   :  { %12549 = vmatmul.mubr.msk.f32.gmra.mrb[12].mxu1 %vm2280_vm5, %v15650_v4  ;;  %v15955_v4 = vld [vmem:[#allocation3 + $0xa1] sm:$0xff] }
 0x32c   :  { %12551 = vmatprep.mubr.msk.f32.mxu1 %vm2280_vm5, %v15660_v29  ;;  %v15961_v29 = vld [vmem:[#allocation3 + $0x101] sm:$0xff] }
 0x32f   :  { %12552 = vmatmul.mubr.msk.f32.gmra.mrb[14].mxu1 %vm2280_vm5, %v15932_v6 }
 0x330   :  { %12556 = vmatprep.mubr.msk.f32.mxu1 %vm2280_vm5, %v15673_v17  ;;  %v2517_v17 = vld [vmem:[#allocation2 + $0x450] ss:$2 sm:$0xff] }
 0x333   :  { %12557 = vmatmul.mubr.msk.f32.vlgmr.msra.gmra.mrb[0].mxu1 %vm2280_vm5, %v15684_v18  ;;  %v2613_v18 = vld [vmem:[#allocation2 + $0x451] ss:$2 sm:$0xff] }
 0x334   :  { %12581 = vmatpush3.msk.msra.mxu1 %vm3084_vm4, %v11068_v63  ;;  %12559 = vmatprep.mubr.msk.f32.mxu1 %vm2280_vm5, %v15690_v30  ;;  %v2709_v30 = vld [vmem:[#allocation2 + $0x468] ss:$2 sm:$0xff] }
 0x335   :  { %12606 = vmatprep.subr.msk.mxu1 %vm3084_vm4, %v11086_v32 }
 0x337   :  { %12560 = vmatmul.mubr.msk.f32.gmra.mrb[2].mxu1 %vm2280_vm5, %v15695_v23  ;;  %v15965_v23 = vld [vmem:[#allocation3 + $0x111] sm:$0xff] }
 0x338   :  { %12562 = vmatprep.mubr.msk.f32.mxu1 %vm2280_vm5, %v15703_v38  ;;  %v2805_v38 = vld [vmem:[#allocation2 + $0x469] ss:$2 sm:$0xff] }
 0x339   :  { %v2902_v51 = vmax.f32 %v2709_v30, %v2805_v38 }
 0x33b   :  { %12563 = vmatmul.mubr.msk.f32.gmra.mrb[4].mxu1 %vm2280_vm5, %v15707_v22  ;;  %v2854_v22 = vmax.f32 %v2517_v17, %v2613_v18  ;;  %v16073_v17 = vld [vmem:[#allocation3 + $0x43] sm:$0xff] }
 0x33c   :  { %12565 = vmatprep.mubr.msk.f32.mxu1 %vm2280_vm5, %v15715_v40  ;;  %v2519_v40 = vld [vmem:[#allocation2 + $0x460] ss:$2 sm:$0xf] }
 0x33d   :  { %v2855_v20 = vmax.f32 %v2519_v40, %v2615_v25  ;;  %v2950_v47 = vmax.f32 %v2854_v22, %v2902_v51  ;;  %v11122_v18 = vld [vmem:[%s16710_s3 + $0xa0] sm:$0x3f]  ;;  %v16096_v51 = vld [vmem:[#allocation3 + $0x73] sm:$0xff] }
 0x33e   :  { %v16090_v22 = vld [vmem:[#allocation3 + $0x63] sm:$0xff] }
 0x33f   :  { %12566 = vmatmul.mubr.msk.f32.gmra.mrb[6].mxu1 %vm2280_vm5, %v15955_v4  ;;  %2999 = vst.msk [vmem:[#allocation3 + $0x170] sm:$0xff] %vm2280_vm5, %v2950_v47  ;;  %v16113_v47 = vld [vmem:[#allocation3 + $0x103] sm:$0xff] }
 0x340   :  { %12568 = vmatprep.mubr.msk.f32.mxu1 %vm2280_vm5, %v15724_v33  ;;  %v2807_v33 = vld [vmem:[#allocation2 + $0x479] ss:$2 sm:$0xf] }
 0x341   :  { %v2903_v13 = vmax.f32 %v2711_v8, %v2807_v33  ;;  %v16102_v8 = vld [vmem:[#allocation3 + $0x83] sm:$0xff] }
 0x342   :  { %v16108_v33 = vld [vmem:[#allocation3 + $0xa3] sm:$0xff] }
 0x343   :  { %12569 = vmatmul.mubr.msk.f32.gmra.mrb[8].mxu1 %vm2280_vm5, %v15961_v29  ;;  %v2951_v48 = vmax.f32 %v2855_v20, %v2903_v13  ;;  %v7120_v20 = vld [vmem:[#allocation3 + $0xf3] sm:$0xff] }
 0x344   :  { %12571 = vmatprep.mubr.msk.f32.mxu1 %vm2280_vm5, %v15965_v23  ;;  %v16117_v13 = vld [vmem:[#allocation3 + $0x113] sm:$0xff] }
 0x345   :  { %3000 = vst.msk [vmem:[#allocation3 + $0x178] sm:$0xf] %vm2953_vm6, %v2951_v48  ;;  %v16121_v48 = vld [vmem:[#allocation3 + $0x123] sm:$0xff] }
 0x347   :  { %12572 = vmatmul.mubr.msk.f32.gmra.mrb[10].mxu1 %vm2280_vm5, %v15969_v9 }
 0x348   :  { %12574 = vmatprep.mubr.msk.f32.mxu1 %vm2280_vm5, %v15973_v26 }
 0x34b   :  { %12575 = vmatmul.mubr.msk.f32.gmra.mrb[12].mxu1 %vm2280_vm5, %v15978_v7 }
 0x34c   :  { %12577 = vmatprep.mubr.msk.f32.mxu1 %vm2280_vm5, %v15741_v11  ;;  %v16003_v11 = vld [vmem:[#allocation3 + $0x62] sm:$0xff] }
 0x34f   :  { %12578 = vmatmul.mubr.msk.f32.gmra.mrb[14].mxu1 %vm2280_vm5, %v15985_v10 }
 0x350   :  { %12582 = vmatprep.mubr.msk.f32.mxu1 %vm2280_vm5, %v6882_v50  ;;  %v16129_v50 = vld [vmem:[#allocation3 + $0x143] sm:$0xff] }
 0x353   :  { %12583 = vmatmul.mubr.msk.f32.vlgmr.msra.gmra.mrb[0].mxu1 %vm2280_vm5, %v15990_v21 }
 0x354   :  { %12607 = vmatpush3.msk.msra.mxu1 %vm3084_vm4, %v11086_v32  ;;  %12585 = vmatprep.mubr.msk.f32.mxu1 %vm2280_vm5, %v15997_v2 }
 0x355   :  { %12632 = vmatprep.subr.msk.mxu1 %vm3084_vm4, %v11104_v53 }
 0x357   :  { %12586 = vmatmul.mubr.msk.f32.gmra.mrb[2].mxu1 %vm2280_vm5, %v16003_v11 }
 0x358   :  { %12588 = vmatprep.mubr.msk.f32.mxu1 %vm2280_vm5, %v16007_v27 }
 0x35b   :  { %12589 = vmatmul.mubr.msk.f32.gmra.mrb[4].mxu1 %vm2280_vm5, %v16011_v35 }
 0x35c   :  { %v16013_v37 = vpop.f32.mrb[144].mxu0  ;;  %12591 = vmatprep.mubr.msk.f32.mxu1 %vm2280_vm5, %v15764_v28  ;;  %v16036_v28 = vld [vmem:[#allocation3 + $0x112] sm:$0xff] }
 0x35d   :  { %v16017_v39 = vpop.f32.mrb[145].mxu0 }
 0x35f   :  { %12592 = vmatmul.mubr.msk.f32.gmra.mrb[6].mxu1 %vm2280_vm5, %v16021_v41 }
 0x360   :  { %v16023_v43 = vpop.f32.mrb[146].mxu0  ;;  %12594 = vmatprep.mubr.msk.f32.mxu1 %vm2280_vm5, %v6890_v49  ;;  %v7342_v49 = vld [vmem:[#allocation3 + $0x34] sm:$0xff] }
 0x361   :  { %v16027_v52 = vpop.f32.mrb[147].mxu0 }
 0x363   :  { %12595 = vmatmul.mubr.msk.f32.gmra.mrb[8].mxu1 %vm2280_vm5, %v16030_v54 }
 0x364   :  { %v16032_v55 = vpop.f32.mrb[148].mxu0  ;;  %12597 = vmatprep.mubr.msk.f32.mxu1 %vm2280_vm5, %v16036_v28 }
 0x365   :  { %v16038_v57 = vpop.f32.mrb[149].mxu0 }
 0x366   :  { %16755 = vst [vmem:[#allocation9_spill] sm:$0xff] %v16038_v57  ;;  %v7577_v57 = vld [vmem:[#allocation3 + $0x80] sm:$0xff] }
 0x367   :  { %12598 = vmatmul.mubr.msk.f32.gmra.mrb[10].mxu1 %vm2280_vm5, %v16042_v58 }
 0x368   :  { %v16044_v59 = vpop.f32.mrb[150].mxu0  ;;  %12600 = vmatprep.mubr.msk.f32.mxu1 %vm2280_vm5, %v16048_v62 }
 0x369   :  { %16756 = vst [vmem:[#allocation10_spill] sm:$0xff] %v16044_v59  ;;  %v16050_v1 = vpop.f32.mrb[151].mxu0  ;;  %v11158_v59 = vld [vmem:[%s16710_s3 + $0xb0] sm:$0x3f] }
 0x36a   :  { %16757 = vst [vmem:[#allocation11_spill] sm:$0xff] %v16050_v1  ;;  %v16194_v1 = vld [vmem:[#allocation3 + $0x164] sm:$0xff] }
 0x36b   :  { %12601 = vmatmul.mubr.msk.f32.gmra.mrb[12].mxu1 %vm2280_vm5, %v16054_v3 }
 0x36c   :  { %v16056_v16 = vpop.f32.mrb[152].mxu0  ;;  %12603 = vmatprep.mubr.msk.f32.mxu1 %vm2280_vm5, %v15782_v60  ;;  %v16082_v60 = vld [vmem:[#allocation3 + $0x53] sm:$0xff] }
 0x36d   :  { %16758 = vst [vmem:[#allocation12_spill] sm:$0xff] %v16056_v16  ;;  %v16060_v34 = vpop.f32.mrb[153].mxu0  ;;  %v16184_v16 = vld [vmem:[#allocation3 + $0x134] sm:$0xff] }
 0x36e   :  { %16759 = vst [vmem:[#allocation13_spill] sm:$0xff] %v16060_v34  ;;  %v16180_v34 = vld [vmem:[#allocation3 + $0x124] sm:$0xff] }
 0x36f   :  { %12604 = vmatmul.mubr.msk.f32.gmra.mrb[14].mxu1 %vm2280_vm5, %v16064_v44 }
 0x370   :  { %v16066_v63 = vpop.f32.mrb[154].mxu0  ;;  %12608 = vmatprep.mubr.msk.f32.mxu1 %vm2280_vm5, %v7112_v42  ;;  %v16140_v42 = vld [vmem:[#allocation3 + $0x44] sm:$0xff] }
 0x371   :  { %16760 = vst [vmem:[#allocation14_spill] sm:$0xff] %v16066_v63  ;;  %v16070_v32 = vpop.f32.mrb[155].mxu0  ;;  %v16176_v63 = vld [vmem:[#allocation3 + $0x114] sm:$0xff] }
 0x372   :  { %16761 = vst [vmem:[#allocation15_spill] sm:$0xff] %v16070_v32  ;;  %v16172_v32 = vld [vmem:[#allocation3 + $0x104] sm:$0xff] }
 0x373   :  { %12609 = vmatmul.mubr.msk.f32.vlgmr.msra.gmra.mrb[0].mxu1 %vm2280_vm5, %v16073_v17 }
 0x374   :  { %v16078_v30 = vpop.f32.mrb[156].mxu0  ;;  %12633 = vmatpush3.msk.msra.mxu1 %vm3084_vm4, %v11104_v53  ;;  %12611 = vmatprep.mubr.msk.f32.mxu1 %vm2280_vm5, %v16082_v60  ;;  %v16135_v53 = vld [vmem:[#allocation3 + $0x163] sm:$0xff] }
 0x375   :  { %16762 = vst [vmem:[#allocation16_spill] sm:$0xff] %v16078_v30  ;;  %v16084_v38 = vpop.f32.mrb[157].mxu0  ;;  %12658 = vmatprep.subr.msk.mxu1 %vm3084_vm4, %v11122_v18  ;;  %v7350_v30 = vld [vmem:[#allocation3 + $0xf4] sm:$0xff] }
 0x376   :  { %16763 = vst [vmem:[#allocation17_spill] sm:$0xff] %v16084_v38  ;;  %v16161_v38 = vld [vmem:[#allocation3 + $0x84] sm:$0xff] }
 0x377   :  { %12612 = vmatmul.mubr.msk.f32.gmra.mrb[2].mxu1 %vm2280_vm5, %v16090_v22 }
 0x378   :  { %v16092_v40 = vpop.f32.mrb[158].mxu0  ;;  %12614 = vmatprep.mubr.msk.f32.mxu1 %vm2280_vm5, %v16096_v51 }
 0x379   :  { %16764 = vst [vmem:[#allocation18_spill] sm:$0xff] %v16092_v40  ;;  %v16098_v25 = vpop.f32.mrb[159].mxu0  ;;  %v16153_v40 = vld [vmem:[#allocation3 + $0x64] sm:$0xff] }
 0x37a   :  { %16765 = vst [vmem:[#allocation19_spill] sm:$0xff] %v16098_v25  ;;  %v16147_v25 = vld [vmem:[#allocation3 + $0x54] sm:$0xff] }
 0x37b   :  { %12615 = vmatmul.mubr.msk.f32.gmra.mrb[4].mxu1 %vm2280_vm5, %v16102_v8 }
 0x37c   :  { %12617 = vmatprep.mubr.msk.f32.mxu1 %vm2280_vm5, %v15811_v46  ;;  %v16125_v46 = vld [vmem:[#allocation3 + $0x133] sm:$0xff] }
 0x37f   :  { %12618 = vmatmul.mubr.msk.f32.gmra.mrb[6].mxu1 %vm2280_vm5, %v16108_v33 }
 0x380   :  { %12620 = vmatprep.mubr.msk.f32.mxu1 %vm2280_vm5, %v7120_v20  ;;  %v11140_v20 = vld [vmem:[%s16710_s3 + $0xa8] sm:$0x3f] }
 0x383   :  { %12621 = vmatmul.mubr.msk.f32.gmra.mrb[8].mxu1 %vm2280_vm5, %v16113_v47 }
 0x384   :  { %12623 = vmatprep.mubr.msk.f32.mxu1 %vm2280_vm5, %v16117_v13 }
 0x387   :  { %12624 = vmatmul.mubr.msk.f32.gmra.mrb[10].mxu1 %vm2280_vm5, %v16121_v48 }
 0x388   :  { %12626 = vmatprep.mubr.msk.f32.mxu1 %vm2280_vm5, %v16125_v46 }
 0x38b   :  { %12627 = vmatmul.mubr.msk.f32.gmra.mrb[12].mxu1 %vm2280_vm5, %v16129_v50 }
 0x38c   :  { %12629 = vmatprep.mubr.msk.f32.mxu1 %vm2280_vm5, %v15829_v45 }
 0x38f   :  { %12630 = vmatmul.mubr.msk.f32.gmra.mrb[14].mxu1 %vm2280_vm5, %v16135_v53 }
 0x390   :  { %12634 = vmatprep.mubr.msk.f32.mxu1 %vm2280_vm5, %v7342_v49  ;;  %v16157_v49 = vld [vmem:[#allocation3 + $0x74] sm:$0xff] }
 0x393   :  { %12635 = vmatmul.mubr.msk.f32.vlgmr.msra.gmra.mrb[0].mxu1 %vm2280_vm5, %v16140_v42 }
 0x394   :  { %12659 = vmatpush3.msk.msra.mxu1 %vm3084_vm4, %v11122_v18  ;;  %12637 = vmatprep.mubr.msk.f32.mxu1 %vm2280_vm5, %v16147_v25  ;;  %v16167_v18 = vld [vmem:[#allocation3 + $0xa4] sm:$0xff] }
 0x395   :  { %12684 = vmatprep.subr.msk.mxu1 %vm3084_vm4, %v11140_v20 }
 0x397   :  { %12638 = vmatmul.mubr.msk.f32.gmra.mrb[2].mxu1 %vm2280_vm5, %v16153_v40 }
 0x398   :  { %12640 = vmatprep.mubr.msk.f32.mxu1 %vm2280_vm5, %v16157_v49 }
 0x39b   :  { %12641 = vmatmul.mubr.msk.f32.gmra.mrb[4].mxu1 %vm2280_vm5, %v16161_v38 }
 0x39c   :  { %12643 = vmatprep.mubr.msk.f32.mxu1 %vm2280_vm5, %v15859_v24 }
 0x39f   :  { %12644 = vmatmul.mubr.msk.f32.gmra.mrb[6].mxu1 %vm2280_vm5, %v16167_v18 }
 0x3a0   :  { %12646 = vmatprep.mubr.msk.f32.mxu1 %vm2280_vm5, %v7350_v30  ;;  %v16188_v30 = vld [vmem:[#allocation3 + $0x144] sm:$0xff] }
 0x3a3   :  { %12647 = vmatmul.mubr.msk.f32.gmra.mrb[8].mxu1 %vm2280_vm5, %v16172_v32 }
 0x3a4   :  { %12649 = vmatprep.mubr.msk.f32.mxu1 %vm2280_vm5, %v16176_v63 }
 0x3a7   :  { %12650 = vmatmul.mubr.msk.f32.gmra.mrb[10].mxu1 %vm2280_vm5, %v16180_v34 }
 0x3a8   :  { %12652 = vmatprep.mubr.msk.f32.mxu1 %vm2280_vm5, %v16184_v16 }
 0x3ab   :  { %12653 = vmatmul.mubr.msk.f32.gmra.mrb[12].mxu1 %vm2280_vm5, %v16188_v30 }
 0x3ac   :  { %12655 = vmatprep.mubr.msk.f32.mxu1 %vm2280_vm5, %v15877_v36 }
 0x3af   :  { %12656 = vmatmul.mubr.msk.f32.gmra.mrb[14].mxu1 %vm2280_vm5, %v16194_v1 }
 0x3b0   :  { %12660 = vmatprep.mubr.msk.f32.mxu1 %vm2280_vm5, %v15882_v61  ;;  %v7578_v61 = vld [vmem:[#allocation3 + $0x90] sm:$0xff] }
 0x3b3   :  { %12661 = vmatmul.mubr.msk.f32.vlgmr.msra.gmra.mrb[0].mxu1 %vm2280_vm5, %v15889_v12  ;;  %v7580_v12 = vld [vmem:[#allocation3 + $0xb0] sm:$0xff] }
 0x3b4   :  { %12685 = vmatpush3.msk.msra.mxu1 %vm3084_vm4, %v11140_v20  ;;  %12663 = vmatprep.mubr.msk.f32.mxu1 %vm2280_vm5, %v15895_v15  ;;  %v7585_v15 = vld [vmem:[#allocation3 + $0x140] sm:$0xff]  ;;  %v7808_v20 = vld [vmem:[#allocation3 + $0x91] sm:$0xff] }
 0x3b5   :  { %12710 = vmatprep.subr.msk.mxu1 %vm3084_vm4, %v11158_v59 }
 0x3b7   :  { %12664 = vmatmul.mubr.msk.f32.gmra.mrb[2].mxu1 %vm2280_vm5, %v15899_v31  ;;  %v7586_v31 = vld [vmem:[#allocation3 + $0x150] sm:$0xff] }
 0x3b8   :  { %12666 = vmatprep.mubr.msk.f32.mxu1 %vm2280_vm5, %v7577_v57  ;;  %v7807_v57 = vld [vmem:[#allocation3 + $0x81] sm:$0xff] }
 0x3bb   :  { %12667 = vmatmul.mubr.msk.f32.gmra.mrb[4].mxu1 %vm2280_vm5, %v7578_v61  ;;  %v7810_v61 = vld [vmem:[#allocation3 + $0xb1] sm:$0xff] }
 0x3bc   :  { %12669 = vmatprep.mubr.msk.f32.mxu1 %vm2280_vm5, %v15907_v0  ;;  %v7588_v0 = vld [vmem:[#allocation3 + $0x170] sm:$0xff] }
 0x3bf   :  { %12670 = vmatmul.mubr.msk.f32.gmra.mrb[6].mxu1 %vm2280_vm5, %v7580_v12 }
 0x3c0   :  { %12672 = vmatprep.mubr.msk.f32.mxu1 %vm2280_vm5, %v15912_v5  ;;  %v7803_v5 = vld [vmem:[#allocation3 + $0x41] sm:$0xff] }
 0x3c3   :  { %12673 = vmatmul.mubr.msk.f32.gmra.mrb[8].mxu1 %vm2280_vm5, %v15916_v19  ;;  %v7804_v19 = vld [vmem:[#allocation3 + $0x51] sm:$0xff] }
 0x3c4   :  { %12675 = vmatprep.mubr.msk.f32.mxu1 %vm2280_vm5, %v15920_v14  ;;  %v11176_v14 = vld [vmem:[%s16710_s3 + $0xb8] sm:$0x3f] }
 0x3c7   :  { %12676 = vmatmul.mubr.msk.f32.gmra.mrb[10].mxu1 %vm2280_vm5, %v15924_v56  ;;  %v7805_v56 = vld [vmem:[#allocation3 + $0x61] sm:$0xff] }
 0x3c8   :  { %12678 = vmatprep.mubr.msk.f32.mxu1 %vm2280_vm5, %v7585_v15 }
 0x3cb   :  { %12679 = vmatmul.mubr.msk.f32.gmra.mrb[12].mxu1 %vm2280_vm5, %v7586_v31 }
 0x3cc   :  { %12681 = vmatprep.mubr.msk.f32.mxu1 %vm2280_vm5, %v15932_v6  ;;  %v7806_v6 = vld [vmem:[#allocation3 + $0x71] sm:$0xff] }
 0x3cf   :  { %12682 = vmatmul.mubr.msk.f32.gmra.mrb[14].mxu1 %vm2280_vm5, %v7588_v0 }
 0x3d0   :  { %12686 = vmatprep.mubr.msk.f32.mxu1 %vm2280_vm5, %v7803_v5 }
 0x3d3   :  { %12687 = vmatmul.mubr.msk.f32.vlgmr.msra.gmra.mrb[0].mxu1 %vm2280_vm5, %v7804_v19 }
 0x3d4   :  { %12711 = vmatpush3.msk.msra.mxu1 %vm3084_vm4, %v11158_v59  ;;  %12689 = vmatprep.mubr.msk.f32.mxu1 %vm2280_vm5, %v7805_v56  ;;  %v7816_v59 = vld [vmem:[#allocation3 + $0x151] sm:$0xff]  ;;  %v16769_v56 = vld [vmem:[#allocation12_spill] sm:$0xff] }
 0x3d5   :  { %12736 = vmatprep.subr.msk.mxu1 %vm3084_vm4, %v11176_v14 }
 0x3d7   :  { %12690 = vmatmul.mubr.msk.f32.gmra.mrb[2].mxu1 %vm2280_vm5, %v7806_v6 }
 0x3d8   :  { %12692 = vmatprep.mubr.msk.f32.mxu1 %vm2280_vm5, %v7807_v57 }
 0x3db   :  { %12693 = vmatmul.mubr.msk.f32.gmra.mrb[4].mxu1 %vm2280_vm5, %v7808_v20 }
 0x3dc   :  { %12695 = vmatprep.mubr.msk.f32.mxu1 %vm2280_vm5, %v15955_v4  ;;  %v7818_v4 = vld [vmem:[#allocation3 + $0x171] sm:$0xff] }
 0x3df   :  { %12696 = vmatmul.mubr.msk.f32.gmra.mrb[6].mxu1 %vm2280_vm5, %v7810_v61  ;;  %v16770_v61 = vld [vmem:[#allocation13_spill] sm:$0xff] }
 0x3e0   :  { %12698 = vmatprep.mubr.msk.f32.mxu1 %vm2280_vm5, %v15961_v29  ;;  %v11194_v29 = vld [vmem:[%s16710_s3 + $0xc0] sm:$0x3f] }
 0x3e3   :  { %12699 = vmatmul.mubr.msk.f32.gmra.mrb[8].mxu1 %vm2280_vm5, %v15965_v23  ;;  %v8038_v23 = vld [vmem:[#allocation3 + $0x92] sm:$0xff] }
 0x3e4   :  { %12701 = vmatprep.mubr.msk.f32.mxu1 %vm2280_vm5, %v15969_v9  ;;  %v8040_v9 = vld [vmem:[#allocation3 + $0xb2] sm:$0xff] }
 0x3e7   :  { %12702 = vmatmul.mubr.msk.f32.gmra.mrb[10].mxu1 %vm2280_vm5, %v15973_v26  ;;  %v8046_v26 = vld [vmem:[#allocation3 + $0x152] sm:$0xff] }
 0x3e8   :  { %12704 = vmatprep.mubr.msk.f32.mxu1 %vm2280_vm5, %v15978_v7  ;;  %v8048_v7 = vld [vmem:[#allocation3 + $0x172] sm:$0xff] }
 0x3eb   :  { %12705 = vmatmul.mubr.msk.f32.gmra.mrb[12].mxu1 %vm2280_vm5, %v7816_v59 }
 0x3ec   :  { %12707 = vmatprep.mubr.msk.f32.mxu1 %vm2280_vm5, %v15985_v10  ;;  %v8268_v10 = vld [vmem:[#allocation3 + $0x93] sm:$0xff] }
 0x3ef   :  { %12708 = vmatmul.mubr.msk.f32.gmra.mrb[14].mxu1 %vm2280_vm5, %v7818_v4 }
 0x3f0   :  { %12712 = vmatprep.mubr.msk.f32.mxu1 %vm2280_vm5, %v15990_v21  ;;  %v8270_v21 = vld [vmem:[#allocation3 + $0xb3] sm:$0xff] }
 0x3f3   :  { %12713 = vmatmul.mubr.msk.f32.vlgmr.msra.gmra.mrb[0].mxu1 %vm2280_vm5, %v15997_v2  ;;  %v8278_v2 = vld [vmem:[#allocation3 + $0x173] sm:$0xff] }
 0x3f4   :  { %12737 = vmatpush3.msk.msra.mxu1 %vm3084_vm4, %v11176_v14  ;;  %12715 = vmatprep.mubr.msk.f32.mxu1 %vm2280_vm5, %v16003_v11  ;;  %v11213_v11 = vld [vmem:[%s16712_s5 + $0x10] sm:$0xff] }
 0x3f5   :  { %12762 = vmatprep.subr.msk.mxu1 %vm3084_vm4, %v11194_v29 }
 0x3f7   :  { %12716 = vmatmul.mubr.msk.f32.gmra.mrb[2].mxu1 %vm2280_vm5, %v16007_v27  ;;  %v11214_v27 = vld [vmem:[%s16712_s5 + $0x18] sm:$0xff] }
 0x3f8   :  { %12718 = vmatprep.mubr.msk.f32.mxu1 %vm2280_vm5, %v16011_v35  ;;  %v14125_v35 = vmov 0.0|0.0  }
 0x3f9   :  { %12968 = vmatprep.subr.bf16.mxu0 %v14125_v35 }
 0x3fb   :  { %12719 = vmatmul.mubr.msk.f32.gmra.mrb[4].mxu1 %vm2280_vm5, %v8038_v23 }
 0x3fc   :  { %12721 = vmatprep.mubr.msk.f32.mxu1 %vm2280_vm5, %v16021_v41  ;;  %v12969_v41 = vpack.c.bf16 %v11214_v27, %v11213_v11 }
 0x3fe   :  { %12970 = vmatpush3.bf16.msra.mxu0 %v12969_v41 }
 0x3ff   :  { %12722 = vmatmul.mubr.msk.f32.gmra.mrb[6].mxu1 %vm2280_vm5, %v8040_v9  ;;  %12971 = vmatprep.subr.bf16.mxu0 %v14125_v35 }
 0x400   :  { %12724 = vmatprep.mubr.msk.f32.mxu1 %vm2280_vm5, %v16030_v54 }
 0x403   :  { %12725 = vmatmul.mubr.msk.f32.gmra.mrb[8].mxu1 %vm2280_vm5, %v16036_v28  ;;  %v16363_v28 = vld [vmem:[%s16711_s4] ss:$0 sm:$0xff] }
 0x404   :  { %12727 = vmatprep.mubr.msk.f32.mxu1 %vm2280_vm5, %v16042_v58 }
 0x407   :  { %12728 = vmatmul.mubr.msk.f32.gmra.mrb[10].mxu1 %vm2280_vm5, %v16048_v62 }
 0x408   :  { %12730 = vmatprep.mubr.msk.f32.mxu1 %vm2280_vm5, %v16054_v3 }
 0x40b   :  { %12731 = vmatmul.mubr.msk.f32.gmra.mrb[12].mxu1 %vm2280_vm5, %v8046_v26 }
 0x40c   :  { %12733 = vmatprep.mubr.msk.f32.mxu1 %vm2280_vm5, %v16064_v44 }
 0x40f   :  { %12734 = vmatmul.mubr.msk.f32.gmra.mrb[14].mxu1 %vm2280_vm5, %v8048_v7 }
 0x410   :  { %12738 = vmatprep.mubr.msk.f32.mxu1 %vm2280_vm5, %v16073_v17 }
 0x413   :  { %12739 = vmatmul.mubr.msk.f32.vlgmr.msra.gmra.mrb[0].mxu1 %vm2280_vm5, %v16082_v60 }
 0x414   :  { %12763 = vmatpush3.msk.msra.mxu1 %vm3084_vm4, %v11194_v29  ;;  %12741 = vmatprep.mubr.msk.f32.mxu1 %vm2280_vm5, %v16090_v22 }
 0x417   :  { %12742 = vmatmul.mubr.msk.f32.gmra.mrb[2].mxu1 %vm2280_vm5, %v16096_v51 }
 0x418   :  { %12744 = vmatprep.mubr.msk.f32.mxu1 %vm2280_vm5, %v16102_v8 }
 0x41b   :  { %12745 = vmatmul.mubr.msk.f32.gmra.mrb[4].mxu1 %vm2280_vm5, %v8268_v10 }
 0x41c   :  { %12747 = vmatprep.mubr.msk.f32.mxu1 %vm2280_vm5, %v16108_v33 }
 0x41f   :  { %12748 = vmatmul.mubr.msk.f32.gmra.mrb[6].mxu1 %vm2280_vm5, %v8270_v21 }
 0x420   :  { %12750 = vmatprep.mubr.msk.f32.mxu1 %vm2280_vm5, %v16113_v47  ;;  %v16766_v47 = vld [vmem:[#allocation9_spill] sm:$0xff] }
 0x423   :  { %12751 = vmatmul.mubr.msk.f32.gmra.mrb[8].mxu1 %vm2280_vm5, %v16117_v13 }
 0x424   :  { %12753 = vmatprep.mubr.msk.f32.mxu1 %vm2280_vm5, %v16121_v48 }
 0x427   :  { %12754 = vmatmul.mubr.msk.f32.gmra.mrb[10].mxu1 %vm2280_vm5, %v16125_v46 }
 0x428   :  { %12756 = vmatprep.mubr.msk.f32.mxu1 %vm2280_vm5, %v16129_v50 }
 0x42b   :  { %12757 = vmatmul.mubr.msk.f32.gmra.mrb[12].mxu1 %vm2280_vm5, %v15829_v45  ;;  %v8500_v45 = vld [vmem:[#allocation3 + $0xb4] sm:$0xff] }
 0x42c   :  { %12759 = vmatprep.mubr.msk.f32.mxu1 %vm2280_vm5, %v16135_v53 }
 0x42f   :  { %12760 = vmatmul.mubr.msk.f32.gmra.mrb[14].mxu1 %vm2280_vm5, %v8278_v2 }
 0x430   :  { %12764 = vmatprep.mubr.msk.f32.mxu1 %vm2280_vm5, %v16140_v42  ;;  %v16767_v42 = vld [vmem:[#allocation10_spill] sm:$0xff] }
 0x433   :  { %12765 = vmatmul.mubr.msk.f32.vlgmr.msra.gmra.mrb[0].mxu1 %vm2280_vm5, %v16147_v25 }
 0x434   :  { %12767 = vmatprep.mubr.msk.f32.mxu1 %vm2280_vm5, %v16153_v40 }
 0x437   :  { %12768 = vmatmul.mubr.msk.f32.gmra.mrb[2].mxu1 %vm2280_vm5, %v16157_v49 }
 0x438   :  { %12770 = vmatprep.mubr.msk.f32.mxu1 %vm2280_vm5, %v16161_v38 }
 0x43b   :  { %12771 = vmatmul.mubr.msk.f32.gmra.mrb[4].mxu1 %vm2280_vm5, %v15859_v24  ;;  %v8508_v24 = vld [vmem:[#allocation3 + $0x174] sm:$0xff] }
 0x43c   :  { %12773 = vmatprep.mubr.msk.f32.mxu1 %vm2280_vm5, %v16167_v18 }
 0x43f   :  { %12774 = vmatmul.mubr.msk.f32.gmra.mrb[6].mxu1 %vm2280_vm5, %v8500_v45 }
 0x440   :  { %12776 = vmatprep.mubr.msk.f32.mxu1 %vm2280_vm5, %v16172_v32 }
 0x443   :  { %12777 = vmatmul.mubr.msk.f32.gmra.mrb[8].mxu1 %vm2280_vm5, %v16176_v63 }
 0x444   :  { %12779 = vmatprep.mubr.msk.f32.mxu1 %vm2280_vm5, %v16180_v34 }
 0x447   :  { %12780 = vmatmul.mubr.msk.f32.gmra.mrb[10].mxu1 %vm2280_vm5, %v16184_v16 }
 0x448   :  { %12782 = vmatprep.mubr.msk.f32.mxu1 %vm2280_vm5, %v16188_v30 }
 0x44b   :  { %12783 = vmatmul.mubr.msk.f32.gmra.mrb[12].mxu1 %vm2280_vm5, %v15877_v36  ;;  %v14127_v36 = vmov 0.0  }
 0x44c   :  { %12785 = vmatprep.mubr.msk.f32.mxu1 %vm2280_vm5, %v16194_v1  ;;  %12792 = vmatprep.mubr.msk.f32.mxu0 %vm14126_vm7, %v14127_v36 }
 0x44f   :  { %12786 = vmatmul.mubr.msk.f32.gmra.mrb[14].mxu1 %vm2280_vm5, %v8508_v24  ;;  %v16771_v24 = vld [vmem:[#allocation14_spill] sm:$0xff] }
 0x506   :  { %v12766_v54 = vpop.f32.mrb[0].mxu1 }
 0x507   :  { %v13052_v58 = vadd.f32 %v12766_v54, %v16013_v37  ;;  %v8628_v62 = vpop.f32.mrb[1].mxu1  ;;  %v16772_v54 = vld [vmem:[#allocation15_spill] sm:$0xff] }
 0x508   :  { %v13053_v1 = vadd.f32 %v8628_v62, %v16017_v39 }
 0x509   :  { %v8731_v3 = vadd.f32 %v13052_v58, %v16363_v28 }
 0x50a   :  { %v8730_v16 = vadd.f32 %v13053_v1, %v16363_v28  ;;  %v12769_v34 = vpop.f32.mrb[2].mxu1 }
 0x50b   :  { %v8747_v44 = vsub.f32 0.0, %v8731_v3  ;;  %v13054_v63 = vadd.f32 %v12769_v34, %v16023_v43  ;;  %v8638_v32 = vpop.f32.mrb[3].mxu1 }
 0x50c   :  { %v8746_v17 = vsub.f32 0.0, %v8730_v16  ;;  %v13055_v60 = vadd.f32 %v8638_v32, %v16027_v52 }
 0x50d   :  { %v8764_v38 = vmul.f32 1.442695, %v8747_v44  ;;  %v8733_v22 = vadd.f32 %v13054_v63, %v16363_v28 }
 0x50e   :  { %v8762_v40 = vmul.f32 1.442695, %v8746_v17  ;;  %v8732_v37 = vadd.f32 %v13055_v60, %v16363_v28  ;;  %v12772_v51 = vpop.f32.mrb[4].mxu1 }
 0x50f   :  { %14017 = vpow2.f32 %v8764_v38  ;;  %v8749_v39 = vsub.f32 0.0, %v8733_v22  ;;  %v13056_v25 = vadd.f32 %v12772_v51, %v16032_v55  ;;  %v8648_v8 = vpop.f32.mrb[5].mxu1  ;;  %v16768_v55 = vld [vmem:[#allocation11_spill] sm:$0xff]  ;;  %v16773_v38 = vld [vmem:[#allocation16_spill] sm:$0xff]  ;;  %v16774_v51 = vld [vmem:[#allocation17_spill] sm:$0xff] }
 0x510   :  { %14019 = vpow2.f32 %v8762_v40  ;;  %v8748_v33 = vsub.f32 0.0, %v8732_v37  ;;  %v13057_v43 = vadd.f32 %v8648_v8, %v16766_v47 }
 0x511   :  { %v8768_v13 = vmul.f32 1.442695, %v8749_v39  ;;  %v8735_v48 = vadd.f32 %v13056_v25, %v16363_v28 }
 0x512   :  { %v8766_v52 = vmul.f32 1.442695, %v8748_v33  ;;  %v8734_v46 = vadd.f32 %v13057_v43, %v16363_v28  ;;  %v12775_v50 = vpop.f32.mrb[6].mxu1 }
 0x513   :  { %14021 = vpow2.f32 %v8768_v13  ;;  %v8751_v53 = vsub.f32 0.0, %v8735_v48  ;;  %v13058_v49 = vadd.f32 %v12775_v50, %v16767_v42  ;;  %v8658_v18 = vpop.f32.mrb[7].mxu1 }
 0x514   :  { %14023 = vpow2.f32 %v8766_v52  ;;  %v8750_v30 = vsub.f32 0.0, %v8734_v46  ;;  %v13059_v12 = vadd.f32 %v8658_v18, %v16768_v55 }
 0x515   :  { %v8772_v15 = vmul.f32 1.442695, %v8751_v53  ;;  %v8737_v31 = vadd.f32 %v13058_v49, %v16363_v28  ;;  %v16775_v53 = vld [vmem:[#allocation18_spill] sm:$0xff] }
 0x516   :  { %v8770_v0 = vmul.f32 1.442695, %v8750_v30  ;;  %v8736_v5 = vadd.f32 %v13059_v12, %v16363_v28  ;;  %v12778_v19 = vpop.f32.mrb[8].mxu1  ;;  %v16776_v30 = vld [vmem:[#allocation19_spill] sm:$0xff] }
 0x517   :  { %14025 = vpow2.f32 %v8772_v15  ;;  %v8753_v14 = vsub.f32 0.0, %v8737_v31  ;;  %v13060_v6 = vadd.f32 %v12778_v19, %v16769_v56  ;;  %v8668_v57 = vpop.f32.mrb[9].mxu1 }
 0x518   :  { %14027 = vpow2.f32 %v8770_v0  ;;  %v8752_v20 = vsub.f32 0.0, %v8736_v5  ;;  %v13061_v59 = vadd.f32 %v8668_v57, %v16770_v61 }
 0x519   :  { %v14018_v4 = vpop.eup %14017  ;;  %v8776_v29 = vmul.f32 1.442695, %v8753_v14  ;;  %v8739_v23 = vadd.f32 %v13060_v6, %v16363_v28 }
 0x51a   :  { %v14020_v9 = vpop.eup %14019  ;;  %v8795_v26 = vadd.f32 1.0, %v14018_v4  ;;  %v8774_v7 = vmul.f32 1.442695, %v8752_v20  ;;  %v8738_v10 = vadd.f32 %v13061_v59, %v16363_v28  ;;  %v12781_v21 = vpop.f32.mrb[10].mxu1 }
 0x51b   :  { %v8794_v2 = vadd.f32 1.0, %v14020_v9  ;;  %14029 = vpow2.f32 %v8776_v29  ;;  %v8755_v45 = vsub.f32 0.0, %v8739_v23  ;;  %v13062_v11 = vadd.f32 %v12781_v21, %v16771_v24  ;;  %v8678_v27 = vpop.f32.mrb[11].mxu1 }
 0x51c   :  { %14031 = vrcp.f32 %v8795_v26  ;;  %v8754_v41 = vsub.f32 0.0, %v8738_v10  ;;  %v13063_v58 = vadd.f32 %v8678_v27, %v16772_v54 }
 0x51d   :  { %v14022_v62 = vpop.eup %14021  ;;  %14033 = vrcp.f32 %v8794_v2  ;;  %v8780_v1 = vmul.f32 1.442695, %v8755_v45  ;;  %v8741_v3 = vadd.f32 %v13062_v11, %v16363_v28 }
 0x51e   :  { %v14024_v16 = vpop.eup %14023  ;;  %v8797_v34 = vadd.f32 1.0, %v14022_v62  ;;  %14035 = vpow2.f32 %v8774_v7  ;;  %v8778_v44 = vmul.f32 1.442695, %v8754_v41  ;;  %v8740_v63 = vadd.f32 %v13063_v58, %v16363_v28  ;;  %v12784_v32 = vpop.f32.mrb[12].mxu1 }
 0x51f   :  { %v8796_v17 = vadd.f32 1.0, %v14024_v16  ;;  %14037 = vpow2.f32 %v8780_v1  ;;  %v8757_v60 = vsub.f32 0.0, %v8741_v3  ;;  %v13064_v22 = vadd.f32 %v12784_v32, %v16773_v38  ;;  %v8688_v40 = vpop.f32.mrb[13].mxu1 }
 0x520   :  { %14039 = vrcp.f32 %v8797_v34  ;;  %v8756_v37 = vsub.f32 0.0, %v8740_v63  ;;  %v13065_v39 = vadd.f32 %v8688_v40, %v16774_v51 }
 0x521   :  { %v14026_v25 = vpop.eup %14025  ;;  %14041 = vrcp.f32 %v8796_v17  ;;  %v8784_v8 = vmul.f32 1.442695, %v8757_v60  ;;  %v8743_v33 = vadd.f32 %v13064_v22, %v16363_v28 }
 0x522   :  { %v14028_v47 = vpop.eup %14027  ;;  %v8799_v43 = vadd.f32 1.0, %v14026_v25  ;;  %14043 = vpow2.f32 %v8778_v44  ;;  %v8782_v13 = vmul.f32 1.442695, %v8756_v37  ;;  %v8742_v48 = vadd.f32 %v13065_v39, %v16363_v28  ;;  %v12787_v52 = vpop.f32.mrb[14].mxu1 }
 0x523   :  { %v8798_v46 = vadd.f32 1.0, %v14028_v47  ;;  %14045 = vpow2.f32 %v8784_v8  ;;  %v8759_v50 = vsub.f32 0.0, %v8743_v33  ;;  %v13066_v42 = vadd.f32 %v12787_v52, %v16775_v53  ;;  %v8698_v49 = vpop.f32.mrb[15].mxu1 }
 0x524   :  { %14047 = vrcp.f32 %v8799_v43  ;;  %v8758_v18 = vsub.f32 0.0, %v8742_v48  ;;  %v13067_v55 = vadd.f32 %v8698_v49, %v16776_v30 }
 0x525   :  { %v14030_v12 = vpop.eup %14029  ;;  %14049 = vrcp.f32 %v8798_v46  ;;  %v8788_v15 = vmul.f32 1.442695, %v8759_v50  ;;  %v8745_v31 = vadd.f32 %v13066_v42, %v16363_v28 }
 0x526   :  { %v14032_v0 = vpop.eup %14031  ;;  %v8801_v5 = vadd.f32 1.0, %v14030_v12  ;;  %14051 = vpow2.f32 %v8782_v13  ;;  %v8786_v19 = vmul.f32 1.442695, %v8758_v18  ;;  %v8744_v14 = vadd.f32 %v13067_v55, %v16363_v28 }
 0x527   :  { %v14034_v56 = vpop.eup %14033  ;;  %8844 = vst.msk [vmem:[#allocation4 + $0x8] sm:$0xff] %vm8842_vm8, %v14032_v0  ;;  %14053 = vpow2.f32 %v8788_v15  ;;  %v8761_v6 = vsub.f32 0.0, %v8745_v31 }
 0x528   :  { %v14036_v57 = vpop.eup %14035  ;;  %8843 = vst.msk [vmem:[#allocation4] sm:$0xff] %vm8842_vm8, %v14034_v56  ;;  %14055 = vrcp.f32 %v8801_v5  ;;  %v8760_v20 = vsub.f32 0.0, %v8744_v14 }
 0x529   :  { %v14038_v61 = vpop.eup %14037  ;;  %v8800_v59 = vadd.f32 1.0, %v14036_v57  ;;  %14057 = vpow2.f32 %v8786_v19  ;;  %v8792_v4 = vmul.f32 1.442695, %v8761_v6 }
 0x52a   :  { %v14040_v29 = vpop.eup %14039  ;;  %v8803_v23 = vadd.f32 1.0, %v14038_v61  ;;  %v8790_v9 = vmul.f32 1.442695, %v8760_v20 }
 0x52b   :  { %v14042_v26 = vpop.eup %14041  ;;  %8846 = vst.msk [vmem:[#allocation4 + $0x18] sm:$0xff] %vm8842_vm8, %v14040_v29  ;;  %14059 = vrcp.f32 %v8800_v59 }
 0x52c   :  { %v14044_v28 = vpop.eup %14043  ;;  %8845 = vst.msk [vmem:[#allocation4 + $0x10] sm:$0xff] %vm8842_vm8, %v14042_v26  ;;  %14061 = vrcp.f32 %v8803_v23 }
 0x52d   :  { %v14046_v7 = vpop.eup %14045  ;;  %v8802_v10 = vadd.f32 1.0, %v14044_v28  ;;  %14063 = vpow2.f32 %v8792_v4 }
 0x52e   :  { %v14048_v21 = vpop.eup %14047  ;;  %v8805_v2 = vadd.f32 1.0, %v14046_v7  ;;  %14065 = vpow2.f32 %v8790_v9  ;;  %v8891_v45 = vld [vmem:[#allocation4 + $0x8] ss:$2 sm:$0xf] }
 0x52f   :  { %v14050_v24 = vpop.eup %14049  ;;  %8848 = vst.msk [vmem:[#allocation4 + $0x28] sm:$0xff] %vm8842_vm8, %v14048_v21  ;;  %14067 = vrcp.f32 %v8802_v10  ;;  %v8859_v11 = vld [vmem:[#allocation4] ss:$2 sm:$0xf] }
 0x530   :  { %v8875_v27 = vld [vmem:[#allocation4 + $0x1] ss:$2 sm:$0xf]  ;;  %v14052_v41 = vpop.eup %14051  ;;  %8847 = vst.msk [vmem:[#allocation4 + $0x20] sm:$0xff] %vm8842_vm8, %v14050_v24  ;;  %14069 = vrcp.f32 %v8805_v2 }
 0x531   :  { %v8907_v54 = vld [vmem:[#allocation4 + $0x9] ss:$2 sm:$0xf]  ;;  %v8922_v58 = vmax.f32 %v8859_v11, %v8875_v27  ;;  %v14054_v62 = vpop.eup %14053  ;;  %v8804_v1 = vadd.f32 1.0, %v14052_v41 }
 0x532   :  { %v8930_v3 = vmax.f32 %v8891_v45, %v8907_v54  ;;  %v14056_v16 = vpop.eup %14055  ;;  %v8807_v34 = vadd.f32 1.0, %v14054_v62  ;;  %v8893_v44 = vld [vmem:[#allocation4 + $0x18] ss:$2 sm:$0xf]  ;;  %v8957_v62 = vld [vmem:[%s16712_s5] sm:$0xff] }
 0x533   :  { %v14058_v63 = vpop.eup %14057  ;;  %8850 = vst.msk [vmem:[#allocation4 + $0x38] sm:$0xff] %vm8842_vm8, %v14056_v16  ;;  %14071 = vrcp.f32 %v8804_v1  ;;  %v8861_v17 = vld [vmem:[#allocation4 + $0x10] ss:$2 sm:$0xf]  ;;  %v8958_v1 = vld [vmem:[%s16712_s5 + $0x8] sm:$0xff] }
 0x534   :  { %v8938_v32 = vmax.f32 %v8922_v58, %v8930_v3  ;;  %v8877_v60 = vld [vmem:[#allocation4 + $0x11] ss:$2 sm:$0xf]  ;;  %14073 = vrcp.f32 %v8807_v34  ;;  %v8806_v38 = vadd.f32 1.0, %v14058_v63 }
 0x535   :  { %v8909_v22 = vld [vmem:[#allocation4 + $0x19] ss:$2 sm:$0xf]  ;;  %v8923_v40 = vmax.f32 %v8861_v17, %v8877_v60  ;;  %v14060_v37 = vpop.eup %14059  ;;  %v12972_v17 = vpack.c.bf16 %v8958_v1, %v8957_v62  ;;  %v11217_v60 = vld [vmem:[%s16712_s5 + $0x20] sm:$0xff] }
 0x536   :  { %8947 = vst.msk [vmem:[#allocation5] sm:$0xf] %vm8946_vm9, %v8938_v32  ;;  %v8931_v51 = vmax.f32 %v8893_v44, %v8909_v22  ;;  %v14062_v39 = vpop.eup %14061  ;;  %14075 = vrcp.f32 %v8806_v38  ;;  %v8895_v25 = vld [vmem:[#allocation4 + $0x28] ss:$2 sm:$0xf] }
 0x537   :  { %8849 = vst.msk [vmem:[#allocation4 + $0x30] sm:$0xff] %vm8842_vm8, %v14060_v37  ;;  %v8911_v8 = vld [vmem:[#allocation4 + $0x29] ss:$2 sm:$0xf]  ;;  %v14064_v33 = vpop.eup %14063  ;;  %8852 = vst.msk [vmem:[#allocation4 + $0x48] sm:$0xff] %vm8842_vm8, %v14062_v39 }
 0x538   :  { %v8939_v47 = vmax.f32 %v8923_v40, %v8931_v51  ;;  %v8863_v43 = vld [vmem:[#allocation4 + $0x20] ss:$2 sm:$0xf]  ;;  %v8879_v13 = vld [vmem:[#allocation4 + $0x21] ss:$2 sm:$0xf]  ;;  %v8932_v48 = vmax.f32 %v8895_v25, %v8911_v8  ;;  %v14066_v52 = vpop.eup %14065 }
 0x539   :  { %v8809_v46 = vadd.f32 1.0, %v14064_v33  ;;  %v8924_v50 = vmax.f32 %v8863_v43, %v8879_v13  ;;  %v14068_v53 = vpop.eup %14067  ;;  %v8808_v42 = vadd.f32 1.0, %v14066_v52  ;;  %v11218_v22 = vld [vmem:[%s16712_s5 + $0x28] sm:$0xff]  ;;  %v11220_v13 = vld [vmem:[%s16712_s5 + $0x30] sm:$0xff] }
 0x53a   :  { %8948 = vst.msk [vmem:[#allocation5 + $0x4] sm:$0xf] %vm8946_vm9, %v8939_v47  ;;  %v14070_v49 = vpop.eup %14069  ;;  %v8897_v30 = vld [vmem:[#allocation4 + $0x38] ss:$2 sm:$0xf]  ;;  %v12975_v47 = vpack.c.bf16 %v11218_v22, %v11217_v60  ;;  %v11241_v60 = vld [vmem:[%s16712_s5 + $0xa0] sm:$0xff] }
 0x53b   :  { %8851 = vst.msk [vmem:[#allocation4 + $0x40] sm:$0xff] %vm8842_vm8, %v14068_v53  ;;  %14077 = vrcp.f32 %v8809_v46  ;;  %v8940_v18 = vmax.f32 %v8924_v50, %v8932_v48  ;;  %8854 = vst.msk [vmem:[#allocation4 + $0x58] sm:$0xff] %vm8842_vm8, %v14070_v49  ;;  %v8913_v55 = vld [vmem:[#allocation4 + $0x39] ss:$2 sm:$0xf] }
 0x53c   :  { %14079 = vrcp.f32 %v8808_v42  ;;  %v8933_v19 = vmax.f32 %v8897_v30, %v8913_v55  ;;  %v11221_v48 = vld [vmem:[%s16712_s5 + $0x38] sm:$0xff]  ;;  %v11224_v30 = vld [vmem:[%s16712_s5 + $0x48] sm:$0xff] }
 0x53d   :  { %8949 = vst.msk [vmem:[#allocation5 + $0x8] sm:$0xf] %vm8946_vm9, %v8940_v18  ;;  %v14072_v12 = vpop.eup %14071  ;;  %v8959_v38 = vld [vmem:[#allocation5 + $0x1] sm:$0x1]  ;;  %v8955_v43 = vld [vmem:[#allocation5] sm:$0x1]  ;;  %v12978_v42 = vpack.c.bf16 %v11221_v48, %v11220_v13 }
 0x53e   :  { %v8865_v15 = vld [vmem:[#allocation4 + $0x30] ss:$2 sm:$0xf]  ;;  %v14074_v31 = vpop.eup %14073  ;;  %8853 = vst.msk [vmem:[#allocation4 + $0x50] sm:$0xff] %vm8842_vm8, %v14072_v12  ;;  %v9117_v49 = vld [vmem:[#allocation5 + $0x2] sm:$0x1] }
 0x53f   :  { %v8899_v0 = vld [vmem:[#allocation4 + $0x48] ss:$2 sm:$0xf]  ;;  %v8915_v5 = vld [vmem:[#allocation4 + $0x49] ss:$2 sm:$0xf] }
 0x540   :  { %8856 = vst.msk [vmem:[#allocation4 + $0x68] sm:$0xff] %vm8842_vm8, %v14074_v31  ;;  %v8881_v14 = vld [vmem:[#allocation4 + $0x31] ss:$2 sm:$0xf]  ;;  %v14076_v56 = vpop.eup %14075  ;;  %v8934_v6 = vmax.f32 %v8899_v0, %v8915_v5  ;;  %v11223_v18 = vld [vmem:[%s16712_s5 + $0x40] sm:$0xff] }
 0x541   :  { %v8925_v57 = vmax.f32 %v8865_v15, %v8881_v14  ;;  %8855 = vst.msk [vmem:[#allocation4 + $0x60] sm:$0xff] %vm8842_vm8, %v14076_v56  ;;  %v12981_v31 = vpack.c.bf16 %v11224_v30, %v11223_v18  ;;  %v9199_v0 = vld [vmem:[#allocation5 + $0x3] sm:$0x1]  ;;  %v11226_v5 = vld [vmem:[%s16712_s5 + $0x50] sm:$0xff]  ;;  %v9528_v1 = vld [vmem:[#allocation5 + $0x7] sm:$0x1] }
 0x542   :  { %v8867_v20 = vld [vmem:[#allocation4 + $0x40] ss:$2 sm:$0xf]  ;;  %v8883_v61 = vld [vmem:[#allocation4 + $0x41] ss:$2 sm:$0xf] }
 0x543   :  { %v8926_v59 = vmax.f32 %v8867_v20, %v8883_v61  ;;  %v8901_v4 = vld [vmem:[#allocation4 + $0x58] ss:$2 sm:$0xf]  ;;  %v8917_v29 = vld [vmem:[#allocation4 + $0x59] ss:$2 sm:$0xf]  ;;  %v8941_v23 = vmax.f32 %v8925_v57, %v8933_v19 }
 0x544   :  { %v8935_v28 = vmax.f32 %v8901_v4, %v8917_v29  ;;  %v11227_v19 = vld [vmem:[%s16712_s5 + $0x58] sm:$0xff]  ;;  %v9282_v20 = vld [vmem:[#allocation5 + $0x4] sm:$0x1]  ;;  %v9775_v48 = vld [vmem:[#allocation5 + $0xa] sm:$0x1] }
 0x545   :  { %v14078_v9 = vpop.eup %14077  ;;  %v8942_v26 = vmax.f32 %v8926_v59, %v8934_v6  ;;  %8950 = vst.msk [vmem:[#allocation5 + $0xc] sm:$0xf] %vm8946_vm9, %v8941_v23  ;;  %v8869_v10 = vld [vmem:[#allocation4 + $0x50] ss:$2 sm:$0xf]  ;;  %v12984_v57 = vpack.c.bf16 %v11227_v19, %v11226_v5  ;;  %v11229_v61 = vld [vmem:[%s16712_s5 + $0x60] sm:$0xff] }
 0x546   :  { %v14080_v7 = vpop.eup %14079  ;;  %8858 = vst.msk [vmem:[#allocation4 + $0x78] sm:$0xff] %vm8842_vm8, %v14078_v9  ;;  %v8885_v21 = vld [vmem:[#allocation4 + $0x51] ss:$2 sm:$0xf]  ;;  %v11230_v59 = vld [vmem:[%s16712_s5 + $0x68] sm:$0xff]  ;;  %v11253_v19 = vld [vmem:[%s16712_s5 + $0xe0] sm:$0xff] }
 0x547   :  { %8857 = vst.msk [vmem:[#allocation4 + $0x70] sm:$0xff] %vm8842_vm8, %v14080_v7  ;;  %v8927_v2 = vmax.f32 %v8869_v10, %v8885_v21  ;;  %v8903_v45 = vld [vmem:[#allocation4 + $0x68] ss:$2 sm:$0xf]  ;;  %v12987_v9 = vpack.c.bf16 %v11230_v59, %v11229_v61  ;;  %v11233_v7 = vld [vmem:[%s16712_s5 + $0x78] sm:$0xff]  ;;  %v11250_v30 = vld [vmem:[%s16712_s5 + $0xd0] sm:$0xff] }
 0x548   :  { %8951 = vst.msk [vmem:[#allocation5 + $0x10] sm:$0xf] %vm8946_vm9, %v8942_v26  ;;  %v8919_v24 = vld [vmem:[#allocation4 + $0x69] ss:$2 sm:$0xf]  ;;  %v11256_v59 = vld [vmem:[%s16712_s5 + $0xf0] sm:$0xff] }
 0x549   :  { %v8936_v11 = vmax.f32 %v8903_v45, %v8919_v24  ;;  %v8943_v27 = vmax.f32 %v8927_v2, %v8935_v28  ;;  %v8871_v41 = vld [vmem:[#allocation4 + $0x60] ss:$2 sm:$0xf]  ;;  %v8887_v54 = vld [vmem:[#allocation4 + $0x61] ss:$2 sm:$0xf] }
 0x54a   :  { %v8928_v58 = vmax.f32 %v8871_v41, %v8887_v54  ;;  %v9364_v26 = vld [vmem:[#allocation5 + $0x5] sm:$0x1]  ;;  %v11232_v28 = vld [vmem:[%s16712_s5 + $0x70] sm:$0xff]  ;;  %v9446_v24 = vld [vmem:[#allocation5 + $0x6] sm:$0x1] }
 0x54b   :  { %8952 = vst.msk [vmem:[#allocation5 + $0x14] sm:$0xf] %vm8946_vm9, %v8943_v27  ;;  %v12990_v45 = vpack.c.bf16 %v11233_v7, %v11232_v28  ;;  %v11236_v27 = vld [vmem:[%s16712_s5 + $0x88] sm:$0xff] }
 0x54c   :  { %v8944_v3 = vmax.f32 %v8928_v58, %v8936_v11  ;;  %v11235_v11 = vld [vmem:[%s16712_s5 + $0x80] sm:$0xff]  ;;  %v9857_v18 = vld [vmem:[#allocation5 + $0xb] sm:$0x1]  ;;  %v9940_v5 = vld [vmem:[#allocation5 + $0xc] sm:$0x1] }
 0x54d   :  { %v8905_v16 = vld [vmem:[#allocation4 + $0x78] ss:$2 sm:$0xf]  ;;  %v8921_v34 = vld [vmem:[#allocation4 + $0x79] ss:$2 sm:$0xf]  ;;  %v12993_v62 = vpack.c.bf16 %v11236_v27, %v11235_v11 }
 0x54e   :  { %8953 = vst.msk [vmem:[#allocation5 + $0x18] sm:$0xf] %vm8946_vm9, %v8944_v3  ;;  %v8873_v40 = vld [vmem:[#allocation4 + $0x70] ss:$2 sm:$0xf]  ;;  %v8937_v37 = vmax.f32 %v8905_v16, %v8921_v34  ;;  %v11239_v16 = vld [vmem:[%s16712_s5 + $0x98] sm:$0xff] }
 0x54f   :  { %v8960_v44 = vld [vmem:[#allocation5 + $0x11] sm:$0x1]  ;;  %v8956_v63 = vld [vmem:[#allocation5 + $0x10] sm:$0x1]  ;;  %v9118_v8 = vld [vmem:[#allocation5 + $0x12] sm:$0x1] }
 0x550   :  { %v8966_v32 = vrot.slane %v8960_v44, 7  ;;  %v9043_v39 = vrot.slane %v8956_v63, 7  ;;  %v8889_v25 = vld [vmem:[#allocation4 + $0x71] ss:$2 sm:$0xf]  ;;  %v9124_v50 = vrot.slane %v9118_v8, 7 }
 0x551   :  { %v8929_v33 = vmax.f32 %v8873_v40, %v8889_v25  ;;  %v9200_v53 = vld [vmem:[#allocation5 + $0x13] sm:$0x1]  ;;  %v11245_v8 = vld [vmem:[%s16712_s5 + $0xb8] sm:$0xff]  ;;  %v10022_v61 = vld [vmem:[#allocation5 + $0xd] sm:$0x1] }
 0x552   :  { %v8968_v51 = vsel %vm8967_vm10, %v8966_v32, %v8959_v38  ;;  %v9044_v46 = vsel %vm8967_vm10, %v9043_v39, %v8955_v43  ;;  %v9125_v55 = vsel %vm8967_vm10, %v9124_v50, %v9117_v49  ;;  %v9206_v12 = vrot.slane %v9200_v53, 7  ;;  %v9283_v15 = vld [vmem:[#allocation5 + $0x14] sm:$0x1]  ;;  %v9365_v6 = vld [vmem:[#allocation5 + $0x15] sm:$0x1]  ;;  %v11242_v38 = vld [vmem:[%s16712_s5 + $0xa8] sm:$0xff] }
 0x553   :  { %12793 = vmatmul.mubr.msk.f32.vlgmr.msra.gmra.mrb[160].mxu0 %vm8842_vm8, %v8968_v51  ;;  %v8945_v52 = vmax.f32 %v8929_v33, %v8937_v37  ;;  %v9289_v56 = vrot.slane %v9283_v15, 7  ;;  %v9371_v29 = vrot.slane %v9365_v6, 7  ;;  %v9447_v23 = vld [vmem:[#allocation5 + $0x16] sm:$0x1]  ;;  %v9529_v2 = vld [vmem:[#allocation5 + $0x17] sm:$0x1]  ;;  %v12999_v51 = vpack.c.bf16 %v11242_v38, %v11241_v60 }
 0x554   :  { %12973 = vmatpush3.bf16.msra.mxu0 %v12972_v17  ;;  %12799 = vmatprep.mubr.msk.f32.mxu0 %vm14126_vm7, %v14127_v36  ;;  %v9207_v14 = vsel %vm8967_vm10, %v9206_v12, %v9199_v0  ;;  %v9453_v21 = vrot.slane %v9447_v23, 7  ;;  %v9535_v54 = vrot.slane %v9529_v2, 7  ;;  %v11238_v3 = vld [vmem:[%s16712_s5 + $0x90] sm:$0xff]  ;;  %v9611_v17 = vld [vmem:[#allocation5 + $0x8] sm:$0x1]  ;;  %v10293_v60 = vld [vmem:[%s16714_s7 + $0x58] sm:$0xff] }
 0x555   :  { %12974 = vmatprep.subr.bf16.mxu0 %v14125_v35  ;;  %8954 = vst.msk [vmem:[#allocation5 + $0x1c] sm:$0xf] %vm8946_vm9, %v8945_v52  ;;  %v9290_v4 = vsel %vm8967_vm10, %v9289_v56, %v9282_v20  ;;  %v9372_v10 = vsel %vm8967_vm10, %v9371_v29, %v9364_v26  ;;  %v9612_v58 = vld [vmem:[#allocation5 + $0x18] sm:$0x1]  ;;  %v9694_v63 = vld [vmem:[#allocation5 + $0x19] sm:$0x1]  ;;  %v12996_v32 = vpack.c.bf16 %v11239_v16, %v11238_v3 }
 0x556   :  { %v9454_v41 = vsel %vm8967_vm10, %v9453_v21, %v9446_v24  ;;  %v9536_v34 = vsel %vm8967_vm10, %v9535_v54, %v9528_v1  ;;  %v9618_v44 = vrot.slane %v9612_v58, 7  ;;  %v9700_v40 = vrot.slane %v9694_v63, 7  ;;  %v9776_v37 = vld [vmem:[#allocation5 + $0x1a] sm:$0x1]  ;;  %v9693_v39 = vld [vmem:[#allocation5 + $0x9] sm:$0x1] }
 0x557   :  { %12800 = vmatmul.mubr.msk.f32.vlgmr.msra.gmra.mrb[162].mxu0 %vm8842_vm8, %v9044_v46  ;;  %v11244_v25 = vld [vmem:[%s16712_s5 + $0xb0] sm:$0xff]  ;;  %v9858_v43 = vld [vmem:[#allocation5 + $0x1b] sm:$0x1]  ;;  %v11247_v52 = vld [vmem:[%s16712_s5 + $0xc0] sm:$0xff] }
 0x558   :  { %12976 = vmatpush3.bf16.msra.mxu0 %v12975_v47  ;;  %12806 = vmatprep.mubr.msk.f32.mxu0 %vm14126_vm7, %v14127_v36  ;;  %v9619_v22 = vsel %vm8967_vm10, %v9618_v44, %v9611_v17  ;;  %v9701_v33 = vsel %vm8967_vm10, %v9700_v40, %v9693_v39  ;;  %v9782_v47 = vrot.slane %v9776_v37, 7  ;;  %v13002_v13 = vpack.c.bf16 %v11245_v8, %v11244_v25  ;;  %v11248_v46 = vld [vmem:[%s16712_s5 + $0xc8] sm:$0xff]  ;;  %v10284_v27 = vld [vmem:[%s16714_s7 + $0x10] sm:$0xff]  ;;  %v10286_v58 = vld [vmem:[%s16714_s7 + $0x20] sm:$0xff] }
 0x559   :  { %12977 = vmatprep.subr.bf16.mxu0 %v14125_v35  ;;  %v9864_v53 = vrot.slane %v9858_v43, 7  ;;  %v13005_v49 = vpack.c.bf16 %v11248_v46, %v11247_v52  ;;  %v10104_v28 = vld [vmem:[#allocation5 + $0xe] sm:$0x1]  ;;  %v10186_v21 = vld [vmem:[#allocation5 + $0xf] sm:$0x1]  ;;  %v10288_v3 = vld [vmem:[%s16714_s7 + $0x30] sm:$0xff] }
 0x55a   :  { %v9783_v50 = vsel %vm8967_vm10, %v9782_v47, %v9775_v48  ;;  %v10283_v24 = vld [vmem:[%s16714_s7 + $0x8] sm:$0xff]  ;;  %v10289_v16 = vld [vmem:[%s16714_s7 + $0x38] sm:$0xff]  ;;  %v10290_v44 = vld [vmem:[%s16714_s7 + $0x40] sm:$0xff] }
 0x55b   :  { %12807 = vmatmul.mubr.msk.f32.vlgmr.msra.gmra.mrb[164].mxu0 %vm8842_vm8, %v9125_v55  ;;  %v11251_v55 = vld [vmem:[%s16712_s5 + $0xd8] sm:$0xff]  ;;  %v9865_v12 = vsel %vm8967_vm10, %v9864_v53, %v9857_v18  ;;  %v10291_v63 = vld [vmem:[%s16714_s7 + $0x48] sm:$0xff]  ;;  %v10292_v17 = vld [vmem:[%s16714_s7 + $0x50] sm:$0xff] }
 0x55c   :  { %12979 = vmatpush3.bf16.msra.mxu0 %v12978_v42  ;;  %12813 = vmatprep.mubr.msk.f32.mxu0 %vm14126_vm7, %v14127_v36  ;;  %v9941_v42 = vld [vmem:[#allocation5 + $0x1c] sm:$0x1]  ;;  %v13008_v0 = vpack.c.bf16 %v11251_v55, %v11250_v30  ;;  %v13032_v38 = vpack.c.bf16 %v10293_v60, %v10292_v17  ;;  %v10295_v40 = vld [vmem:[%s16714_s7 + $0x68] sm:$0xff] }
 0x55d   :  { %12980 = vmatprep.subr.bf16.mxu0 %v14125_v35  ;;  %v9947_v15 = vrot.slane %v9941_v42, 7  ;;  %v10385_v17 = vld [vmem:[%s16716_s9 + $0x8] sm:$0xff] }
 0x55f   :  { %12814 = vmatmul.mubr.msk.f32.vlgmr.msra.gmra.mrb[166].mxu0 %vm8842_vm8, %v9207_v14  ;;  %v11254_v14 = vld [vmem:[%s16712_s5 + $0xe8] sm:$0xff]  ;;  %v9948_v56 = vsel %vm8967_vm10, %v9947_v15, %v9940_v5 }
 0x560   :  { %12982 = vmatpush3.bf16.msra.mxu0 %v12981_v31  ;;  %12820 = vmatprep.mubr.msk.f32.mxu0 %vm14126_vm7, %v14127_v36  ;;  %v10023_v31 = vld [vmem:[#allocation5 + $0x1d] sm:$0x1]  ;;  %v13011_v20 = vpack.c.bf16 %v11254_v14, %v11253_v19 }
 0x561   :  { %12983 = vmatprep.subr.bf16.mxu0 %v14125_v35  ;;  %v10029_v6 = vrot.slane %v10023_v31, 7 }
 0x563   :  { %12821 = vmatmul.mubr.msk.f32.vlgmr.msra.gmra.mrb[168].mxu0 %vm8842_vm8, %v9290_v4  ;;  %v11257_v4 = vld [vmem:[%s16712_s5 + $0xf8] sm:$0xff]  ;;  %v10030_v29 = vsel %vm8967_vm10, %v10029_v6, %v10022_v61 }
 0x564   :  { %12985 = vmatpush3.bf16.msra.mxu0 %v12984_v57  ;;  %12827 = vmatprep.mubr.msk.f32.mxu0 %vm14126_vm7, %v14127_v36  ;;  %v10105_v57 = vld [vmem:[#allocation5 + $0x1e] sm:$0x1]  ;;  %v13014_v26 = vpack.c.bf16 %v11257_v4, %v11256_v59 }
 0x565   :  { %12986 = vmatprep.subr.bf16.mxu0 %v14125_v35  ;;  %v10111_v23 = vrot.slane %v10105_v57, 7 }
 0x567   :  { %12828 = vmatmul.mubr.msk.f32.vlgmr.msra.gmra.mrb[170].mxu0 %vm8842_vm8, %v9372_v10  ;;  %v10112_v7 = vsel %vm8967_vm10, %v10111_v23, %v10104_v28 }
 0x568   :  { %12988 = vmatpush3.bf16.msra.mxu0 %v12987_v9  ;;  %12834 = vmatprep.mubr.msk.f32.mxu0 %vm14126_vm7, %v14127_v36  ;;  %v10187_v9 = vld [vmem:[#allocation5 + $0x1f] sm:$0x1] }
 0x569   :  { %12989 = vmatprep.subr.bf16.mxu0 %v14125_v35  ;;  %v10193_v10 = vrot.slane %v10187_v9, 7 }
 0x56b   :  { %12835 = vmatmul.mubr.msk.f32.vlgmr.msra.gmra.mrb[172].mxu0 %vm8842_vm8, %v9454_v41  ;;  %v10194_v2 = vsel %vm8967_vm10, %v10193_v10, %v10186_v21  ;;  %v10285_v41 = vld [vmem:[%s16714_s7 + $0x18] sm:$0xff] }
 0x56c   :  { %12991 = vmatpush3.bf16.msra.mxu0 %v12990_v45  ;;  %12841 = vmatprep.mubr.msk.f32.mxu0 %vm14126_vm7, %v14127_v36  ;;  %v10282_v45 = vld [vmem:[%s16714_s7] sm:$0xff]  ;;  %v13020_v54 = vpack.c.bf16 %v10285_v41, %v10284_v27 }
 0x56d   :  { %12992 = vmatprep.subr.bf16.mxu0 %v14125_v35  ;;  %v13017_v11 = vpack.c.bf16 %v10283_v24, %v10282_v45 }
 0x56f   :  { %12842 = vmatmul.mubr.msk.f32.vlgmr.msra.gmra.mrb[174].mxu0 %vm8842_vm8, %v9536_v34  ;;  %v13026_v34 = vpack.c.bf16 %v10289_v16, %v10288_v3 }
 0x570   :  { %12994 = vmatpush3.bf16.msra.mxu0 %v12993_v62  ;;  %12848 = vmatprep.mubr.msk.f32.mxu0 %vm14126_vm7, %v14127_v36  ;;  %v10287_v62 = vld [vmem:[%s16714_s7 + $0x28] sm:$0xff] }
 0x571   :  { %12995 = vmatprep.subr.bf16.mxu0 %v14125_v35  ;;  %v13023_v1 = vpack.c.bf16 %v10287_v62, %v10286_v58 }
 0x573   :  { %12849 = vmatmul.mubr.msk.f32.vlgmr.msra.gmra.mrb[176].mxu0 %vm8842_vm8, %v9619_v22  ;;  %v10294_v22 = vld [vmem:[%s16714_s7 + $0x60] sm:$0xff] }
 0x574   :  { %12997 = vmatpush3.bf16.msra.mxu0 %v12996_v32  ;;  %12855 = vmatprep.mubr.msk.f32.mxu0 %vm14126_vm7, %v14127_v36  ;;  %v13029_v32 = vpack.c.bf16 %v10291_v63, %v10290_v44  ;;  %v13035_v37 = vpack.c.bf16 %v10295_v40, %v10294_v22  ;;  %v10387_v22 = vld [vmem:[%s16716_s9 + $0x18] sm:$0xff] }
 0x575   :  { %12998 = vmatprep.subr.bf16.mxu0 %v14125_v35 }
 0x577   :  { %12856 = vmatmul.mubr.msk.f32.vlgmr.msra.gmra.mrb[178].mxu0 %vm8842_vm8, %v9701_v33 }
 0x578   :  { %13000 = vmatpush3.bf16.msra.mxu0 %v12999_v51  ;;  %12862 = vmatprep.mubr.msk.f32.mxu0 %vm14126_vm7, %v14127_v36  ;;  %v10296_v51 = vld [vmem:[%s16714_s7 + $0x70] sm:$0xff] }
 0x579   :  { %13001 = vmatprep.subr.bf16.mxu0 %v14125_v35 }
 0x57b   :  { %12863 = vmatmul.mubr.msk.f32.vlgmr.msra.gmra.mrb[180].mxu0 %vm8842_vm8, %v9783_v50 }
 0x57c   :  { %13003 = vmatpush3.bf16.msra.mxu0 %v13002_v13  ;;  %12869 = vmatprep.mubr.msk.f32.mxu0 %vm14126_vm7, %v14127_v36 }
 0x57d   :  { %13004 = vmatprep.subr.bf16.mxu0 %v14125_v35 }
 0x57f   :  { %12870 = vmatmul.mubr.msk.f32.vlgmr.msra.gmra.mrb[182].mxu0 %vm8842_vm8, %v9865_v12 }
 0x580   :  { %13006 = vmatpush3.bf16.msra.mxu0 %v13005_v49  ;;  %12876 = vmatprep.mubr.msk.f32.mxu0 %vm14126_vm7, %v14127_v36 }
 0x581   :  { %13007 = vmatprep.subr.bf16.mxu0 %v14125_v35 }
 0x583   :  { %12877 = vmatmul.mubr.msk.f32.vlgmr.msra.gmra.mrb[184].mxu0 %vm8842_vm8, %v9948_v56 }
 0x584   :  { %13009 = vmatpush3.bf16.msra.mxu0 %v13008_v0  ;;  %12883 = vmatprep.mubr.msk.f32.mxu0 %vm14126_vm7, %v14127_v36 }
 0x585   :  { %13010 = vmatprep.subr.bf16.mxu0 %v14125_v35 }
 0x587   :  { %12884 = vmatmul.mubr.msk.f32.vlgmr.msra.gmra.mrb[186].mxu0 %vm8842_vm8, %v10030_v29 }
 0x588   :  { %13012 = vmatpush3.bf16.msra.mxu0 %v13011_v20  ;;  %12890 = vmatprep.mubr.msk.f32.mxu0 %vm14126_vm7, %v14127_v36 }
 0x589   :  { %13013 = vmatprep.subr.bf16.mxu0 %v14125_v35 }
 0x58b   :  { %12891 = vmatmul.mubr.msk.f32.vlgmr.msra.gmra.mrb[188].mxu0 %vm8842_vm8, %v10112_v7 }
 0x58c   :  { %13015 = vmatpush3.bf16.msra.mxu0 %v13014_v26  ;;  %12897 = vmatprep.mubr.msk.f32.mxu0 %vm14126_vm7, %v14127_v36 }
 0x58d   :  { %13016 = vmatprep.subr.bf16.mxu0 %v14125_v35 }
 0x58f   :  { %12898 = vmatmul.mubr.msk.f32.vlgmr.msra.gmra.mrb[190].mxu0 %vm8842_vm8, %v10194_v2 }
 0x590   :  { %12930 = vmatprep.mubr.msk.f32.mxu0 %vm14126_vm7, %v14127_v36  ;;  %13018 = vmatpush3.bf16.msra.mxu0 %v13017_v11 }
 0x591   :  { %13019 = vmatprep.subr.bf16.mxu0 %v14125_v35 }
 0x594   :  { %13021 = vmatpush3.bf16.msra.mxu0 %v13020_v54  ;;  %v11259_v54 = vld [vmem:[%s16713_s6] ss:$0 sm:$0xff] }
 0x595   :  { %13022 = vmatprep.subr.bf16.mxu0 %v14125_v35 }
 0x598   :  { %13024 = vmatpush3.bf16.msra.mxu0 %v13023_v1 }
 0x599   :  { %13025 = vmatprep.subr.bf16.mxu0 %v14125_v35 }
 0x59c   :  { %13027 = vmatpush3.bf16.msra.mxu0 %v13026_v34 }
 0x59d   :  { %13028 = vmatprep.subr.bf16.mxu0 %v14125_v35 }
 0x5a0   :  { %13030 = vmatpush3.bf16.msra.mxu0 %v13029_v32  ;;  %v10384_v32 = vld [vmem:[%s16716_s9] sm:$0xff] }
 0x5a1   :  { %13031 = vmatprep.subr.bf16.mxu0 %v14125_v35  ;;  %v13038_v60 = vpack.c.bf16 %v10385_v17, %v10384_v32 }
 0x5a4   :  { %13033 = vmatpush3.bf16.msra.mxu0 %v13032_v38  ;;  %v10386_v38 = vld [vmem:[%s16716_s9 + $0x10] sm:$0xff] }
 0x5a5   :  { %13034 = vmatprep.subr.bf16.mxu0 %v14125_v35  ;;  %v13041_v40 = vpack.c.bf16 %v10387_v22, %v10386_v38 }
 0x5a8   :  { %13036 = vmatpush3.bf16.msra.mxu0 %v13035_v37  ;;  %v10388_v37 = vld [vmem:[%s16716_s9 + $0x20] sm:$0xff] }
 0x5a9   :  { %12928 = vmatprep.subr.mxu0 %v14127_v36 }
 0x5ac   :  { %12929 = vmatpush3.msra.mxu0 %v10296_v51  ;;  %v10389_v51 = vld [vmem:[%s16716_s9 + $0x28] sm:$0xff] }
 0x5ad   :  { %13037 = vmatprep.subr.bf16.mxu0 %v14125_v35 }
 0x626   :  { %v9037_v39 = vpop.f32.mrb[160].mxu0 }
 0x627   :  { %v12794_v25 = vpop.f32.mrb[161].mxu0 }
 0x628   :  { %v10390_v25 = vld [vmem:[%s16716_s9 + $0x30] sm:$0xff] }
 0x62a   :  { %v9113_v8 = vpop.f32.mrb[162].mxu0 }
 0x62b   :  { %v9114_v33 = vadd.f32 %v9113_v8, %v9037_v39  ;;  %v12801_v47 = vpop.f32.mrb[163].mxu0  ;;  %v13044_v39 = vpack.c.bf16 %v10389_v51, %v10388_v37  ;;  %v10391_v8 = vld [vmem:[%s16716_s9 + $0x38] sm:$0xff] }
 0x62c   :  { %v10392_v47 = vld [vmem:[%s16716_s9 + $0x40] sm:$0xff] }
 0x62e   :  { %v9194_v43 = vpop.f32.mrb[164].mxu0 }
 0x62f   :  { %v9198_v13 = vadd.f32 %v9194_v43, %v9114_v33  ;;  %v12808_v48 = vpop.f32.mrb[165].mxu0  ;;  %v13047_v33 = vpack.c.bf16 %v10391_v8, %v10390_v25  ;;  %v10393_v43 = vld [vmem:[%s16716_s9 + $0x48] sm:$0xff] }
 0x630   :  { %v10394_v48 = vld [vmem:[%s16716_s9 + $0x50] sm:$0xf] }
 0x632   :  { %v9276_v52 = vpop.f32.mrb[166].mxu0 }
 0x633   :  { %v9280_v46 = vadd.f32 %v9276_v52, %v9198_v13  ;;  %v12815_v50 = vpop.f32.mrb[167].mxu0  ;;  %v13050_v13 = vpack.c.bf16 %v10393_v43, %v10392_v47  ;;  %v11260_v52 = vld [vmem:[%s16715_s8] ss:$0 sm:$0xff]  ;;  %s14128_s8 = smov [#allocation6]  }
 0x634   :  { %s10499_s7 = sshll.u32 %s14128_s8, 4  ;;  %s10500_s7 = int_to_ptr.vmem [resolvable:$true] %s10499_s7 }
 0x635   :  { %p14105_p1 = scmp.lt.s32.totalorder %s10500_s7, %s10500_s7 }
 0x636   :  { %v9359_v53 = vpop.f32.mrb[168].mxu0 }
 0x637   :  { %v9363_v42 = vadd.f32 %v9359_v53, %v9280_v46  ;;  %v12822_v49 = vpop.f32.mrb[169].mxu0 }
 0x63a   :  { %v9441_v18 = vpop.f32.mrb[170].mxu0 }
 0x63b   :  { %v9445_v30 = vadd.f32 %v9441_v18, %v9363_v42  ;;  %v12829_v55 = vpop.f32.mrb[171].mxu0 }
 0x63e   :  { %v9523_v12 = vpop.f32.mrb[172].mxu0 }
 0x63f   :  { %v9527_v15 = vadd.f32 %v9523_v12, %v9445_v30  ;;  %v12836_v31 = vpop.f32.mrb[173].mxu0  ;;  %v11262_v30 = vld [vmem:[%s16717_s10] ss:$0 sm:$0xff]  ;;  %s14100_s10 = scalar_lea.vmem %s10500_s7, 32 }
 0x640   :  { %p14101_p0 = scmp.ne.s32.totalorder %s10500_s7, %s14100_s10  ;;  %p14106_p2 = scmp.lt.s32.totalorder %s14100_s10, %s14100_s10 }
 0x642   :  { %v9605_v0 = vpop.f32.mrb[174].mxu0  ;;  %p14107_p3 = por %p14106_p2, %p14105_p1 }
 0x643   :  { %v9609_v5 = vadd.f32 %v9605_v0, %v9527_v15  ;;  %v12843_v19 = vpop.f32.mrb[175].mxu0 }
 0x644   :  { %p14108_p4 = pnand %p14107_p3, %p14101_p0 }
 0x646   :  { %v9688_v14 = vpop.f32.mrb[176].mxu0 }
 0x647   :  { %v9692_v56 = vadd.f32 %v9688_v14, %v9609_v5  ;;  %v12850_v6 = vpop.f32.mrb[177].mxu0 }
 0x64a   :  { %v9770_v57 = vpop.f32.mrb[178].mxu0 }
 0x64b   :  { %v9774_v20 = vadd.f32 %v9770_v57, %v9692_v56  ;;  %v12857_v61 = vpop.f32.mrb[179].mxu0 }
 0x64e   :  { %v9852_v59 = vpop.f32.mrb[180].mxu0 }
 0x64f   :  { %v9856_v4 = vadd.f32 %v9852_v59, %v9774_v20  ;;  %v12864_v29 = vpop.f32.mrb[181].mxu0 }
 0x652   :  { %v9934_v23 = vpop.f32.mrb[182].mxu0 }
 0x653   :  { %v9938_v9 = vadd.f32 %v9934_v23, %v9856_v4  ;;  %v12871_v26 = vpop.f32.mrb[183].mxu0 }
 0x656   :  { %v10017_v28 = vpop.f32.mrb[184].mxu0 }
 0x657   :  { %v10021_v7 = vadd.f32 %v10017_v28, %v9938_v9  ;;  %v12878_v10 = vpop.f32.mrb[185].mxu0 }
 0x65a   :  { %v10099_v21 = vpop.f32.mrb[186].mxu0 }
 0x65b   :  { %v10103_v2 = vadd.f32 %v10099_v21, %v10021_v7  ;;  %v12885_v45 = vpop.f32.mrb[187].mxu0 }
 0x65e   :  { %v10181_v24 = vpop.f32.mrb[188].mxu0 }
 0x65f   :  { %v10185_v11 = vadd.f32 %v10181_v24, %v10103_v2  ;;  %v12892_v27 = vpop.f32.mrb[189].mxu0 }
 0x662   :  { %v10263_v41 = vpop.f32.mrb[190].mxu0 }
 0x663   :  { %v10267_v58 = vadd.f32 %v10263_v41, %v10185_v11  ;;  %v12899_v62 = vpop.f32.mrb[191].mxu0 }
 0x665   :  { %v10275_v1 = vadd.f32 %v11259_v54, %v10267_v58 }
 0x667   :  { %v10276_v3 = vsub.f32 0.0, %v10275_v1 }
 0x669   :  { %v10277_v16 = vmul.f32 1.442695, %v10276_v3 }
 0x66b   :  { %14081 = vpow2.f32 %v10277_v16 }
 0x675   :  { %v14082_v34 = vpop.eup %14081 }
 0x676   :  { %v10279_v44 = vadd.f32 1.0, %v14082_v34 }
 0x678   :  { %14083 = vrcp.f32 %v10279_v44 }
 0x682   :  { %v14084_v63 = vpop.eup %14083 }
 0x683   :  { %12931 = vmatmul.mubr.msk.f32.vlgmr.msra.gmra.mrb[192].mxu0 %vm10304_vm11, %v14084_v63 }
 0x684   :  { %12955 = vmatprep.mubr.msk.f32.mxu0 %vm14126_vm7, %v14127_v36  ;;  %13039 = vmatpush3.bf16.msra.mxu0 %v13038_v60 }
 0x685   :  { %13040 = vmatprep.subr.bf16.mxu0 %v14125_v35 }
 0x688   :  { %13042 = vmatpush3.bf16.msra.mxu0 %v13041_v40 }
 0x689   :  { %13043 = vmatprep.subr.bf16.mxu0 %v14125_v35 }
 0x68c   :  { %13045 = vmatpush3.bf16.msra.mxu0 %v13044_v39 }
 0x68d   :  { %13046 = vmatprep.subr.bf16.mxu0 %v14125_v35 }
 0x690   :  { %13048 = vmatpush3.bf16.msra.mxu0 %v13047_v33 }
 0x691   :  { %13049 = vmatprep.subr.bf16.mxu0 %v14125_v35 }
 0x694   :  { %13051 = vmatpush3.bf16.msra.mxu0 %v13050_v13 }
 0x695   :  { %12953 = vmatprep.subr.mxu0 %v14127_v36 }
 0x698   :  { %12954 = vmatpush3.msk.msra.mxu0 %vm10406_vm12, %v10394_v48 }
 0x756   :  { %v10374_v46 = vpop.f32.mrb[192].mxu0 }
 0x757   :  { %v10375_v50 = vadd.f32 %v11260_v52, %v10374_v46  ;;  %v12932_v53 = vpop.f32.mrb[193].mxu0 }
 0x759   :  { %v10378_v42 = vsub.f32 0.0, %v10375_v50 }
 0x75b   :  { %v10379_v49 = vmul.f32 1.442695, %v10378_v42 }
 0x75d   :  { %14085 = vpow2.f32 %v10379_v49 }
 0x767   :  { %v14086_v35 = vpop.eup %14085 }
 0x768   :  { %v10381_v18 = vadd.f32 1.0, %v14086_v35 }
 0x76a   :  { %14087 = vrcp.f32 %v10381_v18 }
 0x774   :  { %v14088_v36 = vpop.eup %14087 }
 0x775   :  { %12956 = vmatmul.mubr.msk.f32.vlgmr.msra.gmra.mrb[194].mxu0 %vm10402_vm13, %v14088_v36 }
 0x848   :  { %v10476_v55 = vpop.f32.mrb[194].mxu0 }
 0x849   :  { %v10477_v12 = vadd.f32 %v11262_v30, %v10476_v55  ;;  %v12957_v15 = vpop.f32.mrb[195].mxu0 }
 0x84b   :  { %v10481_v31 = vsel %vm10480_vm14, %v10477_v12, -inf }
 0x84c   :  { %10482 = vmax.xlane.f32.xlu0 %v10481_v31 }
 0x8d9   :  { %v10483_v0 = vpop.xlane.xlu0 %10482 }
 0x8da   :  { %v10484_v5 = vsub.f32 %v10477_v12, %v10483_v0 }
 0x8dc   :  { %v10485_v19 = vmul.f32 1.442695, %v10484_v5 }
 0x8de   :  { %14089 = vpow2.f32 %v10485_v19 }
 0x8e8   :  { %v14090_v14 = vpop.eup %14089 }
 0x8e9   :  { %v10487_v56 = vsel %vm10480_vm14, %v14090_v14, 0.0 }
 0x8ea   :  { %10488 = vadd.xlane.f32.xlu0 %v10487_v56 }
 0x977   :  { %v10489_v6 = vpop.xlane.xlu0 %10488 }
 0x978   :  { %14091 = vrcp.f32 %v10489_v6 }
 0x982   :  { %v14092_v57 = vpop.eup %14091 }
 0x983   :  { %v10491_v20 = vmul.f32 %v14092_v57, %v14090_v14 }
 0x985   :  { %10492 = vst.msk [vmem:[#allocation6] sm:$0x3] %vm10480_vm14, %v10491_v20 }
 0x986   :  { %14111 = shalt.err (!%p14108_p4)
}
 0x987   :  { %s14112_s3 = scalar_lea.hbm %s16718_s11, 32 }
 0x988   :  { %p14113_p5 = scmp.ne.s32.totalorder %s16718_s11, %s14112_s3  ;;  %p14116_p6 = scmp.lt.u32.totalorder %s14112_s3, %s16718_s11 }
 0x98a   :  { %p14118_p7 = pnand %p14116_p6, %p14113_p5 }
 0x98c   :  { %14121 = shalt.err (!%p14118_p7)
}
 0x98d   :  { %10502 = dma.vmem_to_hbm [thread:$0]  %s10500_s7, 32, %s16718_s11, [#allocation7]  }
 0x98e   :  { %14122 = dma.done.wait [#allocation7], 32  }
 0x98f   :  { %14123 = vsyncadd [#allocation7], 4294967264 }
 0x990   :  { %10506 = vsyncpa [#allocation7], 1 }

</bundles_post_ra>
